<compile_context>
chip_gen: v5e
topology: v5e:2x2
jax: 0.10.0
libtpu: 0.0.40
codegen_flags: <defaults>
</compile_context>

<pallas_src>
import functools

import jax
import jax.numpy as jnp
from jax.experimental import pallas as pl
from jax.experimental.pallas import tpu as pltpu

EPS = 1e-5


def _make_kernel(Bp, L, T, H):
    N = Bp * L
    f32 = jnp.float32
    bf16 = jnp.bfloat16

    def kernel(xcol_ref, w1_ref, b1_ref, s1_ref, t1_ref,
               w2_ref, b2_ref, s2_ref, t2_ref,
               wih0_ref, whh0_ref, bl0_ref,
               wih1_ref, whh1_ref, bl1_ref,
               fc1w_ref, fc1b_ref, fc2w_ref, fc2b_ref,
               out_ref,
               xp_ref, h0all_ref):
        # ---- Conv1 (im2col matmul, time-major rows l*Bp+b) + ReLU + folded BN ----
        # (K = 3*CinP is tiny, so this dot stays f32.)
        y1 = jnp.dot(xcol_ref[...], w1_ref[...], preferred_element_type=f32)
        y1 = jnp.maximum(y1 + b1_ref[...], 0.0) * s1_ref[...] + t1_ref[...]      # (N, C1p)

        # ---- Conv2: neighbours via leading-dim shifts of the time-major 3-D view,
        #      three accumulating K=C1p dots (no 3x-wide im2col concat, no roll) ----
        C1p = y1.shape[1]
        y1_3 = y1.reshape(L, Bp, C1p)                       # tile-aligned (8,128) trailing dims
        zrow = jnp.zeros((1, Bp, C1p), f32)
        left = jnp.concatenate([zrow, y1_3[:L - 1]], axis=0).reshape(N, C1p)     # y1[l-1]
        right = jnp.concatenate([y1_3[1:], zrow], axis=0).reshape(N, C1p)        # y1[l+1]
        y2 = (jnp.dot(left.astype(bf16), w2_ref[0], preferred_element_type=f32)
              + jnp.dot(y1.astype(bf16), w2_ref[1], preferred_element_type=f32)
              + jnp.dot(right.astype(bf16), w2_ref[2], preferred_element_type=f32))
        y2 = jnp.maximum(y2 + b2_ref[...], 0.0) * s2_ref[...] + t2_ref[...]      # (N, C2)

        # ---- AdaptiveAvgPool1d(L//2): exact pair-mean on the VPU (no pooling matmul).
        #      Time-major rows => pooled rows come out (t, b)-ordered for the LSTM. ----
        C2 = y2.shape[1]
        y2_4 = y2.reshape(T, 2, Bp, C2)
        even = jax.lax.slice_in_dim(y2_4, 0, 1, axis=1).reshape(T * Bp, C2)
        odd = jax.lax.slice_in_dim(y2_4, 1, 2, axis=1).reshape(T * Bp, C2)
        pooled = 0.5 * (even + odd)                                              # (T*Bp, C2)

        # ---- LSTM layer 0: hoisted input projection (one big matmul), then the
        #      serial recurrence with a single K=H matmul per step ----
        xp_ref[...] = (jnp.dot(pooled.astype(bf16), wih0_ref[...],
                               preferred_element_type=f32) + bl0_ref[...])       # (T*Bp, 4H)

        # TODO(synk): stage whh0/whh1 in the MXU across the unrolled steps via
        # pltpu.matmul_push_rhs/_acc_lhs/_pop to avoid per-step RHS re-feed
        # (per-chip MXU-index handling); left as a follow-up.
        def lstm_step(whh_ref, h, c, row):
            g = xp_ref[pl.ds(row, Bp), :] + jnp.dot(
                h.astype(bf16), whh_ref[...], preferred_element_type=f32)
            i = jax.nn.sigmoid(g[:, 0:H])
            f = jax.nn.sigmoid(g[:, H:2 * H])
            gg = jnp.tanh(g[:, 2 * H:3 * H])
            o = jax.nn.sigmoid(g[:, 3 * H:4 * H])
            c = f * c + i * gg
            h = o * jnp.tanh(c)
            return h, c

        zeros = jnp.zeros((Bp, H), f32)

        def layer0_body(t, carry):
            h, c = carry
            row = pl.multiple_of(t * Bp, Bp)
            h, c = lstm_step(whh0_ref, h, c, row)
            h0all_ref[pl.ds(row, Bp), :] = h
            return h, c

        _h0, _c0 = jax.lax.fori_loop(0, T, layer0_body, (zeros, zeros), unroll=True)
        # inter-layer dropout (p=0.2) is identity in eval mode

        # ---- LSTM layer 1: hoist h0_all @ w_ih1 into the same scratch, then recur ----
        xp_ref[...] = (jnp.dot(h0all_ref[...].astype(bf16), wih1_ref[...],
                               preferred_element_type=f32) + bl1_ref[...])       # (T*Bp, 4H)

        def layer1_body(t, carry):
            h, c = carry
            row = pl.multiple_of(t * Bp, Bp)
            return lstm_step(whh1_ref, h, c, row)

        h1, _c1 = jax.lax.fori_loop(0, T, layer1_body, (zeros, zeros), unroll=True)

        # ---- Classifier (lane-padded): Linear -> ReLU -> (Dropout=id) -> Linear ----
        z = jnp.maximum(jnp.dot(h1.astype(bf16), fc1w_ref[...],
                                preferred_element_type=f32) + fc1b_ref[...], 0.0)
        out_ref[...] = (jnp.dot(z.astype(bf16), fc2w_ref[...],
                                preferred_element_type=f32) + fc2b_ref[...])

    return kernel


def init_params(key, Cin, NC, C1=64, H=128):
    """Deterministic synthetic parameters (shapes mirror the nn.Module)."""
    C2 = 2 * C1
    Hh = H // 2
    ks = jax.random.split(key, 24)
    f32 = jnp.float32
    n = lambda k, shape, s=0.1: (s * jax.random.normal(k, shape)).astype(f32)
    p = dict(
        conv1_w=n(ks[0], (3, Cin, C1)),          # torch layout (C1, Cin, 3), transposed
        conv1_b=n(ks[1], (C1,)),
        bn1_gamma=(1.0 + n(ks[2], (C1,))), bn1_beta=n(ks[3], (C1,)),
        bn1_mean=n(ks[4], (C1,)), bn1_var=(1.0 + jnp.abs(n(ks[5], (C1,)))),
        conv2_w=n(ks[6], (3, C1, C2)),
        conv2_b=n(ks[7], (C2,)),
        bn2_gamma=(1.0 + n(ks[8], (C2,))), bn2_beta=n(ks[9], (C2,)),
        bn2_mean=n(ks[10], (C2,)), bn2_var=(1.0 + jnp.abs(n(ks[11], (C2,)))),
        w_ih0=n(ks[12], (C2, 4 * H)), w_hh0=n(ks[13], (H, 4 * H)),
        b_ih0=n(ks[14], (4 * H,)), b_hh0=n(ks[15], (4 * H,)),
        w_ih1=n(ks[16], (H, 4 * H)), w_hh1=n(ks[17], (H, 4 * H)),
        b_ih1=n(ks[18], (4 * H,)), b_hh1=n(ks[19], (4 * H,)),
        fc1_w=n(ks[20], (H, Hh)), fc1_b=n(ks[21], (Hh,)),
        fc2_w=n(ks[22], (Hh, NC)), fc2_b=n(ks[23], (NC,)),
    )
    return p


def pack_params(params, Cin, NC, C1=64, H=128):
    """One-time parameter packing (padding, BN folding, bf16 casts).

    Done once outside the jitted forward so per-call work is only the
    input-dependent im2col."""
    C2 = 2 * C1
    Hh = H // 2
    f32, bf16 = jnp.float32, jnp.bfloat16
    CinP = ((max(Cin, 8) + 7) // 8) * 8
    C1p = ((C1 + 127) // 128) * 128
    Hhp = ((Hh + 127) // 128) * 128
    NCp = ((NC + 127) // 128) * 128

    def rowpad(v, n):
        v = jnp.asarray(v, f32).reshape(1, -1)
        return jnp.pad(v, ((0, 0), (0, n - v.shape[1])))

    # conv weights for im2col matmuls (zero-padded channels)
    w1 = jnp.pad(params["conv1_w"].astype(f32),
                 ((0, 0), (0, CinP - Cin), (0, C1p - C1)))       # (3, CinP, C1p)
    w1_flat = w1.reshape(3 * CinP, C1p)                          # f32 (tiny K)
    w2 = jnp.pad(params["conv2_w"].astype(f32),
                 ((0, 0), (0, C1p - C1), (0, 0))).astype(bf16)   # (3, C1p, C2)

    # folded BatchNorm (eval) scale/shift
    inv1 = params["bn1_gamma"] / jnp.sqrt(params["bn1_var"] + EPS)
    inv2 = params["bn2_gamma"] / jnp.sqrt(params["bn2_var"] + EPS)

    packed = dict(
        w1_flat=w1_flat,
        b1=rowpad(params["conv1_b"], C1p),
        s1=rowpad(inv1, C1p),
        t1=rowpad(params["bn1_beta"] - params["bn1_mean"] * inv1, C1p),
        w2=w2,
        b2=rowpad(params["conv2_b"], C2),
        s2=rowpad(inv2, C2),
        t2=rowpad(params["bn2_beta"] - params["bn2_mean"] * inv2, C2),
        wih0=params["w_ih0"].astype(bf16),                       # (C2, 4H)
        whh0=params["w_hh0"].astype(bf16),                       # (H, 4H)
        bl0=rowpad(params["b_ih0"] + params["b_hh0"], 4 * H),
        wih1=params["w_ih1"].astype(bf16),                       # (H, 4H)
        whh1=params["w_hh1"].astype(bf16),                       # (H, 4H)
        bl1=rowpad(params["b_ih1"] + params["b_hh1"], 4 * H),
        fc1w=jnp.pad(params["fc1_w"].astype(f32),
                     ((0, 0), (0, Hhp - Hh))).astype(bf16),      # (H, Hhp)
        fc1b=rowpad(params["fc1_b"], Hhp),
        fc2w=jnp.pad(params["fc2_w"].astype(f32),
                     ((0, Hhp - Hh), (0, NCp - NC))).astype(bf16),  # (Hhp, NCp)
        fc2b=rowpad(params["fc2_b"], NCp),
    )
    return packed


@functools.partial(jax.jit, static_argnames=("NC",))
def cnn_lstm_forward(x, packed, *, NC):
    """x: (B, input_channels, sequence_length) float32 (PyTorch NCL)."""
    B, Cin, L = x.shape
    assert L % 2 == 0, "AdaptiveAvgPool1d(L//2) implemented as exact pair-mean"
    f32 = jnp.float32

    w1_flat = packed["w1_flat"]
    CinP = w1_flat.shape[0] // 3
    C1p = w1_flat.shape[1]
    C2 = packed["w2"].shape[2]
    H = packed["whh0"].shape[0]
    Hhp = packed["fc1w"].shape[1]
    NCp = packed["fc2w"].shape[1]

    T = L // 2
    Bp = ((max(B, 8) + 7) // 8) * 8
    N = Bp * L

    # conv1 im2col, TIME-major rows (row = l*Bp + b): makes the in-kernel conv2
    # shifts, pooling and per-step LSTM slabs all contiguous & (8,128)-aligned.
    xt = jnp.transpose(x, (2, 0, 1)).astype(f32)                 # (L, B, Cin)
    xt = jnp.pad(xt, ((0, 0), (0, Bp - B), (0, CinP - Cin)))     # (L, Bp, CinP)
    xpad = jnp.pad(xt, ((1, 1), (0, 0), (0, 0)))                 # (L+2, Bp, CinP)
    xcol = jnp.concatenate([xpad[k:k + L] for k in range(3)],
                           axis=-1).reshape(N, 3 * CinP)         # (N, 3*CinP) f32

    inputs = (xcol, w1_flat, packed["b1"], packed["s1"], packed["t1"],
              packed["w2"], packed["b2"], packed["s2"], packed["t2"],
              packed["wih0"], packed["whh0"], packed["bl0"],
              packed["wih1"], packed["whh1"], packed["bl1"],
              packed["fc1w"], packed["fc1b"], packed["fc2w"], packed["fc2b"])

    flops = 2 * (N * (3 * CinP) * C1p            # conv1
                 + 3 * N * C1p * C2              # conv2 (3 taps)
                 + (T * Bp) * C2 * (4 * H)       # hoisted layer-0 input proj
                 + (T * Bp) * H * (4 * H)        # hoisted layer-1 input proj
                 + 2 * T * Bp * H * (4 * H)      # recurrent matmuls (2 layers)
                 + Bp * H * Hhp + Bp * Hhp * NCp)
    transcendentals = 2 * T * 5 * Bp * H
    bytes_accessed = (sum(int(a.size) * a.dtype.itemsize for a in inputs)
                      + Bp * NCp * 4)

    kernel = _make_kernel(Bp, L, T, H)
    vmem = pl.BlockSpec(memory_space=pltpu.MemorySpace.VMEM)
    out = pl.pallas_call(
        kernel,
        out_shape=jax.ShapeDtypeStruct((Bp, NCp), f32),
        in_specs=[vmem] * len(inputs),
        out_specs=vmem,
        scratch_shapes=[pltpu.VMEM((T * Bp, 4 * H), f32),   # hoisted gate pre-activations
                        pltpu.VMEM((T * Bp, H), f32)],      # per-step h0 for layer-1 hoist
        cost_estimate=pl.CostEstimate(flops=flops,
                                      transcendentals=transcendentals,
                                      bytes_accessed=bytes_accessed),
    )(*inputs)
    # TODO(synk): for Bp >= 16, add a parallel batch grid axis (BlockSpec-tiled
    # xcol/out + dimension_semantics=("parallel",)) to engage v7x's 2nd TensorCore
    # and bound VMEM, plus CompilerParams(vmem_limit_bytes=...) with headroom;
    # unnecessary at these demo shapes.
    return out[:B, :NC]


def reference_forward(x, p, NC, C1=64, H=128):
    """Pure-JAX f32 eval-mode reference with the module's math."""
    B, Cin, L = x.shape
    C2 = 2 * C1
    f32 = jnp.float32
    xt = jnp.transpose(x, (0, 2, 1)).astype(f32)
    xpad = jnp.pad(xt, ((0, 0), (1, 1), (0, 0)))
    y1 = sum(jnp.einsum("blc,co->blo", xpad[:, k:k + L, :], p["conv1_w"][k])
             for k in range(3)) + p["conv1_b"]
    y1 = jnp.maximum(y1, 0.0)
    y1 = p["bn1_gamma"] * (y1 - p["bn1_mean"]) / jnp.sqrt(p["bn1_var"] + EPS) + p["bn1_beta"]
    y1p = jnp.pad(y1, ((0, 0), (1, 1), (0, 0)))
    y2 = sum(jnp.einsum("blc,co->blo", y1p[:, k:k + L, :], p["conv2_w"][k])
             for k in range(3)) + p["conv2_b"]
    y2 = jnp.maximum(y2, 0.0)
    y2 = p["bn2_gamma"] * (y2 - p["bn2_mean"]) / jnp.sqrt(p["bn2_var"] + EPS) + p["bn2_beta"]
    pooled = y2.reshape(B, L // 2, 2, C2).mean(axis=2)

    bl0 = p["b_ih0"] + p["b_hh0"]
    bl1 = p["b_ih1"] + p["b_hh1"]
    h0 = jnp.zeros((B, H), f32); c0 = jnp.zeros((B, H), f32)
    h1 = jnp.zeros((B, H), f32); c1 = jnp.zeros((B, H), f32)
    for t in range(L // 2):
        xtp = pooled[:, t, :]
        g0 = xtp @ p["w_ih0"] + h0 @ p["w_hh0"] + bl0
        i0, f0 = jax.nn.sigmoid(g0[:, :H]), jax.nn.sigmoid(g0[:, H:2 * H])
        gg0, o0 = jnp.tanh(g0[:, 2 * H:3 * H]), jax.nn.sigmoid(g0[:, 3 * H:])
        c0 = f0 * c0 + i0 * gg0
        h0 = o0 * jnp.tanh(c0)
        g1 = h0 @ p["w_ih1"] + h1 @ p["w_hh1"] + bl1
        i1, f1 = jax.nn.sigmoid(g1[:, :H]), jax.nn.sigmoid(g1[:, H:2 * H])
        gg1, o1 = jnp.tanh(g1[:, 2 * H:3 * H]), jax.nn.sigmoid(g1[:, 3 * H:])
        c1 = f1 * c1 + i1 * gg1
        h1 = o1 * jnp.tanh(c1)

    z = jnp.maximum(h1 @ p["fc1_w"] + p["fc1_b"], 0.0)
    return z @ p["fc2_w"] + p["fc2_b"]


if __name__ == "__main__":
    # shapes consistent with CNNLSTMModel(input_channels=4, sequence_length=16,
    # num_classes=5, cnn_features=64, lstm_hidden=128)
    B, Cin, L, NC = 2, 4, 16, 5
    C1, H = 64, 128

    key = jax.random.PRNGKey(0)
    pkey, xkey = jax.random.split(key)
    params = init_params(pkey, Cin, NC, C1=C1, H=H)
    x = jax.random.normal(xkey, (B, Cin, L), dtype=jnp.float32)

    packed = pack_params(params, Cin, NC, C1=C1, H=H)   # once, outside the hot path
    out = cnn_lstm_forward(x, packed, NC=NC)
    out = jax.block_until_ready(out)

    ref = reference_forward(x, params, NC, C1=C1, H=H)
    assert out.shape == (B, NC)
    # bf16 MXU operands with f32 accumulation -> compare at bf16-level tolerance
    # against the pure-f32 reference.
    assert jnp.allclose(out, ref, rtol=2e-2, atol=2e-2), (out, ref)
    print("KERNEL_OK")
</pallas_src>

<mosaic_0001>
module attributes {stable_mosaic.version = 11 : i64} {
  func.func @kernel(%arg0: memref<128x24xf32, #tpu.memory_space<vmem>>, %arg1: memref<24x128xf32, #tpu.memory_space<vmem>>, %arg2: memref<1x128xf32, #tpu.memory_space<vmem>>, %arg3: memref<1x128xf32, #tpu.memory_space<vmem>>, %arg4: memref<1x128xf32, #tpu.memory_space<vmem>>, %arg5: memref<3x128x128xbf16, #tpu.memory_space<vmem>>, %arg6: memref<1x128xf32, #tpu.memory_space<vmem>>, %arg7: memref<1x128xf32, #tpu.memory_space<vmem>>, %arg8: memref<1x128xf32, #tpu.memory_space<vmem>>, %arg9: memref<128x512xbf16, #tpu.memory_space<vmem>>, %arg10: memref<128x512xbf16, #tpu.memory_space<vmem>>, %arg11: memref<1x512xf32, #tpu.memory_space<vmem>>, %arg12: memref<128x512xbf16, #tpu.memory_space<vmem>>, %arg13: memref<128x512xbf16, #tpu.memory_space<vmem>>, %arg14: memref<1x512xf32, #tpu.memory_space<vmem>>, %arg15: memref<128x128xbf16, #tpu.memory_space<vmem>>, %arg16: memref<1x128xf32, #tpu.memory_space<vmem>>, %arg17: memref<128x128xbf16, #tpu.memory_space<vmem>>, %arg18: memref<1x128xf32, #tpu.memory_space<vmem>>, %arg19: memref<8x128xf32, #tpu.memory_space<vmem>>, %arg20: memref<64x512xf32, #tpu.memory_space<vmem>>, %arg21: memref<64x128xf32, #tpu.memory_space<vmem>>) attributes {dimension_semantics = [], scalar_prefetch = 0 : i64, scratch_operands = 2 : i64, tpu.core_type = #tpu.core_type<tc>} {
    %c0 = arith.constant 0 : index
    %c0_0 = arith.constant 0 : index
    %0 = vector.load %arg0[%c0, %c0_0] : memref<128x24xf32, #tpu.memory_space<vmem>>, vector<128x24xf32>
    %c0_1 = arith.constant 0 : index
    %c0_2 = arith.constant 0 : index
    %1 = vector.load %arg1[%c0_1, %c0_2] : memref<24x128xf32, #tpu.memory_space<vmem>>, vector<24x128xf32>
    %cst = arith.constant dense<0.000000e+00> : vector<128x128xf32>
    %2 = tpu.matmul %0, %1, %cst {dimension_numbers = #tpu.dot_dimension_numbers<[1], [0], [0], [1], [0, 0, 1, 1], [], []>} : vector<128x24xf32>, vector<24x128xf32>, vector<128x128xf32> -> vector<128x128xf32>
    %c0_3 = arith.constant 0 : index
    %c0_4 = arith.constant 0 : index
    %3 = vector.load %arg2[%c0_3, %c0_4] : memref<1x128xf32, #tpu.memory_space<vmem>>, vector<1x128xf32>
    %4 = vector.broadcast %3 : vector<1x128xf32> to vector<128x128xf32>
    %5 = arith.addf %2, %4 : vector<128x128xf32>
    %cst_5 = arith.constant 0.000000e+00 : f32
    %6 = vector.broadcast %cst_5 : f32 to vector<128x128xf32>
    %7 = arith.maximumf %5, %6 : vector<128x128xf32>
    %c0_6 = arith.constant 0 : index
    %c0_7 = arith.constant 0 : index
    %8 = vector.load %arg3[%c0_6, %c0_7] : memref<1x128xf32, #tpu.memory_space<vmem>>, vector<1x128xf32>
    %9 = vector.broadcast %8 : vector<1x128xf32> to vector<128x128xf32>
    %10 = arith.mulf %7, %9 : vector<128x128xf32>
    %c0_8 = arith.constant 0 : index
    %c0_9 = arith.constant 0 : index
    %11 = vector.load %arg4[%c0_8, %c0_9] : memref<1x128xf32, #tpu.memory_space<vmem>>, vector<1x128xf32>
    %12 = vector.broadcast %11 : vector<1x128xf32> to vector<128x128xf32>
    %13 = arith.addf %10, %12 : vector<128x128xf32>
    %14 = vector.shape_cast %13 : vector<128x128xf32> to vector<16x8x128xf32>
    %cst_10 = arith.constant 0.000000e+00 : f32
    %15 = vector.broadcast %cst_10 : f32 to vector<1x8x128xf32>
    %16 = vector.extract_strided_slice %14 {offsets = [0, 0, 0], sizes = [15, 8, 128], strides = [1, 1, 1]} : vector<16x8x128xf32> to vector<15x8x128xf32>
    %17 = tpu.concatenate %15, %16 in 0 : vector<1x8x128xf32>, vector<15x8x128xf32> -> vector<16x8x128xf32>
    %18 = vector.shape_cast %17 : vector<16x8x128xf32> to vector<128x128xf32>
    %19 = vector.extract_strided_slice %14 {offsets = [1, 0, 0], sizes = [15, 8, 128], strides = [1, 1, 1]} : vector<16x8x128xf32> to vector<15x8x128xf32>
    %20 = tpu.concatenate %19, %15 in 0 : vector<15x8x128xf32>, vector<1x8x128xf32> -> vector<16x8x128xf32>
    %21 = vector.shape_cast %20 : vector<16x8x128xf32> to vector<128x128xf32>
    %22 = arith.truncf %18 : vector<128x128xf32> to vector<128x128xbf16>
    %c0_11 = arith.constant 0 : index
    %c0_12 = arith.constant 0 : index
    %c0_13 = arith.constant 0 : index
    %23 = vector.load %arg5[%c0_11, %c0_12, %c0_13] : memref<3x128x128xbf16, #tpu.memory_space<vmem>>, vector<1x128x128xbf16>
    %24 = vector.shape_cast %23 : vector<1x128x128xbf16> to vector<128x128xbf16>
    %cst_14 = arith.constant dense<0.000000e+00> : vector<128x128xf32>
    %25 = tpu.matmul %22, %24, %cst_14 {dimension_numbers = #tpu.dot_dimension_numbers<[1], [0], [0], [1], [0, 0, 1, 1], [], []>} : vector<128x128xbf16>, vector<128x128xbf16>, vector<128x128xf32> -> vector<128x128xf32>
    %26 = arith.truncf %13 : vector<128x128xf32> to vector<128x128xbf16>
    %c1 = arith.constant 1 : index
    %c0_15 = arith.constant 0 : index
    %c0_16 = arith.constant 0 : index
    %27 = vector.load %arg5[%c1, %c0_15, %c0_16] : memref<3x128x128xbf16, #tpu.memory_space<vmem>>, vector<1x128x128xbf16>
    %28 = vector.shape_cast %27 : vector<1x128x128xbf16> to vector<128x128xbf16>
    %cst_17 = arith.constant dense<0.000000e+00> : vector<128x128xf32>
    %29 = tpu.matmul %26, %28, %cst_17 {dimension_numbers = #tpu.dot_dimension_numbers<[1], [0], [0], [1], [0, 0, 1, 1], [], []>} : vector<128x128xbf16>, vector<128x128xbf16>, vector<128x128xf32> -> vector<128x128xf32>
    %30 = arith.addf %25, %29 : vector<128x128xf32>
    %31 = arith.truncf %21 : vector<128x128xf32> to vector<128x128xbf16>
    %c2 = arith.constant 2 : index
    %c0_18 = arith.constant 0 : index
    %c0_19 = arith.constant 0 : index
    %32 = vector.load %arg5[%c2, %c0_18, %c0_19] : memref<3x128x128xbf16, #tpu.memory_space<vmem>>, vector<1x128x128xbf16>
    %33 = vector.shape_cast %32 : vector<1x128x128xbf16> to vector<128x128xbf16>
    %cst_20 = arith.constant dense<0.000000e+00> : vector<128x128xf32>
    %34 = tpu.matmul %31, %33, %cst_20 {dimension_numbers = #tpu.dot_dimension_numbers<[1], [0], [0], [1], [0, 0, 1, 1], [], []>} : vector<128x128xbf16>, vector<128x128xbf16>, vector<128x128xf32> -> vector<128x128xf32>
    %35 = arith.addf %30, %34 : vector<128x128xf32>
    %c0_21 = arith.constant 0 : index
    %c0_22 = arith.constant 0 : index
    %36 = vector.load %arg6[%c0_21, %c0_22] : memref<1x128xf32, #tpu.memory_space<vmem>>, vector<1x128xf32>
    %37 = vector.broadcast %36 : vector<1x128xf32> to vector<128x128xf32>
    %38 = arith.addf %35, %37 : vector<128x128xf32>
    %cst_23 = arith.constant 0.000000e+00 : f32
    %39 = vector.broadcast %cst_23 : f32 to vector<128x128xf32>
    %40 = arith.maximumf %38, %39 : vector<128x128xf32>
    %c0_24 = arith.constant 0 : index
    %c0_25 = arith.constant 0 : index
    %41 = vector.load %arg7[%c0_24, %c0_25] : memref<1x128xf32, #tpu.memory_space<vmem>>, vector<1x128xf32>
    %42 = vector.broadcast %41 : vector<1x128xf32> to vector<128x128xf32>
    %43 = arith.mulf %40, %42 : vector<128x128xf32>
    %c0_26 = arith.constant 0 : index
    %c0_27 = arith.constant 0 : index
    %44 = vector.load %arg8[%c0_26, %c0_27] : memref<1x128xf32, #tpu.memory_space<vmem>>, vector<1x128xf32>
    %45 = vector.broadcast %44 : vector<1x128xf32> to vector<128x128xf32>
    %46 = arith.addf %43, %45 : vector<128x128xf32>
    %47 = vector.shape_cast %46 : vector<128x128xf32> to vector<8x2x8x128xf32>
    %48 = vector.extract_strided_slice %47 {offsets = [0, 0, 0, 0], sizes = [8, 1, 8, 128], strides = [1, 1, 1, 1]} : vector<8x2x8x128xf32> to vector<8x1x8x128xf32>
    %49 = vector.shape_cast %48 : vector<8x1x8x128xf32> to vector<64x128xf32>
    %50 = vector.extract_strided_slice %47 {offsets = [0, 1, 0, 0], sizes = [8, 1, 8, 128], strides = [1, 1, 1, 1]} : vector<8x2x8x128xf32> to vector<8x1x8x128xf32>
    %51 = vector.shape_cast %50 : vector<8x1x8x128xf32> to vector<64x128xf32>
    %52 = arith.addf %49, %51 : vector<64x128xf32>
    %cst_28 = arith.constant 5.000000e-01 : f32
    %53 = vector.broadcast %cst_28 : f32 to vector<64x128xf32>
    %54 = arith.mulf %53, %52 : vector<64x128xf32>
    %55 = arith.truncf %54 : vector<64x128xf32> to vector<64x128xbf16>
    %c0_29 = arith.constant 0 : index
    %c0_30 = arith.constant 0 : index
    %56 = vector.load %arg9[%c0_29, %c0_30] : memref<128x512xbf16, #tpu.memory_space<vmem>>, vector<128x512xbf16>
    %cst_31 = arith.constant dense<0.000000e+00> : vector<64x512xf32>
    %57 = tpu.matmul %55, %56, %cst_31 {dimension_numbers = #tpu.dot_dimension_numbers<[1], [0], [0], [1], [0, 0, 1, 1], [], []>} : vector<64x128xbf16>, vector<128x512xbf16>, vector<64x512xf32> -> vector<64x512xf32>
    %c0_32 = arith.constant 0 : index
    %c0_33 = arith.constant 0 : index
    %58 = vector.load %arg11[%c0_32, %c0_33] : memref<1x512xf32, #tpu.memory_space<vmem>>, vector<1x512xf32>
    %59 = vector.broadcast %58 : vector<1x512xf32> to vector<64x512xf32>
    %60 = arith.addf %57, %59 : vector<64x512xf32>
    %c0_34 = arith.constant 0 : index
    %c0_35 = arith.constant 0 : index
    %61 = vector.load %arg20[%c0_34, %c0_35] : memref<64x512xf32, #tpu.memory_space<vmem>>, vector<64x512xf32>
    tpu.vector_store %arg20[%c0_34, %c0_35], %60 {strides = array<i32>} : memref<64x512xf32, #tpu.memory_space<vmem>>, vector<64x512xf32>,
    %cst_36 = arith.constant 0.000000e+00 : f32
    %62 = vector.broadcast %cst_36 : f32 to vector<8x128xf32>
    %c0_i32 = arith.constant 0 : i32
    %c8_i32 = arith.constant 8 : i32
    %63 = arith.muli %c0_i32, %c8_i32 : i32
    %64 = tpu.assume_multiple %63, 8 : i32
    %65 = arith.index_cast %64 : i32 to index
    %c0_37 = arith.constant 0 : index
    %66 = vector.load %arg20[%65, %c0_37] : memref<64x512xf32, #tpu.memory_space<vmem>>, vector<8x512xf32>
    %67 = arith.truncf %62 : vector<8x128xf32> to vector<8x128xbf16>
    %c0_38 = arith.constant 0 : index
    %c0_39 = arith.constant 0 : index
    %68 = vector.load %arg10[%c0_38, %c0_39] : memref<128x512xbf16, #tpu.memory_space<vmem>>, vector<128x512xbf16>
    %cst_40 = arith.constant dense<0.000000e+00> : vector<8x512xf32>
    %69 = tpu.matmul %67, %68, %cst_40 {dimension_numbers = #tpu.dot_dimension_numbers<[1], [0], [0], [1], [0, 0, 1, 1], [], []>} : vector<8x128xbf16>, vector<128x512xbf16>, vector<8x512xf32> -> vector<8x512xf32>
    %70 = arith.addf %66, %69 : vector<8x512xf32>
    %71 = vector.extract_strided_slice %70 {offsets = [0, 0], sizes = [8, 128], strides = [1, 1]} : vector<8x512xf32> to vector<8x128xf32>
    %72 = arith.negf %71 : vector<8x128xf32>
    %73 = math.exp %72 : vector<8x128xf32>
    %cst_41 = arith.constant 1.000000e+00 : f32
    %74 = vector.broadcast %cst_41 : f32 to vector<8x128xf32>
    %75 = arith.addf %74, %73 : vector<8x128xf32>
    %76 = arith.divf %74, %75 : vector<8x128xf32>
    %77 = vector.extract_strided_slice %70 {offsets = [0, 128], sizes = [8, 128], strides = [1, 1]} : vector<8x512xf32> to vector<8x128xf32>
    %78 = arith.negf %77 : vector<8x128xf32>
    %79 = math.exp %78 : vector<8x128xf32>
    %cst_42 = arith.constant 1.000000e+00 : f32
    %80 = vector.broadcast %cst_42 : f32 to vector<8x128xf32>
    %81 = arith.addf %80, %79 : vector<8x128xf32>
    %82 = arith.divf %80, %81 : vector<8x128xf32>
    %83 = vector.extract_strided_slice %70 {offsets = [0, 256], sizes = [8, 128], strides = [1, 1]} : vector<8x512xf32> to vector<8x128xf32>
    %84 = math.tanh %83 : vector<8x128xf32>
    %85 = vector.extract_strided_slice %70 {offsets = [0, 384], sizes = [8, 128], strides = [1, 1]} : vector<8x512xf32> to vector<8x128xf32>
    %86 = arith.negf %85 : vector<8x128xf32>
    %87 = math.exp %86 : vector<8x128xf32>
    %cst_43 = arith.constant 1.000000e+00 : f32
    %88 = vector.broadcast %cst_43 : f32 to vector<8x128xf32>
    %89 = arith.addf %88, %87 : vector<8x128xf32>
    %90 = arith.divf %88, %89 : vector<8x128xf32>
    %91 = arith.mulf %82, %62 : vector<8x128xf32>
    %92 = arith.mulf %76, %84 : vector<8x128xf32>
    %93 = arith.addf %91, %92 : vector<8x128xf32>
    %94 = math.tanh %93 : vector<8x128xf32>
    %95 = arith.mulf %90, %94 : vector<8x128xf32>
    %96 = arith.index_cast %64 : i32 to index
    %c0_44 = arith.constant 0 : index
    %97 = vector.load %arg21[%96, %c0_44] : memref<64x128xf32, #tpu.memory_space<vmem>>, vector<8x128xf32>
    tpu.vector_store %arg21[%96, %c0_44], %95 {strides = array<i32>} : memref<64x128xf32, #tpu.memory_space<vmem>>, vector<8x128xf32>,
    %c1_i32 = arith.constant 1 : i32
    %c8_i32_45 = arith.constant 8 : i32
    %98 = arith.muli %c1_i32, %c8_i32_45 : i32
    %99 = tpu.assume_multiple %98, 8 : i32
    %100 = arith.index_cast %99 : i32 to index
    %c0_46 = arith.constant 0 : index
    %101 = vector.load %arg20[%100, %c0_46] : memref<64x512xf32, #tpu.memory_space<vmem>>, vector<8x512xf32>
    %102 = arith.truncf %95 : vector<8x128xf32> to vector<8x128xbf16>
    %c0_47 = arith.constant 0 : index
    %c0_48 = arith.constant 0 : index
    %103 = vector.load %arg10[%c0_47, %c0_48] : memref<128x512xbf16, #tpu.memory_space<vmem>>, vector<128x512xbf16>
    %cst_49 = arith.constant dense<0.000000e+00> : vector<8x512xf32>
    %104 = tpu.matmul %102, %103, %cst_49 {dimension_numbers = #tpu.dot_dimension_numbers<[1], [0], [0], [1], [0, 0, 1, 1], [], []>} : vector<8x128xbf16>, vector<128x512xbf16>, vector<8x512xf32> -> vector<8x512xf32>
    %105 = arith.addf %101, %104 : vector<8x512xf32>
    %106 = vector.extract_strided_slice %105 {offsets = [0, 0], sizes = [8, 128], strides = [1, 1]} : vector<8x512xf32> to vector<8x128xf32>
    %107 = arith.negf %106 : vector<8x128xf32>
    %108 = math.exp %107 : vector<8x128xf32>
    %cst_50 = arith.constant 1.000000e+00 : f32
    %109 = vector.broadcast %cst_50 : f32 to vector<8x128xf32>
    %110 = arith.addf %109, %108 : vector<8x128xf32>
    %111 = arith.divf %109, %110 : vector<8x128xf32>
    %112 = vector.extract_strided_slice %105 {offsets = [0, 128], sizes = [8, 128], strides = [1, 1]} : vector<8x512xf32> to vector<8x128xf32>
    %113 = arith.negf %112 : vector<8x128xf32>
    %114 = math.exp %113 : vector<8x128xf32>
    %cst_51 = arith.constant 1.000000e+00 : f32
    %115 = vector.broadcast %cst_51 : f32 to vector<8x128xf32>
    %116 = arith.addf %115, %114 : vector<8x128xf32>
    %117 = arith.divf %115, %116 : vector<8x128xf32>
    %118 = vector.extract_strided_slice %105 {offsets = [0, 256], sizes = [8, 128], strides = [1, 1]} : vector<8x512xf32> to vector<8x128xf32>
    %119 = math.tanh %118 : vector<8x128xf32>
    %120 = vector.extract_strided_slice %105 {offsets = [0, 384], sizes = [8, 128], strides = [1, 1]} : vector<8x512xf32> to vector<8x128xf32>
    %121 = arith.negf %120 : vector<8x128xf32>
    %122 = math.exp %121 : vector<8x128xf32>
    %cst_52 = arith.constant 1.000000e+00 : f32
    %123 = vector.broadcast %cst_52 : f32 to vector<8x128xf32>
    %124 = arith.addf %123, %122 : vector<8x128xf32>
    %125 = arith.divf %123, %124 : vector<8x128xf32>
    %126 = arith.mulf %117, %93 : vector<8x128xf32>
    %127 = arith.mulf %111, %119 : vector<8x128xf32>
    %128 = arith.addf %126, %127 : vector<8x128xf32>
    %129 = math.tanh %128 : vector<8x128xf32>
    %130 = arith.mulf %125, %129 : vector<8x128xf32>
    %131 = arith.index_cast %99 : i32 to index
    %c0_53 = arith.constant 0 : index
    %132 = vector.load %arg21[%131, %c0_53] : memref<64x128xf32, #tpu.memory_space<vmem>>, vector<8x128xf32>
    tpu.vector_store %arg21[%131, %c0_53], %130 {strides = array<i32>} : memref<64x128xf32, #tpu.memory_space<vmem>>, vector<8x128xf32>,
    %c2_i32 = arith.constant 2 : i32
    %c8_i32_54 = arith.constant 8 : i32
    %133 = arith.muli %c2_i32, %c8_i32_54 : i32
    %134 = tpu.assume_multiple %133, 8 : i32
    %135 = arith.index_cast %134 : i32 to index
    %c0_55 = arith.constant 0 : index
    %136 = vector.load %arg20[%135, %c0_55] : memref<64x512xf32, #tpu.memory_space<vmem>>, vector<8x512xf32>
    %137 = arith.truncf %130 : vector<8x128xf32> to vector<8x128xbf16>
    %c0_56 = arith.constant 0 : index
    %c0_57 = arith.constant 0 : index
    %138 = vector.load %arg10[%c0_56, %c0_57] : memref<128x512xbf16, #tpu.memory_space<vmem>>, vector<128x512xbf16>
    %cst_58 = arith.constant dense<0.000000e+00> : vector<8x512xf32>
    %139 = tpu.matmul %137, %138, %cst_58 {dimension_numbers = #tpu.dot_dimension_numbers<[1], [0], [0], [1], [0, 0, 1, 1], [], []>} : vector<8x128xbf16>, vector<128x512xbf16>, vector<8x512xf32> -> vector<8x512xf32>
    %140 = arith.addf %136, %139 : vector<8x512xf32>
    %141 = vector.extract_strided_slice %140 {offsets = [0, 0], sizes = [8, 128], strides = [1, 1]} : vector<8x512xf32> to vector<8x128xf32>
    %142 = arith.negf %141 : vector<8x128xf32>
    %143 = math.exp %142 : vector<8x128xf32>
    %cst_59 = arith.constant 1.000000e+00 : f32
    %144 = vector.broadcast %cst_59 : f32 to vector<8x128xf32>
    %145 = arith.addf %144, %143 : vector<8x128xf32>
    %146 = arith.divf %144, %145 : vector<8x128xf32>
    %147 = vector.extract_strided_slice %140 {offsets = [0, 128], sizes = [8, 128], strides = [1, 1]} : vector<8x512xf32> to vector<8x128xf32>
    %148 = arith.negf %147 : vector<8x128xf32>
    %149 = math.exp %148 : vector<8x128xf32>
    %cst_60 = arith.constant 1.000000e+00 : f32
    %150 = vector.broadcast %cst_60 : f32 to vector<8x128xf32>
    %151 = arith.addf %150, %149 : vector<8x128xf32>
    %152 = arith.divf %150, %151 : vector<8x128xf32>
    %153 = vector.extract_strided_slice %140 {offsets = [0, 256], sizes = [8, 128], strides = [1, 1]} : vector<8x512xf32> to vector<8x128xf32>
    %154 = math.tanh %153 : vector<8x128xf32>
    %155 = vector.extract_strided_slice %140 {offsets = [0, 384], sizes = [8, 128], strides = [1, 1]} : vector<8x512xf32> to vector<8x128xf32>
    %156 = arith.negf %155 : vector<8x128xf32>
    %157 = math.exp %156 : vector<8x128xf32>
    %cst_61 = arith.constant 1.000000e+00 : f32
    %158 = vector.broadcast %cst_61 : f32 to vector<8x128xf32>
    %159 = arith.addf %158, %157 : vector<8x128xf32>
    %160 = arith.divf %158, %159 : vector<8x128xf32>
    %161 = arith.mulf %152, %128 : vector<8x128xf32>
    %162 = arith.mulf %146, %154 : vector<8x128xf32>
    %163 = arith.addf %161, %162 : vector<8x128xf32>
    %164 = math.tanh %163 : vector<8x128xf32>
    %165 = arith.mulf %160, %164 : vector<8x128xf32>
    %166 = arith.index_cast %134 : i32 to index
    %c0_62 = arith.constant 0 : index
    %167 = vector.load %arg21[%166, %c0_62] : memref<64x128xf32, #tpu.memory_space<vmem>>, vector<8x128xf32>
    tpu.vector_store %arg21[%166, %c0_62], %165 {strides = array<i32>} : memref<64x128xf32, #tpu.memory_space<vmem>>, vector<8x128xf32>,
    %c3_i32 = arith.constant 3 : i32
    %c8_i32_63 = arith.constant 8 : i32
    %168 = arith.muli %c3_i32, %c8_i32_63 : i32
    %169 = tpu.assume_multiple %168, 8 : i32
    %170 = arith.index_cast %169 : i32 to index
    %c0_64 = arith.constant 0 : index
    %171 = vector.load %arg20[%170, %c0_64] : memref<64x512xf32, #tpu.memory_space<vmem>>, vector<8x512xf32>
    %172 = arith.truncf %165 : vector<8x128xf32> to vector<8x128xbf16>
    %c0_65 = arith.constant 0 : index
    %c0_66 = arith.constant 0 : index
    %173 = vector.load %arg10[%c0_65, %c0_66] : memref<128x512xbf16, #tpu.memory_space<vmem>>, vector<128x512xbf16>
    %cst_67 = arith.constant dense<0.000000e+00> : vector<8x512xf32>
    %174 = tpu.matmul %172, %173, %cst_67 {dimension_numbers = #tpu.dot_dimension_numbers<[1], [0], [0], [1], [0, 0, 1, 1], [], []>} : vector<8x128xbf16>, vector<128x512xbf16>, vector<8x512xf32> -> vector<8x512xf32>
    %175 = arith.addf %171, %174 : vector<8x512xf32>
    %176 = vector.extract_strided_slice %175 {offsets = [0, 0], sizes = [8, 128], strides = [1, 1]} : vector<8x512xf32> to vector<8x128xf32>
    %177 = arith.negf %176 : vector<8x128xf32>
    %178 = math.exp %177 : vector<8x128xf32>
    %cst_68 = arith.constant 1.000000e+00 : f32
    %179 = vector.broadcast %cst_68 : f32 to vector<8x128xf32>
    %180 = arith.addf %179, %178 : vector<8x128xf32>
    %181 = arith.divf %179, %180 : vector<8x128xf32>
    %182 = vector.extract_strided_slice %175 {offsets = [0, 128], sizes = [8, 128], strides = [1, 1]} : vector<8x512xf32> to vector<8x128xf32>
    %183 = arith.negf %182 : vector<8x128xf32>
    %184 = math.exp %183 : vector<8x128xf32>
    %cst_69 = arith.constant 1.000000e+00 : f32
    %185 = vector.broadcast %cst_69 : f32 to vector<8x128xf32>
    %186 = arith.addf %185, %184 : vector<8x128xf32>
    %187 = arith.divf %185, %186 : vector<8x128xf32>
    %188 = vector.extract_strided_slice %175 {offsets = [0, 256], sizes = [8, 128], strides = [1, 1]} : vector<8x512xf32> to vector<8x128xf32>
    %189 = math.tanh %188 : vector<8x128xf32>
    %190 = vector.extract_strided_slice %175 {offsets = [0, 384], sizes = [8, 128], strides = [1, 1]} : vector<8x512xf32> to vector<8x128xf32>
    %191 = arith.negf %190 : vector<8x128xf32>
    %192 = math.exp %191 : vector<8x128xf32>
    %cst_70 = arith.constant 1.000000e+00 : f32
    %193 = vector.broadcast %cst_70 : f32 to vector<8x128xf32>
    %194 = arith.addf %193, %192 : vector<8x128xf32>
    %195 = arith.divf %193, %194 : vector<8x128xf32>
    %196 = arith.mulf %187, %163 : vector<8x128xf32>
    %197 = arith.mulf %181, %189 : vector<8x128xf32>
    %198 = arith.addf %196, %197 : vector<8x128xf32>
    %199 = math.tanh %198 : vector<8x128xf32>
    %200 = arith.mulf %195, %199 : vector<8x128xf32>
    %201 = arith.index_cast %169 : i32 to index
    %c0_71 = arith.constant 0 : index
    %202 = vector.load %arg21[%201, %c0_71] : memref<64x128xf32, #tpu.memory_space<vmem>>, vector<8x128xf32>
    tpu.vector_store %arg21[%201, %c0_71], %200 {strides = array<i32>} : memref<64x128xf32, #tpu.memory_space<vmem>>, vector<8x128xf32>,
    %c4_i32 = arith.constant 4 : i32
    %c8_i32_72 = arith.constant 8 : i32
    %203 = arith.muli %c4_i32, %c8_i32_72 : i32
    %204 = tpu.assume_multiple %203, 8 : i32
    %205 = arith.index_cast %204 : i32 to index
    %c0_73 = arith.constant 0 : index
    %206 = vector.load %arg20[%205, %c0_73] : memref<64x512xf32, #tpu.memory_space<vmem>>, vector<8x512xf32>
    %207 = arith.truncf %200 : vector<8x128xf32> to vector<8x128xbf16>
    %c0_74 = arith.constant 0 : index
    %c0_75 = arith.constant 0 : index
    %208 = vector.load %arg10[%c0_74, %c0_75] : memref<128x512xbf16, #tpu.memory_space<vmem>>, vector<128x512xbf16>
    %cst_76 = arith.constant dense<0.000000e+00> : vector<8x512xf32>
    %209 = tpu.matmul %207, %208, %cst_76 {dimension_numbers = #tpu.dot_dimension_numbers<[1], [0], [0], [1], [0, 0, 1, 1], [], []>} : vector<8x128xbf16>, vector<128x512xbf16>, vector<8x512xf32> -> vector<8x512xf32>
    %210 = arith.addf %206, %209 : vector<8x512xf32>
    %211 = vector.extract_strided_slice %210 {offsets = [0, 0], sizes = [8, 128], strides = [1, 1]} : vector<8x512xf32> to vector<8x128xf32>
    %212 = arith.negf %211 : vector<8x128xf32>
    %213 = math.exp %212 : vector<8x128xf32>
    %cst_77 = arith.constant 1.000000e+00 : f32
    %214 = vector.broadcast %cst_77 : f32 to vector<8x128xf32>
    %215 = arith.addf %214, %213 : vector<8x128xf32>
    %216 = arith.divf %214, %215 : vector<8x128xf32>
    %217 = vector.extract_strided_slice %210 {offsets = [0, 128], sizes = [8, 128], strides = [1, 1]} : vector<8x512xf32> to vector<8x128xf32>
    %218 = arith.negf %217 : vector<8x128xf32>
    %219 = math.exp %218 : vector<8x128xf32>
    %cst_78 = arith.constant 1.000000e+00 : f32
    %220 = vector.broadcast %cst_78 : f32 to vector<8x128xf32>
    %221 = arith.addf %220, %219 : vector<8x128xf32>
    %222 = arith.divf %220, %221 : vector<8x128xf32>
    %223 = vector.extract_strided_slice %210 {offsets = [0, 256], sizes = [8, 128], strides = [1, 1]} : vector<8x512xf32> to vector<8x128xf32>
    %224 = math.tanh %223 : vector<8x128xf32>
    %225 = vector.extract_strided_slice %210 {offsets = [0, 384], sizes = [8, 128], strides = [1, 1]} : vector<8x512xf32> to vector<8x128xf32>
    %226 = arith.negf %225 : vector<8x128xf32>
    %227 = math.exp %226 : vector<8x128xf32>
    %cst_79 = arith.constant 1.000000e+00 : f32
    %228 = vector.broadcast %cst_79 : f32 to vector<8x128xf32>
    %229 = arith.addf %228, %227 : vector<8x128xf32>
    %230 = arith.divf %228, %229 : vector<8x128xf32>
    %231 = arith.mulf %222, %198 : vector<8x128xf32>
    %232 = arith.mulf %216, %224 : vector<8x128xf32>
    %233 = arith.addf %231, %232 : vector<8x128xf32>
    %234 = math.tanh %233 : vector<8x128xf32>
    %235 = arith.mulf %230, %234 : vector<8x128xf32>
    %236 = arith.index_cast %204 : i32 to index
    %c0_80 = arith.constant 0 : index
    %237 = vector.load %arg21[%236, %c0_80] : memref<64x128xf32, #tpu.memory_space<vmem>>, vector<8x128xf32>
    tpu.vector_store %arg21[%236, %c0_80], %235 {strides = array<i32>} : memref<64x128xf32, #tpu.memory_space<vmem>>, vector<8x128xf32>,
    %c5_i32 = arith.constant 5 : i32
    %c8_i32_81 = arith.constant 8 : i32
    %238 = arith.muli %c5_i32, %c8_i32_81 : i32
    %239 = tpu.assume_multiple %238, 8 : i32
    %240 = arith.index_cast %239 : i32 to index
    %c0_82 = arith.constant 0 : index
    %241 = vector.load %arg20[%240, %c0_82] : memref<64x512xf32, #tpu.memory_space<vmem>>, vector<8x512xf32>
    %242 = arith.truncf %235 : vector<8x128xf32> to vector<8x128xbf16>
    %c0_83 = arith.constant 0 : index
    %c0_84 = arith.constant 0 : index
    %243 = vector.load %arg10[%c0_83, %c0_84] : memref<128x512xbf16, #tpu.memory_space<vmem>>, vector<128x512xbf16>
    %cst_85 = arith.constant dense<0.000000e+00> : vector<8x512xf32>
    %244 = tpu.matmul %242, %243, %cst_85 {dimension_numbers = #tpu.dot_dimension_numbers<[1], [0], [0], [1], [0, 0, 1, 1], [], []>} : vector<8x128xbf16>, vector<128x512xbf16>, vector<8x512xf32> -> vector<8x512xf32>
    %245 = arith.addf %241, %244 : vector<8x512xf32>
    %246 = vector.extract_strided_slice %245 {offsets = [0, 0], sizes = [8, 128], strides = [1, 1]} : vector<8x512xf32> to vector<8x128xf32>
    %247 = arith.negf %246 : vector<8x128xf32>
    %248 = math.exp %247 : vector<8x128xf32>
    %cst_86 = arith.constant 1.000000e+00 : f32
    %249 = vector.broadcast %cst_86 : f32 to vector<8x128xf32>
    %250 = arith.addf %249, %248 : vector<8x128xf32>
    %251 = arith.divf %249, %250 : vector<8x128xf32>
    %252 = vector.extract_strided_slice %245 {offsets = [0, 128], sizes = [8, 128], strides = [1, 1]} : vector<8x512xf32> to vector<8x128xf32>
    %253 = arith.negf %252 : vector<8x128xf32>
    %254 = math.exp %253 : vector<8x128xf32>
    %cst_87 = arith.constant 1.000000e+00 : f32
    %255 = vector.broadcast %cst_87 : f32 to vector<8x128xf32>
    %256 = arith.addf %255, %254 : vector<8x128xf32>
    %257 = arith.divf %255, %256 : vector<8x128xf32>
    %258 = vector.extract_strided_slice %245 {offsets = [0, 256], sizes = [8, 128], strides = [1, 1]} : vector<8x512xf32> to vector<8x128xf32>
    %259 = math.tanh %258 : vector<8x128xf32>
    %260 = vector.extract_strided_slice %245 {offsets = [0, 384], sizes = [8, 128], strides = [1, 1]} : vector<8x512xf32> to vector<8x128xf32>
    %261 = arith.negf %260 : vector<8x128xf32>
    %262 = math.exp %261 : vector<8x128xf32>
    %cst_88 = arith.constant 1.000000e+00 : f32
    %263 = vector.broadcast %cst_88 : f32 to vector<8x128xf32>
    %264 = arith.addf %263, %262 : vector<8x128xf32>
    %265 = arith.divf %263, %264 : vector<8x128xf32>
    %266 = arith.mulf %257, %233 : vector<8x128xf32>
    %267 = arith.mulf %251, %259 : vector<8x128xf32>
    %268 = arith.addf %266, %267 : vector<8x128xf32>
    %269 = math.tanh %268 : vector<8x128xf32>
    %270 = arith.mulf %265, %269 : vector<8x128xf32>
    %271 = arith.index_cast %239 : i32 to index
    %c0_89 = arith.constant 0 : index
    %272 = vector.load %arg21[%271, %c0_89] : memref<64x128xf32, #tpu.memory_space<vmem>>, vector<8x128xf32>
    tpu.vector_store %arg21[%271, %c0_89], %270 {strides = array<i32>} : memref<64x128xf32, #tpu.memory_space<vmem>>, vector<8x128xf32>,
    %c6_i32 = arith.constant 6 : i32
    %c8_i32_90 = arith.constant 8 : i32
    %273 = arith.muli %c6_i32, %c8_i32_90 : i32
    %274 = tpu.assume_multiple %273, 8 : i32
    %275 = arith.index_cast %274 : i32 to index
    %c0_91 = arith.constant 0 : index
    %276 = vector.load %arg20[%275, %c0_91] : memref<64x512xf32, #tpu.memory_space<vmem>>, vector<8x512xf32>
    %277 = arith.truncf %270 : vector<8x128xf32> to vector<8x128xbf16>
    %c0_92 = arith.constant 0 : index
    %c0_93 = arith.constant 0 : index
    %278 = vector.load %arg10[%c0_92, %c0_93] : memref<128x512xbf16, #tpu.memory_space<vmem>>, vector<128x512xbf16>
    %cst_94 = arith.constant dense<0.000000e+00> : vector<8x512xf32>
    %279 = tpu.matmul %277, %278, %cst_94 {dimension_numbers = #tpu.dot_dimension_numbers<[1], [0], [0], [1], [0, 0, 1, 1], [], []>} : vector<8x128xbf16>, vector<128x512xbf16>, vector<8x512xf32> -> vector<8x512xf32>
    %280 = arith.addf %276, %279 : vector<8x512xf32>
    %281 = vector.extract_strided_slice %280 {offsets = [0, 0], sizes = [8, 128], strides = [1, 1]} : vector<8x512xf32> to vector<8x128xf32>
    %282 = arith.negf %281 : vector<8x128xf32>
    %283 = math.exp %282 : vector<8x128xf32>
    %cst_95 = arith.constant 1.000000e+00 : f32
    %284 = vector.broadcast %cst_95 : f32 to vector<8x128xf32>
    %285 = arith.addf %284, %283 : vector<8x128xf32>
    %286 = arith.divf %284, %285 : vector<8x128xf32>
    %287 = vector.extract_strided_slice %280 {offsets = [0, 128], sizes = [8, 128], strides = [1, 1]} : vector<8x512xf32> to vector<8x128xf32>
    %288 = arith.negf %287 : vector<8x128xf32>
    %289 = math.exp %288 : vector<8x128xf32>
    %cst_96 = arith.constant 1.000000e+00 : f32
    %290 = vector.broadcast %cst_96 : f32 to vector<8x128xf32>
    %291 = arith.addf %290, %289 : vector<8x128xf32>
    %292 = arith.divf %290, %291 : vector<8x128xf32>
    %293 = vector.extract_strided_slice %280 {offsets = [0, 256], sizes = [8, 128], strides = [1, 1]} : vector<8x512xf32> to vector<8x128xf32>
    %294 = math.tanh %293 : vector<8x128xf32>
    %295 = vector.extract_strided_slice %280 {offsets = [0, 384], sizes = [8, 128], strides = [1, 1]} : vector<8x512xf32> to vector<8x128xf32>
    %296 = arith.negf %295 : vector<8x128xf32>
    %297 = math.exp %296 : vector<8x128xf32>
    %cst_97 = arith.constant 1.000000e+00 : f32
    %298 = vector.broadcast %cst_97 : f32 to vector<8x128xf32>
    %299 = arith.addf %298, %297 : vector<8x128xf32>
    %300 = arith.divf %298, %299 : vector<8x128xf32>
    %301 = arith.mulf %292, %268 : vector<8x128xf32>
    %302 = arith.mulf %286, %294 : vector<8x128xf32>
    %303 = arith.addf %301, %302 : vector<8x128xf32>
    %304 = math.tanh %303 : vector<8x128xf32>
    %305 = arith.mulf %300, %304 : vector<8x128xf32>
    %306 = arith.index_cast %274 : i32 to index
    %c0_98 = arith.constant 0 : index
    %307 = vector.load %arg21[%306, %c0_98] : memref<64x128xf32, #tpu.memory_space<vmem>>, vector<8x128xf32>
    tpu.vector_store %arg21[%306, %c0_98], %305 {strides = array<i32>} : memref<64x128xf32, #tpu.memory_space<vmem>>, vector<8x128xf32>,
    %c7_i32 = arith.constant 7 : i32
    %c8_i32_99 = arith.constant 8 : i32
    %308 = arith.muli %c7_i32, %c8_i32_99 : i32
    %309 = tpu.assume_multiple %308, 8 : i32
    %310 = arith.index_cast %309 : i32 to index
    %c0_100 = arith.constant 0 : index
    %311 = vector.load %arg20[%310, %c0_100] : memref<64x512xf32, #tpu.memory_space<vmem>>, vector<8x512xf32>
    %312 = arith.truncf %305 : vector<8x128xf32> to vector<8x128xbf16>
    %c0_101 = arith.constant 0 : index
    %c0_102 = arith.constant 0 : index
    %313 = vector.load %arg10[%c0_101, %c0_102] : memref<128x512xbf16, #tpu.memory_space<vmem>>, vector<128x512xbf16>
    %cst_103 = arith.constant dense<0.000000e+00> : vector<8x512xf32>
    %314 = tpu.matmul %312, %313, %cst_103 {dimension_numbers = #tpu.dot_dimension_numbers<[1], [0], [0], [1], [0, 0, 1, 1], [], []>} : vector<8x128xbf16>, vector<128x512xbf16>, vector<8x512xf32> -> vector<8x512xf32>
    %315 = arith.addf %311, %314 : vector<8x512xf32>
    %316 = vector.extract_strided_slice %315 {offsets = [0, 0], sizes = [8, 128], strides = [1, 1]} : vector<8x512xf32> to vector<8x128xf32>
    %317 = arith.negf %316 : vector<8x128xf32>
    %318 = math.exp %317 : vector<8x128xf32>
    %cst_104 = arith.constant 1.000000e+00 : f32
    %319 = vector.broadcast %cst_104 : f32 to vector<8x128xf32>
    %320 = arith.addf %319, %318 : vector<8x128xf32>
    %321 = arith.divf %319, %320 : vector<8x128xf32>
    %322 = vector.extract_strided_slice %315 {offsets = [0, 128], sizes = [8, 128], strides = [1, 1]} : vector<8x512xf32> to vector<8x128xf32>
    %323 = arith.negf %322 : vector<8x128xf32>
    %324 = math.exp %323 : vector<8x128xf32>
    %cst_105 = arith.constant 1.000000e+00 : f32
    %325 = vector.broadcast %cst_105 : f32 to vector<8x128xf32>
    %326 = arith.addf %325, %324 : vector<8x128xf32>
    %327 = arith.divf %325, %326 : vector<8x128xf32>
    %328 = vector.extract_strided_slice %315 {offsets = [0, 256], sizes = [8, 128], strides = [1, 1]} : vector<8x512xf32> to vector<8x128xf32>
    %329 = math.tanh %328 : vector<8x128xf32>
    %330 = vector.extract_strided_slice %315 {offsets = [0, 384], sizes = [8, 128], strides = [1, 1]} : vector<8x512xf32> to vector<8x128xf32>
    %331 = arith.negf %330 : vector<8x128xf32>
    %332 = math.exp %331 : vector<8x128xf32>
    %cst_106 = arith.constant 1.000000e+00 : f32
    %333 = vector.broadcast %cst_106 : f32 to vector<8x128xf32>
    %334 = arith.addf %333, %332 : vector<8x128xf32>
    %335 = arith.divf %333, %334 : vector<8x128xf32>
    %336 = arith.mulf %327, %303 : vector<8x128xf32>
    %337 = arith.mulf %321, %329 : vector<8x128xf32>
    %338 = arith.addf %336, %337 : vector<8x128xf32>
    %339 = math.tanh %338 : vector<8x128xf32>
    %340 = arith.mulf %335, %339 : vector<8x128xf32>
    %341 = arith.index_cast %309 : i32 to index
    %c0_107 = arith.constant 0 : index
    %342 = vector.load %arg21[%341, %c0_107] : memref<64x128xf32, #tpu.memory_space<vmem>>, vector<8x128xf32>
    tpu.vector_store %arg21[%341, %c0_107], %340 {strides = array<i32>} : memref<64x128xf32, #tpu.memory_space<vmem>>, vector<8x128xf32>,
    %c8_i32_108 = arith.constant 8 : i32
    %c0_109 = arith.constant 0 : index
    %c0_110 = arith.constant 0 : index
    %343 = vector.load %arg21[%c0_109, %c0_110] : memref<64x128xf32, #tpu.memory_space<vmem>>, vector<64x128xf32>
    %344 = arith.truncf %343 : vector<64x128xf32> to vector<64x128xbf16>
    %c0_111 = arith.constant 0 : index
    %c0_112 = arith.constant 0 : index
    %345 = vector.load %arg12[%c0_111, %c0_112] : memref<128x512xbf16, #tpu.memory_space<vmem>>, vector<128x512xbf16>
    %cst_113 = arith.constant dense<0.000000e+00> : vector<64x512xf32>
    %346 = tpu.matmul %344, %345, %cst_113 {dimension_numbers = #tpu.dot_dimension_numbers<[1], [0], [0], [1], [0, 0, 1, 1], [], []>} : vector<64x128xbf16>, vector<128x512xbf16>, vector<64x512xf32> -> vector<64x512xf32>
    %c0_114 = arith.constant 0 : index
    %c0_115 = arith.constant 0 : index
    %347 = vector.load %arg14[%c0_114, %c0_115] : memref<1x512xf32, #tpu.memory_space<vmem>>, vector<1x512xf32>
    %348 = vector.broadcast %347 : vector<1x512xf32> to vector<64x512xf32>
    %349 = arith.addf %346, %348 : vector<64x512xf32>
    %c0_116 = arith.constant 0 : index
    %c0_117 = arith.constant 0 : index
    %350 = vector.load %arg20[%c0_116, %c0_117] : memref<64x512xf32, #tpu.memory_space<vmem>>, vector<64x512xf32>
    tpu.vector_store %arg20[%c0_116, %c0_117], %349 {strides = array<i32>} : memref<64x512xf32, #tpu.memory_space<vmem>>, vector<64x512xf32>,
    %c0_i32_118 = arith.constant 0 : i32
    %c8_i32_119 = arith.constant 8 : i32
    %351 = arith.muli %c0_i32_118, %c8_i32_119 : i32
    %352 = tpu.assume_multiple %351, 8 : i32
    %353 = arith.index_cast %352 : i32 to index
    %c0_120 = arith.constant 0 : index
    %354 = vector.load %arg20[%353, %c0_120] : memref<64x512xf32, #tpu.memory_space<vmem>>, vector<8x512xf32>
    %355 = arith.truncf %62 : vector<8x128xf32> to vector<8x128xbf16>
    %c0_121 = arith.constant 0 : index
    %c0_122 = arith.constant 0 : index
    %356 = vector.load %arg13[%c0_121, %c0_122] : memref<128x512xbf16, #tpu.memory_space<vmem>>, vector<128x512xbf16>
    %cst_123 = arith.constant dense<0.000000e+00> : vector<8x512xf32>
    %357 = tpu.matmul %355, %356, %cst_123 {dimension_numbers = #tpu.dot_dimension_numbers<[1], [0], [0], [1], [0, 0, 1, 1], [], []>} : vector<8x128xbf16>, vector<128x512xbf16>, vector<8x512xf32> -> vector<8x512xf32>
    %358 = arith.addf %354, %357 : vector<8x512xf32>
    %359 = vector.extract_strided_slice %358 {offsets = [0, 0], sizes = [8, 128], strides = [1, 1]} : vector<8x512xf32> to vector<8x128xf32>
    %360 = arith.negf %359 : vector<8x128xf32>
    %361 = math.exp %360 : vector<8x128xf32>
    %cst_124 = arith.constant 1.000000e+00 : f32
    %362 = vector.broadcast %cst_124 : f32 to vector<8x128xf32>
    %363 = arith.addf %362, %361 : vector<8x128xf32>
    %364 = arith.divf %362, %363 : vector<8x128xf32>
    %365 = vector.extract_strided_slice %358 {offsets = [0, 128], sizes = [8, 128], strides = [1, 1]} : vector<8x512xf32> to vector<8x128xf32>
    %366 = arith.negf %365 : vector<8x128xf32>
    %367 = math.exp %366 : vector<8x128xf32>
    %cst_125 = arith.constant 1.000000e+00 : f32
    %368 = vector.broadcast %cst_125 : f32 to vector<8x128xf32>
    %369 = arith.addf %368, %367 : vector<8x128xf32>
    %370 = arith.divf %368, %369 : vector<8x128xf32>
    %371 = vector.extract_strided_slice %358 {offsets = [0, 256], sizes = [8, 128], strides = [1, 1]} : vector<8x512xf32> to vector<8x128xf32>
    %372 = math.tanh %371 : vector<8x128xf32>
    %373 = vector.extract_strided_slice %358 {offsets = [0, 384], sizes = [8, 128], strides = [1, 1]} : vector<8x512xf32> to vector<8x128xf32>
    %374 = arith.negf %373 : vector<8x128xf32>
    %375 = math.exp %374 : vector<8x128xf32>
    %cst_126 = arith.constant 1.000000e+00 : f32
    %376 = vector.broadcast %cst_126 : f32 to vector<8x128xf32>
    %377 = arith.addf %376, %375 : vector<8x128xf32>
    %378 = arith.divf %376, %377 : vector<8x128xf32>
    %379 = arith.mulf %370, %62 : vector<8x128xf32>
    %380 = arith.mulf %364, %372 : vector<8x128xf32>
    %381 = arith.addf %379, %380 : vector<8x128xf32>
    %382 = math.tanh %381 : vector<8x128xf32>
    %383 = arith.mulf %378, %382 : vector<8x128xf32>
    %c1_i32_127 = arith.constant 1 : i32
    %c8_i32_128 = arith.constant 8 : i32
    %384 = arith.muli %c1_i32_127, %c8_i32_128 : i32
    %385 = tpu.assume_multiple %384, 8 : i32
    %386 = arith.index_cast %385 : i32 to index
    %c0_129 = arith.constant 0 : index
    %387 = vector.load %arg20[%386, %c0_129] : memref<64x512xf32, #tpu.memory_space<vmem>>, vector<8x512xf32>
    %388 = arith.truncf %383 : vector<8x128xf32> to vector<8x128xbf16>
    %c0_130 = arith.constant 0 : index
    %c0_131 = arith.constant 0 : index
    %389 = vector.load %arg13[%c0_130, %c0_131] : memref<128x512xbf16, #tpu.memory_space<vmem>>, vector<128x512xbf16>
    %cst_132 = arith.constant dense<0.000000e+00> : vector<8x512xf32>
    %390 = tpu.matmul %388, %389, %cst_132 {dimension_numbers = #tpu.dot_dimension_numbers<[1], [0], [0], [1], [0, 0, 1, 1], [], []>} : vector<8x128xbf16>, vector<128x512xbf16>, vector<8x512xf32> -> vector<8x512xf32>
    %391 = arith.addf %387, %390 : vector<8x512xf32>
    %392 = vector.extract_strided_slice %391 {offsets = [0, 0], sizes = [8, 128], strides = [1, 1]} : vector<8x512xf32> to vector<8x128xf32>
    %393 = arith.negf %392 : vector<8x128xf32>
    %394 = math.exp %393 : vector<8x128xf32>
    %cst_133 = arith.constant 1.000000e+00 : f32
    %395 = vector.broadcast %cst_133 : f32 to vector<8x128xf32>
    %396 = arith.addf %395, %394 : vector<8x128xf32>
    %397 = arith.divf %395, %396 : vector<8x128xf32>
    %398 = vector.extract_strided_slice %391 {offsets = [0, 128], sizes = [8, 128], strides = [1, 1]} : vector<8x512xf32> to vector<8x128xf32>
    %399 = arith.negf %398 : vector<8x128xf32>
    %400 = math.exp %399 : vector<8x128xf32>
    %cst_134 = arith.constant 1.000000e+00 : f32
    %401 = vector.broadcast %cst_134 : f32 to vector<8x128xf32>
    %402 = arith.addf %401, %400 : vector<8x128xf32>
    %403 = arith.divf %401, %402 : vector<8x128xf32>
    %404 = vector.extract_strided_slice %391 {offsets = [0, 256], sizes = [8, 128], strides = [1, 1]} : vector<8x512xf32> to vector<8x128xf32>
    %405 = math.tanh %404 : vector<8x128xf32>
    %406 = vector.extract_strided_slice %391 {offsets = [0, 384], sizes = [8, 128], strides = [1, 1]} : vector<8x512xf32> to vector<8x128xf32>
    %407 = arith.negf %406 : vector<8x128xf32>
    %408 = math.exp %407 : vector<8x128xf32>
    %cst_135 = arith.constant 1.000000e+00 : f32
    %409 = vector.broadcast %cst_135 : f32 to vector<8x128xf32>
    %410 = arith.addf %409, %408 : vector<8x128xf32>
    %411 = arith.divf %409, %410 : vector<8x128xf32>
    %412 = arith.mulf %403, %381 : vector<8x128xf32>
    %413 = arith.mulf %397, %405 : vector<8x128xf32>
    %414 = arith.addf %412, %413 : vector<8x128xf32>
    %415 = math.tanh %414 : vector<8x128xf32>
    %416 = arith.mulf %411, %415 : vector<8x128xf32>
    %c2_i32_136 = arith.constant 2 : i32
    %c8_i32_137 = arith.constant 8 : i32
    %417 = arith.muli %c2_i32_136, %c8_i32_137 : i32
    %418 = tpu.assume_multiple %417, 8 : i32
    %419 = arith.index_cast %418 : i32 to index
    %c0_138 = arith.constant 0 : index
    %420 = vector.load %arg20[%419, %c0_138] : memref<64x512xf32, #tpu.memory_space<vmem>>, vector<8x512xf32>
    %421 = arith.truncf %416 : vector<8x128xf32> to vector<8x128xbf16>
    %c0_139 = arith.constant 0 : index
    %c0_140 = arith.constant 0 : index
    %422 = vector.load %arg13[%c0_139, %c0_140] : memref<128x512xbf16, #tpu.memory_space<vmem>>, vector<128x512xbf16>
    %cst_141 = arith.constant dense<0.000000e+00> : vector<8x512xf32>
    %423 = tpu.matmul %421, %422, %cst_141 {dimension_numbers = #tpu.dot_dimension_numbers<[1], [0], [0], [1], [0, 0, 1, 1], [], []>} : vector<8x128xbf16>, vector<128x512xbf16>, vector<8x512xf32> -> vector<8x512xf32>
    %424 = arith.addf %420, %423 : vector<8x512xf32>
    %425 = vector.extract_strided_slice %424 {offsets = [0, 0], sizes = [8, 128], strides = [1, 1]} : vector<8x512xf32> to vector<8x128xf32>
    %426 = arith.negf %425 : vector<8x128xf32>
    %427 = math.exp %426 : vector<8x128xf32>
    %cst_142 = arith.constant 1.000000e+00 : f32
    %428 = vector.broadcast %cst_142 : f32 to vector<8x128xf32>
    %429 = arith.addf %428, %427 : vector<8x128xf32>
    %430 = arith.divf %428, %429 : vector<8x128xf32>
    %431 = vector.extract_strided_slice %424 {offsets = [0, 128], sizes = [8, 128], strides = [1, 1]} : vector<8x512xf32> to vector<8x128xf32>
    %432 = arith.negf %431 : vector<8x128xf32>
    %433 = math.exp %432 : vector<8x128xf32>
    %cst_143 = arith.constant 1.000000e+00 : f32
    %434 = vector.broadcast %cst_143 : f32 to vector<8x128xf32>
    %435 = arith.addf %434, %433 : vector<8x128xf32>
    %436 = arith.divf %434, %435 : vector<8x128xf32>
    %437 = vector.extract_strided_slice %424 {offsets = [0, 256], sizes = [8, 128], strides = [1, 1]} : vector<8x512xf32> to vector<8x128xf32>
    %438 = math.tanh %437 : vector<8x128xf32>
    %439 = vector.extract_strided_slice %424 {offsets = [0, 384], sizes = [8, 128], strides = [1, 1]} : vector<8x512xf32> to vector<8x128xf32>
    %440 = arith.negf %439 : vector<8x128xf32>
    %441 = math.exp %440 : vector<8x128xf32>
    %cst_144 = arith.constant 1.000000e+00 : f32
    %442 = vector.broadcast %cst_144 : f32 to vector<8x128xf32>
    %443 = arith.addf %442, %441 : vector<8x128xf32>
    %444 = arith.divf %442, %443 : vector<8x128xf32>
    %445 = arith.mulf %436, %414 : vector<8x128xf32>
    %446 = arith.mulf %430, %438 : vector<8x128xf32>
    %447 = arith.addf %445, %446 : vector<8x128xf32>
    %448 = math.tanh %447 : vector<8x128xf32>
    %449 = arith.mulf %444, %448 : vector<8x128xf32>
    %c3_i32_145 = arith.constant 3 : i32
    %c8_i32_146 = arith.constant 8 : i32
    %450 = arith.muli %c3_i32_145, %c8_i32_146 : i32
    %451 = tpu.assume_multiple %450, 8 : i32
    %452 = arith.index_cast %451 : i32 to index
    %c0_147 = arith.constant 0 : index
    %453 = vector.load %arg20[%452, %c0_147] : memref<64x512xf32, #tpu.memory_space<vmem>>, vector<8x512xf32>
    %454 = arith.truncf %449 : vector<8x128xf32> to vector<8x128xbf16>
    %c0_148 = arith.constant 0 : index
    %c0_149 = arith.constant 0 : index
    %455 = vector.load %arg13[%c0_148, %c0_149] : memref<128x512xbf16, #tpu.memory_space<vmem>>, vector<128x512xbf16>
    %cst_150 = arith.constant dense<0.000000e+00> : vector<8x512xf32>
    %456 = tpu.matmul %454, %455, %cst_150 {dimension_numbers = #tpu.dot_dimension_numbers<[1], [0], [0], [1], [0, 0, 1, 1], [], []>} : vector<8x128xbf16>, vector<128x512xbf16>, vector<8x512xf32> -> vector<8x512xf32>
    %457 = arith.addf %453, %456 : vector<8x512xf32>
    %458 = vector.extract_strided_slice %457 {offsets = [0, 0], sizes = [8, 128], strides = [1, 1]} : vector<8x512xf32> to vector<8x128xf32>
    %459 = arith.negf %458 : vector<8x128xf32>
    %460 = math.exp %459 : vector<8x128xf32>
    %cst_151 = arith.constant 1.000000e+00 : f32
    %461 = vector.broadcast %cst_151 : f32 to vector<8x128xf32>
    %462 = arith.addf %461, %460 : vector<8x128xf32>
    %463 = arith.divf %461, %462 : vector<8x128xf32>
    %464 = vector.extract_strided_slice %457 {offsets = [0, 128], sizes = [8, 128], strides = [1, 1]} : vector<8x512xf32> to vector<8x128xf32>
    %465 = arith.negf %464 : vector<8x128xf32>
    %466 = math.exp %465 : vector<8x128xf32>
    %cst_152 = arith.constant 1.000000e+00 : f32
    %467 = vector.broadcast %cst_152 : f32 to vector<8x128xf32>
    %468 = arith.addf %467, %466 : vector<8x128xf32>
    %469 = arith.divf %467, %468 : vector<8x128xf32>
    %470 = vector.extract_strided_slice %457 {offsets = [0, 256], sizes = [8, 128], strides = [1, 1]} : vector<8x512xf32> to vector<8x128xf32>
    %471 = math.tanh %470 : vector<8x128xf32>
    %472 = vector.extract_strided_slice %457 {offsets = [0, 384], sizes = [8, 128], strides = [1, 1]} : vector<8x512xf32> to vector<8x128xf32>
    %473 = arith.negf %472 : vector<8x128xf32>
    %474 = math.exp %473 : vector<8x128xf32>
    %cst_153 = arith.constant 1.000000e+00 : f32
    %475 = vector.broadcast %cst_153 : f32 to vector<8x128xf32>
    %476 = arith.addf %475, %474 : vector<8x128xf32>
    %477 = arith.divf %475, %476 : vector<8x128xf32>
    %478 = arith.mulf %469, %447 : vector<8x128xf32>
    %479 = arith.mulf %463, %471 : vector<8x128xf32>
    %480 = arith.addf %478, %479 : vector<8x128xf32>
    %481 = math.tanh %480 : vector<8x128xf32>
    %482 = arith.mulf %477, %481 : vector<8x128xf32>
    %c4_i32_154 = arith.constant 4 : i32
    %c8_i32_155 = arith.constant 8 : i32
    %483 = arith.muli %c4_i32_154, %c8_i32_155 : i32
    %484 = tpu.assume_multiple %483, 8 : i32
    %485 = arith.index_cast %484 : i32 to index
    %c0_156 = arith.constant 0 : index
    %486 = vector.load %arg20[%485, %c0_156] : memref<64x512xf32, #tpu.memory_space<vmem>>, vector<8x512xf32>
    %487 = arith.truncf %482 : vector<8x128xf32> to vector<8x128xbf16>
    %c0_157 = arith.constant 0 : index
    %c0_158 = arith.constant 0 : index
    %488 = vector.load %arg13[%c0_157, %c0_158] : memref<128x512xbf16, #tpu.memory_space<vmem>>, vector<128x512xbf16>
    %cst_159 = arith.constant dense<0.000000e+00> : vector<8x512xf32>
    %489 = tpu.matmul %487, %488, %cst_159 {dimension_numbers = #tpu.dot_dimension_numbers<[1], [0], [0], [1], [0, 0, 1, 1], [], []>} : vector<8x128xbf16>, vector<128x512xbf16>, vector<8x512xf32> -> vector<8x512xf32>
    %490 = arith.addf %486, %489 : vector<8x512xf32>
    %491 = vector.extract_strided_slice %490 {offsets = [0, 0], sizes = [8, 128], strides = [1, 1]} : vector<8x512xf32> to vector<8x128xf32>
    %492 = arith.negf %491 : vector<8x128xf32>
    %493 = math.exp %492 : vector<8x128xf32>
    %cst_160 = arith.constant 1.000000e+00 : f32
    %494 = vector.broadcast %cst_160 : f32 to vector<8x128xf32>
    %495 = arith.addf %494, %493 : vector<8x128xf32>
    %496 = arith.divf %494, %495 : vector<8x128xf32>
    %497 = vector.extract_strided_slice %490 {offsets = [0, 128], sizes = [8, 128], strides = [1, 1]} : vector<8x512xf32> to vector<8x128xf32>
    %498 = arith.negf %497 : vector<8x128xf32>
    %499 = math.exp %498 : vector<8x128xf32>
    %cst_161 = arith.constant 1.000000e+00 : f32
    %500 = vector.broadcast %cst_161 : f32 to vector<8x128xf32>
    %501 = arith.addf %500, %499 : vector<8x128xf32>
    %502 = arith.divf %500, %501 : vector<8x128xf32>
    %503 = vector.extract_strided_slice %490 {offsets = [0, 256], sizes = [8, 128], strides = [1, 1]} : vector<8x512xf32> to vector<8x128xf32>
    %504 = math.tanh %503 : vector<8x128xf32>
    %505 = vector.extract_strided_slice %490 {offsets = [0, 384], sizes = [8, 128], strides = [1, 1]} : vector<8x512xf32> to vector<8x128xf32>
    %506 = arith.negf %505 : vector<8x128xf32>
    %507 = math.exp %506 : vector<8x128xf32>
    %cst_162 = arith.constant 1.000000e+00 : f32
    %508 = vector.broadcast %cst_162 : f32 to vector<8x128xf32>
    %509 = arith.addf %508, %507 : vector<8x128xf32>
    %510 = arith.divf %508, %509 : vector<8x128xf32>
    %511 = arith.mulf %502, %480 : vector<8x128xf32>
    %512 = arith.mulf %496, %504 : vector<8x128xf32>
    %513 = arith.addf %511, %512 : vector<8x128xf32>
    %514 = math.tanh %513 : vector<8x128xf32>
    %515 = arith.mulf %510, %514 : vector<8x128xf32>
    %c5_i32_163 = arith.constant 5 : i32
    %c8_i32_164 = arith.constant 8 : i32
    %516 = arith.muli %c5_i32_163, %c8_i32_164 : i32
    %517 = tpu.assume_multiple %516, 8 : i32
    %518 = arith.index_cast %517 : i32 to index
    %c0_165 = arith.constant 0 : index
    %519 = vector.load %arg20[%518, %c0_165] : memref<64x512xf32, #tpu.memory_space<vmem>>, vector<8x512xf32>
    %520 = arith.truncf %515 : vector<8x128xf32> to vector<8x128xbf16>
    %c0_166 = arith.constant 0 : index
    %c0_167 = arith.constant 0 : index
    %521 = vector.load %arg13[%c0_166, %c0_167] : memref<128x512xbf16, #tpu.memory_space<vmem>>, vector<128x512xbf16>
    %cst_168 = arith.constant dense<0.000000e+00> : vector<8x512xf32>
    %522 = tpu.matmul %520, %521, %cst_168 {dimension_numbers = #tpu.dot_dimension_numbers<[1], [0], [0], [1], [0, 0, 1, 1], [], []>} : vector<8x128xbf16>, vector<128x512xbf16>, vector<8x512xf32> -> vector<8x512xf32>
    %523 = arith.addf %519, %522 : vector<8x512xf32>
    %524 = vector.extract_strided_slice %523 {offsets = [0, 0], sizes = [8, 128], strides = [1, 1]} : vector<8x512xf32> to vector<8x128xf32>
    %525 = arith.negf %524 : vector<8x128xf32>
    %526 = math.exp %525 : vector<8x128xf32>
    %cst_169 = arith.constant 1.000000e+00 : f32
    %527 = vector.broadcast %cst_169 : f32 to vector<8x128xf32>
    %528 = arith.addf %527, %526 : vector<8x128xf32>
    %529 = arith.divf %527, %528 : vector<8x128xf32>
    %530 = vector.extract_strided_slice %523 {offsets = [0, 128], sizes = [8, 128], strides = [1, 1]} : vector<8x512xf32> to vector<8x128xf32>
    %531 = arith.negf %530 : vector<8x128xf32>
    %532 = math.exp %531 : vector<8x128xf32>
    %cst_170 = arith.constant 1.000000e+00 : f32
    %533 = vector.broadcast %cst_170 : f32 to vector<8x128xf32>
    %534 = arith.addf %533, %532 : vector<8x128xf32>
    %535 = arith.divf %533, %534 : vector<8x128xf32>
    %536 = vector.extract_strided_slice %523 {offsets = [0, 256], sizes = [8, 128], strides = [1, 1]} : vector<8x512xf32> to vector<8x128xf32>
    %537 = math.tanh %536 : vector<8x128xf32>
    %538 = vector.extract_strided_slice %523 {offsets = [0, 384], sizes = [8, 128], strides = [1, 1]} : vector<8x512xf32> to vector<8x128xf32>
    %539 = arith.negf %538 : vector<8x128xf32>
    %540 = math.exp %539 : vector<8x128xf32>
    %cst_171 = arith.constant 1.000000e+00 : f32
    %541 = vector.broadcast %cst_171 : f32 to vector<8x128xf32>
    %542 = arith.addf %541, %540 : vector<8x128xf32>
    %543 = arith.divf %541, %542 : vector<8x128xf32>
    %544 = arith.mulf %535, %513 : vector<8x128xf32>
    %545 = arith.mulf %529, %537 : vector<8x128xf32>
    %546 = arith.addf %544, %545 : vector<8x128xf32>
    %547 = math.tanh %546 : vector<8x128xf32>
    %548 = arith.mulf %543, %547 : vector<8x128xf32>
    %c6_i32_172 = arith.constant 6 : i32
    %c8_i32_173 = arith.constant 8 : i32
    %549 = arith.muli %c6_i32_172, %c8_i32_173 : i32
    %550 = tpu.assume_multiple %549, 8 : i32
    %551 = arith.index_cast %550 : i32 to index
    %c0_174 = arith.constant 0 : index
    %552 = vector.load %arg20[%551, %c0_174] : memref<64x512xf32, #tpu.memory_space<vmem>>, vector<8x512xf32>
    %553 = arith.truncf %548 : vector<8x128xf32> to vector<8x128xbf16>
    %c0_175 = arith.constant 0 : index
    %c0_176 = arith.constant 0 : index
    %554 = vector.load %arg13[%c0_175, %c0_176] : memref<128x512xbf16, #tpu.memory_space<vmem>>, vector<128x512xbf16>
    %cst_177 = arith.constant dense<0.000000e+00> : vector<8x512xf32>
    %555 = tpu.matmul %553, %554, %cst_177 {dimension_numbers = #tpu.dot_dimension_numbers<[1], [0], [0], [1], [0, 0, 1, 1], [], []>} : vector<8x128xbf16>, vector<128x512xbf16>, vector<8x512xf32> -> vector<8x512xf32>
    %556 = arith.addf %552, %555 : vector<8x512xf32>
    %557 = vector.extract_strided_slice %556 {offsets = [0, 0], sizes = [8, 128], strides = [1, 1]} : vector<8x512xf32> to vector<8x128xf32>
    %558 = arith.negf %557 : vector<8x128xf32>
    %559 = math.exp %558 : vector<8x128xf32>
    %cst_178 = arith.constant 1.000000e+00 : f32
    %560 = vector.broadcast %cst_178 : f32 to vector<8x128xf32>
    %561 = arith.addf %560, %559 : vector<8x128xf32>
    %562 = arith.divf %560, %561 : vector<8x128xf32>
    %563 = vector.extract_strided_slice %556 {offsets = [0, 128], sizes = [8, 128], strides = [1, 1]} : vector<8x512xf32> to vector<8x128xf32>
    %564 = arith.negf %563 : vector<8x128xf32>
    %565 = math.exp %564 : vector<8x128xf32>
    %cst_179 = arith.constant 1.000000e+00 : f32
    %566 = vector.broadcast %cst_179 : f32 to vector<8x128xf32>
    %567 = arith.addf %566, %565 : vector<8x128xf32>
    %568 = arith.divf %566, %567 : vector<8x128xf32>
    %569 = vector.extract_strided_slice %556 {offsets = [0, 256], sizes = [8, 128], strides = [1, 1]} : vector<8x512xf32> to vector<8x128xf32>
    %570 = math.tanh %569 : vector<8x128xf32>
    %571 = vector.extract_strided_slice %556 {offsets = [0, 384], sizes = [8, 128], strides = [1, 1]} : vector<8x512xf32> to vector<8x128xf32>
    %572 = arith.negf %571 : vector<8x128xf32>
    %573 = math.exp %572 : vector<8x128xf32>
    %cst_180 = arith.constant 1.000000e+00 : f32
    %574 = vector.broadcast %cst_180 : f32 to vector<8x128xf32>
    %575 = arith.addf %574, %573 : vector<8x128xf32>
    %576 = arith.divf %574, %575 : vector<8x128xf32>
    %577 = arith.mulf %568, %546 : vector<8x128xf32>
    %578 = arith.mulf %562, %570 : vector<8x128xf32>
    %579 = arith.addf %577, %578 : vector<8x128xf32>
    %580 = math.tanh %579 : vector<8x128xf32>
    %581 = arith.mulf %576, %580 : vector<8x128xf32>
    %c7_i32_181 = arith.constant 7 : i32
    %c8_i32_182 = arith.constant 8 : i32
    %582 = arith.muli %c7_i32_181, %c8_i32_182 : i32
    %583 = tpu.assume_multiple %582, 8 : i32
    %584 = arith.index_cast %583 : i32 to index
    %c0_183 = arith.constant 0 : index
    %585 = vector.load %arg20[%584, %c0_183] : memref<64x512xf32, #tpu.memory_space<vmem>>, vector<8x512xf32>
    %586 = arith.truncf %581 : vector<8x128xf32> to vector<8x128xbf16>
    %c0_184 = arith.constant 0 : index
    %c0_185 = arith.constant 0 : index
    %587 = vector.load %arg13[%c0_184, %c0_185] : memref<128x512xbf16, #tpu.memory_space<vmem>>, vector<128x512xbf16>
    %cst_186 = arith.constant dense<0.000000e+00> : vector<8x512xf32>
    %588 = tpu.matmul %586, %587, %cst_186 {dimension_numbers = #tpu.dot_dimension_numbers<[1], [0], [0], [1], [0, 0, 1, 1], [], []>} : vector<8x128xbf16>, vector<128x512xbf16>, vector<8x512xf32> -> vector<8x512xf32>
    %589 = arith.addf %585, %588 : vector<8x512xf32>
    %590 = vector.extract_strided_slice %589 {offsets = [0, 0], sizes = [8, 128], strides = [1, 1]} : vector<8x512xf32> to vector<8x128xf32>
    %591 = arith.negf %590 : vector<8x128xf32>
    %592 = math.exp %591 : vector<8x128xf32>
    %cst_187 = arith.constant 1.000000e+00 : f32
    %593 = vector.broadcast %cst_187 : f32 to vector<8x128xf32>
    %594 = arith.addf %593, %592 : vector<8x128xf32>
    %595 = arith.divf %593, %594 : vector<8x128xf32>
    %596 = vector.extract_strided_slice %589 {offsets = [0, 128], sizes = [8, 128], strides = [1, 1]} : vector<8x512xf32> to vector<8x128xf32>
    %597 = arith.negf %596 : vector<8x128xf32>
    %598 = math.exp %597 : vector<8x128xf32>
    %cst_188 = arith.constant 1.000000e+00 : f32
    %599 = vector.broadcast %cst_188 : f32 to vector<8x128xf32>
    %600 = arith.addf %599, %598 : vector<8x128xf32>
    %601 = arith.divf %599, %600 : vector<8x128xf32>
    %602 = vector.extract_strided_slice %589 {offsets = [0, 256], sizes = [8, 128], strides = [1, 1]} : vector<8x512xf32> to vector<8x128xf32>
    %603 = math.tanh %602 : vector<8x128xf32>
    %604 = vector.extract_strided_slice %589 {offsets = [0, 384], sizes = [8, 128], strides = [1, 1]} : vector<8x512xf32> to vector<8x128xf32>
    %605 = arith.negf %604 : vector<8x128xf32>
    %606 = math.exp %605 : vector<8x128xf32>
    %cst_189 = arith.constant 1.000000e+00 : f32
    %607 = vector.broadcast %cst_189 : f32 to vector<8x128xf32>
    %608 = arith.addf %607, %606 : vector<8x128xf32>
    %609 = arith.divf %607, %608 : vector<8x128xf32>
    %610 = arith.mulf %601, %579 : vector<8x128xf32>
    %611 = arith.mulf %595, %603 : vector<8x128xf32>
    %612 = arith.addf %610, %611 : vector<8x128xf32>
    %613 = math.tanh %612 : vector<8x128xf32>
    %614 = arith.mulf %609, %613 : vector<8x128xf32>
    %c8_i32_190 = arith.constant 8 : i32
    %615 = arith.truncf %614 : vector<8x128xf32> to vector<8x128xbf16>
    %c0_191 = arith.constant 0 : index
    %c0_192 = arith.constant 0 : index
    %616 = vector.load %arg15[%c0_191, %c0_192] : memref<128x128xbf16, #tpu.memory_space<vmem>>, vector<128x128xbf16>
    %cst_193 = arith.constant dense<0.000000e+00> : vector<8x128xf32>
    %617 = tpu.matmul %615, %616, %cst_193 {dimension_numbers = #tpu.dot_dimension_numbers<[1], [0], [0], [1], [0, 0, 1, 1], [], []>} : vector<8x128xbf16>, vector<128x128xbf16>, vector<8x128xf32> -> vector<8x128xf32>
    %c0_194 = arith.constant 0 : index
    %c0_195 = arith.constant 0 : index
    %618 = vector.load %arg16[%c0_194, %c0_195] : memref<1x128xf32, #tpu.memory_space<vmem>>, vector<1x128xf32>
    %619 = vector.broadcast %618 : vector<1x128xf32> to vector<8x128xf32>
    %620 = arith.addf %617, %619 : vector<8x128xf32>
    %cst_196 = arith.constant 0.000000e+00 : f32
    %621 = vector.broadcast %cst_196 : f32 to vector<8x128xf32>
    %622 = arith.maximumf %620, %621 : vector<8x128xf32>
    %623 = arith.truncf %622 : vector<8x128xf32> to vector<8x128xbf16>
    %c0_197 = arith.constant 0 : index
    %c0_198 = arith.constant 0 : index
    %624 = vector.load %arg17[%c0_197, %c0_198] : memref<128x128xbf16, #tpu.memory_space<vmem>>, vector<128x128xbf16>
    %cst_199 = arith.constant dense<0.000000e+00> : vector<8x128xf32>
    %625 = tpu.matmul %623, %624, %cst_199 {dimension_numbers = #tpu.dot_dimension_numbers<[1], [0], [0], [1], [0, 0, 1, 1], [], []>} : vector<8x128xbf16>, vector<128x128xbf16>, vector<8x128xf32> -> vector<8x128xf32>
    %c0_200 = arith.constant 0 : index
    %c0_201 = arith.constant 0 : index
    %626 = vector.load %arg18[%c0_200, %c0_201] : memref<1x128xf32, #tpu.memory_space<vmem>>, vector<1x128xf32>
    %627 = vector.broadcast %626 : vector<1x128xf32> to vector<8x128xf32>
    %628 = arith.addf %625, %627 : vector<8x128xf32>
    %c0_202 = arith.constant 0 : index
    %c0_203 = arith.constant 0 : index
    %629 = vector.load %arg19[%c0_202, %c0_203] : memref<8x128xf32, #tpu.memory_space<vmem>>, vector<8x128xf32>
    tpu.vector_store %arg19[%c0_202, %c0_203], %628 {strides = array<i32>} : memref<8x128xf32, #tpu.memory_space<vmem>>, vector<8x128xf32>,
    return
  }
}

</mosaic_0001>

<bundles_post_ra>
// kernel: cnn_lstm_forward.1
= control target key start
LH: loop header
LB: loop body
LE: loop exit
PB: predicated region body
PF: predicated region fallthrough
CT: control target
= control target key end

     0   :  { %s11098_s0 = inlined_call_operand.vmem [shape: f32[128,24], index: 0, kind: input, shape index: {}]   ;;  %s11099_s1 = inlined_call_operand.hbm [shape: f32[24,128], index: 1, kind: input, shape index: {}]   ;;  %s11100_s2 = inlined_call_operand.vmem [shape: f32[1,128], index: 2, kind: input, shape index: {}]   ;;  %s11101_s3 = inlined_call_operand.vmem [shape: f32[1,128], index: 3, kind: input, shape index: {}]   ;;  %s11102_s4 = inlined_call_operand.vmem [shape: f32[1,128], index: 4, kind: input, shape index: {}]   ;;  %s11103_s5 = inlined_call_operand.vmem [shape: bf16[3,128,128], index: 5, kind: input, shape index: {}]   ;;  %s11104_s6 = inlined_call_operand.hbm [shape: f32[1,128], index: 6, kind: input, shape index: {}]   ;;  %s11105_s7 = inlined_call_operand.vmem [shape: f32[1,128], index: 7, kind: input, shape index: {}]   ;;  %s11106_s8 = inlined_call_operand.vmem [shape: f32[1,128], index: 8, kind: input, shape index: {}]   ;;  %s11107_s9 = inlined_call_operand.vmem [shape: bf16[128,512], index: 9, kind: input, shape index: {}]   ;;  %s11108_s10 = inlined_call_operand.vmem [shape: bf16[128,512], index: 10, kind: input, shape index: {}]   ;;  %s11109_s11 = inlined_call_operand.vmem [shape: f32[1,512], index: 11, kind: input, shape index: {}]   ;;  %s11110_s12 = inlined_call_operand.vmem [shape: bf16[128,512], index: 12, kind: input, shape index: {}]   ;;  %s11111_s13 = inlined_call_operand.hbm [shape: bf16[128,512], index: 13, kind: input, shape index: {}]   ;;  %s11112_s14 = inlined_call_operand.vmem [shape: f32[1,512], index: 14, kind: input, shape index: {}]   ;;  %s11113_s15 = inlined_call_operand.hbm [shape: bf16[128,128], index: 15, kind: input, shape index: {}]   ;;  %s11114_s16 = inlined_call_operand.hbm [shape: f32[1,128], index: 16, kind: input, shape index: {}]   ;;  %s11115_s17 = inlined_call_operand.hbm [shape: bf16[128,128], index: 17, kind: input, shape index: {}]   ;;  %s11116_s18 = inlined_call_operand.hbm [shape: f32[1,128], index: 18, kind: input, shape index: {}]   ;;  %s11117_s19 = inlined_call_operand.vmem [shape: f32[8,128], index: 19, kind: output, shape index: {}]  }
   0x1   :  { %11121 = sst [smem:[#allocation45_spill]] %s11098_s0 }
   0x2   :  { %11122 = sst [smem:[#allocation46_spill]] %s11099_s1 }
   0x3   :  { %11123 = sst [smem:[#allocation47_spill]] %s11100_s2 }
   0x4   :  { %11124 = sst [smem:[#allocation48_spill]] %s11101_s3 }
   0x5   :  { %11125 = sst [smem:[#allocation49_spill]] %s11117_s19 }
   0x6   :  { %24 = vsyncpa [#allocation5], 0 }
   0x7   :  { %25 = vsyncpa [#allocation7], 0 }
   0x8   :  { %26 = vsyncpa [#allocation10], 0  ;;  %s56_s20 = sshll.u32 %s11104_s6, 4  ;;  %s57_s20 = int_to_ptr.hbm [resolvable:$true] %s56_s20 }
   0x9   :  { %27 = vsyncpa [#allocation13], 0  ;;  %s7982_s21 = smov [#allocation6]   ;;  %s93_s23 = sshll.u32 %s11113_s15, 4  ;;  %s94_s23 = int_to_ptr.hbm [resolvable:$true] %s93_s23 }
   0xa   :  { %s58_s1 = sshll.u32 %s7982_s21, 4  ;;  %s7983_s24 = smov [#allocation9]   ;;  %s59_s1 = int_to_ptr.vmem [resolvable:$true] %s58_s1 }
   0xb   :  { %61 = dma.hbm_to_vmem [thread:$0]  %s57_s20, 16, %s59_s1, [#allocation7]  }
   0xc   :  { %s95_s25 = sshll.u32 %s7983_s24, 4  ;;  %s7984_s3 = smov 64   ;;  %s96_s25 = int_to_ptr.vmem [resolvable:$true] %s95_s25 }
   0xd   :  { %s7985_s26 = smov 4   ;;  %s117_s6 = sshll.u32 %s11115_s17, 4  ;;  %s118_s6 = int_to_ptr.hbm [resolvable:$true] %s117_s6 }
   0xe   :  { %101 = dma.hbm_to_vmem [thread:$0]  %s94_s23, 1024, %s96_s25, [#allocation10], %s7984_s3, %s7984_s3, %s7985_s26  }
   0xf   :  { %s7986_s29 = smov [#allocation12]   ;;  %s11126_s22 = sld [smem:[#allocation46_spill]] }
  0x10   :  { %s119_s0 = sshll.u32 %s7986_s29, 4  ;;  %s7987_s20 = smov [#allocation4]   ;;  %s120_s0 = int_to_ptr.vmem [resolvable:$true] %s119_s0 }
  0x11   :  { %125 = dma.hbm_to_vmem [thread:$0]  %s118_s6, 1024, %s120_s0, [#allocation13], %s7984_s3, %s7984_s3, %s7985_s26  }
  0x12   :  { %s36_s1 = sshll.u32 %s7987_s20, 4  ;;  %s7988_s2 = smov 128   ;;  %s37_s1 = int_to_ptr.vmem [resolvable:$true] %s36_s1 }
  0x13   :  { %s7989_s24 = smov 8   ;;  %s78_s17 = sshll.u32 %s11111_s13, 4  ;;  %s79_s17 = int_to_ptr.hbm [resolvable:$true] %s78_s17 }
  0x14   :  { %s7990_s27 = smov [#allocation8]   ;;  %s107_s30 = sshll.u32 %s11114_s16, 4  ;;  %s108_s30 = int_to_ptr.hbm [resolvable:$true] %s107_s30 }
  0x15   :  { %s34_s15 = sshll.u32 %s11126_s22, 4  ;;  %s80_s28 = sshll.u32 %s7990_s27, 4  ;;  %s35_s15 = int_to_ptr.hbm [resolvable:$true] %s34_s15  ;;  %s81_s28 = int_to_ptr.vmem [resolvable:$true] %s80_s28 }
  0x16   :  { %42 = dma.hbm_to_vmem [thread:$0]  %s35_s15, 384, %s37_s1, [#allocation5], %s7988_s2, %s7988_s2, %s7989_s24  }
  0x17   :  { %s7991_s3 = smov 256   ;;  %s7992_s26 = smov 16  }
  0x18   :  { %86 = dma.hbm_to_vmem [thread:$0]  %s79_s17, 4096, %s81_s28, [#allocation7], %s7991_s3, %s7991_s3, %s7992_s26  }
  0x19   :  { %s7993_s6 = smov [#allocation11]   ;;  %s131_s15 = sshll.u32 %s11116_s18, 4  ;;  %s132_s15 = int_to_ptr.hbm [resolvable:$true] %s131_s15 }
  0x1a   :  { %s109_s0 = sshll.u32 %s7993_s6, 4  ;;  %s7994_s13 = smov [#allocation14]   ;;  %s110_s0 = int_to_ptr.vmem [resolvable:$true] %s109_s0 }
  0x1b   :  { %112 = dma.hbm_to_vmem [thread:$0]  %s108_s30, 16, %s110_s0, [#allocation10]  }
  0x1c   :  { %s133_s20 = sshll.u32 %s7994_s13, 4  ;;  %s134_s20 = int_to_ptr.vmem [resolvable:$true] %s133_s20 }
  0x1d   :  { %136 = dma.hbm_to_vmem [thread:$0]  %s132_s15, 16, %s134_s20, [#allocation13]  }
  0x1e   :  { %7974 = dma.done.wait [#allocation5], 384  }
  0x1f   :  { %7975 = vsyncadd [#allocation5], 4294966912 }
  0x20   :  { %7976 = dma.done.wait [#allocation7], 4112  }
  0x21   :  { %7977 = vsyncadd [#allocation7], 4294963184 }
  0x22   :  { %7978 = dma.done.wait [#allocation10], 1040  }
  0x23   :  { %7979 = vsyncadd [#allocation10], 4294966256 }
  0x24   :  { %7980 = dma.done.wait [#allocation13], 1040  }
  0x25   :  { %7981 = vsyncadd [#allocation13], 4294966256  ;;  %v184_v0 = vld [vmem:[#allocation4 + $0x10] sm:$0xff]  ;;  %v183_v1 = vld [vmem:[#allocation4 + $0x8] sm:$0xff]  ;;  %s11127_s19 = sld [smem:[#allocation45_spill]]  ;;  %vm189_vm0 = vcmask 195584  }
  0x26   :  { %251 = vmatpush.msra.mxu0 %v184_v0  ;;  %v182_v2 = vld [vmem:[#allocation4] sm:$0xff]  ;;  %v7142_v13 = vld [vmem:[%s11103_s5 + $0x38] sm:$0xff]  ;;  %v7141_v14 = vld [vmem:[%s11103_s5 + $0x30] sm:$0xff]  ;;  %s11128_s13 = sld [smem:[#allocation47_spill]]  ;;  %v7995_v53 = vmov 0.0  }
  0x27   :  { %553 = vmatpush.bf16.msra.mxu2 %v7142_v13  ;;  %v7150_v16 = vld [vmem:[%s11103_s5 + $0x78] sm:$0xff]  ;;  %v7140_v17 = vld [vmem:[%s11103_s5 + $0x28] sm:$0xff]  ;;  %v7149_v18 = vld [vmem:[%s11103_s5 + $0x70] sm:$0xff]  ;;  %s11129_s18 = sld [smem:[#allocation48_spill]] }
  0x28   :  { %252 = vmatpush.msra.mxu0 %v183_v1  ;;  %456 = vmatpush.bf16.msra.mxu1 %v7150_v16  ;;  %v7139_v19 = vld [vmem:[%s11103_s5 + $0x20] sm:$0xff]  ;;  %v7148_v21 = vld [vmem:[%s11103_s5 + $0x68] sm:$0xff]  ;;  %v7138_v22 = vld [vmem:[%s11103_s5 + $0x18] sm:$0xff]  ;;  %s11184_s15 = sld [smem:[#allocation49_spill]] }
  0x29   :  { %v7158_v23 = vld [vmem:[%s11103_s5 + $0xb8] sm:$0xff]  ;;  %v7147_v24 = vld [vmem:[%s11103_s5 + $0x60] sm:$0xff]  ;;  %v7137_v25 = vld [vmem:[%s11103_s5 + $0x10] sm:$0xff] }
  0x2a   :  { %253 = vmatpush.msra.mxu0 %v182_v2  ;;  %668 = vmatpush.bf16.msra.mxu3 %v7158_v23  ;;  %v7157_v26 = vld [vmem:[%s11103_s5 + $0xb0] sm:$0xff]  ;;  %v7146_v28 = vld [vmem:[%s11103_s5 + $0x58] sm:$0xff]  ;;  %v7136_v29 = vld [vmem:[%s11103_s5 + $0x8] sm:$0xff] }
  0x2b   :  { %v166_v3 = vld [vmem:[%s11127_s19] sm:$0xff]  ;;  %v167_v4 = vld [vmem:[%s11127_s19 + $0x8] sm:$0xff]  ;;  %v168_v5 = vld [vmem:[%s11127_s19 + $0x10] sm:$0xff]  ;;  %554 = vmatpush.bf16.msra.mxu2 %v7141_v14 }
  0x2c   :  { %5471 = vmatmul.msk.f32.vlgmr.msra.gmra.mxu0 %vm189_vm0, %v166_v3  ;;  %v169_v6 = vld [vmem:[%s11127_s19 + $0x18] sm:$0xff]  ;;  %v170_v7 = vld [vmem:[%s11127_s19 + $0x20] sm:$0xff]  ;;  %v171_v8 = vld [vmem:[%s11127_s19 + $0x28] sm:$0xff]  ;;  %457 = vmatpush.bf16.msra.mxu1 %v7149_v18 }
  0x2d   :  { %v172_v9 = vld [vmem:[%s11127_s19 + $0x30] sm:$0xff]  ;;  %v173_v10 = vld [vmem:[%s11127_s19 + $0x38] sm:$0xff]  ;;  %v174_v11 = vld [vmem:[%s11127_s19 + $0x40] sm:$0xff] }
  0x2e   :  { %v175_v12 = vld [vmem:[%s11127_s19 + $0x48] sm:$0xff]  ;;  %v176_v15 = vld [vmem:[%s11127_s19 + $0x50] sm:$0xff]  ;;  %v177_v20 = vld [vmem:[%s11127_s19 + $0x58] sm:$0xff]  ;;  %669 = vmatpush.bf16.msra.mxu3 %v7157_v26 }
  0x2f   :  { %555 = vmatpush.bf16.msra.mxu2 %v7140_v17  ;;  %v178_v27 = vld [vmem:[%s11127_s19 + $0x60] sm:$0xff]  ;;  %v7156_v30 = vld [vmem:[%s11103_s5 + $0xa8] sm:$0xff]  ;;  %v7145_v31 = vld [vmem:[%s11103_s5 + $0x50] sm:$0xff] }
  0x30   :  { %458 = vmatpush.bf16.msra.mxu1 %v7148_v21  ;;  %v7135_v32 = vld [vmem:[%s11103_s5] sm:$0xff]  ;;  %v179_v34 = vld [vmem:[%s11127_s19 + $0x68] sm:$0xff]  ;;  %v7154_v36 = vld [vmem:[%s11103_s5 + $0x98] sm:$0xff] }
  0x31   :  { %v7155_v33 = vld [vmem:[%s11103_s5 + $0xa0] sm:$0xff]  ;;  %v7144_v35 = vld [vmem:[%s11103_s5 + $0x48] sm:$0xff]  ;;  %v7153_v38 = vld [vmem:[%s11103_s5 + $0x90] sm:$0xff] }
  0x32   :  { %670 = vmatpush.bf16.msra.mxu3 %v7156_v30  ;;  %v7143_v37 = vld [vmem:[%s11103_s5 + $0x40] sm:$0xff]  ;;  %v180_v39 = vld [vmem:[%s11127_s19 + $0x70] sm:$0xff]  ;;  %v7152_v40 = vld [vmem:[%s11103_s5 + $0x88] sm:$0xff] }
  0x33   :  { %556 = vmatpush.bf16.msra.mxu2 %v7139_v19  ;;  %v7151_v41 = vld [vmem:[%s11103_s5 + $0x80] sm:$0xff]  ;;  %v181_v42 = vld [vmem:[%s11127_s19 + $0x78] sm:$0xff] }
  0x34   :  { %5472 = vmatmul.msk.f32.gmra.mxu0 %vm189_vm0, %v167_v4  ;;  %459 = vmatpush.bf16.msra.mxu1 %v7147_v24  ;;  %v8257_v43 = vld [vmem:[%s11128_s13] ss:$0 sm:$0xff] }
  0x35   :  { %v8263_v46 = vld [vmem:[%s11129_s18] ss:$0 sm:$0xff] }
  0x36   :  { %671 = vmatpush.bf16.msra.mxu3 %v7155_v33  ;;  %v8268_v48 = vld [vmem:[%s11102_s4] ss:$0 sm:$0xff] }
  0x37   :  { %557 = vmatpush.bf16.msra.mxu2 %v7138_v22 }
  0x38   :  { %460 = vmatpush.bf16.msra.mxu1 %v7146_v28 }
  0x3a   :  { %672 = vmatpush.bf16.msra.mxu3 %v7154_v36 }
  0x3b   :  { %558 = vmatpush.bf16.msra.mxu2 %v7137_v25 }
  0x3c   :  { %5473 = vmatmul.msk.f32.gmra.mxu0 %vm189_vm0, %v168_v5  ;;  %461 = vmatpush.bf16.msra.mxu1 %v7145_v31 }
  0x3e   :  { %673 = vmatpush.bf16.msra.mxu3 %v7153_v38 }
  0x3f   :  { %559 = vmatpush.bf16.msra.mxu2 %v7136_v29 }
  0x40   :  { %462 = vmatpush.bf16.msra.mxu1 %v7144_v35 }
  0x42   :  { %674 = vmatpush.bf16.msra.mxu3 %v7152_v40 }
  0x43   :  { %560 = vmatpush.bf16.msra.mxu2 %v7135_v32 }
  0x44   :  { %5474 = vmatmul.msk.f32.gmra.mxu0 %vm189_vm0, %v169_v6  ;;  %463 = vmatpush.bf16.msra.mxu1 %v7143_v37 }
  0x46   :  { %675 = vmatpush.bf16.msra.mxu3 %v7151_v41 }
  0x4c   :  { %5475 = vmatmul.msk.f32.gmra.mxu0 %vm189_vm0, %v170_v7 }
  0x54   :  { %5476 = vmatmul.msk.f32.gmra.mxu0 %vm189_vm0, %v171_v8 }
  0x5c   :  { %5477 = vmatmul.msk.f32.gmra.mxu0 %vm189_vm0, %v172_v9 }
  0x64   :  { %5478 = vmatmul.msk.f32.gmra.mxu0 %vm189_vm0, %v173_v10 }
  0x6c   :  { %5479 = vmatmul.msk.f32.gmra.mxu0 %vm189_vm0, %v174_v11 }
  0x74   :  { %5480 = vmatmul.msk.f32.gmra.mxu0 %vm189_vm0, %v175_v12 }
  0x7c   :  { %5481 = vmatmul.msk.f32.gmra.mxu0 %vm189_vm0, %v176_v15 }
  0x84   :  { %5482 = vmatmul.msk.f32.gmra.mxu0 %vm189_vm0, %v177_v20 }
  0x8c   :  { %5483 = vmatmul.msk.f32.gmra.mxu0 %vm189_vm0, %v178_v27 }
  0x94   :  { %5484 = vmatmul.msk.f32.gmra.mxu0 %vm189_vm0, %v179_v34 }
  0x9c   :  { %5485 = vmatmul.msk.f32.gmra.mxu0 %vm189_vm0, %v180_v39 }
  0xa4   :  { %5486 = vmatmul.msk.f32.gmra.mxu0 %vm189_vm0, %v181_v42 }
  0xa9   :  { %v255_v44 = vpop.f32.mrf.mxu0 }
  0xaa   :  { %v256_v45 = vadd.f32 %v8257_v43, %v255_v44 }
  0xac   :  { %v303_v47 = vmax.f32 %v256_v45, 0.0 }
  0xae   :  { %v323_v49 = vmul.f32 %v8263_v46, %v303_v47 }
  0xb0   :  { %v343_v50 = vadd.f32 %v8268_v48, %v323_v49 }
  0xb1   :  { %v258_v51 = vpop.f32.mrf.mxu0 }
  0xb2   :  { %v259_v52 = vadd.f32 %v8257_v43, %v258_v51  ;;  %v359_v54 = vpack.c.bf16 %v343_v50, %v7995_v53  ;;  %v7189_v51 = vld [vmem:[%s11107_s9 + $0xec] sm:$0xf0] }
  0xb4   :  { %v304_v55 = vmax.f32 %v259_v52, 0.0  ;;  %561 = vmatmul.bf16.vlgmr.msra.gmra.mxu2 %v359_v54  ;;  %v7187_v52 = vld [vmem:[%s11107_s9 + $0xe4] sm:$0xf]  ;;  %v5731_v54 = vld [vmem:[%s11107_s9 + $0xf0] sm:$0xf0] }
  0xb6   :  { %v324_v56 = vmul.f32 %v8263_v46, %v304_v55 }
  0xb8   :  { %v344_v57 = vadd.f32 %v8268_v48, %v324_v56  ;;  %v5734_v56 = vor.u32 %v7187_v52, %v5731_v54  ;;  %v5705_v54 = vld [vmem:[%s11107_s9 + $0xa8] sm:$0xf] }
  0xb9   :  { %v261_v58 = vpop.f32.mrf.mxu0 }
  0xba   :  { %v262_v59 = vadd.f32 %v8257_v43, %v261_v58  ;;  %v383_v60 = vpack.c.bf16 %v344_v57, %v343_v50  ;;  %v5729_v50 = vld [vmem:[%s11107_s9 + $0xe0] sm:$0xf]  ;;  %1060 = vmatpush.bf16.msrb.mxu1 %v5734_v56 }
  0xbb   :  { %v5730_v53 = vor.u32 %v7189_v51, %v5729_v50 }
  0xbc   :  { %v305_v61 = vmax.f32 %v262_v59, 0.0  ;;  %464 = vmatmul.bf16.vlgmr.msra.gmra.mxu1 %v383_v60 }
  0xbd   :  { %1031 = vmatpush.bf16.msrb.mxu0 %v5730_v53 }
  0xbe   :  { %v325_v62 = vmul.f32 %v8263_v46, %v305_v61 }
  0xc0   :  { %v345_v63 = vadd.f32 %v8268_v48, %v325_v62  ;;  %v7188_v62 = vld [vmem:[%s11107_s9 + $0xec] sm:$0xf] }
  0xc1   :  { %v264_v0 = vpop.f32.mrf.mxu0 }
  0xc2   :  { %v265_v1 = vadd.f32 %v8257_v43, %v264_v0  ;;  %v360_v2 = vpack.c.bf16 %v345_v63, %v344_v57 }
  0xc4   :  { %v306_v3 = vmax.f32 %v265_v1, 0.0  ;;  %566 = vmatmul.bf16.gmra.mxu2 %v360_v2  ;;  %676 = vmatmul.bf16.vlgmr.msra.gmra.mxu3 %v360_v2 }
  0xc6   :  { %v326_v4 = vmul.f32 %v8263_v46, %v306_v3 }
  0xc8   :  { %v346_v5 = vadd.f32 %v8268_v48, %v326_v4 }
  0xc9   :  { %v267_v6 = vpop.f32.mrf.mxu0 }
  0xca   :  { %v268_v7 = vadd.f32 %v8257_v43, %v267_v6  ;;  %v384_v8 = vpack.c.bf16 %v346_v5, %v345_v63  ;;  %v5739_v63 = vld [vmem:[%s11107_s9 + $0xf8] sm:$0xf0]  ;;  %v5737_v6 = vld [vmem:[%s11107_s9 + $0xe8] sm:$0xf] }
  0xcb   :  { %v5742_v0 = vor.u32 %v7188_v62, %v5739_v63  ;;  %v7176_v62 = vld [vmem:[%s11107_s9 + $0x8c] sm:$0xf]  ;;  %v5691_v63 = vld [vmem:[%s11107_s9 + $0x98] sm:$0xf0] }
  0xcc   :  { %v307_v9 = vmax.f32 %v268_v7, 0.0  ;;  %469 = vmatmul.bf16.gmra.mxu1 %v384_v8  ;;  %v7190_v7 = vld [vmem:[%s11107_s9 + $0xf4] sm:$0xf0] }
  0xcd   :  { %1118 = vmatpush.bf16.msrb.mxu3 %v5742_v0  ;;  %v5738_v8 = vor.u32 %v7190_v7, %v5737_v6  ;;  %v7173_v6 = vld [vmem:[%s11107_s9 + $0x6c] sm:$0xf0]  ;;  %v7171_v7 = vld [vmem:[%s11107_s9 + $0x64] sm:$0xf] }
  0xce   :  { %v327_v10 = vmul.f32 %v8263_v46, %v307_v9  ;;  %v5713_v9 = vld [vmem:[%s11107_s9 + $0xc0] sm:$0xf] }
  0xcf   :  { %1089 = vmatpush.bf16.msrb.mxu2 %v5738_v8 }
  0xd0   :  { %v347_v11 = vadd.f32 %v8268_v48, %v327_v10  ;;  %v7185_v10 = vld [vmem:[%s11107_s9 + $0xcc] sm:$0xf0] }
  0xd1   :  { %v270_v12 = vpop.f32.mrf.mxu0 }
  0xd2   :  { %v271_v13 = vadd.f32 %v8257_v43, %v270_v12  ;;  %v361_v14 = vpack.c.bf16 %v347_v11, %v346_v5 }
  0xd4   :  { %v308_v15 = vmax.f32 %v271_v13, 0.0  ;;  %571 = vmatmul.bf16.gmra.mxu2 %v361_v14  ;;  %681 = vmatmul.bf16.gmra.mxu3 %v361_v14  ;;  %v5714_v13 = vor.u32 %v7185_v10, %v5713_v9  ;;  %v5715_v14 = vld [vmem:[%s11107_s9 + $0xd0] sm:$0xf0] }
  0xd5   :  { %v5667_v10 = vld [vmem:[%s11107_s9 + $0x70] sm:$0xf0] }
  0xd6   :  { %v328_v16 = vmul.f32 %v8263_v46, %v308_v15  ;;  %1032 = vmatpush.bf16.msrb.mxu0 %v5714_v13  ;;  %v5670_v13 = vor.u32 %v7171_v7, %v5667_v10 }
  0xd8   :  { %v348_v17 = vadd.f32 %v8268_v48, %v328_v16 }
  0xd9   :  { %v273_v18 = vpop.f32.mrf.mxu0 }
  0xda   :  { %v274_v19 = vadd.f32 %v8257_v43, %v273_v18  ;;  %v385_v20 = vpack.c.bf16 %v348_v17, %v347_v11  ;;  %v7183_v11 = vld [vmem:[%s11107_s9 + $0xc4] sm:$0xf] }
  0xdb   :  { %v5718_v15 = vor.u32 %v7183_v11, %v5715_v14  ;;  %v5673_v11 = vld [vmem:[%s11107_s9 + $0x68] sm:$0xf] }
  0xdc   :  { %v309_v21 = vmax.f32 %v274_v19, 0.0  ;;  %474 = vmatmul.bf16.gmra.mxu1 %v385_v20 }
  0xdd   :  { %1061 = vmatpush.bf16.msrb.mxu1 %v5718_v15  ;;  %v7172_v15 = vld [vmem:[%s11107_s9 + $0x6c] sm:$0xf] }
  0xde   :  { %v329_v22 = vmul.f32 %v8263_v46, %v309_v21  ;;  %v7184_v21 = vld [vmem:[%s11107_s9 + $0xcc] sm:$0xf] }
  0xe0   :  { %v349_v23 = vadd.f32 %v8268_v48, %v329_v22  ;;  %v5723_v22 = vld [vmem:[%s11107_s9 + $0xd8] sm:$0xf0] }
  0xe1   :  { %v276_v24 = vpop.f32.mrf.mxu0 }
  0xe2   :  { %v277_v25 = vadd.f32 %v8257_v43, %v276_v24  ;;  %v362_v26 = vpack.c.bf16 %v349_v23, %v348_v17 }
  0xe4   :  { %v310_v27 = vmax.f32 %v277_v25, 0.0  ;;  %576 = vmatmul.bf16.gmra.mxu2 %v362_v26  ;;  %686 = vmatmul.bf16.gmra.mxu3 %v362_v26 }
  0xe6   :  { %v330_v28 = vmul.f32 %v8263_v46, %v310_v27 }
  0xe8   :  { %v350_v29 = vadd.f32 %v8268_v48, %v330_v28 }
  0xe9   :  { %v279_v30 = vpop.f32.mrf.mxu0 }
  0xea   :  { %v280_v31 = vadd.f32 %v8257_v43, %v279_v30  ;;  %v386_v32 = vpack.c.bf16 %v350_v29, %v349_v23  ;;  %v5726_v23 = vor.u32 %v7184_v21, %v5723_v22  ;;  %v7167_v21 = vld [vmem:[%s11107_s9 + $0x44] sm:$0xf] }
  0xec   :  { %v311_v33 = vmax.f32 %v280_v31, 0.0  ;;  %479 = vmatmul.bf16.gmra.mxu1 %v386_v32  ;;  %1119 = vmatpush.bf16.msrb.mxu3 %v5726_v23  ;;  %v5721_v31 = vld [vmem:[%s11107_s9 + $0xc8] sm:$0xf]  ;;  %v7186_v32 = vld [vmem:[%s11107_s9 + $0xd4] sm:$0xf0] }
  0xed   :  { %v5651_v23 = vld [vmem:[%s11107_s9 + $0x50] sm:$0xf0] }
  0xee   :  { %v331_v34 = vmul.f32 %v8263_v46, %v311_v33  ;;  %v5697_v33 = vld [vmem:[%s11107_s9 + $0xa0] sm:$0xf] }
  0xf0   :  { %v351_v35 = vadd.f32 %v8268_v48, %v331_v34 }
  0xf1   :  { %v282_v36 = vpop.f32.mrf.mxu0 }
  0xf2   :  { %v283_v37 = vadd.f32 %v8257_v43, %v282_v36  ;;  %v363_v38 = vpack.c.bf16 %v351_v35, %v350_v29  ;;  %v7181_v36 = vld [vmem:[%s11107_s9 + $0xac] sm:$0xf0] }
  0xf4   :  { %v312_v39 = vmax.f32 %v283_v37, 0.0  ;;  %581 = vmatmul.bf16.gmra.mxu2 %v363_v38  ;;  %691 = vmatmul.bf16.gmra.mxu3 %v363_v38  ;;  %v7179_v37 = vld [vmem:[%s11107_s9 + $0xa4] sm:$0xf]  ;;  %v5699_v38 = vld [vmem:[%s11107_s9 + $0xb0] sm:$0xf0] }
  0xf6   :  { %v332_v40 = vmul.f32 %v8263_v46, %v312_v39 }
  0xf8   :  { %v352_v41 = vadd.f32 %v8268_v48, %v332_v40  ;;  %v5698_v40 = vor.u32 %v7181_v36, %v5697_v33  ;;  %v7163_v33 = vld [vmem:[%s11107_s9 + $0x24] sm:$0xf] }
  0xf9   :  { %v285_v42 = vpop.f32.mrf.mxu0 }
  0xfa   :  { %v286_v44 = vadd.f32 %v8257_v43, %v285_v42  ;;  %v387_v45 = vpack.c.bf16 %v352_v41, %v351_v35  ;;  %v5722_v35 = vor.u32 %v7186_v32, %v5721_v31  ;;  %1033 = vmatpush.bf16.msrb.mxu0 %v5698_v40  ;;  %v5633_v31 = vld [vmem:[%s11107_s9 + $0x20] sm:$0xf]  ;;  %v7165_v32 = vld [vmem:[%s11107_s9 + $0x2c] sm:$0xf0] }
  0xfb   :  { %v5634_v36 = vor.u32 %v7165_v32, %v5633_v31 }
  0xfc   :  { %v313_v47 = vmax.f32 %v286_v44, 0.0  ;;  %484 = vmatmul.bf16.gmra.mxu1 %v387_v45  ;;  %1090 = vmatpush.bf16.msrb.mxu2 %v5722_v35  ;;  %v7180_v45 = vld [vmem:[%s11107_s9 + $0xac] sm:$0xf] }
  0xfe   :  { %v333_v49 = vmul.f32 %v8263_v46, %v313_v47  ;;  %v5707_v47 = vld [vmem:[%s11107_s9 + $0xb8] sm:$0xf0] }
 0x100   :  { %v353_v55 = vadd.f32 %v8268_v48, %v333_v49  ;;  %v5710_v49 = vor.u32 %v7180_v45, %v5707_v47 }
 0x101   :  { %v288_v57 = vpop.f32.mrf.mxu0 }
 0x102   :  { %v289_v58 = vadd.f32 %v8257_v43, %v288_v57  ;;  %v364_v59 = vpack.c.bf16 %v353_v55, %v352_v41  ;;  %v5702_v41 = vor.u32 %v7179_v37, %v5699_v38  ;;  %1120 = vmatpush.bf16.msrb.mxu3 %v5710_v49  ;;  %v5635_v37 = vld [vmem:[%s11107_s9 + $0x30] sm:$0xf0]  ;;  %v5641_v38 = vld [vmem:[%s11107_s9 + $0x28] sm:$0xf]  ;;  %v5617_v49 = vld [vmem:[%s11107_s9] sm:$0xf] }
 0x103   :  { %v5638_v40 = vor.u32 %v7163_v33, %v5635_v37 }
 0x104   :  { %v314_v60 = vmax.f32 %v289_v58, 0.0  ;;  %586 = vmatmul.bf16.gmra.mxu2 %v364_v59  ;;  %696 = vmatmul.bf16.gmra.mxu3 %v364_v59  ;;  %v7175_v58 = vld [vmem:[%s11107_s9 + $0x84] sm:$0xf] }
 0x105   :  { %1062 = vmatpush.bf16.msrb.mxu1 %v5702_v41 }
 0x106   :  { %v334_v61 = vmul.f32 %v8263_v46, %v314_v60 }
 0x108   :  { %v354_v1 = vadd.f32 %v8268_v48, %v334_v61  ;;  %v5683_v61 = vld [vmem:[%s11107_s9 + $0x90] sm:$0xf0] }
 0x109   :  { %v291_v2 = vpop.f32.mrf.mxu0  ;;  %v5686_v0 = vor.u32 %v7175_v58, %v5683_v61 }
 0x10a   :  { %v292_v3 = vadd.f32 %v8257_v43, %v291_v2  ;;  %v388_v4 = vpack.c.bf16 %v354_v1, %v353_v55  ;;  %v7182_v55 = vld [vmem:[%s11107_s9 + $0xb4] sm:$0xf0]  ;;  %v5689_v2 = vld [vmem:[%s11107_s9 + $0x88] sm:$0xf] }
 0x10b   :  { %v5706_v57 = vor.u32 %v7182_v55, %v5705_v54  ;;  %1063 = vmatpush.bf16.msrb.mxu1 %v5686_v0  ;;  %v7162_v54 = vld [vmem:[%s11107_s9 + $0x14] sm:$0xf0] }
 0x10c   :  { %v315_v5 = vmax.f32 %v292_v3, 0.0  ;;  %489 = vmatmul.bf16.gmra.mxu1 %v388_v4  ;;  %v7178_v3 = vld [vmem:[%s11107_s9 + $0x94] sm:$0xf0] }
 0x10d   :  { %1091 = vmatpush.bf16.msrb.mxu2 %v5706_v57  ;;  %v5690_v4 = vor.u32 %v7178_v3, %v5689_v2  ;;  %v8518_v3 = vld [vmem:[#allocation6] ss:$0 sm:$0xff] }
 0x10e   :  { %v335_v12 = vmul.f32 %v8263_v46, %v315_v5  ;;  %v5665_v5 = vld [vmem:[%s11107_s9 + $0x60] sm:$0xf] }
 0x10f   :  { %v5666_v9 = vor.u32 %v7173_v6, %v5665_v5  ;;  %1064 = vmatpush.bf16.msrb.mxu1 %v5670_v13 }
 0x110   :  { %v355_v16 = vadd.f32 %v8268_v48, %v335_v12  ;;  %v7174_v12 = vld [vmem:[%s11107_s9 + $0x74] sm:$0xf0] }
 0x111   :  { %v294_v17 = vpop.f32.mrf.mxu0  ;;  %1092 = vmatpush.bf16.msrb.mxu2 %v5690_v4  ;;  %v5674_v14 = vor.u32 %v7174_v12, %v5673_v11 }
 0x112   :  { %v295_v18 = vadd.f32 %v8257_v43, %v294_v17  ;;  %v365_v19 = vpack.c.bf16 %v355_v16, %v354_v1  ;;  %v5694_v1 = vor.u32 %v7176_v62, %v5691_v63 }
 0x114   :  { %v316_v20 = vmax.f32 %v295_v18, 0.0  ;;  %591 = vmatmul.bf16.gmra.mxu2 %v365_v19  ;;  %701 = vmatmul.bf16.gmra.mxu3 %v365_v19  ;;  %v5649_v19 = vld [vmem:[%s11107_s9 + $0x40] sm:$0xf] }
 0x115   :  { %1121 = vmatpush.bf16.msrb.mxu3 %v5694_v1  ;;  %1093 = vmatpush.bf16.msrb.mxu2 %v5674_v14 }
 0x116   :  { %v336_v24 = vmul.f32 %v8263_v46, %v316_v20  ;;  %v7169_v20 = vld [vmem:[%s11107_s9 + $0x4c] sm:$0xf0] }
 0x117   :  { %v5650_v22 = vor.u32 %v7169_v20, %v5649_v19 }
 0x118   :  { %v356_v25 = vadd.f32 %v8268_v48, %v336_v24  ;;  %v5657_v24 = vld [vmem:[%s11107_s9 + $0x48] sm:$0xf] }
 0x119   :  { %v297_v26 = vpop.f32.mrf.mxu0 }
 0x11a   :  { %v298_v27 = vadd.f32 %v8257_v43, %v297_v26  ;;  %v389_v28 = vpack.c.bf16 %v356_v25, %v355_v16  ;;  %v5675_v16 = vld [vmem:[%s11107_s9 + $0x78] sm:$0xf0]  ;;  %v5654_v26 = vor.u32 %v7167_v21, %v5651_v23  ;;  %v8533_v21 = vld [vmem:[%s11106_s8] ss:$0 sm:$0xff] }
 0x11b   :  { %v5678_v18 = vor.u32 %v7172_v15, %v5675_v16 }
 0x11c   :  { %v317_v29 = vmax.f32 %v298_v27, 0.0  ;;  %494 = vmatmul.bf16.gmra.mxu1 %v389_v28  ;;  %v7168_v28 = vld [vmem:[%s11107_s9 + $0x4c] sm:$0xf] }
 0x11d   :  { %1122 = vmatpush.bf16.msrb.mxu3 %v5678_v18  ;;  %1065 = vmatpush.bf16.msrb.mxu1 %v5654_v26 }
 0x11e   :  { %v337_v30 = vmul.f32 %v8263_v46, %v317_v29  ;;  %v5659_v29 = vld [vmem:[%s11107_s9 + $0x58] sm:$0xf0] }
 0x120   :  { %v357_v34 = vadd.f32 %v8268_v48, %v337_v30  ;;  %v5662_v30 = vor.u32 %v7168_v28, %v5659_v29 }
 0x121   :  { %v300_v39 = vpop.f32.mrf.mxu0  ;;  %1066 = vmatpush.bf16.msrb.mxu1 %v5638_v40 }
 0x122   :  { %v301_v42 = vadd.f32 %v8257_v43, %v300_v39  ;;  %v366_v44 = vpack.c.bf16 %v357_v34, %v356_v25  ;;  %v7170_v25 = vld [vmem:[%s11107_s9 + $0x54] sm:$0xf0]  ;;  %1123 = vmatpush.bf16.msrb.mxu3 %v5662_v30 }
 0x123   :  { %v5658_v27 = vor.u32 %v7170_v25, %v5657_v24  ;;  %v7166_v39 = vld [vmem:[%s11107_s9 + $0x34] sm:$0xf0] }
 0x124   :  { %v318_v50 = vmax.f32 %v301_v42, 0.0  ;;  %596 = vmatmul.bf16.gmra.mxu2 %v366_v44  ;;  %706 = vmatmul.bf16.gmra.mxu3 %v366_v44  ;;  %v5642_v41 = vor.u32 %v7166_v39, %v5641_v38  ;;  %v7164_v42 = vld [vmem:[%s11107_s9 + $0x2c] sm:$0xf]  ;;  %v5643_v44 = vld [vmem:[%s11107_s9 + $0x38] sm:$0xf0] }
 0x125   :  { %1094 = vmatpush.bf16.msrb.mxu2 %v5658_v27  ;;  %v5646_v47 = vor.u32 %v7164_v42, %v5643_v44 }
 0x126   :  { %v338_v51 = vmul.f32 %v8263_v46, %v318_v50  ;;  %v5681_v46 = vld [vmem:[%s11107_s9 + $0x80] sm:$0xf]  ;;  %v7161_v50 = vld [vmem:[%s11107_s9 + $0xc] sm:$0xf0] }
 0x127   :  { %1124 = vmatpush.bf16.msrb.mxu3 %v5646_v47 }
 0x128   :  { %v358_v43 = vadd.f32 %v8268_v48, %v338_v51  ;;  %v7177_v48 = vld [vmem:[%s11107_s9 + $0x8c] sm:$0xf0]  ;;  %v7159_v51 = vld [vmem:[%s11107_s9 + $0x4] sm:$0xf] }
 0x129   :  { %v5682_v60 = vor.u32 %v7177_v48, %v5681_v46  ;;  %1095 = vmatpush.bf16.msrb.mxu2 %v5642_v41  ;;  %v7160_v46 = vld [vmem:[%s11107_s9 + $0xc] sm:$0xf]  ;;  %v5627_v48 = vld [vmem:[%s11107_s9 + $0x18] sm:$0xf0] }
 0x12a   :  { %v390_v52 = vpack.c.bf16 %v358_v43, %v357_v34  ;;  %v602_v53 = vpack.c.bf16 0.0, %v358_v43  ;;  %v5618_v43 = vor.u32 %v7161_v50, %v5617_v49  ;;  %v5630_v58 = vor.u32 %v7160_v46, %v5627_v48 }
 0x12b   :  { %1034 = vmatpush.bf16.msrb.mxu0 %v5682_v60 }
 0x12c   :  { %499 = vmatmul.bf16.gmra.mxu1 %v390_v52  ;;  %v5619_v52 = vld [vmem:[%s11107_s9 + $0x10] sm:$0xf0]  ;;  %1125 = vmatpush.bf16.msrb.mxu3 %v5630_v58 }
 0x12d   :  { %v5622_v55 = vor.u32 %v7159_v51, %v5619_v52 }
 0x12f   :  { %1035 = vmatpush.bf16.msrb.mxu0 %v5666_v9  ;;  %1067 = vmatpush.bf16.msrb.mxu1 %v5622_v55 }
 0x133   :  { %1036 = vmatpush.bf16.msrb.mxu0 %v5650_v22 }
 0x134   :  { %711 = vmatmul.bf16.gmra.mxu3 %v602_v53  ;;  %v5625_v53 = vld [vmem:[%s11107_s9 + $0x8] sm:$0xf] }
 0x135   :  { %v5626_v57 = vor.u32 %v7162_v54, %v5625_v53 }
 0x137   :  { %v8389_v56 = vpop.f32.mrf.mxu2  ;;  %1037 = vmatpush.bf16.msrb.mxu0 %v5634_v36  ;;  %1096 = vmatpush.bf16.msrb.mxu2 %v5626_v57 }
 0x139   :  { %v8400_v59 = vpop.f32.mrf.mxu1 }
 0x13a   :  { %v563_v0 = vadd.f32 %v8389_v56, %v8400_v59  ;;  %v8526_v56 = vld [vmem:[%s11105_s7] ss:$0 sm:$0xff] }
 0x13b   :  { %1038 = vmatpush.bf16.msrb.mxu0 %v5618_v43 }
 0x13f   :  { %v8426_v8 = vpop.f32.mrf.mxu2 }
 0x141   :  { %v467_v17 = vpop.f32.mrf.mxu1 }
 0x142   :  { %v565_v63 = vadd.f32 %v8426_v8, %v467_v17 }
 0x147   :  { %v567_v34 = vpop.f32.mrf.mxu2  ;;  %v677_v35 = vpop.f32.mrf.mxu3 }
 0x148   :  { %v717_v2 = vadd.f32 %v677_v35, %v563_v0 }
 0x149   :  { %v470_v45 = vpop.f32.mrf.mxu1 }
 0x14a   :  { %v568_v4 = vadd.f32 %v567_v34, %v470_v45  ;;  %v737_v11 = vadd.f32 %v8518_v3, %v717_v2 }
 0x14c   :  { %v753_v8 = vmax.f32 %v737_v11, 0.0 }
 0x14e   :  { %v773_v20 = vmul.f32 %v8526_v56, %v753_v8  ;;  %v7221_v8 = vld [vmem:[%s11108_s10 + $0xec] sm:$0xf0] }
 0x14f   :  { %v569_v60 = vpop.f32.mrf.mxu2  ;;  %v679_v61 = vpop.f32.mrf.mxu3 }
 0x150   :  { %v718_v1 = vadd.f32 %v679_v61, %v565_v63  ;;  %v793_v26 = vadd.f32 %v8533_v21, %v773_v20 }
 0x151   :  { %v472_v62 = vpop.f32.mrf.mxu1 }
 0x152   :  { %v738_v7 = vadd.f32 %v8518_v3, %v718_v1  ;;  %v570_v59 = vadd.f32 %v569_v60, %v472_v62 }
 0x154   :  { %v754_v12 = vmax.f32 %v738_v7, 0.0 }
 0x156   :  { %v774_v16 = vmul.f32 %v8526_v56, %v754_v12 }
 0x157   :  { %v572_v5 = vpop.f32.mrf.mxu2  ;;  %v682_v6 = vpop.f32.mrf.mxu3 }
 0x158   :  { %v719_v9 = vadd.f32 %v682_v6, %v568_v4  ;;  %v794_v23 = vadd.f32 %v8533_v21, %v774_v16  ;;  %v5859_v16 = vld [vmem:[%s11108_s10 + $0xf0] sm:$0xf0] }
 0x159   :  { %v475_v10 = vpop.f32.mrf.mxu1 }
 0x15a   :  { %v739_v13 = vadd.f32 %v8518_v3, %v719_v9  ;;  %v809_v32 = vadd.f32 %v794_v23, %v793_v26  ;;  %v573_v42 = vadd.f32 %v572_v5, %v475_v10 }
 0x15c   :  { %v755_v17 = vmax.f32 %v739_v13, 0.0  ;;  %v817_v35 = vmul.f32 0.5, %v809_v32  ;;  %v5857_v13 = vld [vmem:[%s11108_s10 + $0xe0] sm:$0xf]  ;;  %v5843_v32 = vld [vmem:[%s11108_s10 + $0xd0] sm:$0xf0] }
 0x15e   :  { %v775_v24 = vmul.f32 %v8526_v56, %v755_v17  ;;  %v7220_v17 = vld [vmem:[%s11108_s10 + $0xec] sm:$0xf] }
 0x15f   :  { %v574_v14 = vpop.f32.mrf.mxu2  ;;  %v684_v15 = vpop.f32.mrf.mxu3 }
 0x160   :  { %v720_v18 = vadd.f32 %v684_v15, %v570_v59  ;;  %v795_v30 = vadd.f32 %v8533_v21, %v775_v24  ;;  %v7219_v59 = vld [vmem:[%s11108_s10 + $0xe4] sm:$0xf]  ;;  %v5858_v15 = vor.u32 %v7221_v8, %v5857_v13  ;;  %v7209_v8 = vld [vmem:[%s11108_s10 + $0x8c] sm:$0xf0] }
 0x161   :  { %v477_v19 = vpop.f32.mrf.mxu1  ;;  %v5862_v20 = vor.u32 %v7219_v59, %v5859_v16  ;;  %v7207_v59 = vld [vmem:[%s11108_s10 + $0x84] sm:$0xf] }
 0x162   :  { %v740_v22 = vadd.f32 %v8518_v3, %v720_v18  ;;  %v575_v41 = vadd.f32 %v574_v14, %v477_v19  ;;  %v5867_v18 = vld [vmem:[%s11108_s10 + $0xf8] sm:$0xf0]  ;;  %1378 = vmatpush.bf16.msra.mxu0 %v5858_v15 }
 0x163   :  { %v5870_v23 = vor.u32 %v7220_v17, %v5867_v18  ;;  %1391 = vmatpush.bf16.msra.mxu1 %v5862_v20  ;;  %v5819_v20 = vld [vmem:[%s11108_s10 + $0x98] sm:$0xf0] }
 0x164   :  { %v756_v25 = vmax.f32 %v740_v22, 0.0 }
 0x165   :  { %1417 = vmatpush.bf16.msra.mxu3 %v5870_v23 }
 0x166   :  { %v776_v27 = vmul.f32 %v8526_v56, %v756_v25 }
 0x167   :  { %v577_v28 = vpop.f32.mrf.mxu2  ;;  %v687_v29 = vpop.f32.mrf.mxu3 }
 0x168   :  { %v796_v31 = vadd.f32 %v8533_v21, %v776_v27  ;;  %v721_v45 = vadd.f32 %v687_v29, %v573_v42  ;;  %v7217_v29 = vld [vmem:[%s11108_s10 + $0xcc] sm:$0xf0] }
 0x169   :  { %v480_v33 = vpop.f32.mrf.mxu1 }
 0x16a   :  { %v810_v34 = vadd.f32 %v796_v31, %v795_v30  ;;  %v578_v47 = vadd.f32 %v577_v28, %v480_v33  ;;  %v741_v53 = vadd.f32 %v8518_v3, %v721_v45  ;;  %v5841_v28 = vld [vmem:[%s11108_s10 + $0xc0] sm:$0xf]  ;;  %v7215_v30 = vld [vmem:[%s11108_s10 + $0xc4] sm:$0xf]  ;;  %v7216_v33 = vld [vmem:[%s11108_s10 + $0xcc] sm:$0xf] }
 0x16b   :  { %v5842_v31 = vor.u32 %v7217_v29, %v5841_v28 }
 0x16c   :  { %v818_v36 = vmul.f32 0.5, %v810_v34  ;;  %v757_v57 = vmax.f32 %v741_v53, 0.0  ;;  %v5851_v34 = vld [vmem:[%s11108_s10 + $0xd8] sm:$0xf0]  ;;  %v7213_v53 = vld [vmem:[%s11108_s10 + $0xac] sm:$0xf0] }
 0x16d   :  { %1379 = vmatpush.bf16.msra.mxu0 %v5842_v31  ;;  %v7214_v31 = vld [vmem:[%s11108_s10 + $0xb4] sm:$0xf0] }
 0x16e   :  { %v825_v37 = vpack.c.bf16 %v818_v36, %v817_v35  ;;  %v777_v0 = vmul.f32 %v8526_v56, %v757_v57  ;;  %v5846_v36 = vor.u32 %v7215_v30, %v5843_v32  ;;  %v5833_v30 = vld [vmem:[%s11108_s10 + $0xa8] sm:$0xf] }
 0x16f   :  { %v579_v38 = vpop.f32.mrf.mxu2  ;;  %v689_v39 = vpop.f32.mrf.mxu3 }
 0x170   :  { %1039 = vmatmul.bf16.vlgmr.msrb.gmra.mxu0 %v825_v37  ;;  %1068 = vmatmul.bf16.vlgmr.msrb.gmra.mxu1 %v825_v37  ;;  %v722_v44 = vadd.f32 %v689_v39, %v575_v41  ;;  %v797_v6 = vadd.f32 %v8533_v21, %v777_v0 }
 0x171   :  { %1097 = vmatmul.bf16.vlgmr.msrb.gmra.mxu2 %v825_v37  ;;  %1126 = vmatmul.bf16.vlgmr.msrb.gmra.mxu3 %v825_v37  ;;  %v482_v40 = vpop.f32.mrf.mxu1  ;;  %v5854_v37 = vor.u32 %v7216_v33, %v5851_v34 }
 0x172   :  { %v742_v51 = vadd.f32 %v8518_v3, %v722_v44  ;;  %v580_v46 = vadd.f32 %v579_v38, %v482_v40  ;;  %1392 = vmatpush.bf16.msra.mxu1 %v5846_v36  ;;  %v5793_v36 = vld [vmem:[%s11108_s10 + $0x60] sm:$0xf] }
 0x173   :  { %1418 = vmatpush.bf16.msra.mxu3 %v5854_v37  ;;  %v7205_v37 = vld [vmem:[%s11108_s10 + $0x6c] sm:$0xf0] }
 0x174   :  { %v758_v54 = vmax.f32 %v742_v51, 0.0  ;;  %v5865_v51 = vld [vmem:[%s11108_s10 + $0xe8] sm:$0xf] }
 0x176   :  { %v778_v58 = vmul.f32 %v8526_v56, %v758_v54  ;;  %v7211_v54 = vld [vmem:[%s11108_s10 + $0xa4] sm:$0xf] }
 0x177   :  { %v582_v49 = vpop.f32.mrf.mxu2  ;;  %v692_v50 = vpop.f32.mrf.mxu3 }
 0x178   :  { %v723_v43 = vadd.f32 %v692_v50, %v578_v47  ;;  %v798_v2 = vadd.f32 %v8533_v21, %v778_v58  ;;  %v5835_v58 = vld [vmem:[%s11108_s10 + $0xb8] sm:$0xf0] }
 0x179   :  { %v485_v52 = vpop.f32.mrf.mxu1 }
 0x17a   :  { %v743_v55 = vadd.f32 %v8518_v3, %v723_v43  ;;  %v811_v12 = vadd.f32 %v798_v2, %v797_v6  ;;  %v583_v39 = vadd.f32 %v582_v49, %v485_v52  ;;  %v7222_v43 = vld [vmem:[%s11108_s10 + $0xf4] sm:$0xf0]  ;;  %v5825_v49 = vld [vmem:[%s11108_s10 + $0xa0] sm:$0xf] }
 0x17b   :  { %v5866_v52 = vor.u32 %v7222_v43, %v5865_v51  ;;  %v7210_v51 = vld [vmem:[%s11108_s10 + $0x94] sm:$0xf0]  ;;  %v5777_v43 = vld [vmem:[%s11108_s10 + $0x40] sm:$0xf] }
 0x17c   :  { %v759_v60 = vmax.f32 %v743_v55, 0.0  ;;  %v819_v24 = vmul.f32 0.5, %v811_v12  ;;  %v5827_v55 = vld [vmem:[%s11108_s10 + $0xb0] sm:$0xf0]  ;;  %v5809_v12 = vld [vmem:[%s11108_s10 + $0x80] sm:$0xf] }
 0x17d   :  { %1404 = vmatpush.bf16.msra.mxu2 %v5866_v52  ;;  %v5810_v17 = vor.u32 %v7209_v8, %v5809_v12  ;;  %v5763_v8 = vld [vmem:[%s11108_s10 + $0x30] sm:$0xf0] }
 0x17e   :  { %v779_v4 = vmul.f32 %v8526_v56, %v759_v60 }
 0x17f   :  { %v694_v48 = vpop.f32.mrf.mxu3  ;;  %v584_v62 = vpop.f32.mrf.mxu2 }
 0x180   :  { %v724_v61 = vadd.f32 %v694_v48, %v580_v46  ;;  %v799_v10 = vadd.f32 %v8533_v21, %v779_v4  ;;  %v5826_v46 = vor.u32 %v7213_v53, %v5825_v49  ;;  %v7212_v48 = vld [vmem:[%s11108_s10 + $0xac] sm:$0xf]  ;;  %v7201_v53 = vld [vmem:[%s11108_s10 + $0x4c] sm:$0xf0] }
 0x181   :  { %v487_v63 = vpop.f32.mrf.mxu1 }
 0x182   :  { %v744_v1 = vadd.f32 %v8518_v3, %v724_v61  ;;  %v585_v35 = vadd.f32 %v584_v62, %v487_v63  ;;  %v5830_v61 = vor.u32 %v7211_v54, %v5827_v55  ;;  %v5838_v62 = vor.u32 %v7212_v48, %v5835_v58  ;;  %1380 = vmatpush.bf16.msra.mxu0 %v5826_v46  ;;  %v7199_v54 = vld [vmem:[%s11108_s10 + $0x44] sm:$0xf]  ;;  %v5779_v55 = vld [vmem:[%s11108_s10 + $0x50] sm:$0xf0]  ;;  %v7200_v58 = vld [vmem:[%s11108_s10 + $0x4c] sm:$0xf] }
 0x183   :  { %v5778_v48 = vor.u32 %v7201_v53, %v5777_v43 }
 0x184   :  { %v760_v5 = vmax.f32 %v744_v1, 0.0  ;;  %1393 = vmatpush.bf16.msra.mxu1 %v5830_v61  ;;  %1419 = vmatpush.bf16.msra.mxu3 %v5838_v62  ;;  %v5801_v61 = vld [vmem:[%s11108_s10 + $0x68] sm:$0xf]  ;;  %v7206_v62 = vld [vmem:[%s11108_s10 + $0x74] sm:$0xf0] }
 0x186   :  { %v780_v7 = vmul.f32 %v8526_v56, %v760_v5  ;;  %1381 = vmatpush.bf16.msra.mxu0 %v5810_v17 }
 0x187   :  { %v697_v9 = vpop.f32.mrf.mxu3  ;;  %v587_v22 = vpop.f32.mrf.mxu2 }
 0x188   :  { %v800_v11 = vadd.f32 %v8533_v21, %v780_v7  ;;  %v725_v42 = vadd.f32 %v697_v9, %v583_v39 }
 0x189   :  { %v490_v14 = vpop.f32.mrf.mxu1 }
 0x18a   :  { %v812_v19 = vadd.f32 %v800_v11, %v799_v10  ;;  %v588_v44 = vadd.f32 %v587_v22, %v490_v14  ;;  %v745_v57 = vadd.f32 %v8518_v3, %v725_v42  ;;  %v5849_v10 = vld [vmem:[%s11108_s10 + $0xc8] sm:$0xf]  ;;  %v7218_v11 = vld [vmem:[%s11108_s10 + $0xd4] sm:$0xf0]  ;;  %v5811_v14 = vld [vmem:[%s11108_s10 + $0x90] sm:$0xf0] }
 0x18b   :  { %v5850_v13 = vor.u32 %v7218_v11, %v5849_v10  ;;  %v5814_v18 = vor.u32 %v7207_v59, %v5811_v14  ;;  %v7204_v42 = vld [vmem:[%s11108_s10 + $0x6c] sm:$0xf]  ;;  %v7197_v10 = vld [vmem:[%s11108_s10 + $0x2c] sm:$0xf0]  ;;  %v7195_v11 = vld [vmem:[%s11108_s10 + $0x24] sm:$0xf] }
 0x18c   :  { %v820_v25 = vmul.f32 0.5, %v812_v19  ;;  %v761_v1 = vmax.f32 %v745_v57, 0.0  ;;  %v7208_v19 = vld [vmem:[%s11108_s10 + $0x8c] sm:$0xf]  ;;  %v5785_v59 = vld [vmem:[%s11108_s10 + $0x48] sm:$0xf] }
 0x18d   :  { %1405 = vmatpush.bf16.msra.mxu2 %v5850_v13  ;;  %v5822_v22 = vor.u32 %v7208_v19, %v5819_v20  ;;  %1394 = vmatpush.bf16.msra.mxu1 %v5814_v18  ;;  %v7202_v14 = vld [vmem:[%s11108_s10 + $0x54] sm:$0xf0]  ;;  %v7196_v18 = vld [vmem:[%s11108_s10 + $0x2c] sm:$0xf]  ;;  %v5771_v19 = vld [vmem:[%s11108_s10 + $0x38] sm:$0xf0] }
 0x18e   :  { %v826_v26 = vpack.c.bf16 %v820_v25, %v819_v24  ;;  %v781_v15 = vmul.f32 %v8526_v56, %v761_v1  ;;  %v5782_v1 = vor.u32 %v7199_v54, %v5779_v55  ;;  %v5786_v17 = vor.u32 %v7202_v14, %v5785_v59  ;;  %v5745_v20 = vld [vmem:[%s11108_s10] sm:$0xf] }
 0x18f   :  { %v699_v27 = vpop.f32.mrf.mxu3  ;;  %v589_v41 = vpop.f32.mrf.mxu2  ;;  %1420 = vmatpush.bf16.msra.mxu3 %v5822_v22 }
 0x190   :  { %1044 = vmatmul.bf16.gmra.mxu0 %v826_v26  ;;  %1073 = vmatmul.bf16.gmra.mxu1 %v826_v26  ;;  %v726_v40 = vadd.f32 %v699_v27, %v585_v35  ;;  %v5834_v35 = vor.u32 %v7214_v31, %v5833_v30 }
 0x191   :  { %1102 = vmatmul.bf16.gmra.mxu2 %v826_v26  ;;  %1131 = vmatmul.bf16.gmra.mxu3 %v826_v26  ;;  %v492_v38 = vpop.f32.mrf.mxu1  ;;  %v801_v26 = vadd.f32 %v8533_v21, %v781_v15 }
 0x192   :  { %v746_v47 = vadd.f32 %v8518_v3, %v726_v40  ;;  %v590_v2 = vadd.f32 %v589_v41, %v492_v38  ;;  %v7203_v38 = vld [vmem:[%s11108_s10 + $0x64] sm:$0xf]  ;;  %v5794_v40 = vor.u32 %v7205_v37, %v5793_v36  ;;  %v5795_v41 = vld [vmem:[%s11108_s10 + $0x70] sm:$0xf0]  ;;  %1406 = vmatpush.bf16.msra.mxu2 %v5834_v35  ;;  %v5755_v36 = vld [vmem:[%s11108_s10 + $0x18] sm:$0xf0] }
 0x194   :  { %v762_v63 = vmax.f32 %v746_v47, 0.0  ;;  %v5798_v47 = vor.u32 %v7203_v38, %v5795_v41  ;;  %1382 = vmatpush.bf16.msra.mxu0 %v5794_v40 }
 0x196   :  { %v782_v7 = vmul.f32 %v8526_v56, %v762_v63  ;;  %1395 = vmatpush.bf16.msra.mxu1 %v5798_v47 }
 0x197   :  { %v702_v45 = vpop.f32.mrf.mxu3  ;;  %v8619_v4 = vpop.f32.mrf.mxu2 }
 0x198   :  { %v727_v50 = vadd.f32 %v702_v45, %v588_v44  ;;  %v802_v23 = vadd.f32 %v8533_v21, %v782_v7  ;;  %v5803_v44 = vld [vmem:[%s11108_s10 + $0x78] sm:$0xf0]  ;;  %1383 = vmatpush.bf16.msra.mxu0 %v5778_v48 }
 0x199   :  { %v8617_v0 = vpop.f32.mrf.mxu1  ;;  %v5806_v49 = vor.u32 %v7204_v42, %v5803_v44 }
 0x19a   :  { %v747_v60 = vadd.f32 %v8518_v3, %v727_v50  ;;  %v813_v34 = vadd.f32 %v802_v23, %v801_v26  ;;  %v5817_v50 = vld [vmem:[%s11108_s10 + $0x88] sm:$0xf]  ;;  %1396 = vmatpush.bf16.msra.mxu1 %v5782_v1  ;;  %v593_v22 = vadd.f32 %v8619_v4, %v8617_v0  ;;  %v7191_v26 = vld [vmem:[%s11108_s10 + $0x4] sm:$0xf]  ;;  %v7198_v4 = vld [vmem:[%s11108_s10 + $0x34] sm:$0xf0] }
 0x19b   :  { %v5818_v52 = vor.u32 %v7210_v51, %v5817_v50  ;;  %1421 = vmatpush.bf16.msra.mxu3 %v5806_v49  ;;  %v5769_v0 = vld [vmem:[%s11108_s10 + $0x28] sm:$0xf] }
 0x19c   :  { %v763_v5 = vmax.f32 %v747_v60, 0.0  ;;  %v821_v57 = vmul.f32 0.5, %v813_v34  ;;  %v5787_v60 = vld [vmem:[%s11108_s10 + $0x58] sm:$0xf0]  ;;  %v5770_v35 = vor.u32 %v7198_v4, %v5769_v0  ;;  %v7253_v0 = vld [vmem:[%s11108_s10 + $0xec] sm:$0xf0] }
 0x19d   :  { %1407 = vmatpush.bf16.msra.mxu2 %v5818_v52  ;;  %v7251_v4 = vld [vmem:[%s11108_s10 + $0xe4] sm:$0xf] }
 0x19e   :  { %v783_v24 = vmul.f32 %v8526_v56, %v763_v5 }
 0x19f   :  { %v704_v6 = vpop.f32.mrf.mxu3  ;;  %v594_v39 = vpop.f32.mrf.mxu2 }
 0x1a0   :  { %v728_v9 = vadd.f32 %v704_v6, %v590_v2  ;;  %v803_v32 = vadd.f32 %v8533_v21, %v783_v24  ;;  %v5790_v2 = vor.u32 %v7200_v58, %v5787_v60  ;;  %v5802_v6 = vor.u32 %v7206_v62, %v5801_v61 }
 0x1a1   :  { %v497_v28 = vpop.f32.mrf.mxu1  ;;  %v5774_v24 = vor.u32 %v7196_v18, %v5771_v19 }
 0x1a2   :  { %v748_v16 = vadd.f32 %v8518_v3, %v728_v9  ;;  %v5761_v9 = vld [vmem:[%s11108_s10 + $0x20] sm:$0xf]  ;;  %v595_v12 = vadd.f32 %v594_v39, %v497_v28  ;;  %1422 = vmatpush.bf16.msra.mxu3 %v5790_v2  ;;  %1408 = vmatpush.bf16.msra.mxu2 %v5802_v6  ;;  %v5747_v28 = vld [vmem:[%s11108_s10 + $0x10] sm:$0xf0]  ;;  %v7194_v39 = vld [vmem:[%s11108_s10 + $0x14] sm:$0xf0] }
 0x1a3   :  { %v5762_v13 = vor.u32 %v7197_v10, %v5761_v9 }
 0x1a4   :  { %v764_v25 = vmax.f32 %v748_v16, 0.0  ;;  %v5766_v16 = vor.u32 %v7195_v11, %v5763_v8 }
 0x1a5   :  { %1384 = vmatpush.bf16.msra.mxu0 %v5762_v13 }
 0x1a6   :  { %v784_v27 = vmul.f32 %v8526_v56, %v764_v25  ;;  %v7193_v25 = vld [vmem:[%s11108_s10 + $0xc] sm:$0xf0]  ;;  %1397 = vmatpush.bf16.msra.mxu1 %v5766_v16  ;;  %1423 = vmatpush.bf16.msra.mxu3 %v5774_v24 }
 0x1a7   :  { %v8652_v29 = vpop.f32.mrf.mxu3  ;;  %v597_v15 = vpop.f32.mrf.mxu2  ;;  %1409 = vmatpush.bf16.msra.mxu2 %v5786_v17 }
 0x1a8   :  { %v804_v33 = vadd.f32 %v8533_v21, %v784_v27  ;;  %v5746_v27 = vor.u32 %v7193_v25, %v5745_v20  ;;  %v729_v30 = vadd.f32 %v8652_v29, %v593_v22  ;;  %v5753_v29 = vld [vmem:[%s11108_s10 + $0x8] sm:$0xf] }
 0x1a9   :  { %v500_v7 = vpop.f32.mrf.mxu1  ;;  %v5754_v44 = vor.u32 %v7194_v39, %v5753_v29  ;;  %v7252_v39 = vld [vmem:[%s11108_s10 + $0xec] sm:$0xf] }
 0x1aa   :  { %v814_v45 = vadd.f32 %v804_v33, %v803_v32  ;;  %v598_v31 = vadd.f32 %v597_v15, %v500_v7  ;;  %v5750_v32 = vor.u32 %v7191_v26, %v5747_v28  ;;  %v7192_v33 = vld [vmem:[%s11108_s10 + $0xc] sm:$0xf]  ;;  %1385 = vmatpush.bf16.msra.mxu0 %v5746_v27  ;;  %v749_v41 = vadd.f32 %v8518_v3, %v729_v30  ;;  %v5988_v28 = vld [vmem:[%s11108_s10 + $0xe0] sm:$0xf] }
 0x1ab   :  { %v5758_v40 = vor.u32 %v7192_v33, %v5755_v36  ;;  %1410 = vmatpush.bf16.msra.mxu2 %v5770_v35  ;;  %v5990_v33 = vld [vmem:[%s11108_s10 + $0xf0] sm:$0xf0]  ;;  %v7254_v35 = vld [vmem:[%s11108_s10 + $0xf4] sm:$0xf0] }
 0x1ac   :  { %v822_v46 = vmul.f32 0.5, %v814_v45  ;;  %1398 = vmatpush.bf16.msra.mxu1 %v5750_v32  ;;  %v765_v51 = vmax.f32 %v749_v41, 0.0  ;;  %v5989_v32 = vor.u32 %v7253_v0, %v5988_v28  ;;  %v7244_v0 = vld [vmem:[%s11108_s10 + $0xac] sm:$0xf] }
 0x1ad   :  { %1424 = vmatpush.bf16.msra.mxu3 %v5758_v40  ;;  %v5998_v40 = vld [vmem:[%s11108_s10 + $0xf8] sm:$0xf0] }
 0x1ae   :  { %v827_v63 = vpack.c.bf16 %v822_v46, %v821_v57  ;;  %v785_v55 = vmul.f32 %v8526_v56, %v765_v51  ;;  %1698 = vmatpush.bf16.msrb.mxu0 %v5989_v32  ;;  %v6001_v41 = vor.u32 %v7252_v39, %v5998_v40  ;;  %v5980_v51 = vld [vmem:[%s11108_s10 + $0xc8] sm:$0xf]  ;;  %v5942_v40 = vld [vmem:[%s11108_s10 + $0x90] sm:$0xf0] }
 0x1af   :  { %v709_v5 = vpop.f32.mrf.mxu3  ;;  %v599_v50 = vpop.f32.mrf.mxu2  ;;  %1411 = vmatpush.bf16.msra.mxu2 %v5754_v44  ;;  %v7249_v44 = vld [vmem:[%s11108_s10 + $0xcc] sm:$0xf0] }
 0x1b0   :  { %1049 = vmatmul.bf16.gmra.mxu0 %v827_v63  ;;  %1078 = vmatmul.bf16.gmra.mxu1 %v827_v63  ;;  %v730_v23 = vadd.f32 %v709_v5, %v595_v12  ;;  %v805_v60 = vadd.f32 %v8533_v21, %v785_v55  ;;  %v8886_v55 = vld [vmem:[%s11109_s11] sm:$0xf] }
 0x1b1   :  { %1107 = vmatmul.bf16.gmra.mxu2 %v827_v63  ;;  %1136 = vmatmul.bf16.gmra.mxu3 %v827_v63  ;;  %v502_v42 = vpop.f32.mrf.mxu1  ;;  %v8921_v32 = vperm.slane %v8886_v55, 0 }
 0x1b2   :  { %v750_v37 = vadd.f32 %v8518_v3, %v730_v23  ;;  %v600_v43 = vadd.f32 %v599_v50, %v502_v42  ;;  %v5972_v42 = vld [vmem:[%s11108_s10 + $0xc0] sm:$0xf]  ;;  %1737 = vmatpush.bf16.msrb.mxu3 %v6001_v41  ;;  %v5974_v50 = vld [vmem:[%s11108_s10 + $0xd0] sm:$0xf0]  ;;  %v5948_v41 = vld [vmem:[%s11108_s10 + $0x88] sm:$0xf] }
 0x1b4   :  { %v766_v45 = vmax.f32 %v750_v37, 0.0 }
 0x1b6   :  { %v786_v52 = vmul.f32 %v8526_v56, %v766_v45  ;;  %v7247_v45 = vld [vmem:[%s11108_s10 + $0xc4] sm:$0xf] }
 0x1b7   :  { %v712_v34 = vpop.f32.mrf.mxu3 }
 0x1b8   :  { %v731_v38 = vadd.f32 %v712_v34, %v598_v31  ;;  %v806_v46 = vadd.f32 %v8533_v21, %v786_v52  ;;  %v5996_v34 = vld [vmem:[%s11108_s10 + $0xe8] sm:$0xf] }
 0x1b9   :  { %v5997_v29 = vor.u32 %v7254_v35, %v5996_v34  ;;  %v5940_v35 = vld [vmem:[%s11108_s10 + $0x80] sm:$0xf] }
 0x1ba   :  { %v751_v47 = vadd.f32 %v8518_v3, %v731_v38  ;;  %v815_v1 = vadd.f32 %v806_v46, %v805_v60  ;;  %v5993_v38 = vor.u32 %v7251_v4, %v5990_v33  ;;  %v5956_v46 = vld [vmem:[%s11108_s10 + $0xa0] sm:$0xf]  ;;  %v5966_v4 = vld [vmem:[%s11108_s10 + $0xb8] sm:$0xf0]  ;;  %v8924_v33 = vperm.slane %v8886_v55, 1 }
 0x1bb   :  { %1724 = vmatpush.bf16.msrb.mxu2 %v5997_v29  ;;  %v5969_v34 = vor.u32 %v7244_v0, %v5966_v4  ;;  %v7239_v29 = vld [vmem:[%s11108_s10 + $0x84] sm:$0xf]  ;;  %v8983_v0 = vperm.slane %v8886_v55, 3 }
 0x1bc   :  { %v767_v53 = vmax.f32 %v751_v47, 0.0  ;;  %v823_v5 = vmul.f32 0.5, %v815_v1  ;;  %1711 = vmatpush.bf16.msrb.mxu1 %v5993_v38  ;;  %v5973_v47 = vor.u32 %v7249_v44, %v5972_v42  ;;  %v5964_v1 = vld [vmem:[%s11108_s10 + $0xa8] sm:$0xf]  ;;  %v7241_v38 = vld [vmem:[%s11108_s10 + $0x8c] sm:$0xf0]  ;;  %v5945_v44 = vor.u32 %v7239_v29, %v5942_v40 }
 0x1bd   :  { %v5941_v39 = vor.u32 %v7241_v38, %v5940_v35  ;;  %v7242_v42 = vld [vmem:[%s11108_s10 + $0x94] sm:$0xf0]  ;;  %v5908_v38 = vld [vmem:[%s11108_s10 + $0x40] sm:$0xf]  ;;  %v7233_v29 = vld [vmem:[%s11108_s10 + $0x4c] sm:$0xf0] }
 0x1be   :  { %v787_v48 = vmul.f32 %v8526_v56, %v767_v53  ;;  %v7248_v53 = vld [vmem:[%s11108_s10 + $0xcc] sm:$0xf]  ;;  %1699 = vmatpush.bf16.msrb.mxu0 %v5973_v47 }
 0x1bf   :  { %v714_v49 = vpop.f32.mrf.mxu3  ;;  %v7240_v47 = vld [vmem:[%s11108_s10 + $0x8c] sm:$0xf] }
 0x1c0   :  { %v732_v54 = vadd.f32 %v714_v49, %v600_v43  ;;  %v807_v62 = vadd.f32 %v8533_v21, %v787_v48  ;;  %v7250_v43 = vld [vmem:[%s11108_s10 + $0xd4] sm:$0xf0]  ;;  %v5977_v49 = vor.u32 %v7247_v45, %v5974_v50  ;;  %v7245_v48 = vld [vmem:[%s11108_s10 + $0xac] sm:$0xf0]  ;;  %v5949_v45 = vor.u32 %v7242_v42, %v5948_v41  ;;  %v5950_v50 = vld [vmem:[%s11108_s10 + $0x98] sm:$0xf0] }
 0x1c1   :  { %v5981_v52 = vor.u32 %v7250_v43, %v5980_v51  ;;  %v5953_v51 = vor.u32 %v7240_v47, %v5950_v50  ;;  %v5924_v43 = vld [vmem:[%s11108_s10 + $0x60] sm:$0xf]  ;;  %v5909_v42 = vor.u32 %v7233_v29, %v5908_v38  ;;  %v5916_v47 = vld [vmem:[%s11108_s10 + $0x48] sm:$0xf]  ;;  %v7234_v50 = vld [vmem:[%s11108_s10 + $0x54] sm:$0xf0] }
 0x1c2   :  { %v752_v57 = vadd.f32 %v8518_v3, %v732_v54  ;;  %v7996_v3 = vmov 0   ;;  %v5982_v54 = vld [vmem:[%s11108_s10 + $0xd8] sm:$0xf0]  ;;  %1712 = vmatpush.bf16.msrb.mxu1 %v5977_v49  ;;  %v7237_v49 = vld [vmem:[%s11108_s10 + $0x6c] sm:$0xf0] }
 0x1c3   :  { %1725 = vmatpush.bf16.msrb.mxu2 %v5981_v52  ;;  %v7235_v52 = vld [vmem:[%s11108_s10 + $0x64] sm:$0xf] }
 0x1c4   :  { %v768_v58 = vmax.f32 %v752_v57, 0.0  ;;  %v5985_v57 = vor.u32 %v7248_v53, %v5982_v54 }
 0x1c6   :  { %v788_v61 = vmul.f32 %v8526_v56, %v768_v58  ;;  %v7243_v58 = vld [vmem:[%s11108_s10 + $0xa4] sm:$0xf]  ;;  %1738 = vmatpush.bf16.msrb.mxu3 %v5985_v57 }
 0x1c8   :  { %v808_v63 = vadd.f32 %v8533_v21, %v788_v61 }
 0x1ca   :  { %v816_v2 = vadd.f32 %v808_v63, %v807_v62  ;;  %v5957_v62 = vor.u32 %v7245_v48, %v5956_v46  ;;  %v5958_v63 = vld [vmem:[%s11108_s10 + $0xb0] sm:$0xf0]  ;;  %1739 = vmatpush.bf16.msrb.mxu3 %v5969_v34  ;;  %v5925_v48 = vor.u32 %v7237_v49, %v5924_v43  ;;  %v5917_v43 = vor.u32 %v7234_v50, %v5916_v47  ;;  %v5918_v49 = vld [vmem:[%s11108_s10 + $0x58] sm:$0xf0]  ;;  %v7226_v47 = vld [vmem:[%s11108_s10 + $0x14] sm:$0xf0] }
 0x1cc   :  { %v824_v6 = vmul.f32 0.5, %v816_v2  ;;  %v7246_v2 = vld [vmem:[%s11108_s10 + $0xb4] sm:$0xf0]  ;;  %1700 = vmatpush.bf16.msrb.mxu0 %v5957_v62  ;;  %v5932_v62 = vld [vmem:[%s11108_s10 + $0x68] sm:$0xf] }
 0x1cd   :  { %v5965_v28 = vor.u32 %v7246_v2, %v5964_v1 }
 0x1ce   :  { %v828_v7 = vpack.c.bf16 %v824_v6, %v823_v5  ;;  %1740 = vmatpush.bf16.msrb.mxu3 %v5953_v51  ;;  %v7232_v51 = vld [vmem:[%s11108_s10 + $0x4c] sm:$0xf] }
 0x1cf   :  { %1726 = vmatpush.bf16.msrb.mxu2 %v5965_v28  ;;  %v5934_v28 = vld [vmem:[%s11108_s10 + $0x78] sm:$0xf0] }
 0x1d0   :  { %1054 = vmatmul.bf16.gmra.mxu0 %v828_v7  ;;  %1083 = vmatmul.bf16.gmra.mxu1 %v828_v7 }
 0x1d1   :  { %1112 = vmatmul.bf16.gmra.mxu2 %v828_v7  ;;  %1141 = vmatmul.bf16.gmra.mxu3 %v828_v7  ;;  %v5961_v7 = vor.u32 %v7243_v58, %v5958_v63  ;;  %v5926_v58 = vld [vmem:[%s11108_s10 + $0x70] sm:$0xf0] }
 0x1d2   :  { %1701 = vmatpush.bf16.msrb.mxu0 %v5941_v39  ;;  %v5929_v1 = vor.u32 %v7235_v52, %v5926_v58  ;;  %v7231_v39 = vld [vmem:[%s11108_s10 + $0x44] sm:$0xf]  ;;  %v5892_v52 = vld [vmem:[%s11108_s10 + $0x20] sm:$0xf] }
 0x1d3   :  { %1713 = vmatpush.bf16.msrb.mxu1 %v5961_v7  ;;  %1727 = vmatpush.bf16.msrb.mxu2 %v5949_v45  ;;  %v7236_v7 = vld [vmem:[%s11108_s10 + $0x6c] sm:$0xf] }
 0x1d4   :  { %v5937_v35 = vor.u32 %v7236_v7, %v5934_v28  ;;  %v7228_v7 = vld [vmem:[%s11108_s10 + $0x2c] sm:$0xf]  ;;  %v5902_v28 = vld [vmem:[%s11108_s10 + $0x38] sm:$0xf0] }
 0x1d5   :  { %v5905_v29 = vor.u32 %v7228_v7, %v5902_v28 }
 0x1d6   :  { %1702 = vmatpush.bf16.msrb.mxu0 %v5925_v48  ;;  %1741 = vmatpush.bf16.msrb.mxu3 %v5937_v35  ;;  %v5921_v48 = vor.u32 %v7232_v51, %v5918_v49  ;;  %v5886_v49 = vld [vmem:[%s11108_s10 + $0x18] sm:$0xf0] }
 0x1d7   :  { %1714 = vmatpush.bf16.msrb.mxu1 %v5945_v44  ;;  %v5910_v44 = vld [vmem:[%s11108_s10 + $0x50] sm:$0xf0] }
 0x1d8   :  { %v5913_v45 = vor.u32 %v7231_v39, %v5910_v44  ;;  %v5876_v39 = vld [vmem:[%s11108_s10] sm:$0xf]  ;;  %v5878_v44 = vld [vmem:[%s11108_s10 + $0x10] sm:$0xf0] }
 0x1da   :  { %1703 = vmatpush.bf16.msrb.mxu0 %v5909_v42  ;;  %1742 = vmatpush.bf16.msrb.mxu3 %v5921_v48 }
 0x1db   :  { %1715 = vmatpush.bf16.msrb.mxu1 %v5929_v1 }
 0x1de   :  { %1743 = vmatpush.bf16.msrb.mxu3 %v5905_v29 }
 0x1df   :  { %1716 = vmatpush.bf16.msrb.mxu1 %v5913_v45  ;;  %v5884_v45 = vld [vmem:[%s11108_s10 + $0x8] sm:$0xf] }
 0x1e0   :  { %1386 = vmatmul.bf16.vlgmr.msra.gmra.mxu0 %v7996_v3  ;;  %1399 = vmatmul.bf16.vlgmr.msra.gmra.mxu1 %v7996_v3 }
 0x1e1   :  { %1412 = vmatmul.bf16.vlgmr.msra.gmra.mxu2 %v7996_v3  ;;  %1425 = vmatmul.bf16.vlgmr.msra.gmra.mxu3 %v7996_v3 }
 0x1ed   :  { %v8783_v56 = vpop.f32.mrf.mxu0  ;;  %v8785_v21 = vpop.f32.mrf.mxu1 }
 0x1ee   :  { %v1041_v53 = vadd.f32 %v8783_v56, %v8921_v32  ;;  %v1070_v54 = vadd.f32 %v8785_v21, %v8924_v33  ;;  %v7238_v56 = vld [vmem:[%s11108_s10 + $0x74] sm:$0xf0] }
 0x1ef   :  { %v5933_v2 = vor.u32 %v7238_v56, %v5932_v62  ;;  %v7227_v62 = vld [vmem:[%s11108_s10 + $0x24] sm:$0xf]  ;;  %v5894_v56 = vld [vmem:[%s11108_s10 + $0x30] sm:$0xf0] }
 0x1f1   :  { %1728 = vmatpush.bf16.msrb.mxu2 %v5933_v2  ;;  %v7230_v2 = vld [vmem:[%s11108_s10 + $0x34] sm:$0xf0] }
 0x1f4   :  { %v8787_v9 = vpop.f32.mrf.mxu2  ;;  %v8789_v10 = vpop.f32.mrf.mxu3 }
 0x1f5   :  { %v8791_v11 = vpop.f32.mrf.mxu0  ;;  %v8793_v12 = vpop.f32.mrf.mxu1  ;;  %1729 = vmatpush.bf16.msrb.mxu2 %v5917_v43  ;;  %v7224_v43 = vld [vmem:[%s11108_s10 + $0xc] sm:$0xf] }
 0x1fc   :  { %v8795_v13 = vpop.f32.mrf.mxu2  ;;  %v8797_v8 = vpop.f32.mrf.mxu3 }
 0x20d   :  { %v8799_v59 = vpop.f32.mrf.mxu0  ;;  %v8801_v14 = vpop.f32.mrf.mxu1 }
 0x214   :  { %v8803_v15 = vpop.f32.mrf.mxu2  ;;  %v8805_v16 = vpop.f32.mrf.mxu3 }
 0x215   :  { %v8807_v17 = vpop.f32.mrf.mxu0  ;;  %v8809_v18 = vpop.f32.mrf.mxu1 }
 0x21c   :  { %v8811_v19 = vpop.f32.mrf.mxu2  ;;  %v8813_v20 = vpop.f32.mrf.mxu3 }
 0x22d   :  { %v8815_v22 = vpop.f32.mrf.mxu0  ;;  %v8817_v23 = vpop.f32.mrf.mxu1 }
 0x234   :  { %v8819_v24 = vpop.f32.mrf.mxu2  ;;  %v8821_v25 = vpop.f32.mrf.mxu3 }
 0x235   :  { %v8823_v26 = vpop.f32.mrf.mxu0  ;;  %v8825_v27 = vpop.f32.mrf.mxu1 }
 0x23c   :  { %v8836_v30 = vpop.f32.mrf.mxu2  ;;  %v8838_v31 = vpop.f32.mrf.mxu3 }
 0x24d   :  { %v8849_v36 = vpop.f32.mrf.mxu0  ;;  %v8851_v37 = vpop.f32.mrf.mxu1 }
 0x254   :  { %v8897_v60 = vpop.f32.mrf.mxu2  ;;  %v8899_v61 = vpop.f32.mrf.mxu3 }
 0x255   :  { %v8910_v5 = vpop.f32.mrf.mxu0  ;;  %v8912_v6 = vpop.f32.mrf.mxu1 }
 0x25c   :  { %v8963_v57 = vpop.f32.mrf.mxu2  ;;  %v8965_v46 = vpop.f32.mrf.mxu3 }
 0x25d   :  { %v1387_v63 = vpop.f32.mrf.mxu0  ;;  %v1400_v21 = vpop.f32.mrf.mxu1 }
 0x25e   :  { %v1430_v4 = vadd.f32 %v1387_v63, %v1041_v53  ;;  %v1431_v34 = vadd.f32 %v1400_v21, %v1070_v54  ;;  %v7229_v53 = vld [vmem:[%s11108_s10 + $0x2c] sm:$0xf0]  ;;  %v1128_v54 = vadd.f32 %v8789_v10, %v8983_v0  ;;  %v5900_v63 = vld [vmem:[%s11108_s10 + $0x28] sm:$0xf]  ;;  %v5897_v10 = vor.u32 %v7227_v62, %v5894_v56 }
 0x25f   :  { %v5893_v58 = vor.u32 %v7229_v53, %v5892_v52  ;;  %v5901_v38 = vor.u32 %v7230_v2, %v5900_v63  ;;  %v5885_v53 = vor.u32 %v7226_v47, %v5884_v45  ;;  %v9060_v56 = vperm.slane %v8886_v55, 2 }
 0x260   :  { %v5871_v40 = vmul.f32 -1.442695, %v1430_v4  ;;  %v5872_v41 = vmul.f32 -1.442695, %v1431_v34  ;;  %1717 = vmatpush.bf16.msrb.mxu1 %v5897_v10 }
 0x261   :  { %1704 = vmatpush.bf16.msrb.mxu0 %v5893_v58  ;;  %1730 = vmatpush.bf16.msrb.mxu2 %v5901_v38  ;;  %v5889_v58 = vor.u32 %v7224_v43, %v5886_v49  ;;  %v1099_v2 = vadd.f32 %v8787_v9, %v9060_v56 }
 0x262   :  { %7550 = vpow2.f32 %v5871_v40  ;;  %v7225_v40 = vld [vmem:[%s11108_s10 + $0xc] sm:$0xf0] }
 0x263   :  { %7552 = vpow2.f32 %v5872_v41  ;;  %v7223_v41 = vld [vmem:[%s11108_s10 + $0x4] sm:$0xf]  ;;  %v5877_v42 = vor.u32 %v7225_v40, %v5876_v39  ;;  %1744 = vmatpush.bf16.msrb.mxu3 %v5889_v58 }
 0x264   :  { %v1413_v21 = vpop.f32.mrf.mxu2  ;;  %v1426_v1 = vpop.f32.mrf.mxu3  ;;  %v5881_v51 = vor.u32 %v7223_v41, %v5878_v44 }
 0x265   :  { %v1433_v4 = vadd.f32 %v1426_v1, %v1128_v54  ;;  %v1389_v34 = vpop.f32.mrf.mxu0  ;;  %v1402_v35 = vpop.f32.mrf.mxu1  ;;  %1705 = vmatpush.bf16.msrb.mxu0 %v5877_v42  ;;  %1731 = vmatpush.bf16.msrb.mxu2 %v5885_v53 }
 0x266   :  { %1718 = vmatpush.bf16.msrb.mxu1 %v5881_v51 }
 0x267   :  { %v5873_v50 = vmul.f32 -1.442695, %v1433_v4  ;;  %v1432_v4 = vadd.f32 %v1413_v21, %v1099_v2 }
 0x268   :  { %v7551_v52 = vpop.eup %7550 }
 0x269   :  { %v7553_v54 = vpop.eup %7552  ;;  %v1437_v48 = vadd.f32 1.0, %v7551_v52  ;;  %7554 = vpow2.f32 %v5873_v50 }
 0x26a   :  { %v1456_v62 = vadd.f32 1.0, %v7553_v54 }
 0x26b   :  { %7556 = vrcp.f32 %v1437_v48  ;;  %v1449_v39 = vand.u32 2147483648, %v1437_v48  ;;  %v1447_v42 = vand.u32 2147483647, %v1437_v48  ;;  %vm1443_vm3 = vweird.f32 %v1437_v48 }
 0x26c   :  { %7558 = vrcp.f32 %v1456_v62  ;;  %v1428_v63 = vpop.f32.mrf.mxu3  ;;  %v1415_v1 = vpop.f32.mrf.mxu2  ;;  %v1468_v40 = vand.u32 2147483648, %v1456_v62  ;;  %v1466_v45 = vand.u32 2147483647, %v1456_v62  ;;  %vm1462_vm4 = vweird.f32 %v1456_v62 }
 0x26d   :  { %v1450_v21 = vor.u32 1.1754944e-38, %v1449_v39  ;;  %vm1448_vm6 = vcmp.eq.f32.partialorder %v1447_v42, 8.507059e+37 }
 0x26e   :  { %v1469_v43 = vor.u32 1.1754944e-38, %v1468_v40  ;;  %vm1467_vm8 = vcmp.eq.f32.partialorder %v1466_v45, 8.507059e+37  ;;  %v6119_v40 = vld [vmem:[%s11108_s10 + $0xe0] sm:$0xf]  ;;  %v6127_v45 = vld [vmem:[%s11108_s10 + $0xe8] sm:$0xf] }
 0x26f   :  { %v7555_v10 = vpop.eup %7554 }
 0x270   :  { %v1476_v7 = vadd.f32 1.0, %v7555_v10 }
 0x271   :  { %v7557_v28 = vpop.eup %7556 }
 0x272   :  { %v7559_v34 = vpop.eup %7558  ;;  %v1439_v35 = vmul.f32 %v7557_v28, %v1437_v48  ;;  %7560 = vrcp.f32 %v1476_v7  ;;  %vm1444_vm1 = vweird.f32 %v7557_v28  ;;  %vm1482_vm10 = vweird.f32 %v1476_v7 }
 0x273   :  { %v1458_v38 = vmul.f32 %v7559_v34, %v1456_v62  ;;  %7562 = vtanh.f32 %v1432_v4  ;;  %vm1463_vm2 = vweird.f32 %v7559_v34  ;;  %vm1445_vm5 = vmor %vm1443_vm3, %vm1444_vm1  ;;  %v1488_v62 = vand.u32 2147483648, %v1476_v7 }
 0x274   :  { %v1440_v55 = vsub.f32 1.0, %v1439_v35  ;;  %vm1464_vm7 = vmor %vm1462_vm4, %vm1463_vm2 }
 0x275   :  { %v1459_v29 = vsub.f32 1.0, %v1458_v38  ;;  %v1489_v38 = vor.u32 1.1754944e-38, %v1488_v62  ;;  %v6113_v62 = vld [vmem:[%s11108_s10 + $0xd8] sm:$0xf0] }
 0x276   :  { %v1441_v41 = vmul.f32 %v7557_v28, %v1440_v55 }
 0x277   :  { %v1460_v44 = vmul.f32 %v7559_v34, %v1459_v29 }
 0x278   :  { %v7561_v47 = vpop.eup %7560  ;;  %v1442_v9 = vadd.f32 %v7557_v28, %v1441_v41  ;;  %v7283_v41 = vld [vmem:[%s11108_s10 + $0xe4] sm:$0xf] }
 0x279   :  { %v1461_v50 = vadd.f32 %v7559_v34, %v1460_v44  ;;  %v1478_v51 = vmul.f32 %v7561_v47, %v1476_v7  ;;  %v7563_v52 = vpop.eup %7562  ;;  %vm1483_vm9 = vweird.f32 %v7561_v47  ;;  %v6121_v44 = vld [vmem:[%s11108_s10 + $0xf0] sm:$0xf0] }
 0x27a   :  { %v1446_v49 = vsel %vm1445_vm5, %v7557_v28, %v1442_v9  ;;  %v1486_v28 = vand.u32 2147483647, %v1476_v7  ;;  %vm1484_vm11 = vmor %vm1482_vm10, %vm1483_vm9  ;;  %v7285_v7 = vld [vmem:[%s11108_s10 + $0xec] sm:$0xf0]  ;;  %v6124_v9 = vor.u32 %v7283_v41, %v6121_v44  ;;  %v7276_v44 = vld [vmem:[%s11108_s10 + $0xac] sm:$0xf] }
 0x27b   :  { %v1451_v53 = vsel %vm1448_vm6, %v1450_v21, %v1446_v49  ;;  %v1465_v54 = vsel %vm1464_vm7, %v7559_v34, %v1461_v50  ;;  %v1479_v58 = vsub.f32 1.0, %v1478_v51  ;;  %v6120_v42 = vor.u32 %v7285_v7, %v6119_v40  ;;  %v7284_v50 = vld [vmem:[%s11108_s10 + $0xec] sm:$0xf]  ;;  %v6129_v51 = vld [vmem:[%s11108_s10 + $0xf8] sm:$0xf0] }
 0x27c   :  { %v1470_v63 = vsel %vm1467_vm8, %v1469_v43, %v1465_v54  ;;  %v1493_v1 = vmul.f32 %v7563_v52, %v1451_v53  ;;  %vm1487_vm12 = vcmp.eq.f32.partialorder %v1486_v28, 8.507059e+37  ;;  %v6132_v43 = vor.u32 %v7284_v50, %v6129_v51  ;;  %2032 = vmatpush.bf16.msra.mxu1 %v6124_v9  ;;  %v6103_v49 = vld [vmem:[%s11108_s10 + $0xc0] sm:$0xf]  ;;  %v7281_v52 = vld [vmem:[%s11108_s10 + $0xcc] sm:$0xf0] }
 0x27d   :  { %v1492_v10 = vmul.f32 0.0, %v1470_v63  ;;  %v1480_v2 = vmul.f32 %v7561_v47, %v1479_v58  ;;  %2019 = vmatpush.bf16.msra.mxu0 %v6120_v42  ;;  %v7279_v53 = vld [vmem:[%s11108_s10 + $0xc4] sm:$0xf]  ;;  %v6104_v54 = vor.u32 %v7281_v52, %v6103_v49  ;;  %v6105_v58 = vld [vmem:[%s11108_s10 + $0xd0] sm:$0xf0] }
 0x27e   :  { %2058 = vmatpush.bf16.msra.mxu3 %v6132_v43  ;;  %v6111_v63 = vld [vmem:[%s11108_s10 + $0xc8] sm:$0xf]  ;;  %v7278_v7 = vld [vmem:[%s11108_s10 + $0xb4] sm:$0xf0]  ;;  %v6071_v9 = vld [vmem:[%s11108_s10 + $0x80] sm:$0xf] }
 0x27f   :  { %v9064_v4 = vadd.f32 %v1493_v1, %v1492_v10  ;;  %v1481_v48 = vadd.f32 %v7561_v47, %v1480_v2  ;;  %v7282_v1 = vld [vmem:[%s11108_s10 + $0xd4] sm:$0xf0]  ;;  %v6108_v10 = vor.u32 %v7279_v53, %v6105_v58  ;;  %v6095_v40 = vld [vmem:[%s11108_s10 + $0xa8] sm:$0xf]  ;;  %v7271_v50 = vld [vmem:[%s11108_s10 + $0x84] sm:$0xf] }
 0x280   :  { %v6112_v2 = vor.u32 %v7282_v1, %v6111_v63  ;;  %v6096_v42 = vor.u32 %v7278_v7, %v6095_v40  ;;  %v6073_v43 = vld [vmem:[%s11108_s10 + $0x90] sm:$0xf0]  ;;  %v6079_v49 = vld [vmem:[%s11108_s10 + $0x88] sm:$0xf]  ;;  %v7274_v52 = vld [vmem:[%s11108_s10 + $0x94] sm:$0xf0] }
 0x281   :  { %7564 = vtanh.f32 %v9064_v4  ;;  %v1485_v35 = vsel %vm1484_vm11, %v7561_v47, %v1481_v48  ;;  %v7286_v47 = vld [vmem:[%s11108_s10 + $0xf4] sm:$0xf0]  ;;  %v7280_v48 = vld [vmem:[%s11108_s10 + $0xcc] sm:$0xf]  ;;  %2020 = vmatpush.bf16.msra.mxu0 %v6104_v54  ;;  %2033 = vmatpush.bf16.msra.mxu1 %v6108_v10  ;;  %v6076_v53 = vor.u32 %v7271_v50, %v6073_v43  ;;  %v6080_v54 = vor.u32 %v7274_v52, %v6079_v49  ;;  %v6081_v63 = vld [vmem:[%s11108_s10 + $0x98] sm:$0xf0] }
 0x282   :  { %v1490_v55 = vsel %vm1487_vm12, %v1489_v38, %v1485_v35  ;;  %v6128_v21 = vor.u32 %v7286_v47, %v6127_v45  ;;  %v6116_v28 = vor.u32 %v7280_v48, %v6113_v62  ;;  %v6087_v35 = vld [vmem:[%s11108_s10 + $0xa0] sm:$0xf]  ;;  %v7277_v38 = vld [vmem:[%s11108_s10 + $0xac] sm:$0xf0]  ;;  %v6097_v45 = vld [vmem:[%s11108_s10 + $0xb8] sm:$0xf0]  ;;  %v1043_v62 = vadd.f32 %v8791_v11, %v8921_v32 }
 0x283   :  { %v6100_v47 = vor.u32 %v7276_v44, %v6097_v45  ;;  %v7272_v58 = vld [vmem:[%s11108_s10 + $0x8c] sm:$0xf]  ;;  %v6055_v10 = vld [vmem:[%s11108_s10 + $0x60] sm:$0xf]  ;;  %v7267_v48 = vld [vmem:[%s11108_s10 + $0x64] sm:$0xf] }
 0x284   :  { %2045 = vmatpush.bf16.msra.mxu2 %v6128_v21  ;;  %2059 = vmatpush.bf16.msra.mxu3 %v6116_v28  ;;  %v7273_v21 = vld [vmem:[%s11108_s10 + $0x8c] sm:$0xf0]  ;;  %v6084_v1 = vor.u32 %v7272_v58, %v6081_v63  ;;  %v1072_v28 = vadd.f32 %v8793_v12, %v8924_v33  ;;  %v7268_v12 = vld [vmem:[%s11108_s10 + $0x6c] sm:$0xf]  ;;  %v6041_v49 = vld [vmem:[%s11108_s10 + $0x50] sm:$0xf0] }
 0x285   :  { %v6072_v51 = vor.u32 %v7273_v21, %v6071_v9  ;;  %v7265_v9 = vld [vmem:[%s11108_s10 + $0x4c] sm:$0xf0]  ;;  %v7263_v21 = vld [vmem:[%s11108_s10 + $0x44] sm:$0xf]  ;;  %v7264_v58 = vld [vmem:[%s11108_s10 + $0x4c] sm:$0xf] }
 0x286   :  { %v6044_v52 = vor.u32 %v7263_v21, %v6041_v49  ;;  %v7255_v21 = vld [vmem:[%s11108_s10 + $0x4] sm:$0xf]  ;;  %v7258_v49 = vld [vmem:[%s11108_s10 + $0x14] sm:$0xf0] }
 0x287   :  { %v7565_v34 = vpop.eup %7564 }
 0x288   :  { %v9067_v29 = vmul.f32 %v7565_v34, %v1490_v55  ;;  %2046 = vmatpush.bf16.msra.mxu2 %v6112_v2  ;;  %v7275_v34 = vld [vmem:[%s11108_s10 + $0xa4] sm:$0xf]  ;;  %v6088_v55 = vor.u32 %v7277_v38, %v6087_v35  ;;  %2060 = vmatpush.bf16.msra.mxu3 %v6100_v47  ;;  %v7269_v2 = vld [vmem:[%s11108_s10 + $0x6c] sm:$0xf0]  ;;  %v6057_v38 = vld [vmem:[%s11108_s10 + $0x70] sm:$0xf0] }
 0x289   :  { %v6056_v35 = vor.u32 %v7269_v2, %v6055_v10  ;;  %v6060_v11 = vor.u32 %v7267_v48, %v6057_v38  ;;  %v6039_v47 = vld [vmem:[%s11108_s10 + $0x40] sm:$0xf]  ;;  %v7261_v2 = vld [vmem:[%s11108_s10 + $0x2c] sm:$0xf0]  ;;  %v1130_v48 = vadd.f32 %v8797_v8, %v8983_v0  ;;  %v6025_v38 = vld [vmem:[%s11108_s10 + $0x30] sm:$0xf0] }
 0x28a   :  { %v1505_v39 = vpack.c.bf16 %v9067_v29, %v9067_v29  ;;  %2021 = vmatpush.bf16.msra.mxu0 %v6088_v55  ;;  %v7270_v55 = vld [vmem:[%s11108_s10 + $0x74] sm:$0xf0]  ;;  %v6040_v43 = vor.u32 %v7265_v9, %v6039_v47  ;;  %v6023_v10 = vld [vmem:[%s11108_s10 + $0x20] sm:$0xf]  ;;  %v7257_v9 = vld [vmem:[%s11108_s10 + $0xc] sm:$0xf0] }
 0x28b   :  { %v6007_v47 = vld [vmem:[%s11108_s10] sm:$0xf] }
 0x28c   :  { %1706 = vmatmul.bf16.vlgmr.msrb.gmra.mxu0 %v1505_v39  ;;  %1719 = vmatmul.bf16.vlgmr.msrb.gmra.mxu1 %v1505_v39 }
 0x28d   :  { %1732 = vmatmul.bf16.vlgmr.msrb.gmra.mxu2 %v1505_v39  ;;  %1745 = vmatmul.bf16.vlgmr.msrb.gmra.mxu3 %v1505_v39  ;;  %v6089_v39 = vld [vmem:[%s11108_s10 + $0xb0] sm:$0xf0] }
 0x28e   :  { %v6092_v41 = vor.u32 %v7275_v34, %v6089_v39  ;;  %2047 = vmatpush.bf16.msra.mxu2 %v6096_v42  ;;  %2022 = vmatpush.bf16.msra.mxu0 %v6072_v51  ;;  %v6063_v34 = vld [vmem:[%s11108_s10 + $0x68] sm:$0xf] }
 0x28f   :  { %2061 = vmatpush.bf16.msra.mxu3 %v6084_v1  ;;  %v6064_v7 = vor.u32 %v7270_v55, %v6063_v34  ;;  %v6049_v1 = vld [vmem:[%s11108_s10 + $0x58] sm:$0xf0]  ;;  %v6031_v34 = vld [vmem:[%s11108_s10 + $0x28] sm:$0xf] }
 0x290   :  { %2034 = vmatpush.bf16.msra.mxu1 %v6092_v41  ;;  %v6065_v41 = vld [vmem:[%s11108_s10 + $0x78] sm:$0xf0] }
 0x291   :  { %v6068_v45 = vor.u32 %v7268_v12, %v6065_v41 }
 0x292   :  { %2048 = vmatpush.bf16.msra.mxu2 %v6080_v54  ;;  %2023 = vmatpush.bf16.msra.mxu0 %v6056_v35  ;;  %v7266_v54 = vld [vmem:[%s11108_s10 + $0x54] sm:$0xf0]  ;;  %v7259_v35 = vld [vmem:[%s11108_s10 + $0x24] sm:$0xf] }
 0x293   :  { %2062 = vmatpush.bf16.msra.mxu3 %v6068_v45  ;;  %v6028_v8 = vor.u32 %v7259_v35, %v6025_v38 }
 0x294   :  { %2035 = vmatpush.bf16.msra.mxu1 %v6076_v53  ;;  %v6047_v53 = vld [vmem:[%s11108_s10 + $0x48] sm:$0xf] }
 0x295   :  { %v6048_v63 = vor.u32 %v7266_v54, %v6047_v53  ;;  %v7256_v54 = vld [vmem:[%s11108_s10 + $0xc] sm:$0xf] }
 0x296   :  { %2049 = vmatpush.bf16.msra.mxu2 %v6064_v7  ;;  %2024 = vmatpush.bf16.msra.mxu0 %v6040_v43  ;;  %v6033_v7 = vld [vmem:[%s11108_s10 + $0x38] sm:$0xf0]  ;;  %v6015_v43 = vld [vmem:[%s11108_s10 + $0x8] sm:$0xf] }
 0x298   :  { %2036 = vmatpush.bf16.msra.mxu1 %v6060_v11  ;;  %v7260_v11 = vld [vmem:[%s11108_s10 + $0x2c] sm:$0xf] }
 0x299   :  { %v6036_v45 = vor.u32 %v7260_v11, %v6033_v7 }
 0x29a   :  { %2050 = vmatpush.bf16.msra.mxu2 %v6048_v63 }
 0x29c   :  { %2037 = vmatpush.bf16.msra.mxu1 %v6044_v52 }
 0x2a0   :  { %2038 = vmatpush.bf16.msra.mxu1 %v6028_v8 }
 0x309   :  { %v1707_v39 = vpop.f32.mrf.mxu0  ;;  %v1720_v40 = vpop.f32.mrf.mxu1 }
 0x30a   :  { %v1750_v42 = vadd.f32 %v1707_v39, %v1043_v62  ;;  %v1751_v44 = vadd.f32 %v1720_v40, %v1072_v28  ;;  %v6052_v62 = vor.u32 %v7264_v58, %v6049_v1  ;;  %v6024_v28 = vor.u32 %v7261_v2, %v6023_v10  ;;  %v7262_v40 = vld [vmem:[%s11108_s10 + $0x34] sm:$0xf0]  ;;  %v6017_v58 = vld [vmem:[%s11108_s10 + $0x18] sm:$0xf0] }
 0x30b   :  { %v6016_v1 = vor.u32 %v7258_v49, %v6015_v43 }
 0x30c   :  { %v6002_v50 = vmul.f32 -1.442695, %v1750_v42  ;;  %v6003_v51 = vmul.f32 -1.442695, %v1751_v44  ;;  %2063 = vmatpush.bf16.msra.mxu3 %v6052_v62  ;;  %v6032_v44 = vor.u32 %v7262_v40, %v6031_v34  ;;  %2025 = vmatpush.bf16.msra.mxu0 %v6024_v28  ;;  %v1101_v34 = vadd.f32 %v8795_v13, %v9060_v56 }
 0x30e   :  { %7566 = vpow2.f32 %v6002_v50  ;;  %v6008_v50 = vor.u32 %v7257_v9, %v6007_v47  ;;  %2051 = vmatpush.bf16.msra.mxu2 %v6032_v44 }
 0x30f   :  { %7568 = vpow2.f32 %v6003_v51  ;;  %v6009_v51 = vld [vmem:[%s11108_s10 + $0x10] sm:$0xf0] }
 0x310   :  { %v1733_v55 = vpop.f32.mrf.mxu2  ;;  %v1746_v39 = vpop.f32.mrf.mxu3  ;;  %v6012_v53 = vor.u32 %v7255_v21, %v6009_v51  ;;  %2064 = vmatpush.bf16.msra.mxu3 %v6036_v45  ;;  %2026 = vmatpush.bf16.msra.mxu0 %v6008_v50 }
 0x311   :  { %v1753_v12 = vadd.f32 %v1746_v39, %v1130_v48  ;;  %v1709_v41 = vpop.f32.mrf.mxu0  ;;  %v1722_v42 = vpop.f32.mrf.mxu1  ;;  %v6020_v48 = vor.u32 %v7256_v54, %v6017_v58  ;;  %v1752_v40 = vadd.f32 %v1733_v55, %v1101_v34 }
 0x312   :  { %2039 = vmatpush.bf16.msra.mxu1 %v6012_v53  ;;  %2052 = vmatpush.bf16.msra.mxu2 %v6016_v1 }
 0x313   :  { %v6004_v52 = vmul.f32 -1.442695, %v1753_v12 }
 0x314   :  { %v7567_v63 = vpop.eup %7566  ;;  %2065 = vmatpush.bf16.msra.mxu3 %v6020_v48 }
 0x315   :  { %v7569_v10 = vpop.eup %7568  ;;  %v1757_v2 = vadd.f32 1.0, %v7567_v63  ;;  %7570 = vpow2.f32 %v6004_v52 }
 0x316   :  { %v1776_v62 = vadd.f32 1.0, %v7569_v10 }
 0x317   :  { %7572 = vrcp.f32 %v1757_v2  ;;  %v1769_v44 = vand.u32 2147483648, %v1757_v2  ;;  %v1767_v9 = vand.u32 2147483647, %v1757_v2  ;;  %vm1763_vm15 = vweird.f32 %v1757_v2 }
 0x318   :  { %7574 = vrcp.f32 %v1776_v62  ;;  %v1735_v28 = vpop.f32.mrf.mxu2  ;;  %v1748_v35 = vpop.f32.mrf.mxu3  ;;  %v1788_v45 = vand.u32 2147483648, %v1776_v62  ;;  %v1786_v50 = vand.u32 2147483647, %v1776_v62  ;;  %vm1782_vm0 = vweird.f32 %v1776_v62 }
 0x319   :  { %v1770_v55 = vor.u32 1.1754944e-38, %v1769_v44  ;;  %vm1768_vm3 = vcmp.eq.f32.partialorder %v1767_v9, 8.507059e+37  ;;  %v7318_v9 = vld [vmem:[%s11108_s10 + $0xf4] sm:$0xf0] }
 0x31a   :  { %v1789_v52 = vor.u32 1.1754944e-38, %v1788_v45  ;;  %vm1787_vm4 = vcmp.eq.f32.partialorder %v1786_v50, 8.507059e+37  ;;  %v6252_v45 = vld [vmem:[%s11108_s10 + $0xf0] sm:$0xf0] }
 0x31b   :  { %v7571_v38 = vpop.eup %7570 }
 0x31c   :  { %v1796_v39 = vadd.f32 1.0, %v7571_v38 }
 0x31d   :  { %v7573_v8 = vpop.eup %7572 }
 0x31e   :  { %v7575_v11 = vpop.eup %7574  ;;  %v1759_v7 = vmul.f32 %v7573_v8, %v1757_v2  ;;  %7576 = vrcp.f32 %v1796_v39  ;;  %vm1764_vm13 = vweird.f32 %v7573_v8  ;;  %v1808_v38 = vand.u32 2147483648, %v1796_v39 }
 0x31f   :  { %v1778_v12 = vmul.f32 %v7575_v11, %v1776_v62  ;;  %7578 = vtanh.f32 %v1752_v40  ;;  %vm1783_vm14 = vweird.f32 %v7575_v11  ;;  %vm1765_vm1 = vmor %vm1763_vm15, %vm1764_vm13  ;;  %vm1802_vm6 = vweird.f32 %v1796_v39 }
 0x320   :  { %v1760_v41 = vsub.f32 1.0, %v1759_v7  ;;  %vm1784_vm2 = vmor %vm1782_vm0, %vm1783_vm14  ;;  %v1806_v34 = vand.u32 2147483647, %v1796_v39  ;;  %v1809_v40 = vor.u32 1.1754944e-38, %v1808_v38  ;;  %v7309_v38 = vld [vmem:[%s11108_s10 + $0xac] sm:$0xf0] }
 0x321   :  { %v1779_v42 = vsub.f32 1.0, %v1778_v12 }
 0x322   :  { %v1761_v47 = vmul.f32 %v7573_v8, %v1760_v41  ;;  %vm1807_vm8 = vcmp.eq.f32.partialorder %v1806_v34, 8.507059e+37  ;;  %v6250_v41 = vld [vmem:[%s11108_s10 + $0xe0] sm:$0xf]  ;;  %v7307_v34 = vld [vmem:[%s11108_s10 + $0xa4] sm:$0xf] }
 0x323   :  { %v1780_v21 = vmul.f32 %v7575_v11, %v1779_v42  ;;  %v7315_v42 = vld [vmem:[%s11108_s10 + $0xe4] sm:$0xf] }
 0x324   :  { %v7577_v51 = vpop.eup %7576  ;;  %v1762_v13 = vadd.f32 %v7573_v8, %v1761_v47  ;;  %v6258_v47 = vld [vmem:[%s11108_s10 + $0xe8] sm:$0xf] }
 0x325   :  { %v1781_v43 = vadd.f32 %v7575_v11, %v1780_v21  ;;  %v1798_v49 = vmul.f32 %v7577_v51, %v1796_v39  ;;  %v7579_v54 = vpop.eup %7578  ;;  %vm1803_vm5 = vweird.f32 %v7577_v51  ;;  %v7317_v39 = vld [vmem:[%s11108_s10 + $0xec] sm:$0xf0]  ;;  %v6255_v21 = vor.u32 %v7315_v42, %v6252_v45  ;;  %v6228_v42 = vld [vmem:[%s11108_s10 + $0xb8] sm:$0xf0]  ;;  %v6202_v45 = vld [vmem:[%s11108_s10 + $0x80] sm:$0xf] }
 0x326   :  { %v1766_v53 = vsel %vm1765_vm1, %v7573_v8, %v1762_v13  ;;  %vm1804_vm7 = vmor %vm1802_vm6, %vm1803_vm5  ;;  %v6251_v44 = vor.u32 %v7317_v39, %v6250_v41  ;;  %v6259_v50 = vor.u32 %v7318_v9, %v6258_v47  ;;  %v6260_v13 = vld [vmem:[%s11108_s10 + $0xf8] sm:$0xf0]  ;;  %v7308_v39 = vld [vmem:[%s11108_s10 + $0xac] sm:$0xf] }
 0x327   :  { %v1771_v58 = vsel %vm1768_vm3, %v1770_v55, %v1766_v53  ;;  %v1785_v63 = vsel %vm1784_vm2, %v7575_v11, %v1781_v43  ;;  %v1799_v1 = vsub.f32 1.0, %v1798_v49  ;;  %2353 = vmatpush.bf16.msrb.mxu1 %v6255_v21  ;;  %v6234_v43 = vld [vmem:[%s11108_s10 + $0xc0] sm:$0xf]  ;;  %v7313_v49 = vld [vmem:[%s11108_s10 + $0xcc] sm:$0xf0] }
 0x328   :  { %v1790_v10 = vsel %vm1787_vm4, %v1789_v52, %v1785_v63  ;;  %v1813_v48 = vmul.f32 %v7579_v54, %v1771_v58  ;;  %2340 = vmatpush.bf16.msrb.mxu0 %v6251_v44  ;;  %2366 = vmatpush.bf16.msrb.mxu2 %v6259_v50  ;;  %v7311_v52 = vld [vmem:[%s11108_s10 + $0xc4] sm:$0xf]  ;;  %v6235_v53 = vor.u32 %v7313_v49, %v6234_v43  ;;  %v6236_v54 = vld [vmem:[%s11108_s10 + $0xd0] sm:$0xf0]  ;;  %v6242_v58 = vld [vmem:[%s11108_s10 + $0xc8] sm:$0xf] }
 0x329   :  { %v1812_v28 = vmul.f32 %v1790_v10, %v9064_v4  ;;  %v1800_v35 = vmul.f32 %v7577_v51, %v1799_v1  ;;  %v7314_v63 = vld [vmem:[%s11108_s10 + $0xd4] sm:$0xf0]  ;;  %v6239_v1 = vor.u32 %v7311_v52, %v6236_v54  ;;  %v6231_v44 = vor.u32 %v7308_v39, %v6228_v42  ;;  %v7305_v47 = vld [vmem:[%s11108_s10 + $0x8c] sm:$0xf0]  ;;  %v7303_v9 = vld [vmem:[%s11108_s10 + $0x84] sm:$0xf] }
 0x32a   :  { %v6243_v10 = vor.u32 %v7314_v63, %v6242_v58  ;;  %v6203_v21 = vor.u32 %v7305_v47, %v6202_v45  ;;  %v6204_v50 = vld [vmem:[%s11108_s10 + $0x90] sm:$0xf0]  ;;  %v7304_v49 = vld [vmem:[%s11108_s10 + $0x8c] sm:$0xf]  ;;  %v6212_v52 = vld [vmem:[%s11108_s10 + $0x98] sm:$0xf0] }
 0x32b   :  { %v9272_v2 = vadd.f32 %v1813_v48, %v1812_v28  ;;  %v1801_v62 = vadd.f32 %v7577_v51, %v1800_v35  ;;  %v7312_v48 = vld [vmem:[%s11108_s10 + $0xcc] sm:$0xf]  ;;  %v6244_v28 = vld [vmem:[%s11108_s10 + $0xd8] sm:$0xf0]  ;;  %2354 = vmatpush.bf16.msrb.mxu1 %v6239_v1  ;;  %v6186_v54 = vld [vmem:[%s11108_s10 + $0x60] sm:$0xf]  ;;  %v1046_v1 = vadd.f32 %v8799_v59, %v8921_v32 }
 0x32c   :  { %2341 = vmatpush.bf16.msrb.mxu0 %v6235_v53  ;;  %v6247_v35 = vor.u32 %v7312_v48, %v6244_v28  ;;  %2367 = vmatpush.bf16.msrb.mxu2 %v6243_v10  ;;  %v6215_v53 = vor.u32 %v7304_v49, %v6212_v52  ;;  %v7301_v58 = vld [vmem:[%s11108_s10 + $0x6c] sm:$0xf0]  ;;  %v7299_v63 = vld [vmem:[%s11108_s10 + $0x64] sm:$0xf]  ;;  %v1075_v10 = vadd.f32 %v8801_v14, %v8924_v33  ;;  %v6188_v28 = vld [vmem:[%s11108_s10 + $0x70] sm:$0xf0] }
 0x32d   :  { %7580 = vtanh.f32 %v9272_v2  ;;  %v1805_v8 = vsel %vm1804_vm7, %v7577_v51, %v1801_v62  ;;  %v7316_v51 = vld [vmem:[%s11108_s10 + $0xec] sm:$0xf]  ;;  %v6218_v62 = vld [vmem:[%s11108_s10 + $0xa0] sm:$0xf]  ;;  %v6187_v48 = vor.u32 %v7301_v58, %v6186_v54  ;;  %v6191_v59 = vor.u32 %v7299_v63, %v6188_v28  ;;  %v7297_v39 = vld [vmem:[%s11108_s10 + $0x4c] sm:$0xf0] }
 0x32e   :  { %v1810_v7 = vsel %vm1807_vm8, %v1809_v40, %v1805_v8  ;;  %v6263_v55 = vor.u32 %v7316_v51, %v6260_v13  ;;  %v6219_v8 = vor.u32 %v7309_v38, %v6218_v62  ;;  %v6220_v40 = vld [vmem:[%s11108_s10 + $0xb0] sm:$0xf0]  ;;  %v6210_v51 = vld [vmem:[%s11108_s10 + $0x88] sm:$0xf]  ;;  %v7306_v13 = vld [vmem:[%s11108_s10 + $0x94] sm:$0xf0] }
 0x32f   :  { %v6211_v43 = vor.u32 %v7306_v13, %v6210_v51  ;;  %v7302_v62 = vld [vmem:[%s11108_s10 + $0x74] sm:$0xf0]  ;;  %v7300_v14 = vld [vmem:[%s11108_s10 + $0x6c] sm:$0xf]  ;;  %v7295_v42 = vld [vmem:[%s11108_s10 + $0x44] sm:$0xf] }
 0x330   :  { %2379 = vmatpush.bf16.msrb.mxu3 %v6263_v55  ;;  %2342 = vmatpush.bf16.msrb.mxu0 %v6219_v8  ;;  %v6207_v55 = vor.u32 %v7303_v9, %v6204_v50  ;;  %v6172_v9 = vld [vmem:[%s11108_s10 + $0x50] sm:$0xf0]  ;;  %v6178_v50 = vld [vmem:[%s11108_s10 + $0x48] sm:$0xf]  ;;  %v7298_v51 = vld [vmem:[%s11108_s10 + $0x54] sm:$0xf0] }
 0x331   :  { %v7296_v13 = vld [vmem:[%s11108_s10 + $0x4c] sm:$0xf]  ;;  %v6154_v49 = vld [vmem:[%s11108_s10 + $0x20] sm:$0xf]  ;;  %v7293_v52 = vld [vmem:[%s11108_s10 + $0x2c] sm:$0xf0] }
 0x332   :  { %v6155_v58 = vor.u32 %v7293_v52, %v6154_v49  ;;  %v7291_v63 = vld [vmem:[%s11108_s10 + $0x24] sm:$0xf] }
 0x333   :  { %v7581_v11 = vpop.eup %7580 }
 0x334   :  { %v9275_v12 = vmul.f32 %v7581_v11, %v1810_v7  ;;  %2380 = vmatpush.bf16.msrb.mxu3 %v6247_v35  ;;  %v6226_v11 = vld [vmem:[%s11108_s10 + $0xa8] sm:$0xf]  ;;  %v7310_v7 = vld [vmem:[%s11108_s10 + $0xb4] sm:$0xf0]  ;;  %2343 = vmatpush.bf16.msrb.mxu0 %v6203_v21  ;;  %v6175_v21 = vor.u32 %v7295_v42, %v6172_v9  ;;  %v7288_v9 = vld [vmem:[%s11108_s10 + $0xc] sm:$0xf] }
 0x335   :  { %v6227_v41 = vor.u32 %v7310_v7, %v6226_v11  ;;  %v6194_v35 = vld [vmem:[%s11108_s10 + $0x68] sm:$0xf] }
 0x336   :  { %v1826_v4 = vpack.c.bf16 %v9275_v12, %v9275_v12  ;;  %v6195_v8 = vor.u32 %v7302_v62, %v6194_v35  ;;  %v7294_v35 = vld [vmem:[%s11108_s10 + $0x34] sm:$0xf0]  ;;  %v7292_v62 = vld [vmem:[%s11108_s10 + $0x2c] sm:$0xf]  ;;  %v6146_v42 = vld [vmem:[%s11108_s10 + $0x8] sm:$0xf] }
 0x337   :  { %2368 = vmatpush.bf16.msrb.mxu2 %v6227_v41  ;;  %v6170_v41 = vld [vmem:[%s11108_s10 + $0x40] sm:$0xf] }
 0x338   :  { %2027 = vmatmul.bf16.vlgmr.msra.gmra.mxu0 %v1826_v4  ;;  %2040 = vmatmul.bf16.vlgmr.msra.gmra.mxu1 %v1826_v4  ;;  %v6171_v47 = vor.u32 %v7297_v39, %v6170_v41  ;;  %v6140_v39 = vld [vmem:[%s11108_s10 + $0x10] sm:$0xf0] }
 0x339   :  { %2053 = vmatmul.bf16.vlgmr.msra.gmra.mxu2 %v1826_v4  ;;  %2066 = vmatmul.bf16.vlgmr.msra.gmra.mxu3 %v1826_v4  ;;  %v6223_v4 = vor.u32 %v7307_v34, %v6220_v40  ;;  %v6196_v40 = vld [vmem:[%s11108_s10 + $0x78] sm:$0xf0] }
 0x33a   :  { %2381 = vmatpush.bf16.msrb.mxu3 %v6231_v44  ;;  %2344 = vmatpush.bf16.msrb.mxu0 %v6187_v48 }
 0x33b   :  { %2355 = vmatpush.bf16.msrb.mxu1 %v6223_v4  ;;  %2369 = vmatpush.bf16.msrb.mxu2 %v6211_v43  ;;  %v6199_v4 = vor.u32 %v7300_v14, %v6196_v40  ;;  %v6180_v43 = vld [vmem:[%s11108_s10 + $0x58] sm:$0xf0] }
 0x33c   :  { %v6183_v54 = vor.u32 %v7296_v13, %v6180_v43 }
 0x33e   :  { %2382 = vmatpush.bf16.msrb.mxu3 %v6215_v53  ;;  %2345 = vmatpush.bf16.msrb.mxu0 %v6171_v47  ;;  %v1133_v53 = vadd.f32 %v8805_v16, %v8983_v0 }
 0x33f   :  { %2356 = vmatpush.bf16.msrb.mxu1 %v6207_v55  ;;  %2370 = vmatpush.bf16.msrb.mxu2 %v6195_v8  ;;  %v6179_v55 = vor.u32 %v7298_v51, %v6178_v50 }
 0x342   :  { %2383 = vmatpush.bf16.msrb.mxu3 %v6199_v4  ;;  %v7287_v4 = vld [vmem:[%s11108_s10 + $0x4] sm:$0xf]  ;;  %2346 = vmatpush.bf16.msrb.mxu0 %v6155_v58  ;;  %v1104_v58 = vadd.f32 %v8803_v15, %v9060_v56 }
 0x343   :  { %2357 = vmatpush.bf16.msrb.mxu1 %v6191_v59  ;;  %2371 = vmatpush.bf16.msrb.mxu2 %v6179_v55  ;;  %v6143_v47 = vor.u32 %v7287_v4, %v6140_v39 }
 0x346   :  { %2384 = vmatpush.bf16.msrb.mxu3 %v6183_v54 }
 0x347   :  { %2358 = vmatpush.bf16.msrb.mxu1 %v6175_v21  ;;  %v6148_v21 = vld [vmem:[%s11108_s10 + $0x18] sm:$0xf0] }
 0x348   :  { %v6151_v43 = vor.u32 %v7288_v9, %v6148_v21 }
 0x3b5   :  { %v2028_v38 = vpop.f32.mrf.mxu0  ;;  %v2041_v34 = vpop.f32.mrf.mxu1 }
 0x3b6   :  { %v2071_v11 = vadd.f32 %v2028_v38, %v1046_v1  ;;  %v2072_v7 = vadd.f32 %v2041_v34, %v1075_v10  ;;  %v6156_v1 = vld [vmem:[%s11108_s10 + $0x30] sm:$0xf0]  ;;  %v6162_v10 = vld [vmem:[%s11108_s10 + $0x28] sm:$0xf]  ;;  %v6164_v38 = vld [vmem:[%s11108_s10 + $0x38] sm:$0xf0] }
 0x3b7   :  { %v6159_v16 = vor.u32 %v7291_v63, %v6156_v1  ;;  %v6163_v14 = vor.u32 %v7294_v35, %v6162_v10  ;;  %v6167_v40 = vor.u32 %v7292_v62, %v6164_v38 }
 0x3b8   :  { %v6133_v44 = vmul.f32 -1.442695, %v2071_v11  ;;  %v6134_v45 = vmul.f32 -1.442695, %v2072_v7  ;;  %v6138_v11 = vld [vmem:[%s11108_s10] sm:$0xf] }
 0x3b9   :  { %v7289_v7 = vld [vmem:[%s11108_s10 + $0xc] sm:$0xf0]  ;;  %2359 = vmatpush.bf16.msrb.mxu1 %v6159_v16  ;;  %2372 = vmatpush.bf16.msrb.mxu2 %v6163_v14 }
 0x3ba   :  { %7582 = vpow2.f32 %v6133_v44  ;;  %v6139_v41 = vor.u32 %v7289_v7, %v6138_v11  ;;  %v7290_v44 = vld [vmem:[%s11108_s10 + $0x14] sm:$0xf0]  ;;  %2385 = vmatpush.bf16.msrb.mxu3 %v6167_v40 }
 0x3bb   :  { %7584 = vpow2.f32 %v6134_v45  ;;  %v6147_v51 = vor.u32 %v7290_v44, %v6146_v42 }
 0x3bc   :  { %v2054_v48 = vpop.f32.mrf.mxu2  ;;  %v2067_v28 = vpop.f32.mrf.mxu3  ;;  %2347 = vmatpush.bf16.msrb.mxu0 %v6139_v41 }
 0x3bd   :  { %v2074_v34 = vadd.f32 %v2067_v28, %v1133_v53  ;;  %v2030_v59 = vpop.f32.mrf.mxu0  ;;  %v2043_v8 = vpop.f32.mrf.mxu1  ;;  %2360 = vmatpush.bf16.msrb.mxu1 %v6143_v47  ;;  %2373 = vmatpush.bf16.msrb.mxu2 %v6147_v51  ;;  %v2073_v10 = vadd.f32 %v2054_v48, %v1104_v58 }
 0x3be   :  { %2386 = vmatpush.bf16.msrb.mxu3 %v6151_v43 }
 0x3bf   :  { %v6135_v45 = vmul.f32 -1.442695, %v2074_v34 }
 0x3c0   :  { %v7583_v50 = vpop.eup %7582 }
 0x3c1   :  { %v7585_v13 = vpop.eup %7584  ;;  %v2078_v55 = vadd.f32 1.0, %v7583_v50  ;;  %7586 = vpow2.f32 %v6135_v45 }
 0x3c2   :  { %v2097_v49 = vadd.f32 1.0, %v7585_v13 }
 0x3c3   :  { %7588 = vrcp.f32 %v2078_v55  ;;  %v2090_v34 = vand.u32 2147483648, %v2078_v55  ;;  %v2088_v14 = vand.u32 2147483647, %v2078_v55  ;;  %vm2084_vm11 = vweird.f32 %v2078_v55 }
 0x3c4   :  { %7590 = vrcp.f32 %v2097_v49  ;;  %v2056_v52 = vpop.f32.mrf.mxu2  ;;  %v2069_v53 = vpop.f32.mrf.mxu3  ;;  %v2109_v59 = vand.u32 2147483648, %v2097_v49  ;;  %v2107_v11 = vand.u32 2147483647, %v2097_v49  ;;  %vm2103_vm12 = vweird.f32 %v2097_v49 }
 0x3c5   :  { %v2091_v48 = vor.u32 1.1754944e-38, %v2090_v34  ;;  %vm2089_vm15 = vcmp.eq.f32.partialorder %v2088_v14, 8.507059e+37  ;;  %v7350_v34 = vld [vmem:[%s11108_s10 + $0xf4] sm:$0xf0]  ;;  %v7348_v14 = vld [vmem:[%s11108_s10 + $0xec] sm:$0xf] }
 0x3c6   :  { %v2110_v39 = vor.u32 1.1754944e-38, %v2109_v59  ;;  %vm2108_vm0 = vcmp.eq.f32.partialorder %v2107_v11, 8.507059e+37 }
 0x3c7   :  { %v7587_v54 = vpop.eup %7586 }
 0x3c8   :  { %v2117_v63 = vadd.f32 1.0, %v7587_v54 }
 0x3c9   :  { %v7589_v1 = vpop.eup %7588 }
 0x3ca   :  { %v7591_v28 = vpop.eup %7590  ;;  %v2080_v16 = vmul.f32 %v7589_v1, %v2078_v55  ;;  %7592 = vrcp.f32 %v2117_v63  ;;  %vm2085_vm9 = vweird.f32 %v7589_v1  ;;  %vm2123_vm2 = vweird.f32 %v2117_v63 }
 0x3cb   :  { %v2099_v35 = vmul.f32 %v7591_v28, %v2097_v49  ;;  %7594 = vtanh.f32 %v2073_v10  ;;  %vm2104_vm10 = vweird.f32 %v7591_v28  ;;  %vm2086_vm13 = vmor %vm2084_vm11, %vm2085_vm9  ;;  %v2129_v49 = vand.u32 2147483648, %v2117_v63 }
 0x3cc   :  { %v2081_v62 = vsub.f32 1.0, %v2080_v16  ;;  %vm2105_vm14 = vmor %vm2103_vm12, %vm2104_vm10  ;;  %v2127_v52 = vand.u32 2147483647, %v2117_v63  ;;  %v7347_v16 = vld [vmem:[%s11108_s10 + $0xe4] sm:$0xf] }
 0x3cd   :  { %v2100_v38 = vsub.f32 1.0, %v2099_v35  ;;  %v2130_v54 = vor.u32 1.1754944e-38, %v2129_v49  ;;  %v6351_v49 = vld [vmem:[%s11108_s10 + $0xb0] sm:$0xf0] }
 0x3ce   :  { %v2082_v8 = vmul.f32 %v7589_v1, %v2081_v62  ;;  %vm2128_vm4 = vcmp.eq.f32.partialorder %v2127_v52, 8.507059e+37  ;;  %v6383_v62 = vld [vmem:[%s11108_s10 + $0xf0] sm:$0xf0]  ;;  %v6357_v52 = vld [vmem:[%s11108_s10 + $0xa8] sm:$0xf] }
 0x3cf   :  { %v2101_v40 = vmul.f32 %v7591_v28, %v2100_v38  ;;  %v6389_v38 = vld [vmem:[%s11108_s10 + $0xe8] sm:$0xf]  ;;  %v6386_v59 = vor.u32 %v7347_v16, %v6383_v62  ;;  %v7337_v16 = vld [vmem:[%s11108_s10 + $0x8c] sm:$0xf0] }
 0x3d0   :  { %v7593_v7 = vpop.eup %7592  ;;  %v2083_v15 = vadd.f32 %v7589_v1, %v2082_v8  ;;  %v6390_v8 = vor.u32 %v7350_v34, %v6389_v38  ;;  %v6335_v38 = vld [vmem:[%s11108_s10 + $0x90] sm:$0xf0]  ;;  %v6341_v34 = vld [vmem:[%s11108_s10 + $0x88] sm:$0xf] }
 0x3d1   :  { %v2102_v4 = vadd.f32 %v7591_v28, %v2101_v40  ;;  %v2119_v41 = vmul.f32 %v7593_v7, %v2117_v63  ;;  %v7595_v44 = vpop.eup %7594  ;;  %vm2124_vm1 = vweird.f32 %v7593_v7  ;;  %v7349_v63 = vld [vmem:[%s11108_s10 + $0xec] sm:$0xf0]  ;;  %v6391_v40 = vld [vmem:[%s11108_s10 + $0xf8] sm:$0xf0]  ;;  %2674 = vmatpush.bf16.msra.mxu1 %v6386_v59  ;;  %v7338_v59 = vld [vmem:[%s11108_s10 + $0x94] sm:$0xf0] }
 0x3d2   :  { %v2087_v42 = vsel %vm2086_vm13, %v7589_v1, %v2083_v15  ;;  %vm2125_vm3 = vmor %vm2123_vm2, %vm2124_vm1  ;;  %v6394_v11 = vor.u32 %v7348_v14, %v6391_v40  ;;  %2687 = vmatpush.bf16.msra.mxu2 %v6390_v8  ;;  %v7345_v15 = vld [vmem:[%s11108_s10 + $0xcc] sm:$0xf0]  ;;  %v6342_v14 = vor.u32 %v7338_v59, %v6341_v34  ;;  %v7336_v40 = vld [vmem:[%s11108_s10 + $0x8c] sm:$0xf] }
 0x3d3   :  { %v2092_v45 = vsel %vm2089_vm15, %v2091_v48, %v2087_v42  ;;  %v2106_v47 = vsel %vm2105_vm14, %v7591_v28, %v2102_v4  ;;  %v2120_v9 = vsub.f32 1.0, %v2119_v41  ;;  %v6381_v28 = vld [vmem:[%s11108_s10 + $0xe0] sm:$0xf]  ;;  %v7343_v48 = vld [vmem:[%s11108_s10 + $0xc4] sm:$0xf] }
 0x3d4   :  { %v2111_v21 = vsel %vm2108_vm0, %v2110_v39, %v2106_v47  ;;  %v2134_v50 = vmul.f32 %v7595_v44, %v2092_v45  ;;  %v6382_v35 = vor.u32 %v7349_v63, %v6381_v28  ;;  %2700 = vmatpush.bf16.msra.mxu3 %v6394_v11  ;;  %v6367_v41 = vld [vmem:[%s11108_s10 + $0xd0] sm:$0xf0]  ;;  %v6373_v39 = vld [vmem:[%s11108_s10 + $0xc8] sm:$0xf]  ;;  %v7346_v42 = vld [vmem:[%s11108_s10 + $0xd4] sm:$0xf0] }
 0x3d5   :  { %v2133_v51 = vmul.f32 %v2111_v21, %v9272_v2  ;;  %v2121_v13 = vmul.f32 %v7593_v7, %v2120_v9  ;;  %v6370_v44 = vor.u32 %v7343_v48, %v6367_v41  ;;  %v6374_v45 = vor.u32 %v7346_v42, %v6373_v39  ;;  %v7344_v47 = vld [vmem:[%s11108_s10 + $0xcc] sm:$0xf]  ;;  %v6375_v9 = vld [vmem:[%s11108_s10 + $0xd8] sm:$0xf0]  ;;  %v6333_v63 = vld [vmem:[%s11108_s10 + $0x80] sm:$0xf] }
 0x3d6   :  { %2661 = vmatpush.bf16.msra.mxu0 %v6382_v35  ;;  %v6378_v21 = vor.u32 %v7344_v47, %v6375_v9  ;;  %v7335_v35 = vld [vmem:[%s11108_s10 + $0x84] sm:$0xf]  ;;  %v6334_v62 = vor.u32 %v7337_v16, %v6333_v63  ;;  %v6343_v11 = vld [vmem:[%s11108_s10 + $0x98] sm:$0xf0]  ;;  %v7333_v48 = vld [vmem:[%s11108_s10 + $0x6c] sm:$0xf0]  ;;  %v1048_v41 = vadd.f32 %v8807_v17, %v8921_v32  ;;  %v1077_v39 = vadd.f32 %v8809_v18, %v8924_v33 }
 0x3d7   :  { %v9480_v55 = vadd.f32 %v2134_v50, %v2133_v51  ;;  %v2122_v43 = vadd.f32 %v7593_v7, %v2121_v13  ;;  %2675 = vmatpush.bf16.msra.mxu1 %v6370_v44  ;;  %2688 = vmatpush.bf16.msra.mxu2 %v6374_v45  ;;  %v6349_v50 = vld [vmem:[%s11108_s10 + $0xa0] sm:$0xf]  ;;  %v7341_v51 = vld [vmem:[%s11108_s10 + $0xac] sm:$0xf0]  ;;  %v7339_v13 = vld [vmem:[%s11108_s10 + $0xa4] sm:$0xf]  ;;  %v6338_v8 = vor.u32 %v7335_v35, %v6335_v38 }
 0x3d8   :  { %2701 = vmatpush.bf16.msra.mxu3 %v6378_v21  ;;  %v6319_v44 = vld [vmem:[%s11108_s10 + $0x70] sm:$0xf0]  ;;  %v6325_v45 = vld [vmem:[%s11108_s10 + $0x68] sm:$0xf]  ;;  %v7334_v47 = vld [vmem:[%s11108_s10 + $0x74] sm:$0xf0] }
 0x3d9   :  { %7596 = vtanh.f32 %v9480_v55  ;;  %v2126_v53 = vsel %vm2125_vm3, %v7593_v7, %v2122_v43  ;;  %v6365_v7 = vld [vmem:[%s11108_s10 + $0xc0] sm:$0xf]  ;;  %v6350_v43 = vor.u32 %v7341_v51, %v6349_v50  ;;  %v6326_v50 = vor.u32 %v7334_v47, %v6325_v45  ;;  %v7332_v18 = vld [vmem:[%s11108_s10 + $0x6c] sm:$0xf]  ;;  %v6327_v51 = vld [vmem:[%s11108_s10 + $0x78] sm:$0xf0] }
 0x3da   :  { %v2131_v1 = vsel %vm2128_vm4, %v2130_v54, %v2126_v53  ;;  %v6366_v4 = vor.u32 %v7345_v15, %v6365_v7  ;;  %v7342_v53 = vld [vmem:[%s11108_s10 + $0xb4] sm:$0xf0]  ;;  %v6354_v54 = vor.u32 %v7339_v13, %v6351_v49  ;;  %v6346_v7 = vor.u32 %v7336_v40, %v6343_v11  ;;  %v6317_v15 = vld [vmem:[%s11108_s10 + $0x60] sm:$0xf]  ;;  %v6309_v16 = vld [vmem:[%s11108_s10 + $0x48] sm:$0xf] }
 0x3db   :  { %v6318_v42 = vor.u32 %v7333_v48, %v6317_v15  ;;  %v6330_v49 = vor.u32 %v7332_v18, %v6327_v51  ;;  %v7330_v35 = vld [vmem:[%s11108_s10 + $0x54] sm:$0xf0]  ;;  %v6311_v34 = vld [vmem:[%s11108_s10 + $0x58] sm:$0xf0]  ;;  %v6285_v59 = vld [vmem:[%s11108_s10 + $0x20] sm:$0xf] }
 0x3dc   :  { %2662 = vmatpush.bf16.msra.mxu0 %v6366_v4  ;;  %2676 = vmatpush.bf16.msra.mxu1 %v6354_v54  ;;  %v7331_v4 = vld [vmem:[%s11108_s10 + $0x64] sm:$0xf]  ;;  %v6310_v38 = vor.u32 %v7330_v35, %v6309_v16  ;;  %v6287_v15 = vld [vmem:[%s11108_s10 + $0x30] sm:$0xf0]  ;;  %v6293_v48 = vld [vmem:[%s11108_s10 + $0x28] sm:$0xf] }
 0x3dd   :  { %v6322_v17 = vor.u32 %v7331_v4, %v6319_v44  ;;  %v7327_v54 = vld [vmem:[%s11108_s10 + $0x44] sm:$0xf]  ;;  %v6295_v44 = vld [vmem:[%s11108_s10 + $0x38] sm:$0xf0]  ;;  %v7321_v18 = vld [vmem:[%s11108_s10 + $0xc] sm:$0xf0] }
 0x3de   :  { %v7319_v51 = vld [vmem:[%s11108_s10 + $0x4] sm:$0xf] }
 0x3df   :  { %v7597_v58 = vpop.eup %7596 }
 0x3e0   :  { %v9483_v10 = vmul.f32 %v7597_v58, %v2131_v1  ;;  %v6358_v58 = vor.u32 %v7342_v53, %v6357_v52  ;;  %v7340_v1 = vld [vmem:[%s11108_s10 + $0xac] sm:$0xf]  ;;  %2663 = vmatpush.bf16.msra.mxu0 %v6350_v43  ;;  %2677 = vmatpush.bf16.msra.mxu1 %v6338_v8  ;;  %v6301_v52 = vld [vmem:[%s11108_s10 + $0x40] sm:$0xf]  ;;  %v7329_v53 = vld [vmem:[%s11108_s10 + $0x4c] sm:$0xf0] }
 0x3e1   :  { %v7325_v8 = vld [vmem:[%s11108_s10 + $0x2c] sm:$0xf0] }
 0x3e2   :  { %v2147_v2 = vpack.c.bf16 %v9483_v10, %v9483_v10  ;;  %2689 = vmatpush.bf16.msra.mxu2 %v6358_v58  ;;  %v6286_v11 = vor.u32 %v7325_v8, %v6285_v59  ;;  %v1106_v8 = vadd.f32 %v8811_v19, %v9060_v56 }
 0x3e4   :  { %2348 = vmatmul.bf16.vlgmr.msrb.gmra.mxu0 %v2147_v2  ;;  %2361 = vmatmul.bf16.vlgmr.msrb.gmra.mxu1 %v2147_v2 }
 0x3e5   :  { %2374 = vmatmul.bf16.vlgmr.msrb.gmra.mxu2 %v2147_v2  ;;  %2387 = vmatmul.bf16.vlgmr.msrb.gmra.mxu3 %v2147_v2  ;;  %v6359_v2 = vld [vmem:[%s11108_s10 + $0xb8] sm:$0xf0] }
 0x3e6   :  { %v6362_v28 = vor.u32 %v7340_v1, %v6359_v2  ;;  %2664 = vmatpush.bf16.msra.mxu0 %v6334_v62  ;;  %2690 = vmatpush.bf16.msra.mxu2 %v6342_v14  ;;  %v6302_v2 = vor.u32 %v7329_v53, %v6301_v52  ;;  %v7328_v62 = vld [vmem:[%s11108_s10 + $0x4c] sm:$0xf]  ;;  %v1135_v14 = vadd.f32 %v8813_v20, %v8983_v0  ;;  %v7322_v52 = vld [vmem:[%s11108_s10 + $0x14] sm:$0xf0] }
 0x3e7   :  { %2678 = vmatpush.bf16.msra.mxu1 %v6322_v17  ;;  %v6314_v40 = vor.u32 %v7328_v62, %v6311_v34 }
 0x3e8   :  { %2702 = vmatpush.bf16.msra.mxu3 %v6362_v28  ;;  %v6303_v28 = vld [vmem:[%s11108_s10 + $0x50] sm:$0xf0] }
 0x3e9   :  { %v6306_v63 = vor.u32 %v7327_v54, %v6303_v28 }
 0x3ea   :  { %2665 = vmatpush.bf16.msra.mxu0 %v6318_v42  ;;  %2691 = vmatpush.bf16.msra.mxu2 %v6326_v50  ;;  %v7324_v42 = vld [vmem:[%s11108_s10 + $0x2c] sm:$0xf]  ;;  %v6269_v50 = vld [vmem:[%s11108_s10] sm:$0xf] }
 0x3eb   :  { %2679 = vmatpush.bf16.msra.mxu1 %v6306_v63  ;;  %v6298_v17 = vor.u32 %v7324_v42, %v6295_v44 }
 0x3ec   :  { %2703 = vmatpush.bf16.msra.mxu3 %v6346_v7  ;;  %v7323_v7 = vld [vmem:[%s11108_s10 + $0x24] sm:$0xf] }
 0x3ed   :  { %v6290_v20 = vor.u32 %v7323_v7, %v6287_v15 }
 0x3ee   :  { %2666 = vmatpush.bf16.msra.mxu0 %v6302_v2  ;;  %2692 = vmatpush.bf16.msra.mxu2 %v6310_v38 }
 0x3ef   :  { %2680 = vmatpush.bf16.msra.mxu1 %v6290_v20 }
 0x3f0   :  { %2704 = vmatpush.bf16.msra.mxu3 %v6330_v49  ;;  %v6277_v49 = vld [vmem:[%s11108_s10 + $0x8] sm:$0xf] }
 0x3f1   :  { %v6278_v28 = vor.u32 %v7322_v52, %v6277_v49 }
 0x3f2   :  { %2667 = vmatpush.bf16.msra.mxu0 %v6286_v11 }
 0x3f4   :  { %2705 = vmatpush.bf16.msra.mxu3 %v6314_v40 }
 0x3f8   :  { %2706 = vmatpush.bf16.msra.mxu3 %v6298_v17 }
 0x461   :  { %v2349_v9 = vpop.f32.mrf.mxu0  ;;  %v2362_v21 = vpop.f32.mrf.mxu1 }
 0x462   :  { %v2392_v13 = vadd.f32 %v2349_v9, %v1048_v41  ;;  %v2393_v43 = vadd.f32 %v2362_v21, %v1077_v39  ;;  %v7326_v39 = vld [vmem:[%s11108_s10 + $0x34] sm:$0xf0] }
 0x463   :  { %v6294_v21 = vor.u32 %v7326_v39, %v6293_v48 }
 0x464   :  { %v6264_v58 = vmul.f32 -1.442695, %v2392_v13  ;;  %v6265_v1 = vmul.f32 -1.442695, %v2393_v43  ;;  %v6270_v13 = vor.u32 %v7321_v18, %v6269_v50  ;;  %v6271_v43 = vld [vmem:[%s11108_s10 + $0x10] sm:$0xf0] }
 0x465   :  { %v6274_v54 = vor.u32 %v7319_v51, %v6271_v43  ;;  %2693 = vmatpush.bf16.msra.mxu2 %v6294_v21 }
 0x466   :  { %7598 = vpow2.f32 %v6264_v58  ;;  %v7320_v58 = vld [vmem:[%s11108_s10 + $0xc] sm:$0xf]  ;;  %2668 = vmatpush.bf16.msra.mxu0 %v6270_v13 }
 0x467   :  { %7600 = vpow2.f32 %v6265_v1  ;;  %v6279_v1 = vld [vmem:[%s11108_s10 + $0x18] sm:$0xf0]  ;;  %2681 = vmatpush.bf16.msra.mxu1 %v6274_v54 }
 0x468   :  { %v2375_v4 = vpop.f32.mrf.mxu2  ;;  %v2388_v41 = vpop.f32.mrf.mxu3  ;;  %v6282_v35 = vor.u32 %v7320_v58, %v6279_v1 }
 0x469   :  { %v2395_v45 = vadd.f32 %v2388_v41, %v1135_v14  ;;  %v2351_v47 = vpop.f32.mrf.mxu0  ;;  %v2364_v9 = vpop.f32.mrf.mxu1  ;;  %2694 = vmatpush.bf16.msra.mxu2 %v6278_v28  ;;  %v2394_v11 = vadd.f32 %v2375_v4, %v1106_v8  ;;  %v6512_v8 = vld [vmem:[%s11108_s10 + $0xe0] sm:$0xf] }
 0x46a   :  { %2707 = vmatpush.bf16.msra.mxu3 %v6282_v35 }
 0x46b   :  { %v6266_v53 = vmul.f32 -1.442695, %v2395_v45 }
 0x46c   :  { %v7599_v2 = vpop.eup %7598 }
 0x46d   :  { %v7601_v63 = vpop.eup %7600  ;;  %v2399_v16 = vadd.f32 1.0, %v7599_v2  ;;  %7602 = vpow2.f32 %v6266_v53 }
 0x46e   :  { %v2418_v62 = vadd.f32 1.0, %v7601_v63 }
 0x46f   :  { %7604 = vrcp.f32 %v2399_v16  ;;  %v2411_v39 = vand.u32 2147483648, %v2399_v16  ;;  %v2409_v45 = vand.u32 2147483647, %v2399_v16  ;;  %vm2405_vm7 = vweird.f32 %v2399_v16 }
 0x470   :  { %7606 = vrcp.f32 %v2418_v62  ;;  %v2377_v38 = vpop.f32.mrf.mxu2  ;;  %v2390_v34 = vpop.f32.mrf.mxu3  ;;  %v2430_v42 = vand.u32 2147483648, %v2418_v62  ;;  %v2428_v9 = vand.u32 2147483647, %v2418_v62  ;;  %vm2424_vm8 = vweird.f32 %v2418_v62 }
 0x471   :  { %v2412_v4 = vor.u32 1.1754944e-38, %v2411_v39  ;;  %vm2410_vm11 = vcmp.eq.f32.partialorder %v2409_v45, 8.507059e+37  ;;  %v7380_v39 = vld [vmem:[%s11108_s10 + $0xec] sm:$0xf]  ;;  %v6496_v45 = vld [vmem:[%s11108_s10 + $0xc0] sm:$0xf] }
 0x472   :  { %v2431_v18 = vor.u32 1.1754944e-38, %v2430_v42  ;;  %vm2429_vm12 = vcmp.eq.f32.partialorder %v2428_v9, 8.507059e+37  ;;  %v6522_v42 = vld [vmem:[%s11108_s10 + $0xf8] sm:$0xf0]  ;;  %v7375_v9 = vld [vmem:[%s11108_s10 + $0xc4] sm:$0xf] }
 0x473   :  { %v7603_v59 = vpop.eup %7602 }
 0x474   :  { %v2438_v14 = vadd.f32 1.0, %v7603_v59 }
 0x475   :  { %v7605_v40 = vpop.eup %7604 }
 0x476   :  { %v7607_v7 = vpop.eup %7606  ;;  %v2401_v15 = vmul.f32 %v7605_v40, %v2399_v16  ;;  %7608 = vrcp.f32 %v2438_v14  ;;  %vm2406_vm5 = vweird.f32 %v7605_v40  ;;  %v2450_v63 = vand.u32 2147483648, %v2438_v14 }
 0x477   :  { %v2420_v48 = vmul.f32 %v7607_v7, %v2418_v62  ;;  %7610 = vtanh.f32 %v2394_v11  ;;  %vm2425_vm6 = vweird.f32 %v7607_v7  ;;  %vm2407_vm9 = vmor %vm2405_vm7, %vm2406_vm5  ;;  %vm2444_vm14 = vweird.f32 %v2438_v14 }
 0x478   :  { %v2402_v41 = vsub.f32 1.0, %v2401_v15  ;;  %vm2426_vm10 = vmor %vm2424_vm8, %vm2425_vm6  ;;  %v2448_v16 = vand.u32 2147483647, %v2438_v14  ;;  %v2451_v62 = vor.u32 1.1754944e-38, %v2450_v63  ;;  %v6520_v15 = vld [vmem:[%s11108_s10 + $0xe8] sm:$0xf] }
 0x479   :  { %v2421_v20 = vsub.f32 1.0, %v2420_v48  ;;  %v7382_v48 = vld [vmem:[%s11108_s10 + $0xf4] sm:$0xf0] }
 0x47a   :  { %v2403_v44 = vmul.f32 %v7605_v40, %v2402_v41  ;;  %vm2449_vm0 = vcmp.eq.f32.partialorder %v2448_v16, 8.507059e+37 }
 0x47b   :  { %v2422_v47 = vmul.f32 %v7607_v7, %v2421_v20  ;;  %v6521_v20 = vor.u32 %v7382_v48, %v6520_v15 }
 0x47c   :  { %v7609_v21 = vpop.eup %7608  ;;  %v2404_v19 = vadd.f32 %v7605_v40, %v2403_v44  ;;  %v6525_v44 = vor.u32 %v7380_v39, %v6522_v42  ;;  %v6448_v42 = vld [vmem:[%s11108_s10 + $0x60] sm:$0xf] }
 0x47d   :  { %v2423_v17 = vadd.f32 %v7607_v7, %v2422_v47  ;;  %v2440_v50 = vmul.f32 %v7609_v21, %v2438_v14  ;;  %v7611_v13 = vpop.eup %7610  ;;  %vm2445_vm13 = vweird.f32 %v7609_v21  ;;  %v7381_v14 = vld [vmem:[%s11108_s10 + $0xec] sm:$0xf0]  ;;  %3008 = vmatpush.bf16.msrb.mxu2 %v6521_v20  ;;  %v6474_v20 = vld [vmem:[%s11108_s10 + $0x98] sm:$0xf0] }
 0x47e   :  { %v2408_v51 = vsel %vm2407_vm9, %v7605_v40, %v2404_v19  ;;  %vm2446_vm15 = vmor %vm2444_vm14, %vm2445_vm13  ;;  %v7379_v40 = vld [vmem:[%s11108_s10 + $0xe4] sm:$0xf]  ;;  %v6513_v11 = vor.u32 %v7381_v14, %v6512_v8  ;;  %v7377_v47 = vld [vmem:[%s11108_s10 + $0xcc] sm:$0xf0]  ;;  %3021 = vmatpush.bf16.msrb.mxu3 %v6525_v44 }
 0x47f   :  { %v2413_v43 = vsel %vm2410_vm11, %v2412_v4, %v2408_v51  ;;  %v2427_v49 = vsel %vm2426_vm10, %v7607_v7, %v2423_v17  ;;  %v2441_v52 = vsub.f32 1.0, %v2440_v50  ;;  %v6514_v7 = vld [vmem:[%s11108_s10 + $0xf0] sm:$0xf0]  ;;  %v6504_v4 = vld [vmem:[%s11108_s10 + $0xc8] sm:$0xf] }
 0x480   :  { %v2432_v53 = vsel %vm2429_vm12, %v2431_v18, %v2427_v49  ;;  %v2455_v54 = vmul.f32 %v7611_v13, %v2413_v43  ;;  %v6517_v41 = vor.u32 %v7379_v40, %v6514_v7  ;;  %2982 = vmatpush.bf16.msrb.mxu0 %v6513_v11  ;;  %v6498_v19 = vld [vmem:[%s11108_s10 + $0xd0] sm:$0xf0]  ;;  %v7378_v17 = vld [vmem:[%s11108_s10 + $0xd4] sm:$0xf0]  ;;  %v7376_v51 = vld [vmem:[%s11108_s10 + $0xcc] sm:$0xf] }
 0x481   :  { %v2454_v58 = vmul.f32 %v2432_v53, %v9480_v55  ;;  %v2442_v1 = vmul.f32 %v7609_v21, %v2441_v52  ;;  %v6501_v50 = vor.u32 %v7375_v9, %v6498_v19  ;;  %v6505_v18 = vor.u32 %v7378_v17, %v6504_v4  ;;  %v6506_v13 = vld [vmem:[%s11108_s10 + $0xd8] sm:$0xf0]  ;;  %v6480_v49 = vld [vmem:[%s11108_s10 + $0xa0] sm:$0xf]  ;;  %v7373_v52 = vld [vmem:[%s11108_s10 + $0xac] sm:$0xf0] }
 0x482   :  { %2995 = vmatpush.bf16.msrb.mxu1 %v6517_v41  ;;  %v6509_v43 = vor.u32 %v7376_v51, %v6506_v13  ;;  %v7371_v53 = vld [vmem:[%s11108_s10 + $0xa4] sm:$0xf]  ;;  %v6466_v40 = vld [vmem:[%s11108_s10 + $0x90] sm:$0xf0]  ;;  %v6472_v11 = vld [vmem:[%s11108_s10 + $0x88] sm:$0xf]  ;;  %v1080_v9 = vadd.f32 %v8817_v23, %v8924_v33 }
 0x483   :  { %v9688_v2 = vadd.f32 %v2455_v54, %v2454_v58  ;;  %v2443_v28 = vadd.f32 %v7609_v21, %v2442_v1  ;;  %3009 = vmatpush.bf16.msrb.mxu2 %v6505_v18  ;;  %v6481_v54 = vor.u32 %v7373_v52, %v6480_v49  ;;  %v6482_v58 = vld [vmem:[%s11108_s10 + $0xb0] sm:$0xf0]  ;;  %v6488_v1 = vld [vmem:[%s11108_s10 + $0xa8] sm:$0xf]  ;;  %v7367_v8 = vld [vmem:[%s11108_s10 + $0x84] sm:$0xf] }
 0x484   :  { %3022 = vmatpush.bf16.msrb.mxu3 %v6509_v43  ;;  %v6485_v63 = vor.u32 %v7371_v53, %v6482_v58  ;;  %v7370_v7 = vld [vmem:[%s11108_s10 + $0x94] sm:$0xf0]  ;;  %v6469_v15 = vor.u32 %v7367_v8, %v6466_v40  ;;  %v7368_v41 = vld [vmem:[%s11108_s10 + $0x8c] sm:$0xf]  ;;  %v7365_v44 = vld [vmem:[%s11108_s10 + $0x6c] sm:$0xf0] }
 0x485   :  { %7612 = vtanh.f32 %v9688_v2  ;;  %v2447_v35 = vsel %vm2446_vm15, %v7609_v21, %v2443_v28  ;;  %v6497_v21 = vor.u32 %v7377_v47, %v6496_v45  ;;  %v7374_v28 = vld [vmem:[%s11108_s10 + $0xb4] sm:$0xf0]  ;;  %v6473_v48 = vor.u32 %v7370_v7, %v6472_v11  ;;  %v7363_v45 = vld [vmem:[%s11108_s10 + $0x64] sm:$0xf]  ;;  %v6450_v19 = vld [vmem:[%s11108_s10 + $0x70] sm:$0xf0] }
 0x486   :  { %v2452_v34 = vsel %vm2449_vm0, %v2451_v62, %v2447_v35  ;;  %2996 = vmatpush.bf16.msrb.mxu1 %v6501_v50  ;;  %v6489_v16 = vor.u32 %v7374_v28, %v6488_v1  ;;  %v7372_v35 = vld [vmem:[%s11108_s10 + $0xac] sm:$0xf]  ;;  %v6490_v62 = vld [vmem:[%s11108_s10 + $0xb8] sm:$0xf0]  ;;  %v6477_v39 = vor.u32 %v7368_v41, %v6474_v20  ;;  %v1051_v47 = vadd.f32 %v8815_v22, %v8921_v32  ;;  %v6456_v4 = vld [vmem:[%s11108_s10 + $0x68] sm:$0xf] }
 0x487   :  { %2983 = vmatpush.bf16.msrb.mxu0 %v6497_v21  ;;  %v6449_v21 = vor.u32 %v7365_v44, %v6448_v42  ;;  %v7366_v17 = vld [vmem:[%s11108_s10 + $0x74] sm:$0xf0]  ;;  %v6453_v22 = vor.u32 %v7363_v45, %v6450_v19  ;;  %v7364_v23 = vld [vmem:[%s11108_s10 + $0x6c] sm:$0xf]  ;;  %v6458_v13 = vld [vmem:[%s11108_s10 + $0x78] sm:$0xf0]  ;;  %v1138_v11 = vadd.f32 %v8821_v25, %v8983_v0 }
 0x488   :  { %3010 = vmatpush.bf16.msrb.mxu2 %v6489_v16  ;;  %v6457_v51 = vor.u32 %v7366_v17, %v6456_v4  ;;  %v6461_v52 = vor.u32 %v7364_v23, %v6458_v13  ;;  %v6432_v53 = vld [vmem:[%s11108_s10 + $0x40] sm:$0xf]  ;;  %v7359_v58 = vld [vmem:[%s11108_s10 + $0x44] sm:$0xf]  ;;  %v6434_v16 = vld [vmem:[%s11108_s10 + $0x50] sm:$0xf0] }
 0x489   :  { %v6442_v8 = vld [vmem:[%s11108_s10 + $0x58] sm:$0xf0]  ;;  %v7357_v40 = vld [vmem:[%s11108_s10 + $0x2c] sm:$0xf0]  ;;  %v6418_v41 = vld [vmem:[%s11108_s10 + $0x30] sm:$0xf0] }
 0x48a   :  { %2997 = vmatpush.bf16.msrb.mxu1 %v6485_v63  ;;  %v6424_v20 = vld [vmem:[%s11108_s10 + $0x28] sm:$0xf]  ;;  %v7358_v44 = vld [vmem:[%s11108_s10 + $0x34] sm:$0xf0]  ;;  %v7356_v45 = vld [vmem:[%s11108_s10 + $0x2c] sm:$0xf] }
 0x48b   :  { %v7613_v38 = vpop.eup %7612  ;;  %2984 = vmatpush.bf16.msrb.mxu0 %v6481_v54  ;;  %v7361_v54 = vld [vmem:[%s11108_s10 + $0x4c] sm:$0xf0]  ;;  %v6425_v4 = vor.u32 %v7358_v44, %v6424_v20  ;;  %v6402_v23 = vld [vmem:[%s11108_s10 + $0x10] sm:$0xf0]  ;;  %v6408_v13 = vld [vmem:[%s11108_s10 + $0x8] sm:$0xf] }
 0x48c   :  { %v9691_v59 = vmul.f32 %v7613_v38, %v2452_v34  ;;  %v6493_v38 = vor.u32 %v7372_v35, %v6490_v62  ;;  %v6464_v34 = vld [vmem:[%s11108_s10 + $0x80] sm:$0xf]  ;;  %3011 = vmatpush.bf16.msrb.mxu2 %v6473_v48  ;;  %v6433_v63 = vor.u32 %v7361_v54, %v6432_v53  ;;  %v6437_v35 = vor.u32 %v7359_v58, %v6434_v16  ;;  %v6440_v62 = vld [vmem:[%s11108_s10 + $0x48] sm:$0xf]  ;;  %v7355_v48 = vld [vmem:[%s11108_s10 + $0x24] sm:$0xf] }
 0x48d   :  { %v6421_v25 = vor.u32 %v7355_v48, %v6418_v41  ;;  %v7352_v53 = vld [vmem:[%s11108_s10 + $0xc] sm:$0xf]  ;;  %v6410_v54 = vld [vmem:[%s11108_s10 + $0x18] sm:$0xf0] }
 0x48e   :  { %v2468_v55 = vpack.c.bf16 %v9691_v59, %v9691_v59  ;;  %3023 = vmatpush.bf16.msrb.mxu3 %v6493_v38  ;;  %2998 = vmatpush.bf16.msrb.mxu1 %v6469_v15  ;;  %v7362_v38 = vld [vmem:[%s11108_s10 + $0x54] sm:$0xf0]  ;;  %v6413_v16 = vor.u32 %v7352_v53, %v6410_v54 }
 0x490   :  { %2669 = vmatmul.bf16.vlgmr.msra.gmra.mxu0 %v2468_v55  ;;  %2682 = vmatmul.bf16.vlgmr.msra.gmra.mxu1 %v2468_v55 }
 0x491   :  { %2695 = vmatmul.bf16.vlgmr.msra.gmra.mxu2 %v2468_v55  ;;  %2708 = vmatmul.bf16.vlgmr.msra.gmra.mxu3 %v2468_v55  ;;  %v7369_v55 = vld [vmem:[%s11108_s10 + $0x8c] sm:$0xf0] }
 0x492   :  { %v6465_v14 = vor.u32 %v7369_v55, %v6464_v34  ;;  %3024 = vmatpush.bf16.msrb.mxu3 %v6477_v39  ;;  %2999 = vmatpush.bf16.msrb.mxu1 %v6453_v22  ;;  %v7360_v34 = vld [vmem:[%s11108_s10 + $0x4c] sm:$0xf]  ;;  %v6441_v55 = vor.u32 %v7362_v38, %v6440_v62  ;;  %v7351_v22 = vld [vmem:[%s11108_s10 + $0x4] sm:$0xf] }
 0x493   :  { %3012 = vmatpush.bf16.msrb.mxu2 %v6457_v51  ;;  %v6445_v7 = vor.u32 %v7360_v34, %v6442_v8 }
 0x494   :  { %2985 = vmatpush.bf16.msrb.mxu0 %v6465_v14  ;;  %v6416_v14 = vld [vmem:[%s11108_s10 + $0x20] sm:$0xf] }
 0x495   :  { %v6417_v15 = vor.u32 %v7357_v40, %v6416_v14 }
 0x496   :  { %3025 = vmatpush.bf16.msrb.mxu3 %v6461_v52  ;;  %3000 = vmatpush.bf16.msrb.mxu1 %v6437_v35  ;;  %v6405_v52 = vor.u32 %v7351_v22, %v6402_v23 }
 0x497   :  { %3013 = vmatpush.bf16.msrb.mxu2 %v6441_v55  ;;  %v1109_v55 = vadd.f32 %v8819_v24, %v9060_v56 }
 0x498   :  { %2986 = vmatpush.bf16.msrb.mxu0 %v6449_v21 }
 0x49a   :  { %3026 = vmatpush.bf16.msrb.mxu3 %v6445_v7  ;;  %3001 = vmatpush.bf16.msrb.mxu1 %v6421_v25 }
 0x49b   :  { %3014 = vmatpush.bf16.msrb.mxu2 %v6425_v4 }
 0x49c   :  { %2987 = vmatpush.bf16.msrb.mxu0 %v6433_v63 }
 0x49e   :  { %3002 = vmatpush.bf16.msrb.mxu1 %v6405_v52 }
 0x4a0   :  { %2988 = vmatpush.bf16.msrb.mxu0 %v6417_v15 }
 0x50d   :  { %v2670_v50 = vpop.f32.mrf.mxu0  ;;  %v2683_v18 = vpop.f32.mrf.mxu1 }
 0x50e   :  { %v2713_v43 = vadd.f32 %v2670_v50, %v1051_v47  ;;  %v2714_v49 = vadd.f32 %v2683_v18, %v1080_v9  ;;  %v6426_v47 = vld [vmem:[%s11108_s10 + $0x38] sm:$0xf0]  ;;  %v6400_v50 = vld [vmem:[%s11108_s10] sm:$0xf]  ;;  %v7353_v18 = vld [vmem:[%s11108_s10 + $0xc] sm:$0xf0] }
 0x50f   :  { %v6429_v17 = vor.u32 %v7356_v45, %v6426_v47  ;;  %v6401_v51 = vor.u32 %v7353_v18, %v6400_v50 }
 0x510   :  { %v6395_v1 = vmul.f32 -1.442695, %v2713_v43  ;;  %v6396_v28 = vmul.f32 -1.442695, %v2714_v49  ;;  %v7354_v43 = vld [vmem:[%s11108_s10 + $0x14] sm:$0xf0] }
 0x511   :  { %3027 = vmatpush.bf16.msrb.mxu3 %v6429_v17  ;;  %2989 = vmatpush.bf16.msrb.mxu0 %v6401_v51 }
 0x512   :  { %7614 = vpow2.f32 %v6395_v1  ;;  %v6409_v1 = vor.u32 %v7354_v43, %v6408_v13 }
 0x513   :  { %7616 = vpow2.f32 %v6396_v28 }
 0x514   :  { %v2696_v39 = vpop.f32.mrf.mxu2  ;;  %v2709_v42 = vpop.f32.mrf.mxu3  ;;  %3015 = vmatpush.bf16.msrb.mxu2 %v6409_v1 }
 0x515   :  { %v2716_v9 = vadd.f32 %v2709_v42, %v1138_v11  ;;  %v2672_v21 = vpop.f32.mrf.mxu0  ;;  %v2685_v19 = vpop.f32.mrf.mxu1  ;;  %3028 = vmatpush.bf16.msrb.mxu3 %v6413_v16  ;;  %v2715_v40 = vadd.f32 %v2696_v39, %v1109_v55 }
 0x517   :  { %v6397_v49 = vmul.f32 -1.442695, %v2716_v9 }
 0x518   :  { %v7615_v58 = vpop.eup %7614 }
 0x519   :  { %v7617_v28 = vpop.eup %7616  ;;  %v2720_v63 = vadd.f32 1.0, %v7615_v58  ;;  %7618 = vpow2.f32 %v6397_v49 }
 0x51a   :  { %v2739_v35 = vadd.f32 1.0, %v7617_v28 }
 0x51b   :  { %7620 = vrcp.f32 %v2720_v63  ;;  %v2732_v20 = vand.u32 2147483648, %v2720_v63  ;;  %v2730_v44 = vand.u32 2147483647, %v2720_v63  ;;  %vm2726_vm3 = vweird.f32 %v2720_v63 }
 0x51c   :  { %7622 = vrcp.f32 %v2739_v35  ;;  %v2698_v62 = vpop.f32.mrf.mxu2  ;;  %v2711_v38 = vpop.f32.mrf.mxu3  ;;  %v2751_v42 = vand.u32 2147483648, %v2739_v35  ;;  %v2749_v47 = vand.u32 2147483647, %v2739_v35  ;;  %vm2745_vm4 = vweird.f32 %v2739_v35 }
 0x51d   :  { %v2733_v39 = vor.u32 1.1754944e-38, %v2732_v20  ;;  %vm2731_vm7 = vcmp.eq.f32.partialorder %v2730_v44, 8.507059e+37  ;;  %v6643_v62 = vld [vmem:[%s11108_s10 + $0xe0] sm:$0xf]  ;;  %v7413_v38 = vld [vmem:[%s11108_s10 + $0xec] sm:$0xf0] }
 0x51e   :  { %v2752_v4 = vor.u32 1.1754944e-38, %v2751_v42  ;;  %vm2750_vm8 = vcmp.eq.f32.partialorder %v2749_v47, 8.507059e+37  ;;  %v6644_v55 = vor.u32 %v7413_v38, %v6643_v62  ;;  %v6627_v20 = vld [vmem:[%s11108_s10 + $0xc0] sm:$0xf]  ;;  %v7409_v42 = vld [vmem:[%s11108_s10 + $0xcc] sm:$0xf0] }
 0x51f   :  { %v7619_v34 = vpop.eup %7618  ;;  %v6628_v44 = vor.u32 %v7409_v42, %v6627_v20  ;;  %v6635_v47 = vld [vmem:[%s11108_s10 + $0xc8] sm:$0xf]  ;;  %v7402_v38 = vld [vmem:[%s11108_s10 + $0x94] sm:$0xf0]  ;;  %v6581_v42 = vld [vmem:[%s11108_s10 + $0x70] sm:$0xf0] }
 0x520   :  { %v2759_v8 = vadd.f32 1.0, %v7619_v34  ;;  %v7411_v34 = vld [vmem:[%s11108_s10 + $0xe4] sm:$0xf]  ;;  %3303 = vmatpush.bf16.msra.mxu0 %v6644_v55  ;;  %v6603_v62 = vld [vmem:[%s11108_s10 + $0x88] sm:$0xf] }
 0x521   :  { %v7621_v14 = vpop.eup %7620  ;;  %v6604_v55 = vor.u32 %v7402_v38, %v6603_v62  ;;  %v7387_v62 = vld [vmem:[%s11108_s10 + $0x24] sm:$0xf]  ;;  %v6549_v38 = vld [vmem:[%s11108_s10 + $0x30] sm:$0xf0] }
 0x522   :  { %v7623_v11 = vpop.eup %7622  ;;  %v2722_v7 = vmul.f32 %v7621_v14, %v2720_v63  ;;  %7624 = vrcp.f32 %v2759_v8  ;;  %vm2727_vm1 = vweird.f32 %v7621_v14  ;;  %v2771_v54 = vand.u32 2147483648, %v2759_v8 }
 0x523   :  { %v2741_v15 = vmul.f32 %v7623_v11, %v2739_v35  ;;  %7626 = vtanh.f32 %v2715_v40  ;;  %vm2746_vm2 = vweird.f32 %v7623_v11  ;;  %vm2728_vm5 = vmor %vm2726_vm3, %vm2727_vm1  ;;  %vm2765_vm10 = vweird.f32 %v2759_v8  ;;  %v7414_v40 = vld [vmem:[%s11108_s10 + $0xf4] sm:$0xf0] }
 0x524   :  { %v2723_v48 = vsub.f32 1.0, %v2722_v7  ;;  %vm2747_vm6 = vmor %vm2745_vm4, %vm2746_vm2  ;;  %v2769_v58 = vand.u32 2147483647, %v2759_v8  ;;  %v2772_v28 = vor.u32 1.1754944e-38, %v2771_v54  ;;  %3304 = vmatpush.bf16.msra.mxu0 %v6628_v44  ;;  %v6621_v54 = vld [vmem:[%s11108_s10 + $0xb8] sm:$0xf0] }
 0x525   :  { %v2742_v41 = vsub.f32 1.0, %v2741_v15  ;;  %v7412_v15 = vld [vmem:[%s11108_s10 + $0xec] sm:$0xf]  ;;  %v7398_v44 = vld [vmem:[%s11108_s10 + $0x74] sm:$0xf0] }
 0x526   :  { %v2724_v25 = vmul.f32 %v7621_v14, %v2723_v48  ;;  %vm2770_vm12 = vcmp.eq.f32.partialorder %v2769_v58, 8.507059e+37  ;;  %v6653_v48 = vld [vmem:[%s11108_s10 + $0xf8] sm:$0xf0] }
 0x527   :  { %v2743_v45 = vmul.f32 %v7623_v11, %v2742_v41  ;;  %v6656_v41 = vor.u32 %v7412_v15, %v6653_v48  ;;  %v7395_v15 = vld [vmem:[%s11108_s10 + $0x64] sm:$0xf]  ;;  %v1053_v48 = vadd.f32 %v8823_v26, %v8921_v32 }
 0x528   :  { %v7625_v9 = vpop.eup %7624  ;;  %v2725_v24 = vadd.f32 %v7621_v14, %v2724_v25  ;;  %v7407_v25 = vld [vmem:[%s11108_s10 + $0xc4] sm:$0xf]  ;;  %v6584_v26 = vor.u32 %v7395_v15, %v6581_v42  ;;  %v6531_v42 = vld [vmem:[%s11108_s10] sm:$0xf] }
 0x529   :  { %v2744_v21 = vadd.f32 %v7623_v11, %v2743_v45  ;;  %v2761_v19 = vmul.f32 %v7625_v9, %v2759_v8  ;;  %v7627_v50 = vpop.eup %7626  ;;  %vm2766_vm9 = vweird.f32 %v7625_v9  ;;  %v6645_v8 = vld [vmem:[%s11108_s10 + $0xf0] sm:$0xf0]  ;;  %3342 = vmatpush.bf16.msra.mxu3 %v6656_v41  ;;  %v1082_v41 = vadd.f32 %v8825_v27, %v8924_v33  ;;  %v7396_v27 = vld [vmem:[%s11108_s10 + $0x6c] sm:$0xf] }
 0x52a   :  { %v2729_v17 = vsel %vm2728_vm5, %v7621_v14, %v2725_v24  ;;  %vm2767_vm11 = vmor %vm2765_vm10, %vm2766_vm9  ;;  %v6651_v14 = vld [vmem:[%s11108_s10 + $0xe8] sm:$0xf]  ;;  %v6629_v45 = vld [vmem:[%s11108_s10 + $0xd0] sm:$0xf0] }
 0x52b   :  { %v2734_v18 = vsel %vm2731_vm7, %v2733_v39, %v2729_v17  ;;  %v2748_v22 = vsel %vm2747_vm6, %v7623_v11, %v2744_v21  ;;  %v2762_v51 = vsub.f32 1.0, %v2761_v19  ;;  %v6648_v11 = vor.u32 %v7411_v34, %v6645_v8  ;;  %v7408_v21 = vld [vmem:[%s11108_s10 + $0xcc] sm:$0xf]  ;;  %v6637_v19 = vld [vmem:[%s11108_s10 + $0xd8] sm:$0xf0] }
 0x52c   :  { %v2753_v23 = vsel %vm2750_vm8, %v2752_v4, %v2748_v22  ;;  %v2776_v13 = vmul.f32 %v7627_v50, %v2734_v18  ;;  %v6652_v7 = vor.u32 %v7414_v40, %v6651_v14  ;;  %v6632_v24 = vor.u32 %v7407_v25, %v6629_v45  ;;  %v6611_v17 = vld [vmem:[%s11108_s10 + $0xa0] sm:$0xf]  ;;  %v7405_v50 = vld [vmem:[%s11108_s10 + $0xac] sm:$0xf0]  ;;  %v7403_v18 = vld [vmem:[%s11108_s10 + $0xa4] sm:$0xf] }
 0x52d   :  { %v2775_v43 = vmul.f32 %v2753_v23, %v9688_v2  ;;  %v2763_v49 = vmul.f32 %v7625_v9, %v2762_v51  ;;  %3316 = vmatpush.bf16.msra.mxu1 %v6648_v11  ;;  %v6640_v4 = vor.u32 %v7408_v21, %v6637_v19  ;;  %v6612_v22 = vor.u32 %v7405_v50, %v6611_v17  ;;  %v6613_v51 = vld [vmem:[%s11108_s10 + $0xb0] sm:$0xf0]  ;;  %v6619_v23 = vld [vmem:[%s11108_s10 + $0xa8] sm:$0xf]  ;;  %v7400_v8 = vld [vmem:[%s11108_s10 + $0x8c] sm:$0xf] }
 0x52e   :  { %3329 = vmatpush.bf16.msra.mxu2 %v6652_v7  ;;  %v6605_v14 = vld [vmem:[%s11108_s10 + $0x98] sm:$0xf0]  ;;  %v6579_v11 = vld [vmem:[%s11108_s10 + $0x60] sm:$0xf]  ;;  %v7397_v7 = vld [vmem:[%s11108_s10 + $0x6c] sm:$0xf0] }
 0x52f   :  { %v9896_v52 = vadd.f32 %v2776_v13, %v2775_v43  ;;  %v2764_v53 = vadd.f32 %v7625_v9, %v2763_v49  ;;  %3343 = vmatpush.bf16.msra.mxu3 %v6640_v4  ;;  %v7406_v13 = vld [vmem:[%s11108_s10 + $0xb4] sm:$0xf0]  ;;  %v6616_v43 = vor.u32 %v7403_v18, %v6613_v51  ;;  %3305 = vmatpush.bf16.msra.mxu0 %v6612_v22  ;;  %v6587_v25 = vld [vmem:[%s11108_s10 + $0x68] sm:$0xf]  ;;  %v6563_v4 = vld [vmem:[%s11108_s10 + $0x40] sm:$0xf] }
 0x530   :  { %v6620_v49 = vor.u32 %v7406_v13, %v6619_v23  ;;  %v6608_v40 = vor.u32 %v7400_v8, %v6605_v14  ;;  %v6580_v20 = vor.u32 %v7397_v7, %v6579_v11  ;;  %v7393_v17 = vld [vmem:[%s11108_s10 + $0x4c] sm:$0xf0]  ;;  %v7391_v50 = vld [vmem:[%s11108_s10 + $0x44] sm:$0xf]  ;;  %v6565_v23 = vld [vmem:[%s11108_s10 + $0x50] sm:$0xf0] }
 0x531   :  { %7628 = vtanh.f32 %v9896_v52  ;;  %v2768_v1 = vsel %vm2767_vm11, %v7625_v9, %v2764_v53  ;;  %v7410_v9 = vld [vmem:[%s11108_s10 + $0xd4] sm:$0xf0]  ;;  %3317 = vmatpush.bf16.msra.mxu1 %v6632_v24  ;;  %v7404_v53 = vld [vmem:[%s11108_s10 + $0xac] sm:$0xf]  ;;  %v6589_v24 = vld [vmem:[%s11108_s10 + $0x78] sm:$0xf0]  ;;  %v6564_v51 = vor.u32 %v7393_v17, %v6563_v4  ;;  %v6568_v13 = vor.u32 %v7391_v50, %v6565_v23 }
 0x532   :  { %v2773_v16 = vsel %vm2770_vm12, %v2772_v28, %v2768_v1  ;;  %v6636_v39 = vor.u32 %v7410_v9, %v6635_v47  ;;  %v6624_v58 = vor.u32 %v7404_v53, %v6621_v54  ;;  %v6595_v1 = vld [vmem:[%s11108_s10 + $0x80] sm:$0xf]  ;;  %v7401_v28 = vld [vmem:[%s11108_s10 + $0x8c] sm:$0xf0]  ;;  %v6588_v9 = vor.u32 %v7398_v44, %v6587_v25  ;;  %v7392_v53 = vld [vmem:[%s11108_s10 + $0x4c] sm:$0xf] }
 0x533   :  { %v6592_v19 = vor.u32 %v7396_v27, %v6589_v24  ;;  %v7390_v14 = vld [vmem:[%s11108_s10 + $0x34] sm:$0xf0]  ;;  %v6557_v11 = vld [vmem:[%s11108_s10 + $0x38] sm:$0xf0]  ;;  %v7385_v25 = vld [vmem:[%s11108_s10 + $0xc] sm:$0xf0] }
 0x534   :  { %3330 = vmatpush.bf16.msra.mxu2 %v6636_v39  ;;  %3344 = vmatpush.bf16.msra.mxu3 %v6624_v58  ;;  %v6573_v58 = vld [vmem:[%s11108_s10 + $0x58] sm:$0xf0]  ;;  %v7383_v44 = vld [vmem:[%s11108_s10 + $0x4] sm:$0xf] }
 0x535   :  { %3318 = vmatpush.bf16.msra.mxu1 %v6616_v43  ;;  %v6571_v43 = vld [vmem:[%s11108_s10 + $0x48] sm:$0xf] }
 0x537   :  { %v7629_v63 = vpop.eup %7628 }
 0x538   :  { %v9899_v35 = vmul.f32 %v7629_v63, %v2773_v16  ;;  %3331 = vmatpush.bf16.msra.mxu2 %v6620_v49  ;;  %v7399_v63 = vld [vmem:[%s11108_s10 + $0x84] sm:$0xf]  ;;  %v6596_v16 = vor.u32 %v7401_v28, %v6595_v1  ;;  %3345 = vmatpush.bf16.msra.mxu3 %v6608_v40  ;;  %v7394_v49 = vld [vmem:[%s11108_s10 + $0x54] sm:$0xf0]  ;;  %v6547_v1 = vld [vmem:[%s11108_s10 + $0x20] sm:$0xf] }
 0x539   :  { %v6572_v54 = vor.u32 %v7394_v49, %v6571_v43  ;;  %v7389_v28 = vld [vmem:[%s11108_s10 + $0x2c] sm:$0xf0]  ;;  %v7388_v40 = vld [vmem:[%s11108_s10 + $0x2c] sm:$0xf]  ;;  %v1111_v43 = vadd.f32 %v8836_v30, %v9060_v56 }
 0x53a   :  { %v2789_v2 = vpack.c.bf16 %v9899_v35, %v9899_v35  ;;  %3306 = vmatpush.bf16.msra.mxu0 %v6596_v16  ;;  %v6576_v16 = vor.u32 %v7392_v53, %v6573_v58 }
 0x53c   :  { %2990 = vmatmul.bf16.vlgmr.msrb.gmra.mxu0 %v2789_v2  ;;  %3003 = vmatmul.bf16.vlgmr.msrb.gmra.mxu1 %v2789_v2 }
 0x53d   :  { %3016 = vmatmul.bf16.vlgmr.msrb.gmra.mxu2 %v2789_v2  ;;  %3029 = vmatmul.bf16.vlgmr.msrb.gmra.mxu3 %v2789_v2  ;;  %v6597_v2 = vld [vmem:[%s11108_s10 + $0x90] sm:$0xf0] }
 0x53e   :  { %v6600_v34 = vor.u32 %v7399_v63, %v6597_v2  ;;  %3332 = vmatpush.bf16.msra.mxu2 %v6604_v55  ;;  %3307 = vmatpush.bf16.msra.mxu0 %v6580_v20  ;;  %v1140_v63 = vadd.f32 %v8838_v31, %v8983_v0  ;;  %v6548_v2 = vor.u32 %v7389_v28, %v6547_v1 }
 0x53f   :  { %3346 = vmatpush.bf16.msra.mxu3 %v6592_v19  ;;  %v6552_v31 = vor.u32 %v7387_v62, %v6549_v38  ;;  %v6560_v20 = vor.u32 %v7388_v40, %v6557_v11 }
 0x540   :  { %3319 = vmatpush.bf16.msra.mxu1 %v6600_v34  ;;  %v6555_v34 = vld [vmem:[%s11108_s10 + $0x28] sm:$0xf] }
 0x542   :  { %3333 = vmatpush.bf16.msra.mxu2 %v6588_v9  ;;  %3308 = vmatpush.bf16.msra.mxu0 %v6564_v51  ;;  %v7386_v9 = vld [vmem:[%s11108_s10 + $0x14] sm:$0xf0] }
 0x543   :  { %3347 = vmatpush.bf16.msra.mxu3 %v6576_v16 }
 0x544   :  { %3320 = vmatpush.bf16.msra.mxu1 %v6584_v26  ;;  %v6539_v26 = vld [vmem:[%s11108_s10 + $0x8] sm:$0xf] }
 0x545   :  { %v6540_v4 = vor.u32 %v7386_v9, %v6539_v26 }
 0x546   :  { %3334 = vmatpush.bf16.msra.mxu2 %v6572_v54  ;;  %3309 = vmatpush.bf16.msra.mxu0 %v6548_v2 }
 0x547   :  { %3348 = vmatpush.bf16.msra.mxu3 %v6560_v20 }
 0x548   :  { %3321 = vmatpush.bf16.msra.mxu1 %v6568_v13 }
 0x54c   :  { %3322 = vmatpush.bf16.msra.mxu1 %v6552_v31 }
 0x5b9   :  { %v2991_v45 = vpop.f32.mrf.mxu0  ;;  %v3004_v47 = vpop.f32.mrf.mxu1 }
 0x5ba   :  { %v3034_v39 = vadd.f32 %v2991_v45, %v1053_v48  ;;  %v3035_v21 = vadd.f32 %v3004_v47, %v1082_v41  ;;  %v6556_v41 = vor.u32 %v7390_v14, %v6555_v34  ;;  %v6532_v45 = vor.u32 %v7385_v25, %v6531_v42  ;;  %v6533_v47 = vld [vmem:[%s11108_s10 + $0x10] sm:$0xf0] }
 0x5bb   :  { %v6536_v24 = vor.u32 %v7383_v44, %v6533_v47 }
 0x5bc   :  { %v6526_v18 = vmul.f32 -1.442695, %v3034_v39  ;;  %v6527_v22 = vmul.f32 -1.442695, %v3035_v21  ;;  %v7384_v39 = vld [vmem:[%s11108_s10 + $0xc] sm:$0xf]  ;;  %3335 = vmatpush.bf16.msra.mxu2 %v6556_v41  ;;  %3310 = vmatpush.bf16.msra.mxu0 %v6532_v45 }
 0x5bd   :  { %v6541_v21 = vld [vmem:[%s11108_s10 + $0x18] sm:$0xf0]  ;;  %3323 = vmatpush.bf16.msra.mxu1 %v6536_v24 }
 0x5be   :  { %7630 = vpow2.f32 %v6526_v18  ;;  %v6544_v18 = vor.u32 %v7384_v39, %v6541_v21 }
 0x5bf   :  { %7632 = vpow2.f32 %v6527_v22 }
 0x5c0   :  { %v3017_v55 = vpop.f32.mrf.mxu2  ;;  %v3030_v8 = vpop.f32.mrf.mxu3  ;;  %3336 = vmatpush.bf16.msra.mxu2 %v6540_v4  ;;  %3349 = vmatpush.bf16.msra.mxu3 %v6544_v18  ;;  %v7445_v18 = vld [vmem:[%s11108_s10 + $0xec] sm:$0xf0] }
 0x5c1   :  { %v3037_v7 = vadd.f32 %v3030_v8, %v1140_v63  ;;  %v2993_v15 = vpop.f32.mrf.mxu0  ;;  %v3006_v48 = vpop.f32.mrf.mxu1  ;;  %v3036_v54 = vadd.f32 %v3017_v55, %v1111_v43  ;;  %v7446_v43 = vld [vmem:[%s11108_s10 + $0xf4] sm:$0xf0] }
 0x5c3   :  { %v6528_v27 = vmul.f32 -1.442695, %v3037_v7 }
 0x5c4   :  { %v7631_v19 = vpop.eup %7630 }
 0x5c5   :  { %v7633_v17 = vpop.eup %7632  ;;  %v3041_v50 = vadd.f32 1.0, %v7631_v19  ;;  %7634 = vpow2.f32 %v6528_v27 }
 0x5c6   :  { %v3060_v22 = vadd.f32 1.0, %v7633_v17 }
 0x5c7   :  { %7636 = vrcp.f32 %v3041_v50  ;;  %v3053_v2 = vand.u32 2147483648, %v3041_v50  ;;  %v3051_v34 = vand.u32 2147483647, %v3041_v50  ;;  %vm3047_vm15 = vweird.f32 %v3041_v50 }
 0x5c8   :  { %7638 = vrcp.f32 %v3060_v22  ;;  %v3019_v51 = vpop.f32.mrf.mxu2  ;;  %v3032_v23 = vpop.f32.mrf.mxu3  ;;  %v3072_v62 = vand.u32 2147483648, %v3060_v22  ;;  %v3070_v31 = vand.u32 2147483647, %v3060_v22  ;;  %vm3066_vm0 = vweird.f32 %v3060_v22 }
 0x5c9   :  { %v3054_v55 = vor.u32 1.1754944e-38, %v3053_v2  ;;  %vm3052_vm3 = vcmp.eq.f32.partialorder %v3051_v34, 8.507059e+37  ;;  %v6776_v23 = vld [vmem:[%s11108_s10 + $0xf0] sm:$0xf0]  ;;  %v7442_v34 = vld [vmem:[%s11108_s10 + $0xd4] sm:$0xf0] }
 0x5ca   :  { %v3073_v7 = vor.u32 1.1754944e-38, %v3072_v62  ;;  %vm3071_vm4 = vcmp.eq.f32.partialorder %v3070_v31, 8.507059e+37  ;;  %v6760_v62 = vld [vmem:[%s11108_s10 + $0xd0] sm:$0xf0] }
 0x5cb   :  { %v7635_v13 = vpop.eup %7634 }
 0x5cc   :  { %v3080_v49 = vadd.f32 1.0, %v7635_v13  ;;  %v6782_v13 = vld [vmem:[%s11108_s10 + $0xe8] sm:$0xf] }
 0x5cd   :  { %v7637_v53 = vpop.eup %7636 }
 0x5ce   :  { %v7639_v58 = vpop.eup %7638  ;;  %v3043_v1 = vmul.f32 %v7637_v53, %v3041_v50  ;;  %7640 = vrcp.f32 %v3080_v49  ;;  %vm3048_vm13 = vweird.f32 %v7637_v53  ;;  %v3092_v27 = vand.u32 2147483648, %v3080_v49  ;;  %v6774_v50 = vld [vmem:[%s11108_s10 + $0xe0] sm:$0xf] }
 0x5cf   :  { %v3062_v28 = vmul.f32 %v7639_v58, %v3060_v22  ;;  %7642 = vtanh.f32 %v3036_v54  ;;  %vm3067_vm14 = vweird.f32 %v7639_v58  ;;  %vm3049_vm1 = vmor %vm3047_vm15, %vm3048_vm13  ;;  %vm3086_vm6 = vweird.f32 %v3080_v49  ;;  %v7443_v22 = vld [vmem:[%s11108_s10 + $0xe4] sm:$0xf]  ;;  %v7444_v54 = vld [vmem:[%s11108_s10 + $0xec] sm:$0xf] }
 0x5d0   :  { %v3044_v63 = vsub.f32 1.0, %v3043_v1  ;;  %vm3068_vm2 = vmor %vm3066_vm0, %vm3067_vm14  ;;  %v3090_v24 = vand.u32 2147483647, %v3080_v49  ;;  %v3093_v21 = vor.u32 1.1754944e-38, %v3092_v27  ;;  %v6775_v51 = vor.u32 %v7445_v18, %v6774_v50  ;;  %v7433_v27 = vld [vmem:[%s11108_s10 + $0x8c] sm:$0xf0] }
 0x5d1   :  { %v3063_v16 = vsub.f32 1.0, %v3062_v28  ;;  %v6758_v28 = vld [vmem:[%s11108_s10 + $0xc0] sm:$0xf]  ;;  %v7432_v18 = vld [vmem:[%s11108_s10 + $0x8c] sm:$0xf] }
 0x5d2   :  { %v3045_v38 = vmul.f32 %v7637_v53, %v3044_v63  ;;  %vm3091_vm8 = vcmp.eq.f32.partialorder %v3090_v24, 8.507059e+37  ;;  %3624 = vmatpush.bf16.msrb.mxu0 %v6775_v51  ;;  %v7441_v63 = vld [vmem:[%s11108_s10 + $0xcc] sm:$0xf0]  ;;  %v7431_v24 = vld [vmem:[%s11108_s10 + $0x84] sm:$0xf] }
 0x5d3   :  { %v3064_v8 = vmul.f32 %v7639_v58, %v3063_v16  ;;  %v7439_v16 = vld [vmem:[%s11108_s10 + $0xc4] sm:$0xf]  ;;  %v6759_v2 = vor.u32 %v7441_v63, %v6758_v28  ;;  %v7428_v63 = vld [vmem:[%s11108_s10 + $0x6c] sm:$0xf] }
 0x5d4   :  { %v7641_v14 = vpop.eup %7640  ;;  %v3046_v30 = vadd.f32 %v7637_v53, %v3045_v38  ;;  %v6766_v38 = vld [vmem:[%s11108_s10 + $0xc8] sm:$0xf] }
 0x5d5   :  { %v3065_v40 = vadd.f32 %v7639_v58, %v3064_v8  ;;  %v3082_v11 = vmul.f32 %v7641_v14, %v3080_v49  ;;  %v7643_v48 = vpop.eup %7642  ;;  %vm3087_vm5 = vweird.f32 %v7641_v14  ;;  %v6779_v49 = vor.u32 %v7443_v22, %v6776_v23  ;;  %v6736_v22 = vld [vmem:[%s11108_s10 + $0x98] sm:$0xf0]  ;;  %v6710_v23 = vld [vmem:[%s11108_s10 + $0x60] sm:$0xf] }
 0x5d6   :  { %v3050_v15 = vsel %vm3049_vm1, %v7637_v53, %v3046_v30  ;;  %vm3088_vm7 = vmor %vm3086_vm6, %vm3087_vm5  ;;  %v6783_v53 = vor.u32 %v7446_v43, %v6782_v13  ;;  %v6763_v8 = vor.u32 %v7439_v16, %v6760_v62  ;;  %v6767_v31 = vor.u32 %v7442_v34, %v6766_v38  ;;  %v6768_v30 = vld [vmem:[%s11108_s10 + $0xd8] sm:$0xf0]  ;;  %3625 = vmatpush.bf16.msrb.mxu0 %v6759_v2  ;;  %v7429_v13 = vld [vmem:[%s11108_s10 + $0x6c] sm:$0xf0] }
 0x5d7   :  { %v3055_v41 = vsel %vm3052_vm3, %v3054_v55, %v3050_v15  ;;  %v3069_v20 = vsel %vm3068_vm2, %v7639_v58, %v3065_v40  ;;  %v3083_v42 = vsub.f32 1.0, %v3082_v11  ;;  %v6784_v58 = vld [vmem:[%s11108_s10 + $0xf8] sm:$0xf0]  ;;  %3637 = vmatpush.bf16.msrb.mxu1 %v6779_v49  ;;  %v6742_v40 = vld [vmem:[%s11108_s10 + $0xa0] sm:$0xf]  ;;  %v6739_v51 = vor.u32 %v7432_v18, %v6736_v22 }
 0x5d8   :  { %v3074_v25 = vsel %vm3071_vm4, %v3073_v7, %v3069_v20  ;;  %v3097_v44 = vmul.f32 %v7643_v48, %v3055_v41  ;;  %v6787_v1 = vor.u32 %v7444_v54, %v6784_v58  ;;  %3650 = vmatpush.bf16.msrb.mxu2 %v6783_v53  ;;  %v7437_v11 = vld [vmem:[%s11108_s10 + $0xac] sm:$0xf0]  ;;  %v7435_v7 = vld [vmem:[%s11108_s10 + $0xa4] sm:$0xf]  ;;  %v6744_v48 = vld [vmem:[%s11108_s10 + $0xb0] sm:$0xf0]  ;;  %v6711_v49 = vor.u32 %v7429_v13, %v6710_v23 }
 0x5d9   :  { %v3096_v45 = vmul.f32 %v3074_v25, %v9896_v52  ;;  %v3084_v47 = vmul.f32 %v7641_v14, %v3083_v42  ;;  %v6743_v15 = vor.u32 %v7437_v11, %v6742_v40  ;;  %v6750_v41 = vld [vmem:[%s11108_s10 + $0xa8] sm:$0xf]  ;;  %v7438_v20 = vld [vmem:[%s11108_s10 + $0xb4] sm:$0xf0]  ;;  %v6747_v42 = vor.u32 %v7435_v7, %v6744_v48  ;;  %v7427_v43 = vld [vmem:[%s11108_s10 + $0x64] sm:$0xf] }
 0x5da   :  { %3663 = vmatpush.bf16.msrb.mxu3 %v6787_v1  ;;  %v6751_v25 = vor.u32 %v7438_v20, %v6750_v41  ;;  %v6712_v53 = vld [vmem:[%s11108_s10 + $0x70] sm:$0xf0]  ;;  %v6718_v54 = vld [vmem:[%s11108_s10 + $0x68] sm:$0xf]  ;;  %v7430_v58 = vld [vmem:[%s11108_s10 + $0x74] sm:$0xf0]  ;;  %v1085_v23 = vadd.f32 %v8851_v37, %v8924_v33 }
 0x5db   :  { %v10104_v26 = vadd.f32 %v3097_v44, %v3096_v45  ;;  %v3085_v9 = vadd.f32 %v7641_v14, %v3084_v47  ;;  %3638 = vmatpush.bf16.msrb.mxu1 %v6763_v8  ;;  %v7436_v44 = vld [vmem:[%s11108_s10 + $0xac] sm:$0xf]  ;;  %v6752_v45 = vld [vmem:[%s11108_s10 + $0xb8] sm:$0xf0]  ;;  %3626 = vmatpush.bf16.msrb.mxu0 %v6743_v15  ;;  %v6715_v1 = vor.u32 %v7427_v43, %v6712_v53  ;;  %v6694_v62 = vld [vmem:[%s11108_s10 + $0x40] sm:$0xf] }
 0x5dc   :  { %3651 = vmatpush.bf16.msrb.mxu2 %v6767_v31  ;;  %v6755_v47 = vor.u32 %v7436_v44, %v6752_v45  ;;  %v6719_v28 = vor.u32 %v7430_v58, %v6718_v54  ;;  %v6720_v16 = vld [vmem:[%s11108_s10 + $0x78] sm:$0xf0]  ;;  %v7425_v38 = vld [vmem:[%s11108_s10 + $0x4c] sm:$0xf0]  ;;  %v7423_v34 = vld [vmem:[%s11108_s10 + $0x44] sm:$0xf] }
 0x5dd   :  { %7644 = vtanh.f32 %v10104_v26  ;;  %v3089_v39 = vsel %vm3088_vm7, %v7641_v14, %v3085_v9  ;;  %v7440_v14 = vld [vmem:[%s11108_s10 + $0xcc] sm:$0xf]  ;;  %v6726_v9 = vld [vmem:[%s11108_s10 + $0x80] sm:$0xf]  ;;  %v6723_v2 = vor.u32 %v7428_v63, %v6720_v16  ;;  %v6695_v8 = vor.u32 %v7425_v38, %v6694_v62  ;;  %v6696_v31 = vld [vmem:[%s11108_s10 + $0x50] sm:$0xf0] }
 0x5de   :  { %v3094_v4 = vsel %vm3091_vm8, %v3093_v21, %v3089_v39  ;;  %v6771_v55 = vor.u32 %v7440_v14, %v6768_v30  ;;  %v6727_v39 = vor.u32 %v7433_v27, %v6726_v9  ;;  %v6728_v21 = vld [vmem:[%s11108_s10 + $0x90] sm:$0xf0]  ;;  %v6702_v14 = vld [vmem:[%s11108_s10 + $0x48] sm:$0xf]  ;;  %v7426_v30 = vld [vmem:[%s11108_s10 + $0x54] sm:$0xf0] }
 0x5df   :  { %3639 = vmatpush.bf16.msrb.mxu1 %v6747_v42  ;;  %v6703_v40 = vor.u32 %v7426_v30, %v6702_v14  ;;  %v7424_v11 = vld [vmem:[%s11108_s10 + $0x4c] sm:$0xf]  ;;  %v6704_v7 = vld [vmem:[%s11108_s10 + $0x58] sm:$0xf0]  ;;  %v6678_v48 = vld [vmem:[%s11108_s10 + $0x20] sm:$0xf] }
 0x5e0   :  { %3664 = vmatpush.bf16.msrb.mxu3 %v6771_v55  ;;  %3652 = vmatpush.bf16.msrb.mxu2 %v6751_v25  ;;  %v6699_v55 = vor.u32 %v7423_v34, %v6696_v31  ;;  %v6707_v15 = vor.u32 %v7424_v11, %v6704_v7  ;;  %v7421_v41 = vld [vmem:[%s11108_s10 + $0x2c] sm:$0xf0]  ;;  %v7419_v20 = vld [vmem:[%s11108_s10 + $0x24] sm:$0xf]  ;;  %v6680_v25 = vld [vmem:[%s11108_s10 + $0x30] sm:$0xf0] }
 0x5e1   :  { %3627 = vmatpush.bf16.msrb.mxu0 %v6727_v39  ;;  %v6679_v42 = vor.u32 %v7421_v41, %v6678_v48  ;;  %v6686_v44 = vld [vmem:[%s11108_s10 + $0x28] sm:$0xf]  ;;  %v7422_v45 = vld [vmem:[%s11108_s10 + $0x34] sm:$0xf0]  ;;  %v7420_v27 = vld [vmem:[%s11108_s10 + $0x2c] sm:$0xf] }
 0x5e2   :  { %v6687_v9 = vor.u32 %v7422_v45, %v6686_v44  ;;  %v6670_v18 = vld [vmem:[%s11108_s10 + $0x8] sm:$0xf]  ;;  %v7418_v22 = vld [vmem:[%s11108_s10 + $0x14] sm:$0xf0]  ;;  %v6672_v53 = vld [vmem:[%s11108_s10 + $0x18] sm:$0xf0] }
 0x5e3   :  { %v7645_v19 = vpop.eup %7644  ;;  %v6671_v43 = vor.u32 %v7418_v22, %v6670_v18  ;;  %v6905_v54 = vld [vmem:[%s11110_s12 + $0xe0] sm:$0xf]  ;;  %v7477_v37 = vld [vmem:[%s11110_s12 + $0xec] sm:$0xf0]  ;;  %v6907_v63 = vld [vmem:[%s11110_s12 + $0xf0] sm:$0xf0] }
 0x5e4   :  { %v10107_v17 = vmul.f32 %v7645_v19, %v3094_v4  ;;  %3665 = vmatpush.bf16.msrb.mxu3 %v6755_v47  ;;  %v6734_v19 = vld [vmem:[%s11108_s10 + $0x88] sm:$0xf]  ;;  %v7434_v4 = vld [vmem:[%s11108_s10 + $0x94] sm:$0xf0]  ;;  %v6683_v47 = vor.u32 %v7419_v20, %v6680_v25  ;;  %v6906_v62 = vor.u32 %v7477_v37, %v6905_v54  ;;  %v6915_v30 = vld [vmem:[%s11110_s12 + $0xf8] sm:$0xf0] }
 0x5e5   :  { %v6735_v50 = vor.u32 %v7434_v4, %v6734_v19  ;;  %3628 = vmatpush.bf16.msrb.mxu0 %v6711_v49  ;;  %v7417_v19 = vld [vmem:[%s11108_s10 + $0xc] sm:$0xf0]  ;;  %v7415_v4 = vld [vmem:[%s11108_s10 + $0x4] sm:$0xf]  ;;  %v7416_v49 = vld [vmem:[%s11108_s10 + $0xc] sm:$0xf] }
 0x5e6   :  { %v3110_v52 = vpack.c.bf16 %v10107_v17, %v10107_v17  ;;  %v6913_v38 = vld [vmem:[%s11110_s12 + $0xe8] sm:$0xf]  ;;  %v7478_v34 = vld [vmem:[%s11110_s12 + $0xf4] sm:$0xf0]  ;;  %v7471_v41 = vld [vmem:[%s11110_s12 + $0xc4] sm:$0xf] }
 0x5e7   :  { %3653 = vmatpush.bf16.msrb.mxu2 %v6735_v50  ;;  %v6664_v50 = vld [vmem:[%s11108_s10 + $0x10] sm:$0xf0]  ;;  %v6914_v14 = vor.u32 %v7478_v34, %v6913_v38  ;;  %v7474_v25 = vld [vmem:[%s11110_s12 + $0xd4] sm:$0xf0]  ;;  %v6883_v54 = vld [vmem:[%s11110_s12 + $0xb8] sm:$0xf0] }
 0x5e8   :  { %3311 = vmatmul.bf16.vlgmr.msra.gmra.mxu0 %v3110_v52  ;;  %3324 = vmatmul.bf16.vlgmr.msra.gmra.mxu1 %v3110_v52  ;;  %v6667_v13 = vor.u32 %v7415_v4, %v6664_v50  ;;  %v6891_v20 = vld [vmem:[%s11110_s12 + $0xd0] sm:$0xf0]  ;;  %v7470_v22 = vld [vmem:[%s11110_s12 + $0xb4] sm:$0xf0]  ;;  %v7463_v37 = vld [vmem:[%s11110_s12 + $0x84] sm:$0xf] }
 0x5e9   :  { %3337 = vmatmul.bf16.vlgmr.msra.gmra.mxu2 %v3110_v52  ;;  %3350 = vmatmul.bf16.vlgmr.msra.gmra.mxu3 %v3110_v52  ;;  %v6731_v52 = vor.u32 %v7431_v24, %v6728_v21  ;;  %v6688_v24 = vld [vmem:[%s11108_s10 + $0x38] sm:$0xf0]  ;;  %v6662_v21 = vld [vmem:[%s11108_s10] sm:$0xf]  ;;  %v6894_v44 = vor.u32 %v7471_v41, %v6891_v20  ;;  %v6875_v4 = vld [vmem:[%s11110_s12 + $0xb0] sm:$0xf0]  ;;  %v1114_v20 = vadd.f32 %v8897_v60, %v9060_v56 }
 0x5ea   :  { %3666 = vmatpush.bf16.msrb.mxu3 %v6739_v51  ;;  %3629 = vmatpush.bf16.msrb.mxu0 %v6695_v8  ;;  %v6691_v39 = vor.u32 %v7420_v27, %v6688_v24  ;;  %v1056_v51 = vadd.f32 %v8849_v36, %v8921_v32  ;;  %v6675_v36 = vor.u32 %v7416_v49, %v6672_v53  ;;  %v7476_v8 = vld [vmem:[%s11110_s12 + $0xec] sm:$0xf]  ;;  %v6873_v27 = vld [vmem:[%s11110_s12 + $0xa0] sm:$0xf]  ;;  %v7461_v41 = vld [vmem:[%s11110_s12 + $0x6c] sm:$0xf0] }
 0x5eb   :  { %3640 = vmatpush.bf16.msrb.mxu1 %v6731_v52  ;;  %3654 = vmatpush.bf16.msrb.mxu2 %v6719_v28  ;;  %v6663_v52 = vor.u32 %v7417_v19, %v6662_v21  ;;  %v7475_v28 = vld [vmem:[%s11110_s12 + $0xe4] sm:$0xf]  ;;  %v1143_v24 = vadd.f32 %v8899_v61, %v8983_v0  ;;  %v7469_v21 = vld [vmem:[%s11110_s12 + $0xac] sm:$0xf0]  ;;  %v6881_v61 = vld [vmem:[%s11110_s12 + $0xa8] sm:$0xf] }
 0x5ec   :  { %v6910_v31 = vor.u32 %v7475_v28, %v6907_v63  ;;  %v7467_v19 = vld [vmem:[%s11110_s12 + $0xa4] sm:$0xf]  ;;  %v6874_v18 = vor.u32 %v7469_v21, %v6873_v27  ;;  %v6882_v53 = vor.u32 %v7470_v22, %v6881_v61  ;;  %v6859_v28 = vld [vmem:[%s11110_s12 + $0x90] sm:$0xf0]  ;;  %v6865_v63 = vld [vmem:[%s11110_s12 + $0x88] sm:$0xf] }
 0x5ed   :  { %v6878_v49 = vor.u32 %v7467_v19, %v6875_v4  ;;  %v7462_v60 = vld [vmem:[%s11110_s12 + $0x74] sm:$0xf0]  ;;  %v7460_v21 = vld [vmem:[%s11110_s12 + $0x6c] sm:$0xf]  ;;  %v6851_v19 = vld [vmem:[%s11110_s12 + $0x78] sm:$0xf0] }
 0x5ee   :  { %3667 = vmatpush.bf16.msrb.mxu3 %v6723_v2  ;;  %3630 = vmatpush.bf16.msrb.mxu0 %v6679_v42  ;;  %v6897_v42 = vld [vmem:[%s11110_s12 + $0xc8] sm:$0xf]  ;;  %v6825_v4 = vld [vmem:[%s11110_s12 + $0x40] sm:$0xf]  ;;  %v7455_v61 = vld [vmem:[%s11110_s12 + $0x44] sm:$0xf] }
 0x5ef   :  { %3641 = vmatpush.bf16.msrb.mxu1 %v6715_v1  ;;  %3655 = vmatpush.bf16.msrb.mxu2 %v6703_v40  ;;  %v7473_v40 = vld [vmem:[%s11110_s12 + $0xcc] sm:$0xf0]  ;;  %v6898_v45 = vor.u32 %v7474_v25, %v6897_v42  ;;  %v7459_v25 = vld [vmem:[%s11110_s12 + $0x64] sm:$0xf] }
 0x5f2   :  { %3668 = vmatpush.bf16.msrb.mxu3 %v6707_v15  ;;  %3631 = vmatpush.bf16.msrb.mxu0 %v6663_v52  ;;  %v6918_v15 = vor.u32 %v7476_v8, %v6915_v30  ;;  %v6867_v8 = vld [vmem:[%s11110_s12 + $0x98] sm:$0xf0]  ;;  %v6862_v30 = vor.u32 %v7463_v37, %v6859_v28 }
 0x5f3   :  { %3642 = vmatpush.bf16.msrb.mxu1 %v6699_v55  ;;  %3656 = vmatpush.bf16.msrb.mxu2 %v6687_v9  ;;  %v6889_v55 = vld [vmem:[%s11110_s12 + $0xc0] sm:$0xf]  ;;  %v6899_v9 = vld [vmem:[%s11110_s12 + $0xd8] sm:$0xf0] }
 0x5f4   :  { %v6890_v48 = vor.u32 %v7473_v40, %v6889_v55 }
 0x5f6   :  { %3669 = vmatpush.bf16.msrb.mxu3 %v6691_v39  ;;  %3959 = vmatpush.bf16.msra.mxu0 %v6906_v62  ;;  %v7464_v62 = vld [vmem:[%s11110_s12 + $0x8c] sm:$0xf] }
 0x5f7   :  { %3643 = vmatpush.bf16.msrb.mxu1 %v6683_v47  ;;  %3657 = vmatpush.bf16.msrb.mxu2 %v6671_v43  ;;  %v7472_v47 = vld [vmem:[%s11110_s12 + $0xcc] sm:$0xf] }
 0x5f8   :  { %v6902_v39 = vor.u32 %v7472_v47, %v6899_v9  ;;  %v6849_v9 = vld [vmem:[%s11110_s12 + $0x68] sm:$0xf] }
 0x5fa   :  { %3670 = vmatpush.bf16.msrb.mxu3 %v6675_v36  ;;  %3960 = vmatpush.bf16.msra.mxu0 %v6890_v48 }
 0x5fb   :  { %3644 = vmatpush.bf16.msrb.mxu1 %v6667_v13  ;;  %4017 = vmatpush.bf16.msra.mxu2 %v6914_v14 }
 0x5fe   :  { %4046 = vmatpush.bf16.msra.mxu3 %v6918_v15  ;;  %3961 = vmatpush.bf16.msra.mxu0 %v6874_v18  ;;  %v6854_v18 = vor.u32 %v7460_v21, %v6851_v19  ;;  %v6795_v21 = vld [vmem:[%s11110_s12 + $0x10] sm:$0xf0]  ;;  %v6801_v19 = vld [vmem:[%s11110_s12 + $0x8] sm:$0xf] }
 0x5ff   :  { %3988 = vmatpush.bf16.msra.mxu1 %v6910_v31  ;;  %4018 = vmatpush.bf16.msra.mxu2 %v6898_v45 }
 0x602   :  { %4047 = vmatpush.bf16.msra.mxu3 %v6902_v39  ;;  %v6850_v39 = vor.u32 %v7462_v60, %v6849_v9  ;;  %v7449_v9 = vld [vmem:[%s11110_s12 + $0xc] sm:$0xf0]  ;;  %v7447_v60 = vld [vmem:[%s11110_s12 + $0x4] sm:$0xf] }
 0x603   :  { %3989 = vmatpush.bf16.msra.mxu1 %v6894_v44  ;;  %4019 = vmatpush.bf16.msra.mxu2 %v6882_v53  ;;  %v6843_v44 = vld [vmem:[%s11110_s12 + $0x70] sm:$0xf0] }
 0x604   :  { %v6846_v47 = vor.u32 %v7459_v25, %v6843_v44 }
 0x607   :  { %3990 = vmatpush.bf16.msra.mxu1 %v6878_v49 }
 0x60b   :  { %3991 = vmatpush.bf16.msra.mxu1 %v6862_v30 }
 0x60f   :  { %3992 = vmatpush.bf16.msra.mxu1 %v6846_v47  ;;  %v6793_v47 = vld [vmem:[%s11110_s12] sm:$0xf] }
 0x665   :  { %v3312_v58 = vpop.f32.mrf.mxu0  ;;  %v3325_v1 = vpop.f32.mrf.mxu1 }
 0x666   :  { %v3355_v16 = vadd.f32 %v3312_v58, %v1056_v51  ;;  %v3356_v2 = vadd.f32 %v3325_v1, %v1085_v23  ;;  %v7468_v51 = vld [vmem:[%s11110_s12 + $0xac] sm:$0xf]  ;;  %v6857_v58 = vld [vmem:[%s11110_s12 + $0x80] sm:$0xf]  ;;  %v7465_v1 = vld [vmem:[%s11110_s12 + $0x8c] sm:$0xf0] }
 0x667   :  { %v6886_v36 = vor.u32 %v7468_v51, %v6883_v54  ;;  %v6858_v34 = vor.u32 %v7465_v1, %v6857_v58  ;;  %v7456_v54 = vld [vmem:[%s11110_s12 + $0x4c] sm:$0xf]  ;;  %v6835_v58 = vld [vmem:[%s11110_s12 + $0x58] sm:$0xf0]  ;;  %v6809_v1 = vld [vmem:[%s11110_s12 + $0x20] sm:$0xf] }
 0x668   :  { %v6657_v11 = vmul.f32 -1.442695, %v3355_v16  ;;  %v6658_v7 = vmul.f32 -1.442695, %v3356_v2  ;;  %v7466_v2 = vld [vmem:[%s11110_s12 + $0x94] sm:$0xf0] }
 0x669   :  { %v6866_v55 = vor.u32 %v7466_v2, %v6865_v63  ;;  %4048 = vmatpush.bf16.msra.mxu3 %v6886_v36  ;;  %3962 = vmatpush.bf16.msra.mxu0 %v6858_v34  ;;  %v7453_v63 = vld [vmem:[%s11110_s12 + $0x2c] sm:$0xf0]  ;;  %v7451_v34 = vld [vmem:[%s11110_s12 + $0x24] sm:$0xf] }
 0x66a   :  { %7646 = vpow2.f32 %v6657_v11  ;;  %v6870_v11 = vor.u32 %v7464_v62, %v6867_v8  ;;  %v6811_v8 = vld [vmem:[%s11110_s12 + $0x30] sm:$0xf0] }
 0x66b   :  { %7648 = vpow2.f32 %v6658_v7  ;;  %v6841_v7 = vld [vmem:[%s11110_s12 + $0x60] sm:$0xf]  ;;  %4020 = vmatpush.bf16.msra.mxu2 %v6866_v55 }
 0x66c   :  { %v3338_v52 = vpop.f32.mrf.mxu2  ;;  %v3351_v50 = vpop.f32.mrf.mxu3  ;;  %v6842_v42 = vor.u32 %v7461_v41, %v6841_v7  ;;  %v6817_v7 = vld [vmem:[%s11110_s12 + $0x28] sm:$0xf]  ;;  %v7454_v41 = vld [vmem:[%s11110_s12 + $0x34] sm:$0xf0] }
 0x66d   :  { %v3358_v23 = vadd.f32 %v3351_v50, %v1143_v24  ;;  %v3314_v13 = vpop.f32.mrf.mxu0  ;;  %v3327_v43 = vpop.f32.mrf.mxu1  ;;  %4049 = vmatpush.bf16.msra.mxu3 %v6870_v11  ;;  %v3357_v24 = vadd.f32 %v3338_v52, %v1114_v20  ;;  %v7457_v52 = vld [vmem:[%s11110_s12 + $0x4c] sm:$0xf0]  ;;  %v6810_v11 = vor.u32 %v7453_v63, %v6809_v1  ;;  %v7452_v20 = vld [vmem:[%s11110_s12 + $0x2c] sm:$0xf]  ;;  %v6818_v44 = vor.u32 %v7454_v41, %v6817_v7  ;;  %v7507_v7 = vld [vmem:[#allocation8 + $0xe4] sm:$0xf] }
 0x66e   :  { %3963 = vmatpush.bf16.msra.mxu0 %v6842_v42  ;;  %v6826_v51 = vor.u32 %v7457_v52, %v6825_v4  ;;  %v6833_v13 = vld [vmem:[%s11110_s12 + $0x48] sm:$0xf]  ;;  %v7458_v43 = vld [vmem:[%s11110_s12 + $0x54] sm:$0xf0]  ;;  %v6819_v42 = vld [vmem:[%s11110_s12 + $0x38] sm:$0xf0] }
 0x66f   :  { %v6659_v16 = vmul.f32 -1.442695, %v3358_v23  ;;  %4021 = vmatpush.bf16.msra.mxu2 %v6850_v39  ;;  %v6827_v23 = vld [vmem:[%s11110_s12 + $0x50] sm:$0xf0]  ;;  %v6834_v62 = vor.u32 %v7458_v43, %v6833_v13  ;;  %v6794_v39 = vor.u32 %v7449_v9, %v6793_v47  ;;  %v7450_v4 = vld [vmem:[%s11110_s12 + $0x14] sm:$0xf0] }
 0x670   :  { %v7647_v38 = vpop.eup %7646  ;;  %v6830_v2 = vor.u32 %v7455_v61, %v6827_v23  ;;  %v7448_v23 = vld [vmem:[%s11110_s12 + $0xc] sm:$0xf]  ;;  %v6803_v13 = vld [vmem:[%s11110_s12 + $0x18] sm:$0xf0] }
 0x671   :  { %v7649_v31 = vpop.eup %7648  ;;  %v10405_v14 = vadd.f32 1.0, %v7647_v38  ;;  %7650 = vpow2.f32 %v6659_v16  ;;  %4050 = vmatpush.bf16.msra.mxu3 %v6854_v18  ;;  %v6838_v38 = vor.u32 %v7456_v54, %v6835_v58  ;;  %v6802_v54 = vor.u32 %v7450_v4, %v6801_v19  ;;  %v7019_v19 = vld [vmem:[#allocation8 + $0xd0] sm:$0xf0]  ;;  %v7504_v4 = vld [vmem:[#allocation8 + $0xcc] sm:$0xf] }
 0x672   :  { %v10407_v40 = vadd.f32 1.0, %v7649_v31  ;;  %3964 = vmatpush.bf16.msra.mxu0 %v6826_v51  ;;  %3993 = vmatpush.bf16.msra.mxu1 %v6830_v2 }
 0x673   :  { %7652 = vrcp.f32 %v10405_v14  ;;  %v3372_v45 = vand.u32 2147483647, %v10405_v14  ;;  %v3374_v28 = vand.u32 2147483648, %v10405_v14  ;;  %4022 = vmatpush.bf16.msra.mxu2 %v6834_v62  ;;  %vm3368_vm13 = vweird.f32 %v10405_v14 }
 0x674   :  { %7654 = vrcp.f32 %v10407_v40  ;;  %v3340_v15 = vpop.f32.mrf.mxu2  ;;  %v3353_v48 = vpop.f32.mrf.mxu3  ;;  %v3393_v37 = vand.u32 2147483648, %v10407_v40  ;;  %v3391_v55 = vand.u32 2147483647, %v10407_v40  ;;  %vm3387_vm12 = vweird.f32 %v10407_v40 }
 0x675   :  { %vm10487_vm9 = vcmp.eq.f32.partialorder %v3372_v45, 8.507059e+37  ;;  %v6814_v48 = vor.u32 %v7451_v34, %v6811_v8  ;;  %4051 = vmatpush.bf16.msra.mxu3 %v6838_v38  ;;  %v6822_v45 = vor.u32 %v7452_v20, %v6819_v42  ;;  %v3754_v20 = vpack.c.bf16 %v9691_v59, %v9483_v10  ;;  %v7043_v42 = vld [vmem:[#allocation8 + $0xf8] sm:$0xf0] }
 0x676   :  { %3965 = vmatpush.bf16.msra.mxu0 %v6810_v11  ;;  %v3394_v52 = vor.u32 1.1754944e-38, %v3393_v37  ;;  %vm3392_vm0 = vcmp.eq.f32.partialorder %v3391_v55, 8.507059e+37  ;;  %v6806_v37 = vor.u32 %v7448_v23, %v6803_v13  ;;  %v3753_v55 = vpack.c.bf16 %v9275_v12, %v9067_v29  ;;  %v7509_v11 = vld [vmem:[#allocation8 + $0xec] sm:$0xf0]  ;;  %v7508_v12 = vld [vmem:[#allocation8 + $0xec] sm:$0xf] }
 0x677   :  { %v7651_v27 = vpop.eup %7650  ;;  %3994 = vmatpush.bf16.msra.mxu1 %v6814_v48  ;;  %4023 = vmatpush.bf16.msra.mxu2 %v6818_v44  ;;  %v7035_v48 = vld [vmem:[#allocation8 + $0xf0] sm:$0xf0]  ;;  %v3755_v29 = vpack.c.bf16 %v10107_v17, %v9899_v35  ;;  %v7041_v44 = vld [vmem:[#allocation8 + $0xe8] sm:$0xf]  ;;  %v1058_v59 = vadd.f32 %v8910_v5, %v8921_v32  ;;  %v1087_v35 = vadd.f32 %v8912_v6, %v8924_v33  ;;  %v7001_v33 = vld [vmem:[#allocation8 + $0xa0] sm:$0xf] }
 0x678   :  { %v10441_v50 = vadd.f32 1.0, %v7651_v27  ;;  %v10562_v41 = vor.u32 %v7507_v7, %v7035_v48  ;;  %v7025_v6 = vld [vmem:[#allocation8 + $0xc8] sm:$0xf]  ;;  %v7003_v13 = vld [vmem:[#allocation8 + $0xb0] sm:$0xf0] }
 0x679   :  { %v10449_v22 = vpop.eup %7652  ;;  %4052 = vmatpush.bf16.msra.mxu3 %v6822_v45  ;;  %v7510_v45 = vld [vmem:[#allocation8 + $0xf4] sm:$0xf0]  ;;  %v7493_v7 = vld [vmem:[#allocation8 + $0x6c] sm:$0xf0]  ;;  %v7491_v48 = vld [vmem:[#allocation8 + $0x64] sm:$0xf] }
 0x67a   :  { %v10460_v49 = vpop.eup %7654  ;;  %v3364_v53 = vmul.f32 %v10449_v22, %v10405_v14  ;;  %7656 = vrcp.f32 %v10441_v50  ;;  %vm3369_vm10 = vweird.f32 %v10449_v22  ;;  %v3375_v14 = vor.u32 1.1754944e-38, %v3374_v28  ;;  %3966 = vmatpush.bf16.msra.mxu0 %v6794_v39  ;;  %v7503_v39 = vld [vmem:[#allocation8 + $0xc4] sm:$0xf] }
 0x67b   :  { %v3383_v36 = vmul.f32 %v10460_v49, %v10407_v40  ;;  %7658 = vtanh.f32 %v3357_v24  ;;  %vm3388_vm11 = vweird.f32 %v10460_v49  ;;  %vm3370_vm14 = vmor %vm3368_vm13, %vm3369_vm10  ;;  %4024 = vmatpush.bf16.msra.mxu2 %v6802_v54  ;;  %vm3407_vm2 = vweird.f32 %v10441_v50 }
 0x67c   :  { %v3365_v16 = vsub.f32 1.0, %v3364_v53  ;;  %vm3389_vm15 = vmor %vm3387_vm12, %vm3388_vm11  ;;  %v6798_v53 = vor.u32 %v7447_v60, %v6795_v21  ;;  %v3411_v62 = vand.u32 2147483647, %v10441_v50  ;;  %v10573_v10 = vor.u32 %v7510_v45, %v7041_v44  ;;  %v6979_v45 = vld [vmem:[#allocation8 + $0x78] sm:$0xf0] }
 0x67d   :  { %v3384_v31 = vsub.f32 1.0, %v3383_v36  ;;  %4053 = vmatpush.bf16.msra.mxu3 %v6806_v37  ;;  %v10582_v5 = vor.u32 %v7503_v39, %v7019_v19  ;;  %v1145_v54 = vadd.f32 %v8965_v46, %v8983_v0  ;;  %v6985_v37 = vld [vmem:[#allocation8 + $0x80] sm:$0xf]  ;;  %v6995_v0 = vld [vmem:[#allocation8 + $0x98] sm:$0xf0] }
 0x67e   :  { %v3366_v15 = vmul.f32 %v10449_v22, %v3365_v16  ;;  %3995 = vmatpush.bf16.msra.mxu1 %v6798_v53  ;;  %vm3412_vm4 = vcmp.eq.f32.partialorder %v3411_v62, 8.507059e+37  ;;  %v7011_v53 = vld [vmem:[#allocation8 + $0xb8] sm:$0xf0]  ;;  %v7496_v62 = vld [vmem:[#allocation8 + $0x8c] sm:$0xf] }
 0x67f   :  { %v3385_v25 = vmul.f32 %v10460_v49, %v3384_v31  ;;  %v6953_v39 = vld [vmem:[#allocation8 + $0x40] sm:$0xf]  ;;  %v7489_v19 = vld [vmem:[#allocation8 + $0x4c] sm:$0xf0] }
 0x680   :  { %v7657_v27 = vpop.eup %7656  ;;  %v3367_v24 = vadd.f32 %v10449_v22, %v3366_v15 }
 0x681   :  { %v7659_v18 = vpop.eup %7658  ;;  %v3386_v61 = vadd.f32 %v10460_v49, %v3385_v25  ;;  %v3403_v51 = vmul.f32 %v7657_v27, %v10441_v50  ;;  %vm3408_vm1 = vweird.f32 %v7657_v27  ;;  %v10570_v25 = vor.u32 %v7508_v12, %v7043_v42  ;;  %v6971_v12 = vld [vmem:[#allocation8 + $0x70] sm:$0xf0]  ;;  %v7492_v42 = vld [vmem:[#allocation8 + $0x6c] sm:$0xf] }
 0x682   :  { %v3371_v43 = vsel %vm3370_vm14, %v10449_v22, %v3367_v24  ;;  %vm3409_vm3 = vmor %vm3407_vm2, %vm3408_vm1  ;;  %v7505_v24 = vld [vmem:[#allocation8 + $0xcc] sm:$0xf0] }
 0x683   :  { %v3376_v58 = vsel %vm10487_vm9, %v3375_v14, %v3371_v43  ;;  %v3390_v1 = vsel %vm3389_vm15, %v10460_v49, %v3386_v61  ;;  %v3404_v36 = vsub.f32 1.0, %v3403_v51  ;;  %v3413_v49 = vand.u32 2147483648, %v10441_v50  ;;  %v7033_v50 = vld [vmem:[#allocation8 + $0xe0] sm:$0xf]  ;;  %v7501_v61 = vld [vmem:[#allocation8 + $0xac] sm:$0xf0] }
 0x684   :  { %v3395_v28 = vsel %vm3392_vm0, %v3394_v52, %v3390_v1  ;;  %v3418_v63 = vmul.f32 %v7659_v18, %v3376_v58  ;;  %v10560_v15 = vor.u32 %v7509_v11, %v7033_v50  ;;  %v7027_v18 = vld [vmem:[#allocation8 + $0xd8] sm:$0xf0]  ;;  %v7499_v51 = vld [vmem:[#allocation8 + $0xa4] sm:$0xf]  ;;  %v10589_v23 = vor.u32 %v7501_v61, %v7001_v33  ;;  %v7500_v43 = vld [vmem:[#allocation8 + $0xac] sm:$0xf] }
 0x685   :  { %v3417_v40 = vmul.f32 %v3395_v28, %v10104_v26  ;;  %v3405_v16 = vmul.f32 %v7657_v27, %v3404_v36  ;;  %v3414_v34 = vor.u32 1.1754944e-38, %v3413_v49  ;;  %v10584_v32 = vor.u32 %v7504_v4, %v7027_v18  ;;  %v7506_v36 = vld [vmem:[#allocation8 + $0xd4] sm:$0xf0]  ;;  %v7497_v28 = vld [vmem:[#allocation8 + $0x8c] sm:$0xf0] }
 0x686   :  { %v10593_v58 = vor.u32 %v7499_v51, %v7003_v13  ;;  %v10595_v1 = vor.u32 %v7500_v43, %v7011_v53  ;;  %v6987_v49 = vld [vmem:[#allocation8 + $0x90] sm:$0xf0]  ;;  %v10602_v46 = vor.u32 %v7497_v28, %v6985_v37  ;;  %v10608_v50 = vor.u32 %v7496_v62, %v6995_v0  ;;  %v6969_v11 = vld [vmem:[#allocation8 + $0x60] sm:$0xf]  ;;  %v7487_v18 = vld [vmem:[#allocation8 + $0x44] sm:$0xf] }
 0x687   :  { %v10548_v22 = vadd.f32 %v3418_v63, %v3417_v40  ;;  %v3406_v2 = vadd.f32 %v7657_v27, %v3405_v16  ;;  %v10599_v16 = vor.u32 %v7506_v36, %v7025_v6  ;;  %v6963_v61 = vld [vmem:[#allocation8 + $0x58] sm:$0xf0]  ;;  %v10632_v51 = vor.u32 %v7489_v19, %v6953_v39  ;;  %v6977_v13 = vld [vmem:[#allocation8 + $0x68] sm:$0xf]  ;;  %v7494_v43 = vld [vmem:[#allocation8 + $0x74] sm:$0xf0] }
 0x688   :  { %v6937_v36 = vld [vmem:[#allocation8 + $0x20] sm:$0xf]  ;;  %v7485_v37 = vld [vmem:[#allocation8 + $0x2c] sm:$0xf0]  ;;  %v6939_v62 = vld [vmem:[#allocation8 + $0x30] sm:$0xf0] }
 0x689   :  { %7660 = vtanh.f32 %v10548_v22  ;;  %v3410_v38 = vsel %vm3409_vm3, %v7657_v27, %v3406_v2  ;;  %v7017_v27 = vld [vmem:[#allocation8 + $0xc0] sm:$0xf]  ;;  %v7495_v2 = vld [vmem:[#allocation8 + $0x84] sm:$0xf] }
 0x68a   :  { %v3415_v8 = vsel %vm3412_vm4, %v3414_v34, %v3410_v38  ;;  %v10580_v21 = vor.u32 %v7505_v24, %v7017_v27  ;;  %v10622_v27 = vor.u32 %v7491_v48, %v6971_v12  ;;  %v10624_v24 = vor.u32 %v7492_v42, %v6979_v45  ;;  %v6921_v19 = vld [vmem:[#allocation8] sm:$0xf] }
 0x68f   :  { %v7661_v26 = vpop.eup %7660 }
 0x690   :  { %v10554_v31 = vmul.f32 %v7661_v26, %v3415_v8  ;;  %v7009_v8 = vld [vmem:[#allocation8 + $0xa8] sm:$0xf] }
 0x692   :  { %v3431_v30 = vpack.c.bf16 %v10554_v31, %v10554_v31 }
 0x694   :  { %3632 = vmatmul.bf16.vlgmr.msrb.gmra.mxu0 %v3431_v30  ;;  %3645 = vmatmul.bf16.vlgmr.msrb.gmra.mxu1 %v3431_v30 }
 0x695   :  { %3658 = vmatmul.bf16.vlgmr.msrb.gmra.mxu2 %v3431_v30  ;;  %3671 = vmatmul.bf16.vlgmr.msrb.gmra.mxu3 %v3431_v30  ;;  %v7502_v30 = vld [vmem:[#allocation8 + $0xb4] sm:$0xf0] }
 0x696   :  { %4303 = vmatpush.bf16.msrb.mxu0 %v10560_v15  ;;  %4316 = vmatpush.bf16.msrb.mxu1 %v10562_v41 }
 0x697   :  { %4342 = vmatpush.bf16.msrb.mxu3 %v10570_v25  ;;  %4329 = vmatpush.bf16.msrb.mxu2 %v10573_v10 }
 0x69a   :  { %4304 = vmatpush.bf16.msrb.mxu0 %v10580_v21  ;;  %4317 = vmatpush.bf16.msrb.mxu1 %v10582_v5 }
 0x69b   :  { %4343 = vmatpush.bf16.msrb.mxu3 %v10584_v32  ;;  %4330 = vmatpush.bf16.msrb.mxu2 %v10599_v16 }
 0x69e   :  { %4305 = vmatpush.bf16.msrb.mxu0 %v10589_v23  ;;  %4318 = vmatpush.bf16.msrb.mxu1 %v10593_v58 }
 0x69f   :  { %4344 = vmatpush.bf16.msrb.mxu3 %v10595_v1 }
 0x6a2   :  { %4306 = vmatpush.bf16.msrb.mxu0 %v10602_v46 }
 0x6a3   :  { %4345 = vmatpush.bf16.msrb.mxu3 %v10608_v50 }
 0x6a4   :  { %3967 = vmatmul.bf16.vlgmr.msra.gmra.mxu0 %v3753_v55  ;;  %3996 = vmatmul.bf16.vlgmr.msra.gmra.mxu1 %v3753_v55 }
 0x6a5   :  { %4025 = vmatmul.bf16.vlgmr.msra.gmra.mxu2 %v3753_v55  ;;  %4054 = vmatmul.bf16.vlgmr.msra.gmra.mxu3 %v3753_v55  ;;  %v10606_v55 = vor.u32 %v7495_v2, %v6987_v49  ;;  %v10643_v2 = vor.u32 %v7494_v43, %v6977_v13  ;;  %v7483_v49 = vld [vmem:[#allocation8 + $0x24] sm:$0xf] }
 0x6a6   :  { %v10660_v48 = vor.u32 %v7483_v49, %v6939_v62  ;;  %v6929_v49 = vld [vmem:[#allocation8 + $0x8] sm:$0xf]  ;;  %v7482_v62 = vld [vmem:[#allocation8 + $0x14] sm:$0xf0] }
 0x6a7   :  { %4319 = vmatpush.bf16.msrb.mxu1 %v10606_v55  ;;  %4346 = vmatpush.bf16.msrb.mxu3 %v10624_v24 }
 0x6ab   :  { %4320 = vmatpush.bf16.msrb.mxu1 %v10622_v27 }
 0x6b4   :  { %3972 = vmatmul.bf16.gmra.mxu0 %v3754_v20  ;;  %4001 = vmatmul.bf16.gmra.mxu1 %v3754_v20 }
 0x6b5   :  { %4030 = vmatmul.bf16.gmra.mxu2 %v3754_v20  ;;  %4059 = vmatmul.bf16.gmra.mxu3 %v3754_v20 }
 0x6c4   :  { %3977 = vmatmul.bf16.gmra.mxu0 %v3755_v29  ;;  %4006 = vmatmul.bf16.gmra.mxu1 %v3755_v29 }
 0x6c5   :  { %4035 = vmatmul.bf16.gmra.mxu2 %v3755_v29  ;;  %4064 = vmatmul.bf16.gmra.mxu3 %v3755_v29  ;;  %v10611_v29 = vor.u32 %v7502_v30, %v7009_v8  ;;  %v10651_v30 = vor.u32 %v7485_v37, %v6937_v36  ;;  %v7480_v37 = vld [vmem:[#allocation8 + $0xc] sm:$0xf] }
 0x6c7   :  { %4331 = vmatpush.bf16.msrb.mxu2 %v10611_v29 }
 0x711   :  { %v3633_v17 = vpop.f32.mrf.mxu0  ;;  %v3646_v47 = vpop.f32.mrf.mxu1 }
 0x712   :  { %v3676_v9 = vadd.f32 %v3633_v17, %v1058_v59  ;;  %v3677_v60 = vadd.f32 %v3646_v47, %v1087_v35  ;;  %v6993_v59 = vld [vmem:[#allocation8 + $0x88] sm:$0xf]  ;;  %v7498_v35 = vld [vmem:[#allocation8 + $0x94] sm:$0xf0] }
 0x713   :  { %v10628_v4 = vor.u32 %v7498_v35, %v6993_v59  ;;  %v6945_v59 = vld [vmem:[#allocation8 + $0x28] sm:$0xf]  ;;  %v7486_v35 = vld [vmem:[#allocation8 + $0x34] sm:$0xf0] }
 0x714   :  { %v6788_v52 = vmul.f32 -1.442695, %v3676_v9  ;;  %v6789_v14 = vmul.f32 -1.442695, %v3677_v60  ;;  %v10616_v9 = vor.u32 %v7493_v7, %v6969_v11  ;;  %v7484_v11 = vld [vmem:[#allocation8 + $0x2c] sm:$0xf]  ;;  %v10685_v36 = vor.u32 %v7486_v35, %v6945_v59 }
 0x715   :  { %4332 = vmatpush.bf16.msrb.mxu2 %v10628_v4  ;;  %v10704_v59 = vor.u32 %v7482_v62, %v6929_v49 }
 0x716   :  { %7662 = vpow2.f32 %v6788_v52  ;;  %v6955_v52 = vld [vmem:[#allocation8 + $0x50] sm:$0xf0]  ;;  %4307 = vmatpush.bf16.msrb.mxu0 %v10616_v9 }
 0x717   :  { %7664 = vpow2.f32 %v6789_v14  ;;  %v7488_v14 = vld [vmem:[#allocation8 + $0x4c] sm:$0xf]  ;;  %v10636_v53 = vor.u32 %v7487_v18, %v6955_v52  ;;  %v7481_v18 = vld [vmem:[#allocation8 + $0xc] sm:$0xf0] }
 0x718   :  { %v10597_v63 = vpop.f32.mrf.mxu2  ;;  %v3672_v40 = vpop.f32.mrf.mxu3  ;;  %v10681_v13 = vor.u32 %v7481_v18, %v6921_v19 }
 0x719   :  { %v3679_v38 = vadd.f32 %v3672_v40, %v1145_v54  ;;  %v3635_v34 = vpop.f32.mrf.mxu0  ;;  %v3648_v26 = vpop.f32.mrf.mxu1  ;;  %v10638_v54 = vor.u32 %v7488_v14, %v6963_v61  ;;  %v1116_v40 = vadd.f32 %v8963_v57, %v9060_v56  ;;  %v6947_v57 = vld [vmem:[#allocation8 + $0x38] sm:$0xf0]  ;;  %4321 = vmatpush.bf16.msrb.mxu1 %v10636_v53  ;;  %4333 = vmatpush.bf16.msrb.mxu2 %v10643_v2 }
 0x71a   :  { %v6961_v34 = vld [vmem:[#allocation8 + $0x48] sm:$0xf]  ;;  %v7490_v26 = vld [vmem:[#allocation8 + $0x54] sm:$0xf0]  ;;  %4308 = vmatpush.bf16.msrb.mxu0 %v10632_v51  ;;  %v10669_v45 = vor.u32 %v7484_v11, %v6947_v57 }
 0x71b   :  { %v6790_v20 = vmul.f32 -1.442695, %v3679_v38  ;;  %v3678_v8 = vadd.f32 %v10597_v63, %v1116_v40  ;;  %4347 = vmatpush.bf16.msrb.mxu3 %v10638_v54  ;;  %v10666_v12 = vor.u32 %v7490_v26, %v6961_v34  ;;  %v6931_v34 = vld [vmem:[#allocation8 + $0x18] sm:$0xf0] }
 0x71c   :  { %v7663_v44 = vpop.eup %7662  ;;  %v10695_v57 = vor.u32 %v7480_v37, %v6931_v34 }
 0x71d   :  { %v7665_v17 = vpop.eup %7664  ;;  %v10613_v47 = vadd.f32 1.0, %v7663_v44  ;;  %7666 = vpow2.f32 %v6790_v20  ;;  %4322 = vmatpush.bf16.msrb.mxu1 %v10660_v48  ;;  %4334 = vmatpush.bf16.msrb.mxu2 %v10666_v12 }
 0x71e   :  { %v10618_v60 = vadd.f32 1.0, %v7665_v17  ;;  %4309 = vmatpush.bf16.msrb.mxu0 %v10651_v30 }
 0x71f   :  { %7668 = vrcp.f32 %v10613_v47  ;;  %v3693_v20 = vand.u32 2147483647, %v10613_v47  ;;  %v3695_v44 = vand.u32 2147483648, %v10613_v47  ;;  %4348 = vmatpush.bf16.msrb.mxu3 %v10669_v45  ;;  %vm3689_vm8 = vweird.f32 %v10613_v47 }
 0x720   :  { %7670 = vrcp.f32 %v10618_v60  ;;  %v3661_v6 = vpop.f32.mrf.mxu2  ;;  %v3674_v33 = vpop.f32.mrf.mxu3  ;;  %v3714_v39 = vand.u32 2147483648, %v10618_v60  ;;  %v3712_v14 = vand.u32 2147483647, %v10618_v60  ;;  %vm3708_vm7 = vweird.f32 %v10618_v60 }
 0x721   :  { %v7479_v6 = vld [vmem:[#allocation8 + $0x4] sm:$0xf]  ;;  %v6923_v33 = vld [vmem:[#allocation8 + $0x10] sm:$0xf0]  ;;  %v3696_v26 = vor.u32 1.1754944e-38, %v3695_v44  ;;  %vm3694_vm11 = vcmp.eq.f32.partialorder %v3693_v20, 8.507059e+37  ;;  %4335 = vmatpush.bf16.msrb.mxu2 %v10685_v36 }
 0x722   :  { %v10683_v43 = vor.u32 %v7479_v6, %v6923_v33  ;;  %4310 = vmatpush.bf16.msrb.mxu0 %v10681_v13  ;;  %vm3713_vm12 = vcmp.eq.f32.partialorder %v3712_v14, 8.507059e+37 }
 0x723   :  { %v7667_v28 = vpop.eup %7666  ;;  %4349 = vmatpush.bf16.msrb.mxu3 %v10695_v57 }
 0x724   :  { %v10645_v38 = vadd.f32 1.0, %v7667_v28  ;;  %4323 = vmatpush.bf16.msrb.mxu1 %v10683_v43 }
 0x725   :  { %v10647_v0 = vpop.eup %7668  ;;  %4336 = vmatpush.bf16.msrb.mxu2 %v10704_v59 }
 0x726   :  { %v10653_v56 = vpop.eup %7670  ;;  %v3685_v7 = vmul.f32 %v10647_v0, %v10613_v47  ;;  %7672 = vrcp.f32 %v10645_v38  ;;  %vm3690_vm6 = vweird.f32 %v10647_v0  ;;  %4427 = vmatpush.bf16.msra.mxu0 %v10560_v15  ;;  %v3734_v19 = vand.u32 2147483648, %v10645_v38 }
 0x727   :  { %v3704_v63 = vmul.f32 %v10653_v56, %v10618_v60  ;;  %7674 = vtanh.f32 %v3678_v8  ;;  %vm3709_vm5 = vweird.f32 %v10653_v56  ;;  %vm3691_vm9 = vmor %vm3689_vm8, %vm3690_vm6  ;;  %v3715_v60 = vor.u32 1.1754944e-38, %v3714_v39  ;;  %4466 = vmatpush.bf16.msra.mxu3 %v10570_v25 }
 0x728   :  { %v3686_v42 = vsub.f32 1.0, %v3685_v7  ;;  %vm3710_vm10 = vmor %vm3708_vm7, %vm3709_vm5  ;;  %4440 = vmatpush.bf16.msra.mxu1 %v10562_v41  ;;  %vm3728_vm14 = vweird.f32 %v10645_v38  ;;  %v4055_v37 = vpop.f32.mrf.mxu3 }
 0x729   :  { %v3705_v17 = vsub.f32 1.0, %v3704_v63  ;;  %4453 = vmatpush.bf16.msra.mxu2 %v10573_v10 }
 0x72a   :  { %v3687_v52 = vmul.f32 %v10647_v0, %v3686_v42  ;;  %4428 = vmatpush.bf16.msra.mxu0 %v10580_v21 }
 0x72b   :  { %v3706_v61 = vmul.f32 %v10653_v56, %v3705_v17  ;;  %4467 = vmatpush.bf16.msra.mxu3 %v10584_v32 }
 0x72c   :  { %v7673_v28 = vpop.eup %7672  ;;  %v3688_v40 = vadd.f32 %v10647_v0, %v3687_v52  ;;  %4441 = vmatpush.bf16.msra.mxu1 %v10582_v5  ;;  %v3735_v52 = vor.u32 1.1754944e-38, %v3734_v19 }
 0x72d   :  { %v3707_v8 = vadd.f32 %v10653_v56, %v3706_v61  ;;  %v3724_v11 = vmul.f32 %v7673_v28, %v10645_v38  ;;  %v7675_v7 = vpop.eup %7674  ;;  %vm3729_vm13 = vweird.f32 %v7673_v28  ;;  %4454 = vmatpush.bf16.msra.mxu2 %v10599_v16  ;;  %v4026_v61 = vpop.f32.mrf.mxu2 }
 0x72e   :  { %v3692_v47 = vsel %vm3691_vm9, %v10647_v0, %v3688_v40  ;;  %4429 = vmatpush.bf16.msra.mxu0 %v10589_v23  ;;  %vm3730_vm15 = vmor %vm3728_vm14, %vm3729_vm13 }
 0x72f   :  { %v3697_v63 = vsel %vm3694_vm11, %v3696_v26, %v3692_v47  ;;  %v3711_v42 = vsel %vm3710_vm10, %v10653_v56, %v3707_v8  ;;  %v3725_v44 = vsub.f32 1.0, %v3724_v11  ;;  %4468 = vmatpush.bf16.msra.mxu3 %v10595_v1 }
 0x730   :  { %v3716_v35 = vsel %vm3713_vm12, %v3715_v60, %v3711_v42  ;;  %v3739_v17 = vmul.f32 %v7675_v7, %v3697_v63  ;;  %4442 = vmatpush.bf16.msra.mxu1 %v10593_v58  ;;  %v10786_v62 = vpop.f32.mrf.mxu3 }
 0x731   :  { %v3738_v0 = vmul.f32 %v3716_v35, %v10548_v22  ;;  %v3726_v20 = vmul.f32 %v7673_v28, %v3725_v44  ;;  %v3732_v22 = vand.u32 2147483647, %v10645_v38  ;;  %4455 = vmatpush.bf16.msra.mxu2 %v10611_v29 }
 0x732   :  { %4430 = vmatpush.bf16.msra.mxu0 %v10602_v46 }
 0x733   :  { %v3740_v39 = vadd.f32 %v3739_v17, %v3738_v0  ;;  %v3727_v56 = vadd.f32 %v7673_v28, %v3726_v20  ;;  %vm3733_vm0 = vcmp.eq.f32.partialorder %v3732_v22, 8.507059e+37  ;;  %4469 = vmatpush.bf16.msra.mxu3 %v10608_v50 }
 0x734   :  { %4443 = vmatpush.bf16.msra.mxu1 %v10606_v55 }
 0x735   :  { %7676 = vtanh.f32 %v3740_v39  ;;  %v3731_v18 = vsel %vm3730_vm15, %v7673_v28, %v3727_v56  ;;  %4456 = vmatpush.bf16.msra.mxu2 %v10628_v4  ;;  %v10784_v49 = vpop.f32.mrf.mxu2 }
 0x736   :  { %v3736_v6 = vsel %vm3733_vm0, %v3735_v52, %v3731_v18  ;;  %4431 = vmatpush.bf16.msra.mxu0 %v10616_v9  ;;  %11132 = vst [vmem:[#allocation19_spill] sm:$0xff] %v10784_v49 }
 0x737   :  { %4470 = vmatpush.bf16.msra.mxu3 %v10624_v24 }
 0x738   :  { %4444 = vmatpush.bf16.msra.mxu1 %v10622_v27  ;;  %v10794_v11 = vpop.f32.mrf.mxu3 }
 0x739   :  { %4457 = vmatpush.bf16.msra.mxu2 %v10643_v2  ;;  %11136 = vst [vmem:[#allocation23_spill] sm:$0xff] %v10794_v11 }
 0x73a   :  { %4432 = vmatpush.bf16.msra.mxu0 %v10632_v51 }
 0x73b   :  { %v7677_v14 = vpop.eup %7676  ;;  %4471 = vmatpush.bf16.msra.mxu3 %v10638_v54 }
 0x73c   :  { %v3742_v33 = vmul.f32 %v7677_v14, %v3736_v6  ;;  %4445 = vmatpush.bf16.msra.mxu1 %v10636_v53  ;;  %v3789_v14 = vld [vmem:[%s11112_s14] sm:$0xf] }
 0x73d   :  { %4458 = vmatpush.bf16.msra.mxu2 %v10666_v12  ;;  %v10792_v8 = vpop.f32.mrf.mxu2 }
 0x73e   :  { %v3756_v38 = vpack.c.bf16 %v3742_v33, %v10554_v31  ;;  %4433 = vmatpush.bf16.msra.mxu0 %v10651_v30  ;;  %v3997_v31 = vpop.f32.mrf.mxu1  ;;  %11135 = vst [vmem:[#allocation22_spill] sm:$0xff] %v10792_v8 }
 0x73f   :  { %4472 = vmatpush.bf16.msra.mxu3 %v10669_v45 }
 0x740   :  { %3982 = vmatmul.bf16.gmra.mxu0 %v3756_v38  ;;  %4011 = vmatmul.bf16.gmra.mxu1 %v3756_v38  ;;  %v10802_v63 = vpop.f32.mrf.mxu3 }
 0x741   :  { %4040 = vmatmul.bf16.gmra.mxu2 %v3756_v38  ;;  %4069 = vmatmul.bf16.gmra.mxu3 %v3756_v38  ;;  %11140 = vst [vmem:[#allocation27_spill] sm:$0xff] %v10802_v63  ;;  %v10835_v38 = vperm.slane %v3789_v14, 0 }
 0x742   :  { %4446 = vmatpush.bf16.msra.mxu1 %v10660_v48  ;;  %4434 = vmatpush.bf16.msra.mxu0 %v10681_v13 }
 0x743   :  { %4459 = vmatpush.bf16.msra.mxu2 %v10685_v36  ;;  %4473 = vmatpush.bf16.msra.mxu3 %v10695_v57 }
 0x745   :  { %v10800_v7 = vpop.f32.mrf.mxu2 }
 0x746   :  { %4447 = vmatpush.bf16.msra.mxu1 %v10683_v43  ;;  %v10782_v40 = vpop.f32.mrf.mxu1  ;;  %11139 = vst [vmem:[#allocation26_spill] sm:$0xff] %v10800_v7 }
 0x747   :  { %4460 = vmatpush.bf16.msra.mxu2 %v10704_v59 }
 0x748   :  { %v10810_v17 = vpop.f32.mrf.mxu3 }
 0x749   :  { %11144 = vst [vmem:[#allocation31_spill] sm:$0xff] %v10810_v17  ;;  %v10845_v17 = vperm.slane %v3789_v14, 3 }
 0x74d   :  { %v10808_v35 = vpop.f32.mrf.mxu2 }
 0x74e   :  { %v10790_v26 = vpop.f32.mrf.mxu1  ;;  %11143 = vst [vmem:[#allocation30_spill] sm:$0xff] %v10808_v35 }
 0x74f   :  { %11134 = vst [vmem:[#allocation21_spill] sm:$0xff] %v10790_v26 }
 0x750   :  { %4311 = vmatmul.bf16.vlgmr.msrb.gmra.mxu0 %v7996_v3  ;;  %4324 = vmatmul.bf16.vlgmr.msrb.gmra.mxu1 %v7996_v3  ;;  %v10818_v56 = vpop.f32.mrf.mxu3 }
 0x751   :  { %4337 = vmatmul.bf16.vlgmr.msrb.gmra.mxu2 %v7996_v3  ;;  %4350 = vmatmul.bf16.vlgmr.msrb.gmra.mxu3 %v7996_v3  ;;  %v3968_v3 = vpop.f32.mrf.mxu0  ;;  %11148 = vst [vmem:[#allocation35_spill] sm:$0xff] %v10818_v56 }
 0x752   :  { %4551 = vmatpush.bf16.msrb.mxu0 %v10560_v15  ;;  %4564 = vmatpush.bf16.msrb.mxu1 %v10562_v41 }
 0x753   :  { %4577 = vmatpush.bf16.msrb.mxu2 %v10573_v10  ;;  %4590 = vmatpush.bf16.msrb.mxu3 %v10570_v25 }
 0x755   :  { %v10816_v39 = vpop.f32.mrf.mxu2 }
 0x756   :  { %4552 = vmatpush.bf16.msrb.mxu0 %v10580_v21  ;;  %4565 = vmatpush.bf16.msrb.mxu1 %v10582_v5  ;;  %v10798_v47 = vpop.f32.mrf.mxu1  ;;  %11147 = vst [vmem:[#allocation34_spill] sm:$0xff] %v10816_v39  ;;  %v10837_v39 = vperm.slane %v3789_v14, 1 }
 0x757   :  { %4578 = vmatpush.bf16.msrb.mxu2 %v10599_v16  ;;  %4591 = vmatpush.bf16.msrb.mxu3 %v10584_v32  ;;  %11138 = vst [vmem:[#allocation25_spill] sm:$0xff] %v10798_v47 }
 0x759   :  { %v10780_v28 = vpop.f32.mrf.mxu0 }
 0x75a   :  { %4553 = vmatpush.bf16.msrb.mxu0 %v10589_v23  ;;  %4566 = vmatpush.bf16.msrb.mxu1 %v10593_v58 }
 0x75b   :  { %4579 = vmatpush.bf16.msrb.mxu2 %v10611_v29  ;;  %4592 = vmatpush.bf16.msrb.mxu3 %v10595_v1 }
 0x75e   :  { %4554 = vmatpush.bf16.msrb.mxu0 %v10602_v46  ;;  %4567 = vmatpush.bf16.msrb.mxu1 %v10606_v55  ;;  %v10806_v44 = vpop.f32.mrf.mxu1 }
 0x75f   :  { %4580 = vmatpush.bf16.msrb.mxu2 %v10628_v4  ;;  %4593 = vmatpush.bf16.msrb.mxu3 %v10608_v50  ;;  %11142 = vst [vmem:[#allocation29_spill] sm:$0xff] %v10806_v44  ;;  %v4056_v44 = vadd.f32 %v4055_v37, %v10845_v17 }
 0x761   :  { %v10788_v34 = vpop.f32.mrf.mxu0 }
 0x762   :  { %4555 = vmatpush.bf16.msrb.mxu0 %v10616_v9  ;;  %4568 = vmatpush.bf16.msrb.mxu1 %v10622_v27  ;;  %11133 = vst [vmem:[#allocation20_spill] sm:$0xff] %v10788_v34 }
 0x763   :  { %4581 = vmatpush.bf16.msrb.mxu2 %v10643_v2  ;;  %4594 = vmatpush.bf16.msrb.mxu3 %v10624_v24 }
 0x766   :  { %4556 = vmatpush.bf16.msrb.mxu0 %v10632_v51  ;;  %4569 = vmatpush.bf16.msrb.mxu1 %v10636_v53  ;;  %v10814_v20 = vpop.f32.mrf.mxu1 }
 0x767   :  { %4582 = vmatpush.bf16.msrb.mxu2 %v10666_v12  ;;  %4595 = vmatpush.bf16.msrb.mxu3 %v10638_v54  ;;  %11146 = vst [vmem:[#allocation33_spill] sm:$0xff] %v10814_v20 }
 0x769   :  { %v10796_v60 = vpop.f32.mrf.mxu0 }
 0x76a   :  { %4557 = vmatpush.bf16.msrb.mxu0 %v10651_v30  ;;  %4570 = vmatpush.bf16.msrb.mxu1 %v10660_v48  ;;  %11137 = vst [vmem:[#allocation24_spill] sm:$0xff] %v10796_v60 }
 0x76b   :  { %4583 = vmatpush.bf16.msrb.mxu2 %v10685_v36  ;;  %4596 = vmatpush.bf16.msrb.mxu3 %v10669_v45 }
 0x76e   :  { %4558 = vmatpush.bf16.msrb.mxu0 %v10681_v13  ;;  %4571 = vmatpush.bf16.msrb.mxu1 %v10683_v43 }
 0x76f   :  { %4584 = vmatpush.bf16.msrb.mxu2 %v10704_v59  ;;  %4597 = vmatpush.bf16.msrb.mxu3 %v10695_v57 }
 0x771   :  { %v10804_v42 = vpop.f32.mrf.mxu0 }
 0x772   :  { %11141 = vst [vmem:[#allocation28_spill] sm:$0xff] %v10804_v42 }
 0x779   :  { %v10812_v0 = vpop.f32.mrf.mxu0 }
 0x77a   :  { %11145 = vst [vmem:[#allocation32_spill] sm:$0xff] %v10812_v0 }
 0x7bd   :  { %v10820_v19 = vpop.f32.mrf.mxu0  ;;  %v10822_v22 = vpop.f32.mrf.mxu1 }
 0x7be   :  { %11149 = vst [vmem:[#allocation36_spill] sm:$0xff] %v10820_v19  ;;  %v3969_v19 = vadd.f32 %v3968_v3, %v10835_v38 }
 0x7bf   :  { %11150 = vst [vmem:[#allocation37_spill] sm:$0xff] %v10822_v22  ;;  %v3998_v22 = vadd.f32 %v3997_v31, %v10837_v39 }
 0x7c4   :  { %v10824_v18 = vpop.f32.mrf.mxu2  ;;  %v10826_v52 = vpop.f32.mrf.mxu3 }
 0x7c5   :  { %11151 = vst [vmem:[#allocation38_spill] sm:$0xff] %v10824_v18  ;;  %v10831_v6 = vpop.f32.mrf.mxu0  ;;  %v10833_v33 = vpop.f32.mrf.mxu1 }
 0x7c6   :  { %11152 = vst [vmem:[#allocation39_spill] sm:$0xff] %v10826_v52 }
 0x7c7   :  { %11153 = vst [vmem:[#allocation40_spill] sm:$0xff] %v10831_v6 }
 0x7c8   :  { %11154 = vst [vmem:[#allocation41_spill] sm:$0xff] %v10833_v33 }
 0x7cc   :  { %v10841_v56 = vpop.f32.mrf.mxu2  ;;  %v10843_v18 = vpop.f32.mrf.mxu3 }
 0x7cd   :  { %11155 = vst [vmem:[#allocation42_spill] sm:$0xff] %v10841_v56  ;;  %v4312_v52 = vpop.f32.mrf.mxu0  ;;  %v4325_v20 = vpop.f32.mrf.mxu1 }
 0x7ce   :  { %11156 = vst [vmem:[#allocation43_spill] sm:$0xff] %v10843_v18  ;;  %v4355_v0 = vadd.f32 %v4312_v52, %v3969_v19  ;;  %v4356_v35 = vadd.f32 %v4325_v20, %v3998_v22  ;;  %v10848_v20 = vperm.slane %v3789_v14, 2 }
 0x7d0   :  { %v7047_v6 = vmul.f32 -1.442695, %v4355_v0  ;;  %v7048_v33 = vmul.f32 -1.442695, %v4356_v35  ;;  %11157 = vst [vmem:[#allocation44_spill] sm:$0xff] %v10848_v20  ;;  %v4027_v37 = vadd.f32 %v4026_v61, %v10848_v20 }
 0x7d2   :  { %7678 = vpow2.f32 %v7047_v6 }
 0x7d3   :  { %7680 = vpow2.f32 %v7048_v33 }
 0x7d4   :  { %v4338_v42 = vpop.f32.mrf.mxu2  ;;  %v4351_v3 = vpop.f32.mrf.mxu3 }
 0x7d5   :  { %v4358_v7 = vadd.f32 %v4351_v3, %v4056_v44  ;;  %v4314_v31 = vpop.f32.mrf.mxu0  ;;  %v4327_v63 = vpop.f32.mrf.mxu1  ;;  %v4357_v44 = vadd.f32 %v4338_v42, %v4027_v37 }
 0x7d7   :  { %v7049_v56 = vmul.f32 -1.442695, %v4358_v7 }
 0x7d8   :  { %v7679_v47 = vpop.eup %7678 }
 0x7d9   :  { %v7681_v18 = vpop.eup %7680  ;;  %v4362_v60 = vadd.f32 1.0, %v7679_v47  ;;  %7682 = vpow2.f32 %v7049_v56 }
 0x7da   :  { %v4381_v19 = vadd.f32 1.0, %v7681_v18 }
 0x7db   :  { %7684 = vrcp.f32 %v4362_v60  ;;  %v4374_v56 = vand.u32 2147483648, %v4362_v60  ;;  %v4372_v31 = vand.u32 2147483647, %v4362_v60  ;;  %vm4368_vm3 = vweird.f32 %v4362_v60 }
 0x7dc   :  { %7686 = vrcp.f32 %v4381_v19  ;;  %v4353_v35 = vpop.f32.mrf.mxu3  ;;  %v4340_v0 = vpop.f32.mrf.mxu2  ;;  %v4393_v18 = vand.u32 2147483648, %v4381_v19  ;;  %vm4387_vm4 = vweird.f32 %v4381_v19 }
 0x7dd   :  { %v4391_v0 = vand.u32 2147483647, %v4381_v19  ;;  %v4375_v42 = vor.u32 1.1754944e-38, %v4374_v56  ;;  %vm4373_vm6 = vcmp.eq.f32.partialorder %v4372_v31, 8.507059e+37 }
 0x7de   :  { %v4394_v11 = vor.u32 1.1754944e-38, %v4393_v18 }
 0x7df   :  { %v7683_v22 = vpop.eup %7682  ;;  %vm4392_vm8 = vcmp.eq.f32.partialorder %v4391_v0, 8.507059e+37 }
 0x7e0   :  { %v4401_v52 = vadd.f32 1.0, %v7683_v22 }
 0x7e1   :  { %v7685_v6 = vpop.eup %7684 }
 0x7e2   :  { %v7687_v33 = vpop.eup %7686  ;;  %v4364_v63 = vmul.f32 %v7685_v6, %v4362_v60  ;;  %7688 = vrcp.f32 %v4401_v52  ;;  %vm4369_vm1 = vweird.f32 %v7685_v6  ;;  %vm4407_vm10 = vweird.f32 %v4401_v52 }
 0x7e3   :  { %v4383_v7 = vmul.f32 %v7687_v33, %v4381_v19  ;;  %7690 = vtanh.f32 %v4357_v44  ;;  %vm4388_vm2 = vweird.f32 %v7687_v33  ;;  %vm4370_vm5 = vmor %vm4368_vm3, %vm4369_vm1  ;;  %v4413_v19 = vand.u32 2147483648, %v4401_v52 }
 0x7e4   :  { %v4365_v3 = vsub.f32 1.0, %v4364_v63  ;;  %vm4389_vm7 = vmor %vm4387_vm4, %vm4388_vm2 }
 0x7e5   :  { %v4384_v47 = vsub.f32 1.0, %v4383_v7  ;;  %v4414_v18 = vor.u32 1.1754944e-38, %v4413_v19 }
 0x7e6   :  { %v4366_v14 = vmul.f32 %v7685_v6, %v4365_v3 }
 0x7e7   :  { %v4385_v35 = vmul.f32 %v7687_v33, %v4384_v47 }
 0x7e8   :  { %v7689_v8 = vpop.eup %7688  ;;  %v4367_v61 = vadd.f32 %v7685_v6, %v4366_v14 }
 0x7e9   :  { %v4386_v22 = vadd.f32 %v7687_v33, %v4385_v35  ;;  %v4403_v37 = vmul.f32 %v7689_v8, %v4401_v52  ;;  %v7691_v44 = vpop.eup %7690  ;;  %vm4408_vm9 = vweird.f32 %v7689_v8 }
 0x7ea   :  { %v4371_v63 = vsel %vm4370_vm5, %v7685_v6, %v4367_v61  ;;  %v4411_v6 = vand.u32 2147483647, %v4401_v52  ;;  %vm4409_vm11 = vmor %vm4407_vm10, %vm4408_vm9 }
 0x7eb   :  { %v4376_v7 = vsel %vm4373_vm6, %v4375_v42, %v4371_v63  ;;  %v4390_v3 = vsel %vm4389_vm7, %v7687_v33, %v4386_v22  ;;  %v4404_v26 = vsub.f32 1.0, %v4403_v37  ;;  %v4058_v42 = vadd.f32 %v10786_v62, %v10845_v17 }
 0x7ec   :  { %v4395_v47 = vsel %vm4392_vm8, %v4394_v11, %v4390_v3  ;;  %v4418_v34 = vmul.f32 %v7691_v44, %v4376_v7  ;;  %vm4412_vm12 = vcmp.eq.f32.partialorder %v4411_v6, 8.507059e+37 }
 0x7ed   :  { %v4417_v49 = vmul.f32 0.0, %v4395_v47  ;;  %v4405_v20 = vmul.f32 %v7689_v8, %v4404_v26 }
 0x7ef   :  { %v10851_v14 = vadd.f32 %v4418_v34, %v4417_v49  ;;  %v4406_v60 = vadd.f32 %v7689_v8, %v4405_v20  ;;  %v3971_v49 = vadd.f32 %v10780_v28, %v10835_v38  ;;  %v4000_v34 = vadd.f32 %v10782_v40, %v10837_v39 }
 0x7f1   :  { %7692 = vtanh.f32 %v10851_v14  ;;  %v4410_v56 = vsel %vm4409_vm11, %v7689_v8, %v4406_v60 }
 0x7f2   :  { %v4415_v31 = vsel %vm4412_vm12, %v4414_v18, %v4410_v56  ;;  %v11158_v18 = vld [vmem:[#allocation44_spill] sm:$0xff] }
 0x7f7   :  { %v7693_v33 = vpop.eup %7692 }
 0x7f8   :  { %v4421_v35 = vmul.f32 %v7693_v33, %v4415_v31  ;;  %v11159_v33 = vld [vmem:[#allocation19_spill] sm:$0xff] }
 0x7f9   :  { %v4029_v62 = vadd.f32 %v11159_v33, %v11158_v18 }
 0x7fa   :  { %v4426_v11 = vpack.c.bf16 %v4421_v35, %v4421_v35 }
 0x7fc   :  { %4435 = vmatmul.bf16.vlgmr.msra.gmra.mxu0 %v4426_v11  ;;  %4448 = vmatmul.bf16.vlgmr.msra.gmra.mxu1 %v4426_v11 }
 0x7fd   :  { %4461 = vmatmul.bf16.vlgmr.msra.gmra.mxu2 %v4426_v11  ;;  %4474 = vmatmul.bf16.vlgmr.msra.gmra.mxu3 %v4426_v11 }
 0x7fe   :  { %4675 = vmatpush.bf16.msra.mxu0 %v10560_v15  ;;  %4688 = vmatpush.bf16.msra.mxu1 %v10562_v41 }
 0x7ff   :  { %4701 = vmatpush.bf16.msra.mxu2 %v10573_v10  ;;  %4714 = vmatpush.bf16.msra.mxu3 %v10570_v25 }
 0x802   :  { %4676 = vmatpush.bf16.msra.mxu0 %v10580_v21  ;;  %4689 = vmatpush.bf16.msra.mxu1 %v10582_v5 }
 0x803   :  { %4702 = vmatpush.bf16.msra.mxu2 %v10599_v16  ;;  %4715 = vmatpush.bf16.msra.mxu3 %v10584_v32 }
 0x806   :  { %4677 = vmatpush.bf16.msra.mxu0 %v10589_v23  ;;  %4690 = vmatpush.bf16.msra.mxu1 %v10593_v58 }
 0x807   :  { %4703 = vmatpush.bf16.msra.mxu2 %v10611_v29  ;;  %4716 = vmatpush.bf16.msra.mxu3 %v10595_v1 }
 0x80a   :  { %4678 = vmatpush.bf16.msra.mxu0 %v10602_v46  ;;  %4691 = vmatpush.bf16.msra.mxu1 %v10606_v55 }
 0x80b   :  { %4704 = vmatpush.bf16.msra.mxu2 %v10628_v4  ;;  %4717 = vmatpush.bf16.msra.mxu3 %v10608_v50 }
 0x80e   :  { %4679 = vmatpush.bf16.msra.mxu0 %v10616_v9  ;;  %4692 = vmatpush.bf16.msra.mxu1 %v10622_v27 }
 0x80f   :  { %4705 = vmatpush.bf16.msra.mxu2 %v10643_v2  ;;  %4718 = vmatpush.bf16.msra.mxu3 %v10624_v24 }
 0x812   :  { %4680 = vmatpush.bf16.msra.mxu0 %v10632_v51  ;;  %4693 = vmatpush.bf16.msra.mxu1 %v10636_v53 }
 0x813   :  { %4706 = vmatpush.bf16.msra.mxu2 %v10666_v12  ;;  %4719 = vmatpush.bf16.msra.mxu3 %v10638_v54 }
 0x816   :  { %4681 = vmatpush.bf16.msra.mxu0 %v10651_v30  ;;  %4694 = vmatpush.bf16.msra.mxu1 %v10660_v48 }
 0x817   :  { %4707 = vmatpush.bf16.msra.mxu2 %v10685_v36  ;;  %4720 = vmatpush.bf16.msra.mxu3 %v10669_v45 }
 0x81a   :  { %4682 = vmatpush.bf16.msra.mxu0 %v10681_v13  ;;  %4695 = vmatpush.bf16.msra.mxu1 %v10683_v43 }
 0x81b   :  { %4708 = vmatpush.bf16.msra.mxu2 %v10704_v59  ;;  %4721 = vmatpush.bf16.msra.mxu3 %v10695_v57 }
 0x879   :  { %v4436_v26 = vpop.f32.mrf.mxu0  ;;  %v4449_v8 = vpop.f32.mrf.mxu1 }
 0x87a   :  { %v4479_v20 = vadd.f32 %v4436_v26, %v3971_v49  ;;  %v4480_v52 = vadd.f32 %v4449_v8, %v4000_v34 }
 0x87c   :  { %v7050_v0 = vmul.f32 -1.442695, %v4479_v20  ;;  %v7051_v61 = vmul.f32 -1.442695, %v4480_v52 }
 0x87e   :  { %7694 = vpow2.f32 %v7050_v0 }
 0x87f   :  { %7696 = vpow2.f32 %v7051_v61 }
 0x880   :  { %v4462_v22 = vpop.f32.mrf.mxu2  ;;  %v4475_v37 = vpop.f32.mrf.mxu3 }
 0x881   :  { %v4482_v63 = vadd.f32 %v4475_v37, %v4058_v42  ;;  %v4438_v44 = vpop.f32.mrf.mxu0  ;;  %v4451_v7 = vpop.f32.mrf.mxu1  ;;  %v4481_v11 = vadd.f32 %v4462_v22, %v4029_v62 }
 0x883   :  { %v7052_v28 = vmul.f32 -1.442695, %v4482_v63 }
 0x884   :  { %v7695_v3 = vpop.eup %7694 }
 0x885   :  { %v7697_v47 = vpop.eup %7696  ;;  %v4486_v40 = vadd.f32 1.0, %v7695_v3  ;;  %7698 = vpow2.f32 %v7052_v28 }
 0x886   :  { %v4505_v60 = vadd.f32 1.0, %v7697_v47 }
 0x887   :  { %7700 = vrcp.f32 %v4486_v40  ;;  %v4498_v52 = vand.u32 2147483648, %v4486_v40  ;;  %v4496_v42 = vand.u32 2147483647, %v4486_v40  ;;  %vm4492_vm15 = vweird.f32 %v4486_v40 }
 0x888   :  { %7702 = vrcp.f32 %v4505_v60  ;;  %v4464_v19 = vpop.f32.mrf.mxu2  ;;  %v4477_v6 = vpop.f32.mrf.mxu3  ;;  %v4517_v0 = vand.u32 2147483648, %v4505_v60  ;;  %v4515_v63 = vand.u32 2147483647, %v4505_v60  ;;  %vm4511_vm0 = vweird.f32 %v4505_v60 }
 0x889   :  { %v4499_v22 = vor.u32 1.1754944e-38, %v4498_v52  ;;  %vm4497_vm3 = vcmp.eq.f32.partialorder %v4496_v42, 8.507059e+37 }
 0x88a   :  { %v4518_v47 = vor.u32 1.1754944e-38, %v4517_v0  ;;  %vm4516_vm4 = vcmp.eq.f32.partialorder %v4515_v63, 8.507059e+37  ;;  %v11161_v63 = vld [vmem:[#allocation21_spill] sm:$0xff] }
 0x88b   :  { %v7699_v56 = vpop.eup %7698 }
 0x88c   :  { %v4525_v31 = vadd.f32 1.0, %v7699_v56 }
 0x88d   :  { %v7701_v35 = vpop.eup %7700 }
 0x88e   :  { %v7703_v49 = vpop.eup %7702  ;;  %v4488_v34 = vmul.f32 %v7701_v35, %v4486_v40  ;;  %7704 = vrcp.f32 %v4525_v31  ;;  %vm4493_vm13 = vweird.f32 %v7701_v35  ;;  %vm4531_vm6 = vweird.f32 %v4525_v31 }
 0x88f   :  { %v4507_v26 = vmul.f32 %v7703_v49, %v4505_v60  ;;  %7706 = vtanh.f32 %v4481_v11  ;;  %vm4512_vm14 = vweird.f32 %v7703_v49  ;;  %vm4494_vm1 = vmor %vm4492_vm15, %vm4493_vm13 }
 0x890   :  { %v4489_v8 = vsub.f32 1.0, %v4488_v34  ;;  %vm4513_vm2 = vmor %vm4511_vm0, %vm4512_vm14 }
 0x891   :  { %v4508_v20 = vsub.f32 1.0, %v4507_v26 }
 0x892   :  { %v4490_v61 = vmul.f32 %v7701_v35, %v4489_v8 }
 0x893   :  { %v4509_v37 = vmul.f32 %v7703_v49, %v4508_v20  ;;  %v4537_v20 = vand.u32 2147483648, %v4525_v31 }
 0x894   :  { %v7705_v44 = vpop.eup %7704  ;;  %v4491_v7 = vadd.f32 %v7701_v35, %v4490_v61 }
 0x895   :  { %v4510_v28 = vadd.f32 %v7703_v49, %v4509_v37  ;;  %v4527_v3 = vmul.f32 %v7705_v44, %v4525_v31  ;;  %v7707_v6 = vpop.eup %7706  ;;  %vm4532_vm5 = vweird.f32 %v7705_v44  ;;  %v4538_v0 = vor.u32 1.1754944e-38, %v4537_v20 }
 0x896   :  { %v4495_v19 = vsel %vm4494_vm1, %v7701_v35, %v4491_v7  ;;  %v4535_v35 = vand.u32 2147483647, %v4525_v31  ;;  %vm4533_vm7 = vmor %vm4531_vm6, %vm4532_vm5 }
 0x897   :  { %v4500_v56 = vsel %vm4497_vm3, %v4499_v22, %v4495_v19  ;;  %v4514_v33 = vsel %vm4513_vm2, %v7703_v49, %v4510_v28  ;;  %v4528_v62 = vsub.f32 1.0, %v4527_v3 }
 0x898   :  { %v4519_v11 = vsel %vm4516_vm4, %v4518_v47, %v4514_v33  ;;  %v4542_v34 = vmul.f32 %v7707_v6, %v4500_v56  ;;  %vm4536_vm8 = vcmp.eq.f32.partialorder %v4535_v35, 8.507059e+37  ;;  %v11162_v6 = vld [vmem:[#allocation23_spill] sm:$0xff] }
 0x899   :  { %v4541_v26 = vmul.f32 %v4519_v11, %v10851_v14  ;;  %v4529_v8 = vmul.f32 %v7705_v44, %v4528_v62  ;;  %v11160_v14 = vld [vmem:[#allocation20_spill] sm:$0xff]  ;;  %v4061_v56 = vadd.f32 %v11162_v6, %v10845_v17 }
 0x89a   :  { %v3974_v31 = vadd.f32 %v11160_v14, %v10835_v38 }
 0x89b   :  { %v10895_v40 = vadd.f32 %v4542_v34, %v4541_v26  ;;  %v4530_v60 = vadd.f32 %v7705_v44, %v4529_v8 }
 0x89d   :  { %7708 = vtanh.f32 %v10895_v40  ;;  %v4534_v52 = vsel %vm4533_vm7, %v7705_v44, %v4530_v60  ;;  %v4003_v44 = vadd.f32 %v11161_v63, %v10837_v39 }
 0x89e   :  { %v4539_v61 = vsel %vm4536_vm8, %v4538_v0, %v4534_v52 }
 0x8a3   :  { %v7709_v49 = vpop.eup %7708 }
 0x8a4   :  { %v4545_v42 = vmul.f32 %v7709_v49, %v4539_v61 }
 0x8a6   :  { %v4550_v37 = vpack.c.bf16 %v4545_v42, %v4545_v42  ;;  %v11163_v42 = vld [vmem:[#allocation22_spill] sm:$0xff] }
 0x8a8   :  { %4559 = vmatmul.bf16.vlgmr.msrb.gmra.mxu0 %v4550_v37  ;;  %4572 = vmatmul.bf16.vlgmr.msrb.gmra.mxu1 %v4550_v37 }
 0x8a9   :  { %4585 = vmatmul.bf16.vlgmr.msrb.gmra.mxu2 %v4550_v37  ;;  %4598 = vmatmul.bf16.vlgmr.msrb.gmra.mxu3 %v4550_v37  ;;  %v4032_v37 = vadd.f32 %v11163_v42, %v11158_v18 }
 0x8aa   :  { %4799 = vmatpush.bf16.msrb.mxu0 %v10560_v15  ;;  %4812 = vmatpush.bf16.msrb.mxu1 %v10562_v41 }
 0x8ab   :  { %4825 = vmatpush.bf16.msrb.mxu2 %v10573_v10  ;;  %4838 = vmatpush.bf16.msrb.mxu3 %v10570_v25 }
 0x8ae   :  { %4800 = vmatpush.bf16.msrb.mxu0 %v10580_v21  ;;  %4813 = vmatpush.bf16.msrb.mxu1 %v10582_v5 }
 0x8af   :  { %4826 = vmatpush.bf16.msrb.mxu2 %v10599_v16  ;;  %4839 = vmatpush.bf16.msrb.mxu3 %v10584_v32 }
 0x8b2   :  { %4801 = vmatpush.bf16.msrb.mxu0 %v10589_v23  ;;  %4814 = vmatpush.bf16.msrb.mxu1 %v10593_v58 }
 0x8b3   :  { %4827 = vmatpush.bf16.msrb.mxu2 %v10611_v29  ;;  %4840 = vmatpush.bf16.msrb.mxu3 %v10595_v1 }
 0x8b6   :  { %4802 = vmatpush.bf16.msrb.mxu0 %v10602_v46  ;;  %4815 = vmatpush.bf16.msrb.mxu1 %v10606_v55 }
 0x8b7   :  { %4828 = vmatpush.bf16.msrb.mxu2 %v10628_v4  ;;  %4841 = vmatpush.bf16.msrb.mxu3 %v10608_v50 }
 0x8ba   :  { %4803 = vmatpush.bf16.msrb.mxu0 %v10616_v9  ;;  %4816 = vmatpush.bf16.msrb.mxu1 %v10622_v27 }
 0x8bb   :  { %4829 = vmatpush.bf16.msrb.mxu2 %v10643_v2  ;;  %4842 = vmatpush.bf16.msrb.mxu3 %v10624_v24 }
 0x8be   :  { %4804 = vmatpush.bf16.msrb.mxu0 %v10632_v51  ;;  %4817 = vmatpush.bf16.msrb.mxu1 %v10636_v53 }
 0x8bf   :  { %4830 = vmatpush.bf16.msrb.mxu2 %v10666_v12  ;;  %4843 = vmatpush.bf16.msrb.mxu3 %v10638_v54 }
 0x8c2   :  { %4805 = vmatpush.bf16.msrb.mxu0 %v10651_v30  ;;  %4818 = vmatpush.bf16.msrb.mxu1 %v10660_v48 }
 0x8c3   :  { %4831 = vmatpush.bf16.msrb.mxu2 %v10685_v36  ;;  %4844 = vmatpush.bf16.msrb.mxu3 %v10669_v45 }
 0x8c6   :  { %4806 = vmatpush.bf16.msrb.mxu0 %v10681_v13  ;;  %4819 = vmatpush.bf16.msrb.mxu1 %v10683_v43 }
 0x8c7   :  { %4832 = vmatpush.bf16.msrb.mxu2 %v10704_v59  ;;  %4845 = vmatpush.bf16.msrb.mxu3 %v10695_v57 }
 0x925   :  { %v4560_v7 = vpop.f32.mrf.mxu0  ;;  %v4573_v22 = vpop.f32.mrf.mxu1 }
 0x926   :  { %v4603_v28 = vadd.f32 %v4560_v7, %v3974_v31  ;;  %v4604_v3 = vadd.f32 %v4573_v22, %v4003_v44 }
 0x928   :  { %v7053_v47 = vmul.f32 -1.442695, %v4603_v28  ;;  %v7054_v19 = vmul.f32 -1.442695, %v4604_v3 }
 0x92a   :  { %7710 = vpow2.f32 %v7053_v47 }
 0x92b   :  { %7712 = vpow2.f32 %v7054_v19 }
 0x92c   :  { %v4586_v33 = vpop.f32.mrf.mxu2  ;;  %v4599_v62 = vpop.f32.mrf.mxu3 }
 0x92d   :  { %v4606_v11 = vadd.f32 %v4599_v62, %v4061_v56  ;;  %v4562_v34 = vpop.f32.mrf.mxu0  ;;  %v4575_v26 = vpop.f32.mrf.mxu1  ;;  %v4605_v63 = vadd.f32 %v4586_v33, %v4032_v37 }
 0x92f   :  { %v7055_v8 = vmul.f32 -1.442695, %v4606_v11 }
 0x930   :  { %v7711_v60 = vpop.eup %7710 }
 0x931   :  { %v7713_v20 = vpop.eup %7712  ;;  %v4610_v35 = vadd.f32 1.0, %v7711_v60  ;;  %7714 = vpow2.f32 %v7055_v8 }
 0x932   :  { %v4629_v52 = vadd.f32 1.0, %v7713_v20 }
 0x933   :  { %7716 = vrcp.f32 %v4610_v35  ;;  %v4622_v47 = vand.u32 2147483648, %v4610_v35  ;;  %v4620_v56 = vand.u32 2147483647, %v4610_v35  ;;  %vm4616_vm11 = vweird.f32 %v4610_v35 }
 0x934   :  { %7718 = vrcp.f32 %v4629_v52  ;;  %v4588_v0 = vpop.f32.mrf.mxu2  ;;  %v4601_v49 = vpop.f32.mrf.mxu3  ;;  %v4641_v19 = vand.u32 2147483648, %v4629_v52  ;;  %v4639_v11 = vand.u32 2147483647, %v4629_v52  ;;  %vm4635_vm12 = vweird.f32 %v4629_v52 }
 0x935   :  { %v4623_v33 = vor.u32 1.1754944e-38, %v4622_v47  ;;  %vm4621_vm15 = vcmp.eq.f32.partialorder %v4620_v56, 8.507059e+37 }
 0x936   :  { %v4642_v20 = vor.u32 1.1754944e-38, %v4641_v19  ;;  %vm4640_vm0 = vcmp.eq.f32.partialorder %v4639_v11, 8.507059e+37  ;;  %v11165_v11 = vld [vmem:[#allocation25_spill] sm:$0xff] }
 0x937   :  { %v7715_v61 = vpop.eup %7714 }
 0x938   :  { %v4649_v14 = vadd.f32 1.0, %v7715_v61 }
 0x939   :  { %v7717_v31 = vpop.eup %7716 }
 0x93a   :  { %v7719_v44 = vpop.eup %7718  ;;  %v4612_v7 = vmul.f32 %v7717_v31, %v4610_v35  ;;  %7720 = vrcp.f32 %v4649_v14  ;;  %vm4617_vm9 = vweird.f32 %v7717_v31  ;;  %vm4655_vm2 = vweird.f32 %v4649_v14 }
 0x93b   :  { %v4631_v22 = vmul.f32 %v7719_v44, %v4629_v52  ;;  %7722 = vtanh.f32 %v4605_v63  ;;  %vm4636_vm10 = vweird.f32 %v7719_v44  ;;  %vm4618_vm13 = vmor %vm4616_vm11, %vm4617_vm9 }
 0x93c   :  { %v4613_v28 = vsub.f32 1.0, %v4612_v7  ;;  %vm4637_vm14 = vmor %vm4635_vm12, %vm4636_vm10 }
 0x93d   :  { %v4632_v3 = vsub.f32 1.0, %v4631_v22 }
 0x93e   :  { %v4614_v6 = vmul.f32 %v7717_v31, %v4613_v28 }
 0x93f   :  { %v4633_v62 = vmul.f32 %v7719_v44, %v4632_v3  ;;  %v4661_v3 = vand.u32 2147483648, %v4649_v14 }
 0x940   :  { %v7721_v34 = vpop.eup %7720  ;;  %v4615_v26 = vadd.f32 %v7717_v31, %v4614_v6 }
 0x941   :  { %v4634_v8 = vadd.f32 %v7719_v44, %v4633_v62  ;;  %v4651_v60 = vmul.f32 %v7721_v34, %v4649_v14  ;;  %v7723_v49 = vpop.eup %7722  ;;  %vm4656_vm1 = vweird.f32 %v7721_v34  ;;  %v4662_v19 = vor.u32 1.1754944e-38, %v4661_v3 }
 0x942   :  { %v4619_v0 = vsel %vm4618_vm13, %v7717_v31, %v4615_v26  ;;  %v4659_v31 = vand.u32 2147483647, %v4649_v14  ;;  %vm4657_vm3 = vmor %vm4655_vm2, %vm4656_vm1 }
 0x943   :  { %v4624_v61 = vsel %vm4621_vm15, %v4623_v33, %v4619_v0  ;;  %v4638_v42 = vsel %vm4637_vm14, %v7719_v44, %v4634_v8  ;;  %v4652_v37 = vsub.f32 1.0, %v4651_v60 }
 0x944   :  { %v4643_v63 = vsel %vm4640_vm0, %v4642_v20, %v4638_v42  ;;  %v4666_v7 = vmul.f32 %v7723_v49, %v4624_v61  ;;  %vm4660_vm4 = vcmp.eq.f32.partialorder %v4659_v31, 8.507059e+37  ;;  %v11166_v49 = vld [vmem:[#allocation27_spill] sm:$0xff] }
 0x945   :  { %v4665_v22 = vmul.f32 %v4643_v63, %v10895_v40  ;;  %v4653_v28 = vmul.f32 %v7721_v34, %v4652_v37  ;;  %v11164_v40 = vld [vmem:[#allocation24_spill] sm:$0xff]  ;;  %v4063_v61 = vadd.f32 %v11166_v49, %v10845_v17 }
 0x946   :  { %v3976_v14 = vadd.f32 %v11164_v40, %v10835_v38 }
 0x947   :  { %v10939_v35 = vadd.f32 %v4666_v7, %v4665_v22  ;;  %v4654_v52 = vadd.f32 %v7721_v34, %v4653_v28 }
 0x949   :  { %7724 = vtanh.f32 %v10939_v35  ;;  %v4658_v47 = vsel %vm4657_vm3, %v7721_v34, %v4654_v52  ;;  %v4005_v34 = vadd.f32 %v11165_v11, %v10837_v39 }
 0x94a   :  { %v4663_v6 = vsel %vm4660_vm4, %v4662_v19, %v4658_v47 }
 0x94f   :  { %v7725_v44 = vpop.eup %7724 }
 0x950   :  { %v4669_v56 = vmul.f32 %v7725_v44, %v4663_v6 }
 0x952   :  { %v4674_v62 = vpack.c.bf16 %v4669_v56, %v4669_v56  ;;  %v11167_v56 = vld [vmem:[#allocation26_spill] sm:$0xff] }
 0x954   :  { %4683 = vmatmul.bf16.vlgmr.msra.gmra.mxu0 %v4674_v62  ;;  %4696 = vmatmul.bf16.vlgmr.msra.gmra.mxu1 %v4674_v62 }
 0x955   :  { %4709 = vmatmul.bf16.vlgmr.msra.gmra.mxu2 %v4674_v62  ;;  %4722 = vmatmul.bf16.vlgmr.msra.gmra.mxu3 %v4674_v62  ;;  %v4034_v62 = vadd.f32 %v11167_v56, %v11158_v18 }
 0x956   :  { %4923 = vmatpush.bf16.msra.mxu0 %v10560_v15  ;;  %4936 = vmatpush.bf16.msra.mxu1 %v10562_v41 }
 0x957   :  { %4949 = vmatpush.bf16.msra.mxu2 %v10573_v10  ;;  %4962 = vmatpush.bf16.msra.mxu3 %v10570_v25 }
 0x95a   :  { %4924 = vmatpush.bf16.msra.mxu0 %v10580_v21  ;;  %4937 = vmatpush.bf16.msra.mxu1 %v10582_v5 }
 0x95b   :  { %4950 = vmatpush.bf16.msra.mxu2 %v10599_v16  ;;  %4963 = vmatpush.bf16.msra.mxu3 %v10584_v32 }
 0x95e   :  { %4925 = vmatpush.bf16.msra.mxu0 %v10589_v23  ;;  %4938 = vmatpush.bf16.msra.mxu1 %v10593_v58 }
 0x95f   :  { %4951 = vmatpush.bf16.msra.mxu2 %v10611_v29  ;;  %4964 = vmatpush.bf16.msra.mxu3 %v10595_v1 }
 0x962   :  { %4926 = vmatpush.bf16.msra.mxu0 %v10602_v46  ;;  %4939 = vmatpush.bf16.msra.mxu1 %v10606_v55 }
 0x963   :  { %4952 = vmatpush.bf16.msra.mxu2 %v10628_v4  ;;  %4965 = vmatpush.bf16.msra.mxu3 %v10608_v50 }
 0x966   :  { %4927 = vmatpush.bf16.msra.mxu0 %v10616_v9  ;;  %4940 = vmatpush.bf16.msra.mxu1 %v10622_v27 }
 0x967   :  { %4953 = vmatpush.bf16.msra.mxu2 %v10643_v2  ;;  %4966 = vmatpush.bf16.msra.mxu3 %v10624_v24 }
 0x96a   :  { %4928 = vmatpush.bf16.msra.mxu0 %v10632_v51  ;;  %4941 = vmatpush.bf16.msra.mxu1 %v10636_v53 }
 0x96b   :  { %4954 = vmatpush.bf16.msra.mxu2 %v10666_v12  ;;  %4967 = vmatpush.bf16.msra.mxu3 %v10638_v54 }
 0x96e   :  { %4929 = vmatpush.bf16.msra.mxu0 %v10651_v30  ;;  %4942 = vmatpush.bf16.msra.mxu1 %v10660_v48 }
 0x96f   :  { %4955 = vmatpush.bf16.msra.mxu2 %v10685_v36  ;;  %4968 = vmatpush.bf16.msra.mxu3 %v10669_v45 }
 0x972   :  { %4930 = vmatpush.bf16.msra.mxu0 %v10681_v13  ;;  %4943 = vmatpush.bf16.msra.mxu1 %v10683_v43 }
 0x973   :  { %4956 = vmatpush.bf16.msra.mxu2 %v10704_v59  ;;  %4969 = vmatpush.bf16.msra.mxu3 %v10695_v57 }
 0x9d1   :  { %v4684_v26 = vpop.f32.mrf.mxu0  ;;  %v4697_v33 = vpop.f32.mrf.mxu1 }
 0x9d2   :  { %v4727_v8 = vadd.f32 %v4684_v26, %v3976_v14  ;;  %v4728_v60 = vadd.f32 %v4697_v33, %v4005_v34 }
 0x9d4   :  { %v7056_v20 = vmul.f32 -1.442695, %v4727_v8  ;;  %v7057_v0 = vmul.f32 -1.442695, %v4728_v60 }
 0x9d6   :  { %7726 = vpow2.f32 %v7056_v20 }
 0x9d7   :  { %7728 = vpow2.f32 %v7057_v0 }
 0x9d8   :  { %v4710_v42 = vpop.f32.mrf.mxu2  ;;  %v4723_v37 = vpop.f32.mrf.mxu3 }
 0x9d9   :  { %v4730_v63 = vadd.f32 %v4723_v37, %v4063_v61  ;;  %v4686_v7 = vpop.f32.mrf.mxu0  ;;  %v4699_v22 = vpop.f32.mrf.mxu1  ;;  %v4729_v11 = vadd.f32 %v4710_v42, %v4034_v62 }
 0x9db   :  { %v7058_v28 = vmul.f32 -1.442695, %v4730_v63 }
 0x9dc   :  { %v7727_v52 = vpop.eup %7726 }
 0x9dd   :  { %v7729_v3 = vpop.eup %7728  ;;  %v4734_v31 = vadd.f32 1.0, %v7727_v52  ;;  %7730 = vpow2.f32 %v7058_v28 }
 0x9de   :  { %v4753_v47 = vadd.f32 1.0, %v7729_v3 }
 0x9df   :  { %7732 = vrcp.f32 %v4734_v31  ;;  %v4746_v20 = vand.u32 2147483648, %v4734_v31  ;;  %v4744_v61 = vand.u32 2147483647, %v4734_v31  ;;  %vm4740_vm7 = vweird.f32 %v4734_v31 }
 0x9e0   :  { %7734 = vrcp.f32 %v4753_v47  ;;  %v4712_v19 = vpop.f32.mrf.mxu2  ;;  %v4725_v44 = vpop.f32.mrf.mxu3  ;;  %v4765_v0 = vand.u32 2147483648, %v4753_v47  ;;  %v4763_v63 = vand.u32 2147483647, %v4753_v47  ;;  %vm4759_vm8 = vweird.f32 %v4753_v47 }
 0x9e1   :  { %v4747_v42 = vor.u32 1.1754944e-38, %v4746_v20  ;;  %vm4745_vm11 = vcmp.eq.f32.partialorder %v4744_v61, 8.507059e+37 }
 0x9e2   :  { %v4766_v3 = vor.u32 1.1754944e-38, %v4765_v0  ;;  %vm4764_vm12 = vcmp.eq.f32.partialorder %v4763_v63, 8.507059e+37  ;;  %v11169_v63 = vld [vmem:[#allocation29_spill] sm:$0xff] }
 0x9e3   :  { %v7731_v6 = vpop.eup %7730 }
 0x9e4   :  { %v4773_v40 = vadd.f32 1.0, %v7731_v6 }
 0x9e5   :  { %v7733_v14 = vpop.eup %7732 }
 0x9e6   :  { %v7735_v34 = vpop.eup %7734  ;;  %v4736_v26 = vmul.f32 %v7733_v14, %v4734_v31  ;;  %7736 = vrcp.f32 %v4773_v40  ;;  %vm4741_vm5 = vweird.f32 %v7733_v14  ;;  %vm4779_vm14 = vweird.f32 %v4773_v40 }
 0x9e7   :  { %v4755_v33 = vmul.f32 %v7735_v34, %v4753_v47  ;;  %7738 = vtanh.f32 %v4729_v11  ;;  %vm4760_vm6 = vweird.f32 %v7735_v34  ;;  %vm4742_vm9 = vmor %vm4740_vm7, %vm4741_vm5 }
 0x9e8   :  { %v4737_v8 = vsub.f32 1.0, %v4736_v26  ;;  %vm4761_vm10 = vmor %vm4759_vm8, %vm4760_vm6 }
 0x9e9   :  { %v4756_v60 = vsub.f32 1.0, %v4755_v33 }
 0x9ea   :  { %v4738_v49 = vmul.f32 %v7733_v14, %v4737_v8 }
 0x9eb   :  { %v4757_v37 = vmul.f32 %v7735_v34, %v4756_v60  ;;  %v4785_v60 = vand.u32 2147483648, %v4773_v40 }
 0x9ec   :  { %v7737_v7 = vpop.eup %7736  ;;  %v4739_v22 = vadd.f32 %v7733_v14, %v4738_v49 }
 0x9ed   :  { %v4758_v28 = vadd.f32 %v7735_v34, %v4757_v37  ;;  %v4775_v52 = vmul.f32 %v7737_v7, %v4773_v40  ;;  %v7739_v44 = vpop.eup %7738  ;;  %vm4780_vm13 = vweird.f32 %v7737_v7  ;;  %v4786_v0 = vor.u32 1.1754944e-38, %v4785_v60 }
 0x9ee   :  { %v4743_v19 = vsel %vm4742_vm9, %v7733_v14, %v4739_v22  ;;  %v4783_v14 = vand.u32 2147483647, %v4773_v40  ;;  %vm4781_vm15 = vmor %vm4779_vm14, %vm4780_vm13 }
 0x9ef   :  { %v4748_v6 = vsel %vm4745_vm11, %v4747_v42, %v4743_v19  ;;  %v4762_v56 = vsel %vm4761_vm10, %v7735_v34, %v4758_v28  ;;  %v4776_v62 = vsub.f32 1.0, %v4775_v52 }
 0x9f0   :  { %v4767_v11 = vsel %vm4764_vm12, %v4766_v3, %v4762_v56  ;;  %v4790_v26 = vmul.f32 %v7739_v44, %v4748_v6  ;;  %vm4784_vm0 = vcmp.eq.f32.partialorder %v4783_v14, 8.507059e+37  ;;  %v11170_v44 = vld [vmem:[#allocation31_spill] sm:$0xff] }
 0x9f1   :  { %v4789_v33 = vmul.f32 %v4767_v11, %v10939_v35  ;;  %v4777_v8 = vmul.f32 %v7737_v7, %v4776_v62  ;;  %v11168_v35 = vld [vmem:[#allocation28_spill] sm:$0xff]  ;;  %v4066_v6 = vadd.f32 %v11170_v44, %v10845_v17 }
 0x9f2   :  { %v3979_v40 = vadd.f32 %v11168_v35, %v10835_v38 }
 0x9f3   :  { %v10983_v31 = vadd.f32 %v4790_v26, %v4789_v33  ;;  %v4778_v47 = vadd.f32 %v7737_v7, %v4777_v8 }
 0x9f5   :  { %7740 = vtanh.f32 %v10983_v31  ;;  %v4782_v20 = vsel %vm4781_vm15, %v7737_v7, %v4778_v47  ;;  %v4008_v7 = vadd.f32 %v11169_v63, %v10837_v39 }
 0x9f6   :  { %v4787_v49 = vsel %vm4784_vm0, %v4786_v0, %v4782_v20 }
 0x9fb   :  { %v7741_v34 = vpop.eup %7740 }
 0x9fc   :  { %v4793_v61 = vmul.f32 %v7741_v34, %v4787_v49 }
 0x9fe   :  { %v4798_v37 = vpack.c.bf16 %v4793_v61, %v4793_v61  ;;  %v11171_v61 = vld [vmem:[#allocation30_spill] sm:$0xff] }
 0xa00   :  { %4807 = vmatmul.bf16.vlgmr.msrb.gmra.mxu0 %v4798_v37  ;;  %4820 = vmatmul.bf16.vlgmr.msrb.gmra.mxu1 %v4798_v37 }
 0xa01   :  { %4833 = vmatmul.bf16.vlgmr.msrb.gmra.mxu2 %v4798_v37  ;;  %4846 = vmatmul.bf16.vlgmr.msrb.gmra.mxu3 %v4798_v37  ;;  %v4037_v37 = vadd.f32 %v11171_v61, %v11158_v18 }
 0xa02   :  { %5047 = vmatpush.bf16.msrb.mxu0 %v10560_v15  ;;  %5060 = vmatpush.bf16.msrb.mxu1 %v10562_v41 }
 0xa03   :  { %5073 = vmatpush.bf16.msrb.mxu2 %v10573_v10  ;;  %5086 = vmatpush.bf16.msrb.mxu3 %v10570_v25 }
 0xa06   :  { %5048 = vmatpush.bf16.msrb.mxu0 %v10580_v21  ;;  %5061 = vmatpush.bf16.msrb.mxu1 %v10582_v5 }
 0xa07   :  { %5074 = vmatpush.bf16.msrb.mxu2 %v10599_v16  ;;  %5087 = vmatpush.bf16.msrb.mxu3 %v10584_v32 }
 0xa0a   :  { %5049 = vmatpush.bf16.msrb.mxu0 %v10589_v23  ;;  %5062 = vmatpush.bf16.msrb.mxu1 %v10593_v58 }
 0xa0b   :  { %5075 = vmatpush.bf16.msrb.mxu2 %v10611_v29  ;;  %5088 = vmatpush.bf16.msrb.mxu3 %v10595_v1 }
 0xa0e   :  { %5050 = vmatpush.bf16.msrb.mxu0 %v10602_v46  ;;  %5063 = vmatpush.bf16.msrb.mxu1 %v10606_v55 }
 0xa0f   :  { %5076 = vmatpush.bf16.msrb.mxu2 %v10628_v4  ;;  %5089 = vmatpush.bf16.msrb.mxu3 %v10608_v50 }
 0xa12   :  { %5051 = vmatpush.bf16.msrb.mxu0 %v10616_v9  ;;  %5064 = vmatpush.bf16.msrb.mxu1 %v10622_v27 }
 0xa13   :  { %5077 = vmatpush.bf16.msrb.mxu2 %v10643_v2  ;;  %5090 = vmatpush.bf16.msrb.mxu3 %v10624_v24 }
 0xa16   :  { %5052 = vmatpush.bf16.msrb.mxu0 %v10632_v51  ;;  %5065 = vmatpush.bf16.msrb.mxu1 %v10636_v53 }
 0xa17   :  { %5078 = vmatpush.bf16.msrb.mxu2 %v10666_v12  ;;  %5091 = vmatpush.bf16.msrb.mxu3 %v10638_v54 }
 0xa1a   :  { %5053 = vmatpush.bf16.msrb.mxu0 %v10651_v30  ;;  %5066 = vmatpush.bf16.msrb.mxu1 %v10660_v48 }
 0xa1b   :  { %5079 = vmatpush.bf16.msrb.mxu2 %v10685_v36  ;;  %5092 = vmatpush.bf16.msrb.mxu3 %v10669_v45 }
 0xa1e   :  { %5054 = vmatpush.bf16.msrb.mxu0 %v10681_v13  ;;  %5067 = vmatpush.bf16.msrb.mxu1 %v10683_v43 }
 0xa1f   :  { %5080 = vmatpush.bf16.msrb.mxu2 %v10704_v59  ;;  %5093 = vmatpush.bf16.msrb.mxu3 %v10695_v57 }
 0xa7d   :  { %v4808_v22 = vpop.f32.mrf.mxu0  ;;  %v4821_v42 = vpop.f32.mrf.mxu1 }
 0xa7e   :  { %v4851_v28 = vadd.f32 %v4808_v22, %v3979_v40  ;;  %v4852_v52 = vadd.f32 %v4821_v42, %v4008_v7 }
 0xa80   :  { %v7059_v3 = vmul.f32 -1.442695, %v4851_v28  ;;  %v7060_v19 = vmul.f32 -1.442695, %v4852_v52 }
 0xa82   :  { %7742 = vpow2.f32 %v7059_v3 }
 0xa83   :  { %7744 = vpow2.f32 %v7060_v19 }
 0xa84   :  { %v4834_v56 = vpop.f32.mrf.mxu2  ;;  %v4847_v62 = vpop.f32.mrf.mxu3 }
 0xa85   :  { %v4854_v11 = vadd.f32 %v4847_v62, %v4066_v6  ;;  %v4810_v26 = vpop.f32.mrf.mxu0  ;;  %v4823_v33 = vpop.f32.mrf.mxu1  ;;  %v4853_v63 = vadd.f32 %v4834_v56, %v4037_v37 }
 0xa87   :  { %v7061_v8 = vmul.f32 -1.442695, %v4854_v11 }
 0xa88   :  { %v7743_v47 = vpop.eup %7742 }
 0xa89   :  { %v7745_v60 = vpop.eup %7744  ;;  %v4858_v14 = vadd.f32 1.0, %v7743_v47  ;;  %7746 = vpow2.f32 %v7061_v8 }
 0xa8a   :  { %v4877_v20 = vadd.f32 1.0, %v7745_v60 }
 0xa8b   :  { %7748 = vrcp.f32 %v4858_v14  ;;  %v4870_v3 = vand.u32 2147483648, %v4858_v14  ;;  %v4868_v6 = vand.u32 2147483647, %v4858_v14  ;;  %vm4864_vm3 = vweird.f32 %v4858_v14 }
 0xa8c   :  { %7750 = vrcp.f32 %v4877_v20  ;;  %v4836_v0 = vpop.f32.mrf.mxu2  ;;  %v4849_v34 = vpop.f32.mrf.mxu3  ;;  %v4889_v19 = vand.u32 2147483648, %v4877_v20  ;;  %v4887_v11 = vand.u32 2147483647, %v4877_v20  ;;  %vm4883_vm4 = vweird.f32 %v4877_v20 }
 0xa8d   :  { %v4871_v56 = vor.u32 1.1754944e-38, %v4870_v3  ;;  %vm4869_vm7 = vcmp.eq.f32.partialorder %v4868_v6, 8.507059e+37 }
 0xa8e   :  { %v4890_v60 = vor.u32 1.1754944e-38, %v4889_v19  ;;  %vm4888_vm8 = vcmp.eq.f32.partialorder %v4887_v11, 8.507059e+37 }
 0xa8f   :  { %v7747_v49 = vpop.eup %7746 }
 0xa90   :  { %v4897_v35 = vadd.f32 1.0, %v7747_v49 }
 0xa91   :  { %v7749_v40 = vpop.eup %7748 }
 0xa92   :  { %v7751_v7 = vpop.eup %7750  ;;  %v4860_v22 = vmul.f32 %v7749_v40, %v4858_v14  ;;  %7752 = vrcp.f32 %v4897_v35  ;;  %vm4865_vm1 = vweird.f32 %v7749_v40  ;;  %vm4903_vm10 = vweird.f32 %v4897_v35 }
 0xa93   :  { %v4879_v42 = vmul.f32 %v7751_v7, %v4877_v20  ;;  %7754 = vtanh.f32 %v4853_v63  ;;  %vm4884_vm2 = vweird.f32 %v7751_v7  ;;  %vm4866_vm5 = vmor %vm4864_vm3, %vm4865_vm1 }
 0xa94   :  { %v4861_v28 = vsub.f32 1.0, %v4860_v22  ;;  %vm4885_vm6 = vmor %vm4883_vm4, %vm4884_vm2 }
 0xa95   :  { %v4880_v52 = vsub.f32 1.0, %v4879_v42 }
 0xa96   :  { %v4862_v44 = vmul.f32 %v7749_v40, %v4861_v28 }
 0xa97   :  { %v4881_v62 = vmul.f32 %v7751_v7, %v4880_v52  ;;  %v4909_v52 = vand.u32 2147483648, %v4897_v35 }
 0xa98   :  { %v7753_v26 = vpop.eup %7752  ;;  %v4863_v33 = vadd.f32 %v7749_v40, %v4862_v44 }
 0xa99   :  { %v4882_v8 = vadd.f32 %v7751_v7, %v4881_v62  ;;  %v4899_v47 = vmul.f32 %v7753_v26, %v4897_v35  ;;  %v7755_v34 = vpop.eup %7754  ;;  %vm4904_vm9 = vweird.f32 %v7753_v26  ;;  %v4910_v19 = vor.u32 1.1754944e-38, %v4909_v52 }
 0xa9a   :  { %v4867_v0 = vsel %vm4866_vm5, %v7749_v40, %v4863_v33  ;;  %v4907_v40 = vand.u32 2147483647, %v4897_v35  ;;  %vm4905_vm11 = vmor %vm4903_vm10, %vm4904_vm9 }
 0xa9b   :  { %v4872_v49 = vsel %vm4869_vm7, %v4871_v56, %v4867_v0  ;;  %v4886_v61 = vsel %vm4885_vm6, %v7751_v7, %v4882_v8  ;;  %v4900_v37 = vsub.f32 1.0, %v4899_v47 }
 0xa9c   :  { %v4891_v63 = vsel %vm4888_vm8, %v4890_v60, %v4886_v61  ;;  %v4914_v22 = vmul.f32 %v7755_v34, %v4872_v49  ;;  %vm4908_vm12 = vcmp.eq.f32.partialorder %v4907_v40, 8.507059e+37 }
 0xa9d   :  { %v4913_v42 = vmul.f32 %v4891_v63, %v10983_v31  ;;  %v4901_v28 = vmul.f32 %v7753_v26, %v4900_v37 }
 0xa9f   :  { %v11027_v14 = vadd.f32 %v4914_v22, %v4913_v42  ;;  %v4902_v20 = vadd.f32 %v7753_v26, %v4901_v28 }
 0xaa1   :  { %7756 = vtanh.f32 %v11027_v14  ;;  %v4906_v3 = vsel %vm4905_vm11, %v7753_v26, %v4902_v20 }
 0xaa2   :  { %v4911_v44 = vsel %vm4908_vm12, %v4910_v19, %v4906_v3 }
 0xaa7   :  { %v7757_v7 = vpop.eup %7756 }
 0xaa8   :  { %v4917_v6 = vmul.f32 %v7757_v7, %v4911_v44 }
 0xaaa   :  { %v4922_v62 = vpack.c.bf16 %v4917_v6, %v4917_v6 }
 0xaac   :  { %4931 = vmatmul.bf16.vlgmr.msra.gmra.mxu0 %v4922_v62  ;;  %4944 = vmatmul.bf16.vlgmr.msra.gmra.mxu1 %v4922_v62 }
 0xaad   :  { %4957 = vmatmul.bf16.vlgmr.msra.gmra.mxu2 %v4922_v62  ;;  %4970 = vmatmul.bf16.vlgmr.msra.gmra.mxu3 %v4922_v62 }
 0xaae   :  { %5171 = vmatpush.bf16.msra.mxu0 %v10560_v15  ;;  %5184 = vmatpush.bf16.msra.mxu1 %v10562_v41  ;;  %v11172_v15 = vld [vmem:[#allocation32_spill] sm:$0xff] }
 0xaaf   :  { %5197 = vmatpush.bf16.msra.mxu2 %v10573_v10  ;;  %5210 = vmatpush.bf16.msra.mxu3 %v10570_v25  ;;  %v3981_v41 = vadd.f32 %v11172_v15, %v10835_v38  ;;  %v11173_v25 = vld [vmem:[#allocation33_spill] sm:$0xff] }
 0xab0   :  { %v4010_v10 = vadd.f32 %v11173_v25, %v10837_v39 }
 0xab2   :  { %5172 = vmatpush.bf16.msra.mxu0 %v10580_v21  ;;  %5185 = vmatpush.bf16.msra.mxu1 %v10582_v5 }
 0xab3   :  { %5198 = vmatpush.bf16.msra.mxu2 %v10599_v16  ;;  %5211 = vmatpush.bf16.msra.mxu3 %v10584_v32  ;;  %v11174_v16 = vld [vmem:[#allocation35_spill] sm:$0xff] }
 0xab6   :  { %5173 = vmatpush.bf16.msra.mxu0 %v10589_v23  ;;  %5186 = vmatpush.bf16.msra.mxu1 %v10593_v58 }
 0xab7   :  { %5199 = vmatpush.bf16.msra.mxu2 %v10611_v29  ;;  %5212 = vmatpush.bf16.msra.mxu3 %v10595_v1 }
 0xaba   :  { %5174 = vmatpush.bf16.msra.mxu0 %v10602_v46  ;;  %5187 = vmatpush.bf16.msra.mxu1 %v10606_v55  ;;  %v4068_v46 = vadd.f32 %v11174_v16, %v10845_v17 }
 0xabb   :  { %5200 = vmatpush.bf16.msra.mxu2 %v10628_v4  ;;  %5213 = vmatpush.bf16.msra.mxu3 %v10608_v50 }
 0xabe   :  { %5175 = vmatpush.bf16.msra.mxu0 %v10616_v9  ;;  %5188 = vmatpush.bf16.msra.mxu1 %v10622_v27 }
 0xabf   :  { %5201 = vmatpush.bf16.msra.mxu2 %v10643_v2  ;;  %5214 = vmatpush.bf16.msra.mxu3 %v10624_v24 }
 0xac2   :  { %5176 = vmatpush.bf16.msra.mxu0 %v10632_v51  ;;  %5189 = vmatpush.bf16.msra.mxu1 %v10636_v53 }
 0xac3   :  { %5202 = vmatpush.bf16.msra.mxu2 %v10666_v12  ;;  %5215 = vmatpush.bf16.msra.mxu3 %v10638_v54  ;;  %v11175_v12 = vld [vmem:[#allocation34_spill] sm:$0xff] }
 0xac6   :  { %5177 = vmatpush.bf16.msra.mxu0 %v10651_v30  ;;  %5190 = vmatpush.bf16.msra.mxu1 %v10660_v48 }
 0xac7   :  { %5203 = vmatpush.bf16.msra.mxu2 %v10685_v36  ;;  %5216 = vmatpush.bf16.msra.mxu3 %v10669_v45  ;;  %v4039_v45 = vadd.f32 %v11175_v12, %v11158_v18 }
 0xaca   :  { %5178 = vmatpush.bf16.msra.mxu0 %v10681_v13  ;;  %5191 = vmatpush.bf16.msra.mxu1 %v10683_v43 }
 0xacb   :  { %5204 = vmatpush.bf16.msra.mxu2 %v10704_v59  ;;  %5217 = vmatpush.bf16.msra.mxu3 %v10695_v57 }
 0xb29   :  { %v4932_v21 = vpop.f32.mrf.mxu0  ;;  %v4945_v5 = vpop.f32.mrf.mxu1 }
 0xb2a   :  { %v4975_v32 = vadd.f32 %v4932_v21, %v3981_v41  ;;  %v4976_v23 = vadd.f32 %v4945_v5, %v4010_v10 }
 0xb2c   :  { %v7062_v58 = vmul.f32 -1.442695, %v4975_v32  ;;  %v7063_v1 = vmul.f32 -1.442695, %v4976_v23 }
 0xb2e   :  { %7758 = vpow2.f32 %v7062_v58  ;;  %v11177_v58 = vld [vmem:[#allocation37_spill] sm:$0xff] }
 0xb2f   :  { %7760 = vpow2.f32 %v7063_v1  ;;  %v4013_v1 = vadd.f32 %v11177_v58, %v10837_v39 }
 0xb30   :  { %v4958_v55 = vpop.f32.mrf.mxu2  ;;  %v4971_v50 = vpop.f32.mrf.mxu3 }
 0xb31   :  { %v4978_v29 = vadd.f32 %v4971_v50, %v4068_v46  ;;  %v4934_v9 = vpop.f32.mrf.mxu0  ;;  %v4947_v27 = vpop.f32.mrf.mxu1  ;;  %v4977_v36 = vadd.f32 %v4958_v55, %v4039_v45 }
 0xb32   :  { %v11178_v27 = vld [vmem:[#allocation39_spill] sm:$0xff] }
 0xb33   :  { %v7064_v24 = vmul.f32 -1.442695, %v4978_v29 }
 0xb34   :  { %v7759_v4 = vpop.eup %7758 }
 0xb35   :  { %v7761_v51 = vpop.eup %7760  ;;  %v4982_v53 = vadd.f32 1.0, %v7759_v4  ;;  %7762 = vpow2.f32 %v7064_v24  ;;  %v4071_v24 = vadd.f32 %v11178_v27, %v10845_v17  ;;  %v11180_v27 = vld [vmem:[#allocation40_spill] sm:$0xff] }
 0xb36   :  { %v5001_v54 = vadd.f32 1.0, %v7761_v51 }
 0xb37   :  { %7764 = vrcp.f32 %v4982_v53  ;;  %v4994_v26 = vand.u32 2147483648, %v4982_v53  ;;  %v4992_v8 = vand.u32 2147483647, %v4982_v53  ;;  %vm4988_vm15 = vweird.f32 %v4982_v53 }
 0xb38   :  { %7766 = vrcp.f32 %v5001_v54  ;;  %v4960_v2 = vpop.f32.mrf.mxu2  ;;  %v4973_v30 = vpop.f32.mrf.mxu3  ;;  %v5013_v33 = vand.u32 2147483648, %v5001_v54  ;;  %v5011_v60 = vand.u32 2147483647, %v5001_v54  ;;  %vm5007_vm0 = vweird.f32 %v5001_v54 }
 0xb39   :  { %v4995_v49 = vor.u32 1.1754944e-38, %v4994_v26  ;;  %vm4993_vm3 = vcmp.eq.f32.partialorder %v4992_v8, 8.507059e+37 }
 0xb3a   :  { %v5014_v63 = vor.u32 1.1754944e-38, %v5013_v33  ;;  %vm5012_vm4 = vcmp.eq.f32.partialorder %v5011_v60, 8.507059e+37 }
 0xb3b   :  { %v7763_v48 = vpop.eup %7762 }
 0xb3c   :  { %v5021_v13 = vadd.f32 1.0, %v7763_v48 }
 0xb3d   :  { %v7765_v43 = vpop.eup %7764 }
 0xb3e   :  { %v7767_v57 = vpop.eup %7766  ;;  %v4984_v59 = vmul.f32 %v7765_v43, %v4982_v53  ;;  %7768 = vrcp.f32 %v5021_v13  ;;  %vm4989_vm13 = vweird.f32 %v7765_v43  ;;  %v5033_v62 = vand.u32 2147483648, %v5021_v13 }
 0xb3f   :  { %v5003_v31 = vmul.f32 %v7767_v57, %v5001_v54  ;;  %7770 = vtanh.f32 %v4977_v36  ;;  %vm5008_vm14 = vweird.f32 %v7767_v57  ;;  %vm4990_vm1 = vmor %vm4988_vm15, %vm4989_vm13  ;;  %vm5027_vm6 = vweird.f32 %v5021_v13 }
 0xb40   :  { %v4985_v35 = vsub.f32 1.0, %v4984_v59  ;;  %vm5009_vm2 = vmor %vm5007_vm0, %vm5008_vm14  ;;  %v5031_v15 = vand.u32 2147483647, %v5021_v13  ;;  %v5034_v25 = vor.u32 1.1754944e-38, %v5033_v62  ;;  %v11179_v59 = vld [vmem:[#allocation38_spill] sm:$0xff] }
 0xb41   :  { %v5004_v11 = vsub.f32 1.0, %v5003_v31  ;;  %v4042_v31 = vadd.f32 %v11179_v59, %v11158_v18 }
 0xb42   :  { %v4986_v56 = vmul.f32 %v7765_v43, %v4985_v35  ;;  %vm5032_vm8 = vcmp.eq.f32.partialorder %v5031_v15, 8.507059e+37 }
 0xb43   :  { %v5005_v47 = vmul.f32 %v7767_v57, %v5004_v11 }
 0xb44   :  { %v7769_v0 = vpop.eup %7768  ;;  %v4987_v34 = vadd.f32 %v7765_v43, %v4986_v56 }
 0xb45   :  { %v5006_v61 = vadd.f32 %v7767_v57, %v5005_v47  ;;  %v5023_v37 = vmul.f32 %v7769_v0, %v5021_v13  ;;  %v7771_v42 = vpop.eup %7770  ;;  %vm5028_vm5 = vweird.f32 %v7769_v0 }
 0xb46   :  { %v4991_v22 = vsel %vm4990_vm1, %v7765_v43, %v4987_v34  ;;  %vm5029_vm7 = vmor %vm5027_vm6, %vm5028_vm5 }
 0xb47   :  { %v4996_v28 = vsel %vm4993_vm3, %v4995_v49, %v4991_v22  ;;  %v5010_v20 = vsel %vm5009_vm2, %v7767_v57, %v5006_v61  ;;  %v5024_v52 = vsub.f32 1.0, %v5023_v37 }
 0xb48   :  { %v5015_v40 = vsel %vm5012_vm4, %v5014_v63, %v5010_v20  ;;  %v5038_v3 = vmul.f32 %v7771_v42, %v4996_v28 }
 0xb49   :  { %v5037_v19 = vmul.f32 %v5015_v40, %v11027_v14  ;;  %v5025_v7 = vmul.f32 %v7769_v0, %v5024_v52  ;;  %v11176_v14 = vld [vmem:[#allocation36_spill] sm:$0xff] }
 0xb4a   :  { %v3984_v23 = vadd.f32 %v11176_v14, %v10835_v38 }
 0xb4b   :  { %v11071_v44 = vadd.f32 %v5038_v3, %v5037_v19  ;;  %v5026_v6 = vadd.f32 %v7769_v0, %v5025_v7 }
 0xb4d   :  { %7772 = vtanh.f32 %v11071_v44  ;;  %v5030_v41 = vsel %vm5029_vm7, %v7769_v0, %v5026_v6 }
 0xb4e   :  { %v5035_v21 = vsel %vm5032_vm8, %v5034_v25, %v5030_v41 }
 0xb53   :  { %v7773_v10 = vpop.eup %7772 }
 0xb54   :  { %v5041_v5 = vmul.f32 %v7773_v10, %v5035_v21 }
 0xb56   :  { %v5046_v32 = vpack.c.bf16 %v5041_v5, %v5041_v5 }
 0xb58   :  { %5055 = vmatmul.bf16.vlgmr.msrb.gmra.mxu0 %v5046_v32  ;;  %5068 = vmatmul.bf16.vlgmr.msrb.gmra.mxu1 %v5046_v32 }
 0xb59   :  { %5081 = vmatmul.bf16.vlgmr.msrb.gmra.mxu2 %v5046_v32  ;;  %5094 = vmatmul.bf16.vlgmr.msrb.gmra.mxu3 %v5046_v32 }
 0xbd5   :  { %v5056_v16 = vpop.f32.mrf.mxu0  ;;  %v5069_v46 = vpop.f32.mrf.mxu1 }
 0xbd6   :  { %v5099_v55 = vadd.f32 %v5056_v16, %v3984_v23  ;;  %v5100_v50 = vadd.f32 %v5069_v46, %v4013_v1 }
 0xbd8   :  { %v7065_v29 = vmul.f32 -1.442695, %v5099_v55  ;;  %v7066_v9 = vmul.f32 -1.442695, %v5100_v50  ;;  %v7517_v50 = vld [vmem:[#allocation9 + $0x30] sm:$0xff] }
 0xbda   :  { %7774 = vpow2.f32 %v7065_v29  ;;  %v7516_v29 = vld [vmem:[#allocation9 + $0x28] sm:$0xff] }
 0xbdb   :  { %7776 = vpow2.f32 %v7066_v9  ;;  %v7515_v9 = vld [vmem:[#allocation9 + $0x20] sm:$0xff] }
 0xbdc   :  { %v5082_v4 = vpop.f32.mrf.mxu2  ;;  %v5095_v51 = vpop.f32.mrf.mxu3 }
 0xbdd   :  { %v5102_v53 = vadd.f32 %v5095_v51, %v4071_v24  ;;  %v5058_v54 = vpop.f32.mrf.mxu0  ;;  %v5071_v2 = vpop.f32.mrf.mxu1  ;;  %v5101_v26 = vadd.f32 %v5082_v4, %v4042_v31  ;;  %v3986_v24 = vadd.f32 %v11180_v27, %v10835_v38  ;;  %v11181_v4 = vld [vmem:[#allocation41_spill] sm:$0xff] }
 0xbde   :  { %v4015_v51 = vadd.f32 %v11181_v4, %v10837_v39  ;;  %v7521_v4 = vld [vmem:[#allocation12 + $0x10] sm:$0xff] }
 0xbdf   :  { %v7067_v30 = vmul.f32 -1.442695, %v5102_v53  ;;  %v7514_v53 = vld [vmem:[#allocation9 + $0x18] sm:$0xff] }
 0xbe0   :  { %v7775_v48 = vpop.eup %7774 }
 0xbe1   :  { %v7777_v12 = vpop.eup %7776  ;;  %v5106_v45 = vadd.f32 1.0, %v7775_v48  ;;  %7778 = vpow2.f32 %v7067_v30 }
 0xbe2   :  { %v5125_v13 = vadd.f32 1.0, %v7777_v12 }
 0xbe3   :  { %7780 = vrcp.f32 %v5106_v45  ;;  %v5118_v0 = vand.u32 2147483648, %v5106_v45  ;;  %v5116_v61 = vand.u32 2147483647, %v5106_v45  ;;  %vm5112_vm11 = vweird.f32 %v5106_v45 }
 0xbe4   :  { %7782 = vrcp.f32 %v5125_v13  ;;  %v5084_v43 = vpop.f32.mrf.mxu2  ;;  %v5097_v36 = vpop.f32.mrf.mxu3  ;;  %v5137_v34 = vand.u32 2147483648, %v5125_v13  ;;  %v5135_v63 = vand.u32 2147483647, %v5125_v13  ;;  %vm5131_vm12 = vweird.f32 %v5125_v13 }
 0xbe5   :  { %v5119_v28 = vor.u32 1.1754944e-38, %v5118_v0  ;;  %vm5117_vm15 = vcmp.eq.f32.partialorder %v5116_v61, 8.507059e+37  ;;  %v7512_v43 = vld [vmem:[#allocation9 + $0x8] sm:$0xff]  ;;  %v11183_v61 = vld [vmem:[#allocation42_spill] sm:$0xff] }
 0xbe6   :  { %v5138_v40 = vor.u32 1.1754944e-38, %v5137_v34  ;;  %vm5136_vm0 = vcmp.eq.f32.partialorder %v5135_v63, 8.507059e+37  ;;  %v11182_v36 = vld [vmem:[#allocation43_spill] sm:$0xff]  ;;  %v7525_v34 = vld [vmem:[#allocation12 + $0x30] sm:$0xff] }
 0xbe7   :  { %v7779_v57 = vpop.eup %7778 }
 0xbe8   :  { %v5145_v35 = vadd.f32 1.0, %v7779_v57  ;;  %v4073_v57 = vadd.f32 %v11182_v36, %v10845_v17  ;;  %v7526_v17 = vld [vmem:[#allocation12 + $0x38] sm:$0xff]  ;;  %v7519_v36 = vld [vmem:[#allocation12] sm:$0xff] }
 0xbe9   :  { %v7781_v11 = vpop.eup %7780  ;;  %5442 = vmatpush.bf16.msrb.mxu1 %v7526_v17 }
 0xbea   :  { %v7783_v33 = vpop.eup %7782  ;;  %v5108_v56 = vmul.f32 %v7781_v11, %v5106_v45  ;;  %7784 = vrcp.f32 %v5145_v35  ;;  %vm5113_vm9 = vweird.f32 %v7781_v11  ;;  %v5157_v32 = vand.u32 2147483648, %v5145_v35 }
 0xbeb   :  { %v5127_v8 = vmul.f32 %v7783_v33, %v5125_v13  ;;  %7786 = vtanh.f32 %v5101_v26  ;;  %vm5132_vm10 = vweird.f32 %v7783_v33  ;;  %vm5114_vm13 = vmor %vm5112_vm11, %vm5113_vm9  ;;  %vm5151_vm2 = vweird.f32 %v5145_v35  ;;  %v7513_v13 = vld [vmem:[#allocation9 + $0x10] sm:$0xff] }
 0xbec   :  { %v5109_v47 = vsub.f32 1.0, %v5108_v56  ;;  %vm5133_vm14 = vmor %vm5131_vm12, %vm5132_vm10  ;;  %v5155_v14 = vand.u32 2147483647, %v5145_v35  ;;  %v5158_v58 = vor.u32 1.1754944e-38, %v5157_v32 }
 0xbed   :  { %v5128_v60 = vsub.f32 1.0, %v5127_v8  ;;  %5443 = vmatpush.bf16.msrb.mxu1 %v7525_v34 }
 0xbee   :  { %v5110_v49 = vmul.f32 %v7781_v11, %v5109_v47  ;;  %vm5156_vm4 = vcmp.eq.f32.partialorder %v5155_v14, 8.507059e+37 }
 0xbef   :  { %v5129_v37 = vmul.f32 %v7783_v33, %v5128_v60 }
 0xbf0   :  { %v7785_v22 = vpop.eup %7784  ;;  %v5111_v42 = vadd.f32 %v7781_v11, %v5110_v49 }
 0xbf1   :  { %v5130_v20 = vadd.f32 %v7783_v33, %v5129_v37  ;;  %v5147_v52 = vmul.f32 %v7785_v22, %v5145_v35  ;;  %v7787_v19 = vpop.eup %7786  ;;  %vm5152_vm1 = vweird.f32 %v7785_v22  ;;  %v4044_v37 = vadd.f32 %v11183_v61, %v11158_v18 }
 0xbf2   :  { %v5115_v3 = vsel %vm5114_vm13, %v7781_v11, %v5111_v42  ;;  %vm5153_vm3 = vmor %vm5151_vm2, %vm5152_vm1  ;;  %v7511_v11 = vld [vmem:[#allocation9] sm:$0xff] }
 0xbf3   :  { %v5120_v7 = vsel %vm5117_vm15, %v5119_v28, %v5115_v3  ;;  %v5134_v6 = vsel %vm5133_vm14, %v7783_v33, %v5130_v20  ;;  %v5148_v62 = vsub.f32 1.0, %v5147_v52  ;;  %v7524_v52 = vld [vmem:[#allocation12 + $0x28] sm:$0xff] }
 0xbf4   :  { %v5139_v15 = vsel %vm5136_vm0, %v5138_v40, %v5134_v6  ;;  %v5162_v41 = vmul.f32 %v7787_v19, %v5120_v7  ;;  %5444 = vmatpush.bf16.msrb.mxu1 %v7524_v52 }
 0xbf5   :  { %v5161_v25 = vmul.f32 %v5139_v15, %v11071_v44  ;;  %v5149_v10 = vmul.f32 %v7785_v22, %v5148_v62  ;;  %v7518_v44 = vld [vmem:[#allocation9 + $0x38] sm:$0xff] }
 0xbf6   :  { %5359 = vmatpush.bf16.msrb.mxu0 %v7518_v44 }
 0xbf7   :  { %v11083_v21 = vadd.f32 %v5162_v41, %v5161_v25  ;;  %v5150_v5 = vadd.f32 %v7785_v22, %v5149_v10  ;;  %v7523_v41 = vld [vmem:[#allocation12 + $0x20] sm:$0xff] }
 0xbf8   :  { %5445 = vmatpush.bf16.msrb.mxu1 %v7523_v41 }
 0xbf9   :  { %7788 = vtanh.f32 %v11083_v21  ;;  %v5154_v23 = vsel %vm5153_vm3, %v7785_v22, %v5150_v5 }
 0xbfa   :  { %v5159_v16 = vsel %vm5156_vm4, %v5158_v58, %v5154_v23  ;;  %5360 = vmatpush.bf16.msrb.mxu0 %v7517_v50 }
 0xbfe   :  { %5361 = vmatpush.bf16.msrb.mxu0 %v7516_v29 }
 0xbff   :  { %v7789_v1 = vpop.eup %7788 }
 0xc00   :  { %v5165_v46 = vmul.f32 %v7789_v1, %v5159_v16  ;;  %v7522_v16 = vld [vmem:[#allocation12 + $0x18] sm:$0xff] }
 0xc01   :  { %5446 = vmatpush.bf16.msrb.mxu1 %v7522_v16 }
 0xc02   :  { %v5170_v55 = vpack.c.bf16 %v5165_v46, %v5165_v46  ;;  %5362 = vmatpush.bf16.msrb.mxu0 %v7515_v9 }
 0xc04   :  { %5179 = vmatmul.bf16.vlgmr.msra.gmra.mxu0 %v5170_v55  ;;  %5192 = vmatmul.bf16.vlgmr.msra.gmra.mxu1 %v5170_v55 }
 0xc05   :  { %5205 = vmatmul.bf16.vlgmr.msra.gmra.mxu2 %v5170_v55  ;;  %5218 = vmatmul.bf16.vlgmr.msra.gmra.mxu3 %v5170_v55 }
 0xc06   :  { %5363 = vmatpush.bf16.msrb.mxu0 %v7514_v53  ;;  %5447 = vmatpush.bf16.msrb.mxu1 %v7521_v4 }
 0xc0a   :  { %5364 = vmatpush.bf16.msrb.mxu0 %v7513_v13 }
 0xc0e   :  { %5365 = vmatpush.bf16.msrb.mxu0 %v7512_v43 }
 0xc12   :  { %5366 = vmatpush.bf16.msrb.mxu0 %v7511_v11  ;;  %v7549_v11 = vld [vmem:[#allocation14] ss:$0 sm:$0xff] }
 0xc81   :  { %v5180_v54 = vpop.f32.mrf.mxu0  ;;  %v5193_v2 = vpop.f32.mrf.mxu1 }
 0xc82   :  { %v5223_v30 = vadd.f32 %v5180_v54, %v3986_v24  ;;  %v5224_v48 = vadd.f32 %v5193_v2, %v4015_v51 }
 0xc84   :  { %v7068_v12 = vmul.f32 -1.442695, %v5223_v30  ;;  %v7069_v45 = vmul.f32 -1.442695, %v5224_v48 }
 0xc86   :  { %7790 = vpow2.f32 %v7068_v12 }
 0xc87   :  { %7792 = vpow2.f32 %v7069_v45 }
 0xc88   :  { %v5206_v38 = vpop.f32.mrf.mxu2  ;;  %v5219_v59 = vpop.f32.mrf.mxu3 }
 0xc89   :  { %v5226_v31 = vadd.f32 %v5219_v59, %v4073_v57  ;;  %v5182_v39 = vpop.f32.mrf.mxu0  ;;  %v5195_v35 = vpop.f32.mrf.mxu1  ;;  %v5225_v42 = vadd.f32 %v5206_v38, %v4044_v37  ;;  %v7548_v57 = vld [vmem:[#allocation11] ss:$0 sm:$0xff] }
 0xc8b   :  { %v7070_v26 = vmul.f32 -1.442695, %v5226_v31 }
 0xc8c   :  { %v7791_v33 = vpop.eup %7790 }
 0xc8d   :  { %v7793_v56 = vpop.eup %7792  ;;  %v5230_v8 = vadd.f32 1.0, %v7791_v33  ;;  %7794 = vpow2.f32 %v7070_v26 }
 0xc8e   :  { %v5249_v47 = vadd.f32 1.0, %v7793_v56 }
 0xc8f   :  { %7796 = vrcp.f32 %v5230_v8  ;;  %v5242_v7 = vand.u32 2147483648, %v5230_v8  ;;  %v5240_v15 = vand.u32 2147483647, %v5230_v8  ;;  %vm5236_vm7 = vweird.f32 %v5230_v8 }
 0xc90   :  { %7798 = vrcp.f32 %v5249_v47  ;;  %v5208_v60 = vpop.f32.mrf.mxu2  ;;  %v5221_v0 = vpop.f32.mrf.mxu3  ;;  %v5261_v6 = vand.u32 2147483648, %v5249_v47  ;;  %v5259_v25 = vand.u32 2147483647, %v5249_v47  ;;  %vm5255_vm8 = vweird.f32 %v5249_v47 }
 0xc91   :  { %v5243_v32 = vor.u32 1.1754944e-38, %v5242_v7  ;;  %vm5241_vm11 = vcmp.eq.f32.partialorder %v5240_v15, 8.507059e+37 }
 0xc92   :  { %v5262_v58 = vor.u32 1.1754944e-38, %v5261_v6  ;;  %vm5260_vm12 = vcmp.eq.f32.partialorder %v5259_v25, 8.507059e+37 }
 0xc93   :  { %v7795_v49 = vpop.eup %7794 }
 0xc94   :  { %v5269_v63 = vadd.f32 1.0, %v7795_v49 }
 0xc95   :  { %v7797_v22 = vpop.eup %7796 }
 0xc96   :  { %v7799_v28 = vpop.eup %7798  ;;  %v5232_v20 = vmul.f32 %v7797_v22, %v5230_v8  ;;  %7800 = vrcp.f32 %v5269_v63  ;;  %vm5237_vm5 = vweird.f32 %v7797_v22  ;;  %v5281_v54 = vand.u32 2147483648, %v5269_v63 }
 0xc97   :  { %v5251_v40 = vmul.f32 %v7799_v28, %v5249_v47  ;;  %7802 = vtanh.f32 %v5225_v42  ;;  %vm5256_vm6 = vweird.f32 %v7799_v28  ;;  %vm5238_vm9 = vmor %vm5236_vm7, %vm5237_vm5  ;;  %vm5275_vm14 = vweird.f32 %v5269_v63 }
 0xc98   :  { %v5233_v3 = vsub.f32 1.0, %v5232_v20  ;;  %vm5257_vm10 = vmor %vm5255_vm8, %vm5256_vm6  ;;  %v5279_v2 = vand.u32 2147483647, %v5269_v63  ;;  %v5282_v48 = vor.u32 1.1754944e-38, %v5281_v54 }
 0xc99   :  { %v5252_v19 = vsub.f32 1.0, %v5251_v40 }
 0xc9a   :  { %v5234_v62 = vmul.f32 %v7797_v22, %v5233_v3  ;;  %vm5280_vm0 = vcmp.eq.f32.partialorder %v5279_v2, 8.507059e+37 }
 0xc9b   :  { %v5253_v18 = vmul.f32 %v7799_v28, %v5252_v19 }
 0xc9c   :  { %v7801_v10 = vpop.eup %7800  ;;  %v5235_v5 = vadd.f32 %v7797_v22, %v5234_v62 }
 0xc9d   :  { %v5254_v14 = vadd.f32 %v7799_v28, %v5253_v18  ;;  %v5271_v23 = vmul.f32 %v7801_v10, %v5269_v63  ;;  %v7803_v46 = vpop.eup %7802  ;;  %vm5276_vm13 = vweird.f32 %v7801_v10 }
 0xc9e   :  { %v5239_v1 = vsel %vm5238_vm9, %v7797_v22, %v5235_v5  ;;  %vm5277_vm15 = vmor %vm5275_vm14, %vm5276_vm13 }
 0xc9f   :  { %v5244_v55 = vsel %vm5241_vm11, %v5243_v32, %v5239_v1  ;;  %v5258_v44 = vsel %vm5257_vm10, %v7799_v28, %v5254_v14  ;;  %v5272_v50 = vsub.f32 1.0, %v5271_v23 }
 0xca0   :  { %v5263_v29 = vsel %vm5260_vm12, %v5262_v58, %v5258_v44  ;;  %v5286_v9 = vmul.f32 %v7803_v46, %v5244_v55 }
 0xca1   :  { %v5285_v27 = vmul.f32 %v5263_v29, %v11083_v21  ;;  %v5273_v24 = vmul.f32 %v7801_v10, %v5272_v50  ;;  %v7520_v21 = vld [vmem:[#allocation12 + $0x8] sm:$0xff] }
 0xca2   :  { %5448 = vmatpush.bf16.msrb.mxu1 %v7520_v21 }
 0xca3   :  { %v5287_v51 = vadd.f32 %v5286_v9, %v5285_v27  ;;  %v5274_v53 = vadd.f32 %v7801_v10, %v5273_v24 }
 0xca5   :  { %7804 = vtanh.f32 %v5287_v51  ;;  %v5278_v30 = vsel %vm5277_vm15, %v7801_v10, %v5274_v53 }
 0xca6   :  { %v5283_v45 = vsel %vm5280_vm0, %v5282_v48, %v5278_v30  ;;  %5449 = vmatpush.bf16.msrb.mxu1 %v7519_v36 }
 0xcab   :  { %v7805_v12 = vpop.eup %7804 }
 0xcac   :  { %v5289_v13 = vmul.f32 %v7805_v12, %v5283_v45 }
 0xcae   :  { %v5290_v43 = vpack.c.bf16 %v5289_v13, %v5289_v13 }
 0xcb0   :  { %5367 = vmatmul.bf16.vlgmr.msrb.gmra.mxu0 %v5290_v43 }
 0xd2d   :  { %v5368_v38 = vpop.f32.mrf.mxu0 }
 0xd2e   :  { %v5369_v59 = vadd.f32 %v7548_v57, %v5368_v38 }
 0xd30   :  { %v5372_v31 = vmax.f32 %v5369_v59, 0.0 }
 0xd32   :  { %v5373_v39 = vpack.c.bf16 %v5372_v31, %v5372_v31 }
 0xd34   :  { %5450 = vmatmul.bf16.vlgmr.msrb.gmra.mxu1 %v5373_v39 }
 0xd35   :  { %v5370_v35 = vpop.f32.mrf.mxu0 }
 0xdb1   :  { %v5451_v26 = vpop.f32.mrf.mxu1 }
 0xdb2   :  { %v5452_v33 = vadd.f32 %v7549_v11, %v5451_v26 }
 0xdb4   :  { %5455 = vst [vmem:[%s11184_s15] sm:$0xff] %v5452_v33 }
 0xdb9   :  { %v5453_v56 = vpop.f32.mrf.mxu1 }
 0xdba   :  { %5460 = vsyncpa [#allocation5], 1 }
 0xdbb   :  { %5461 = vsyncpa [#allocation7], 1 }
 0xdbc   :  { %5462 = vsyncpa [#allocation10], 1 }
 0xdbd   :  { %5463 = vsyncpa [#allocation13], 1 }

</bundles_post_ra>
